<compile_context>
chip_gen: v6e
topology: v6e:2x2x1
jax: 0.10.0
libtpu: 0.0.40
codegen_flags: <defaults>
</compile_context>

<pallas_src>
import functools

import jax
import jax.numpy as jnp
from jax.experimental import pallas as pl
from jax.experimental.pallas import tpu as pltpu


# ----------------------------------------------------------------------------
# Fused kernel: conv1(+pool1) -> conv2(+pool2) -> linear, one image per step.
# Row space convention: activations after pool1 live in a zero-padded,
# flattened (18*18, 16) matrix A1 with row index r = hp*18 + wp, where the
# interior hp,wp in [2,16) holds pool1 output (hp-2, wp-2) and the border is 0.
# conv2's tap (i, j) is then a contiguous row window A1[i*18+j : i*18+j+248].
# ----------------------------------------------------------------------------
def _cnn_kernel(cols1_ref, w1_ref, b1_ref, mask1_ref, w2_ref, b2_ref,
                sel2_ref, wo_ref, bo_ref, out_ref, a1_ref, p2_ref):
    f32 = jnp.float32

    # ---- conv1 as 4 pool-phase matmuls, maxpool1 = max over the phases ----
    w1 = w1_ref[...]                                            # (25, 16) bf16
    z = None
    for p in range(4):
        yp = jnp.dot(cols1_ref[0, p], w1,
                     preferred_element_type=f32)                # (324, 16) f32
        z = yp if z is None else jnp.maximum(z, yp)
    # bias + ReLU commute with the window max; mask re-zeroes the border rows
    a1 = mask1_ref[...] * jnp.maximum(z + b1_ref[...], 0.0)     # (324, 16) f32
    a1_ref[...] = a1.astype(jnp.bfloat16)

    # ---- conv2: 25 shifted-window matmuls over the padded row space ----
    y2 = None
    for i in range(5):
        for j in range(5):
            off = i * 18 + j                                    # 0 .. 76
            lhs = a1_ref[off:off + 248, :]                      # (248, 16) bf16
            t = jnp.dot(lhs, w2_ref[i * 5 + j],
                        preferred_element_type=f32)             # (248, 32) f32
            y2 = t if y2 is None else y2 + t
    y2b = y2.astype(jnp.bfloat16)

    # ---- maxpool2: 4 one-hot row-selection matmuls + elementwise max ----
    m = None
    for p in range(4):
        sp = jnp.dot(sel2_ref[p], y2b,
                     preferred_element_type=f32)                # (49, 32) f32
        m = sp if m is None else jnp.maximum(m, sp)
    p2 = jnp.maximum(m + b2_ref[...], 0.0)                      # (49, 32) f32
    p2_ref[...] = p2.astype(jnp.bfloat16)

    # ---- linear: 49 accumulated (1,32)@(32,128) matmuls (CHW order folded
    #      into wo packing); lane-dense (1,128) store ----
    acc = jnp.zeros((1, 128), f32)
    for r in range(49):
        acc = acc + jnp.dot(p2_ref[r:r + 1, :], wo_ref[r],
                            preferred_element_type=f32)         # (1, 128)
    out_ref[0] = acc + bo_ref[...]


# ----------------------------------------------------------------------------
# One-time weight packing (call OUTSIDE jit): matmul-ready, lane-dense layouts.
# ----------------------------------------------------------------------------
def pack_params(params):
    w1 = params["w1"].astype(jnp.float32)       # (16, 1, 5, 5)
    b1 = params["b1"].astype(jnp.float32)       # (16,)
    w2 = params["w2"].astype(jnp.float32)       # (32, 16, 5, 5)
    b2 = params["b2"].astype(jnp.float32)       # (32,)
    wo = params["wo"].astype(jnp.float32)       # (10, 1568)
    bo = params["bo"].astype(jnp.float32)       # (10,)
    nc = wo.shape[0]

    # conv1 weight: (Cout, 1, 5, 5) -> (25, 16), tap order k = i*5 + j
    w1p = w1.reshape(16, 25).T.astype(jnp.bfloat16)
    b1p = b1.reshape(1, 16)

    # conv2 weight: (Cout, Cin, 5, 5) -> (25, Cin=16, Cout=32)
    w2p = jnp.transpose(w2, (2, 3, 1, 0)).reshape(25, 16, 32).astype(jnp.bfloat16)
    b2p = b2.reshape(1, 32)

    # linear weight: torch flat index = c*49 + h*7 + w; kernel row r = h*7 + w
    wo3 = jnp.transpose(wo.reshape(nc, 32, 49), (2, 1, 0))      # (49, 32, nc)
    wo_p = jnp.pad(wo3, ((0, 0), (0, 0), (0, 128 - nc))).astype(jnp.bfloat16)
    bo_p = jnp.pad(bo, (0, 128 - nc)).reshape(1, 128)

    # interior mask of the flattened 18x18 padded row space
    idx = jnp.arange(18)
    interior = (idx >= 2) & (idx < 16)
    mask1 = (interior[:, None] & interior[None, :]).reshape(324, 1)
    mask1 = mask1.astype(jnp.float32)

    # pool2 one-hot row selectors: phase (dy,dx) picks conv2 row (2m+dy)*18+2n+dx
    mm = jnp.arange(7)
    sels = []
    for dy in (0, 1):
        for dx in (0, 1):
            rin = ((2 * mm[:, None] + dy) * 18 +
                   (2 * mm[None, :] + dx)).reshape(49)
            sels.append(jax.nn.one_hot(rin, 248, dtype=jnp.bfloat16))
    sel2 = jnp.stack(sels, axis=0)                              # (4, 49, 248)

    return {"w1": w1p, "b1": b1p, "w2": w2p, "b2": b2p,
            "wo": wo_p, "bo": bo_p, "mask1": mask1, "sel2": sel2}


# ----------------------------------------------------------------------------
# Forward pass: one fused pallas_call over the batch.
# ----------------------------------------------------------------------------
@functools.partial(jax.jit, static_argnames=("num_classes",))
def cnn_forward(packed, x_nchw, num_classes=10):
    B = x_nchw.shape[0]
    x = x_nchw.astype(jnp.float32).reshape(B, 28, 28)
    xp = jnp.pad(x, ((0, 0), (2, 2), (2, 2)))                   # (B, 32, 32)

    # Tiny im2col for conv1 (single input channel), produced directly as the
    # four 2x2-pool phases in the padded 18x18 flattened row space.
    patches = jnp.stack([xp[:, i:i + 28, j:j + 28]
                         for i in range(5) for j in range(5)], axis=-1)
    blocks = []
    for dy in (0, 1):
        for dx in (0, 1):
            ph = patches[:, dy::2, dx::2, :]                    # (B,14,14,25)
            ph = jnp.pad(ph, ((0, 0), (2, 2), (2, 2), (0, 0)))  # (B,18,18,25)
            blocks.append(ph.reshape(B, 324, 25))
    cols1 = jnp.stack(blocks, axis=1).astype(jnp.bfloat16)      # (B,4,324,25)

    out = pl.pallas_call(
        _cnn_kernel,
        out_shape=jax.ShapeDtypeStruct((B, 1, 128), jnp.float32),
        grid_spec=pltpu.PrefetchScalarGridSpec(
            num_scalar_prefetch=0,
            grid=(B,),
            in_specs=[
                pl.BlockSpec((1, 4, 324, 25), lambda b: (b, 0, 0, 0)),  # cols1
                pl.BlockSpec((25, 16), lambda b: (0, 0)),               # w1
                pl.BlockSpec((1, 16), lambda b: (0, 0)),                # b1
                pl.BlockSpec((324, 1), lambda b: (0, 0)),               # mask1
                pl.BlockSpec((25, 16, 32), lambda b: (0, 0, 0)),        # w2
                pl.BlockSpec((1, 32), lambda b: (0, 0)),                # b2
                pl.BlockSpec((4, 49, 248), lambda b: (0, 0, 0)),        # sel2
                pl.BlockSpec((49, 32, 128), lambda b: (0, 0, 0)),       # wo
                pl.BlockSpec((1, 128), lambda b: (0, 0)),               # bo
            ],
            out_specs=pl.BlockSpec((1, 1, 128), lambda b: (b, 0, 0)),
            scratch_shapes=[
                pltpu.VMEM((324, 16), jnp.bfloat16),   # padded pool1 activations
                pltpu.VMEM((49, 32), jnp.bfloat16),    # pooled conv2 activations
            ],
        ),
        compiler_params=pltpu.CompilerParams(
            dimension_semantics=("parallel",)),
    )(cols1, packed["w1"], packed["b1"], packed["mask1"],
      packed["w2"], packed["b2"], packed["sel2"], packed["wo"], packed["bo"])

    return out[:, 0, :num_classes]


# ----------------------------------------------------------------------------
# Parameters (deterministic, PyTorch-default-style uniform init).
# ----------------------------------------------------------------------------
def init_params(key, num_classes=10):
    ks = jax.random.split(key, 6)

    def uni(k, shape, fan_in):
        bound = 1.0 / jnp.sqrt(jnp.float32(fan_in))
        return jax.random.uniform(k, shape, jnp.float32, -bound, bound)

    return {
        "w1": uni(ks[0], (16, 1, 5, 5), 1 * 25),
        "b1": uni(ks[1], (16,), 1 * 25),
        "w2": uni(ks[2], (32, 16, 5, 5), 16 * 25),
        "b2": uni(ks[3], (32,), 16 * 25),
        "wo": uni(ks[4], (num_classes, 32 * 7 * 7), 32 * 7 * 7),
        "bo": uni(ks[5], (num_classes,), 32 * 7 * 7),
    }


# ----------------------------------------------------------------------------
# Pure-JAX reference (numerical sanity check only).
# ----------------------------------------------------------------------------
def reference_forward(params, x_nchw):
    x = x_nchw.astype(jnp.float32)

    def conv(x, w, b):
        y = jax.lax.conv_general_dilated(
            x, w, window_strides=(1, 1), padding=((2, 2), (2, 2)),
            dimension_numbers=("NCHW", "OIHW", "NCHW"))
        return jax.nn.relu(y + b.reshape(1, -1, 1, 1))

    def pool(x):
        return jax.lax.reduce_window(
            x, -jnp.inf, jax.lax.max, (1, 1, 2, 2), (1, 1, 2, 2), "VALID")

    x = pool(conv(x, params["w1"], params["b1"]))
    x = pool(conv(x, params["w2"], params["b2"]))
    xf = x.reshape(x.shape[0], -1)
    return xf @ params["wo"].T + params["bo"]


if __name__ == "__main__":
    key = jax.random.PRNGKey(0)
    pkey, xkey = jax.random.split(key)
    params = init_params(pkey)
    packed = pack_params(params)     # one-time weight packing, outside jit

    # Linear(32*7*7, 10) implies a 28x28 spatial input; keep batch small.
    x = jax.random.normal(xkey, (2, 1, 28, 28), dtype=jnp.float32)

    out = cnn_forward(packed, x, num_classes=10)
    out = jax.block_until_ready(out)
    assert out.shape == (2, 10), out.shape

    ref = jax.block_until_ready(reference_forward(params, x))
    assert jnp.allclose(out, ref, atol=5e-2, rtol=5e-2), (
        float(jnp.max(jnp.abs(out - ref))))

    print("KERNEL_OK")
</pallas_src>

<mosaic_0001>
module attributes {stable_mosaic.version = 11 : i64} {
  func.func @_cnn_kernel(%arg0: i32, %arg1: memref<1x4x324x25xbf16, #tpu.memory_space<vmem>>, %arg2: memref<25x16xbf16, #tpu.memory_space<vmem>>, %arg3: memref<1x16xf32, #tpu.memory_space<vmem>>, %arg4: memref<324x1xf32, #tpu.memory_space<vmem>>, %arg5: memref<25x16x32xbf16, #tpu.memory_space<vmem>>, %arg6: memref<1x32xf32, #tpu.memory_space<vmem>>, %arg7: memref<4x49x248xbf16, #tpu.memory_space<vmem>>, %arg8: memref<49x32x128xbf16, #tpu.memory_space<vmem>>, %arg9: memref<1x128xf32, #tpu.memory_space<vmem>>, %arg10: memref<1x1x128xf32, #tpu.memory_space<vmem>>, %arg11: memref<324x16xbf16, #tpu.memory_space<vmem>>, %arg12: memref<49x32xbf16, #tpu.memory_space<vmem>>) attributes {dimension_semantics = [#tpu.dimension_semantics<parallel>], iteration_bounds = array<i64: 2>, scalar_prefetch = 0 : i64, scratch_operands = 2 : i64, tpu.core_type = #tpu.core_type<tc>, window_params = [{transform_indices = @transform_0, window_bounds = array<i64: 1, 4, 324, 25>}, {pipeline_mode = #tpu.pipeline_mode<synchronous>, transform_indices = @transform_1, window_bounds = array<i64: 25, 16>}, {pipeline_mode = #tpu.pipeline_mode<synchronous>, transform_indices = @transform_2, window_bounds = array<i64: 1, 16>}, {pipeline_mode = #tpu.pipeline_mode<synchronous>, transform_indices = @transform_3, window_bounds = array<i64: 324, 1>}, {pipeline_mode = #tpu.pipeline_mode<synchronous>, transform_indices = @transform_4, window_bounds = array<i64: 25, 16, 32>}, {pipeline_mode = #tpu.pipeline_mode<synchronous>, transform_indices = @transform_5, window_bounds = array<i64: 1, 32>}, {pipeline_mode = #tpu.pipeline_mode<synchronous>, transform_indices = @transform_6, window_bounds = array<i64: 4, 49, 248>}, {pipeline_mode = #tpu.pipeline_mode<synchronous>, transform_indices = @transform_7, window_bounds = array<i64: 49, 32, 128>}, {pipeline_mode = #tpu.pipeline_mode<synchronous>, transform_indices = @transform_8, window_bounds = array<i64: 1, 128>}, {transform_indices = @transform_9, window_bounds = array<i64: 1, 1, 128>}]} {
    %c0 = arith.constant 0 : index
    %c0_0 = arith.constant 0 : index
    %0 = vector.load %arg2[%c0, %c0_0] : memref<25x16xbf16, #tpu.memory_space<vmem>>, vector<25x16xbf16>
    %c0_1 = arith.constant 0 : index
    %c0_2 = arith.constant 0 : index
    %c0_3 = arith.constant 0 : index
    %c0_4 = arith.constant 0 : index
    %1 = vector.load %arg1[%c0_1, %c0_2, %c0_3, %c0_4] : memref<1x4x324x25xbf16, #tpu.memory_space<vmem>>, vector<1x1x324x25xbf16>
    %2 = vector.shape_cast %1 : vector<1x1x324x25xbf16> to vector<324x25xbf16>
    %cst = arith.constant dense<0.000000e+00> : vector<324x16xf32>
    %3 = tpu.matmul %2, %0, %cst {dimension_numbers = #tpu.dot_dimension_numbers<[1], [0], [0], [1], [0, 0, 1, 1], [], []>} : vector<324x25xbf16>, vector<25x16xbf16>, vector<324x16xf32> -> vector<324x16xf32>
    %c0_5 = arith.constant 0 : index
    %c1 = arith.constant 1 : index
    %c0_6 = arith.constant 0 : index
    %c0_7 = arith.constant 0 : index
    %4 = vector.load %arg1[%c0_5, %c1, %c0_6, %c0_7] : memref<1x4x324x25xbf16, #tpu.memory_space<vmem>>, vector<1x1x324x25xbf16>
    %5 = vector.shape_cast %4 : vector<1x1x324x25xbf16> to vector<324x25xbf16>
    %cst_8 = arith.constant dense<0.000000e+00> : vector<324x16xf32>
    %6 = tpu.matmul %5, %0, %cst_8 {dimension_numbers = #tpu.dot_dimension_numbers<[1], [0], [0], [1], [0, 0, 1, 1], [], []>} : vector<324x25xbf16>, vector<25x16xbf16>, vector<324x16xf32> -> vector<324x16xf32>
    %7 = arith.maximumf %3, %6 : vector<324x16xf32>
    %c0_9 = arith.constant 0 : index
    %c2 = arith.constant 2 : index
    %c0_10 = arith.constant 0 : index
    %c0_11 = arith.constant 0 : index
    %8 = vector.load %arg1[%c0_9, %c2, %c0_10, %c0_11] : memref<1x4x324x25xbf16, #tpu.memory_space<vmem>>, vector<1x1x324x25xbf16>
    %9 = vector.shape_cast %8 : vector<1x1x324x25xbf16> to vector<324x25xbf16>
    %cst_12 = arith.constant dense<0.000000e+00> : vector<324x16xf32>
    %10 = tpu.matmul %9, %0, %cst_12 {dimension_numbers = #tpu.dot_dimension_numbers<[1], [0], [0], [1], [0, 0, 1, 1], [], []>} : vector<324x25xbf16>, vector<25x16xbf16>, vector<324x16xf32> -> vector<324x16xf32>
    %11 = arith.maximumf %7, %10 : vector<324x16xf32>
    %c0_13 = arith.constant 0 : index
    %c3 = arith.constant 3 : index
    %c0_14 = arith.constant 0 : index
    %c0_15 = arith.constant 0 : index
    %12 = vector.load %arg1[%c0_13, %c3, %c0_14, %c0_15] : memref<1x4x324x25xbf16, #tpu.memory_space<vmem>>, vector<1x1x324x25xbf16>
    %13 = vector.shape_cast %12 : vector<1x1x324x25xbf16> to vector<324x25xbf16>
    %cst_16 = arith.constant dense<0.000000e+00> : vector<324x16xf32>
    %14 = tpu.matmul %13, %0, %cst_16 {dimension_numbers = #tpu.dot_dimension_numbers<[1], [0], [0], [1], [0, 0, 1, 1], [], []>} : vector<324x25xbf16>, vector<25x16xbf16>, vector<324x16xf32> -> vector<324x16xf32>
    %15 = arith.maximumf %11, %14 : vector<324x16xf32>
    %c0_17 = arith.constant 0 : index
    %c0_18 = arith.constant 0 : index
    %16 = vector.load %arg4[%c0_17, %c0_18] : memref<324x1xf32, #tpu.memory_space<vmem>>, vector<324x1xf32>
    %c0_19 = arith.constant 0 : index
    %c0_20 = arith.constant 0 : index
    %17 = vector.load %arg3[%c0_19, %c0_20] : memref<1x16xf32, #tpu.memory_space<vmem>>, vector<1x16xf32>
    %18 = vector.broadcast %17 : vector<1x16xf32> to vector<324x16xf32>
    %19 = arith.addf %15, %18 : vector<324x16xf32>
    %cst_21 = arith.constant 0.000000e+00 : f32
    %20 = vector.broadcast %cst_21 : f32 to vector<324x16xf32>
    %21 = arith.maximumf %19, %20 : vector<324x16xf32>
    %22 = vector.broadcast %16 : vector<324x1xf32> to vector<324x16xf32>
    %23 = arith.mulf %22, %21 : vector<324x16xf32>
    %24 = arith.truncf %23 : vector<324x16xf32> to vector<324x16xbf16>
    %c0_22 = arith.constant 0 : index
    %c0_23 = arith.constant 0 : index
    %25 = vector.load %arg11[%c0_22, %c0_23] : memref<324x16xbf16, #tpu.memory_space<vmem>>, vector<324x16xbf16>
    tpu.vector_store %arg11[%c0_22, %c0_23], %24 {strides = array<i32>} : memref<324x16xbf16, #tpu.memory_space<vmem>>, vector<324x16xbf16>,
    %c0_24 = arith.constant 0 : index
    %c0_25 = arith.constant 0 : index
    %26 = vector.load %arg11[%c0_24, %c0_25] : memref<324x16xbf16, #tpu.memory_space<vmem>>, vector<248x16xbf16>
    %c0_26 = arith.constant 0 : index
    %c0_27 = arith.constant 0 : index
    %c0_28 = arith.constant 0 : index
    %27 = vector.load %arg5[%c0_26, %c0_27, %c0_28] : memref<25x16x32xbf16, #tpu.memory_space<vmem>>, vector<1x16x32xbf16>
    %28 = vector.shape_cast %27 : vector<1x16x32xbf16> to vector<16x32xbf16>
    %cst_29 = arith.constant dense<0.000000e+00> : vector<248x32xf32>
    %29 = tpu.matmul %26, %28, %cst_29 {dimension_numbers = #tpu.dot_dimension_numbers<[1], [0], [0], [1], [0, 0, 1, 1], [], []>} : vector<248x16xbf16>, vector<16x32xbf16>, vector<248x32xf32> -> vector<248x32xf32>
    %c1_30 = arith.constant 1 : index
    %c0_31 = arith.constant 0 : index
    %30 = vector.load %arg11[%c1_30, %c0_31] : memref<324x16xbf16, #tpu.memory_space<vmem>>, vector<248x16xbf16>
    %c1_32 = arith.constant 1 : index
    %c0_33 = arith.constant 0 : index
    %c0_34 = arith.constant 0 : index
    %31 = vector.load %arg5[%c1_32, %c0_33, %c0_34] : memref<25x16x32xbf16, #tpu.memory_space<vmem>>, vector<1x16x32xbf16>
    %32 = vector.shape_cast %31 : vector<1x16x32xbf16> to vector<16x32xbf16>
    %cst_35 = arith.constant dense<0.000000e+00> : vector<248x32xf32>
    %33 = tpu.matmul %30, %32, %cst_35 {dimension_numbers = #tpu.dot_dimension_numbers<[1], [0], [0], [1], [0, 0, 1, 1], [], []>} : vector<248x16xbf16>, vector<16x32xbf16>, vector<248x32xf32> -> vector<248x32xf32>
    %34 = arith.addf %29, %33 : vector<248x32xf32>
    %c2_36 = arith.constant 2 : index
    %c0_37 = arith.constant 0 : index
    %35 = vector.load %arg11[%c2_36, %c0_37] : memref<324x16xbf16, #tpu.memory_space<vmem>>, vector<248x16xbf16>
    %c2_38 = arith.constant 2 : index
    %c0_39 = arith.constant 0 : index
    %c0_40 = arith.constant 0 : index
    %36 = vector.load %arg5[%c2_38, %c0_39, %c0_40] : memref<25x16x32xbf16, #tpu.memory_space<vmem>>, vector<1x16x32xbf16>
    %37 = vector.shape_cast %36 : vector<1x16x32xbf16> to vector<16x32xbf16>
    %cst_41 = arith.constant dense<0.000000e+00> : vector<248x32xf32>
    %38 = tpu.matmul %35, %37, %cst_41 {dimension_numbers = #tpu.dot_dimension_numbers<[1], [0], [0], [1], [0, 0, 1, 1], [], []>} : vector<248x16xbf16>, vector<16x32xbf16>, vector<248x32xf32> -> vector<248x32xf32>
    %39 = arith.addf %34, %38 : vector<248x32xf32>
    %c3_42 = arith.constant 3 : index
    %c0_43 = arith.constant 0 : index
    %40 = vector.load %arg11[%c3_42, %c0_43] : memref<324x16xbf16, #tpu.memory_space<vmem>>, vector<248x16xbf16>
    %c3_44 = arith.constant 3 : index
    %c0_45 = arith.constant 0 : index
    %c0_46 = arith.constant 0 : index
    %41 = vector.load %arg5[%c3_44, %c0_45, %c0_46] : memref<25x16x32xbf16, #tpu.memory_space<vmem>>, vector<1x16x32xbf16>
    %42 = vector.shape_cast %41 : vector<1x16x32xbf16> to vector<16x32xbf16>
    %cst_47 = arith.constant dense<0.000000e+00> : vector<248x32xf32>
    %43 = tpu.matmul %40, %42, %cst_47 {dimension_numbers = #tpu.dot_dimension_numbers<[1], [0], [0], [1], [0, 0, 1, 1], [], []>} : vector<248x16xbf16>, vector<16x32xbf16>, vector<248x32xf32> -> vector<248x32xf32>
    %44 = arith.addf %39, %43 : vector<248x32xf32>
    %c4 = arith.constant 4 : index
    %c0_48 = arith.constant 0 : index
    %45 = vector.load %arg11[%c4, %c0_48] : memref<324x16xbf16, #tpu.memory_space<vmem>>, vector<248x16xbf16>
    %c4_49 = arith.constant 4 : index
    %c0_50 = arith.constant 0 : index
    %c0_51 = arith.constant 0 : index
    %46 = vector.load %arg5[%c4_49, %c0_50, %c0_51] : memref<25x16x32xbf16, #tpu.memory_space<vmem>>, vector<1x16x32xbf16>
    %47 = vector.shape_cast %46 : vector<1x16x32xbf16> to vector<16x32xbf16>
    %cst_52 = arith.constant dense<0.000000e+00> : vector<248x32xf32>
    %48 = tpu.matmul %45, %47, %cst_52 {dimension_numbers = #tpu.dot_dimension_numbers<[1], [0], [0], [1], [0, 0, 1, 1], [], []>} : vector<248x16xbf16>, vector<16x32xbf16>, vector<248x32xf32> -> vector<248x32xf32>
    %49 = arith.addf %44, %48 : vector<248x32xf32>
    %c18 = arith.constant 18 : index
    %c0_53 = arith.constant 0 : index
    %50 = vector.load %arg11[%c18, %c0_53] : memref<324x16xbf16, #tpu.memory_space<vmem>>, vector<248x16xbf16>
    %c5 = arith.constant 5 : index
    %c0_54 = arith.constant 0 : index
    %c0_55 = arith.constant 0 : index
    %51 = vector.load %arg5[%c5, %c0_54, %c0_55] : memref<25x16x32xbf16, #tpu.memory_space<vmem>>, vector<1x16x32xbf16>
    %52 = vector.shape_cast %51 : vector<1x16x32xbf16> to vector<16x32xbf16>
    %cst_56 = arith.constant dense<0.000000e+00> : vector<248x32xf32>
    %53 = tpu.matmul %50, %52, %cst_56 {dimension_numbers = #tpu.dot_dimension_numbers<[1], [0], [0], [1], [0, 0, 1, 1], [], []>} : vector<248x16xbf16>, vector<16x32xbf16>, vector<248x32xf32> -> vector<248x32xf32>
    %54 = arith.addf %49, %53 : vector<248x32xf32>
    %c19 = arith.constant 19 : index
    %c0_57 = arith.constant 0 : index
    %55 = vector.load %arg11[%c19, %c0_57] : memref<324x16xbf16, #tpu.memory_space<vmem>>, vector<248x16xbf16>
    %c6 = arith.constant 6 : index
    %c0_58 = arith.constant 0 : index
    %c0_59 = arith.constant 0 : index
    %56 = vector.load %arg5[%c6, %c0_58, %c0_59] : memref<25x16x32xbf16, #tpu.memory_space<vmem>>, vector<1x16x32xbf16>
    %57 = vector.shape_cast %56 : vector<1x16x32xbf16> to vector<16x32xbf16>
    %cst_60 = arith.constant dense<0.000000e+00> : vector<248x32xf32>
    %58 = tpu.matmul %55, %57, %cst_60 {dimension_numbers = #tpu.dot_dimension_numbers<[1], [0], [0], [1], [0, 0, 1, 1], [], []>} : vector<248x16xbf16>, vector<16x32xbf16>, vector<248x32xf32> -> vector<248x32xf32>
    %59 = arith.addf %54, %58 : vector<248x32xf32>
    %c20 = arith.constant 20 : index
    %c0_61 = arith.constant 0 : index
    %60 = vector.load %arg11[%c20, %c0_61] : memref<324x16xbf16, #tpu.memory_space<vmem>>, vector<248x16xbf16>
    %c7 = arith.constant 7 : index
    %c0_62 = arith.constant 0 : index
    %c0_63 = arith.constant 0 : index
    %61 = vector.load %arg5[%c7, %c0_62, %c0_63] : memref<25x16x32xbf16, #tpu.memory_space<vmem>>, vector<1x16x32xbf16>
    %62 = vector.shape_cast %61 : vector<1x16x32xbf16> to vector<16x32xbf16>
    %cst_64 = arith.constant dense<0.000000e+00> : vector<248x32xf32>
    %63 = tpu.matmul %60, %62, %cst_64 {dimension_numbers = #tpu.dot_dimension_numbers<[1], [0], [0], [1], [0, 0, 1, 1], [], []>} : vector<248x16xbf16>, vector<16x32xbf16>, vector<248x32xf32> -> vector<248x32xf32>
    %64 = arith.addf %59, %63 : vector<248x32xf32>
    %c21 = arith.constant 21 : index
    %c0_65 = arith.constant 0 : index
    %65 = vector.load %arg11[%c21, %c0_65] : memref<324x16xbf16, #tpu.memory_space<vmem>>, vector<248x16xbf16>
    %c8 = arith.constant 8 : index
    %c0_66 = arith.constant 0 : index
    %c0_67 = arith.constant 0 : index
    %66 = vector.load %arg5[%c8, %c0_66, %c0_67] : memref<25x16x32xbf16, #tpu.memory_space<vmem>>, vector<1x16x32xbf16>
    %67 = vector.shape_cast %66 : vector<1x16x32xbf16> to vector<16x32xbf16>
    %cst_68 = arith.constant dense<0.000000e+00> : vector<248x32xf32>
    %68 = tpu.matmul %65, %67, %cst_68 {dimension_numbers = #tpu.dot_dimension_numbers<[1], [0], [0], [1], [0, 0, 1, 1], [], []>} : vector<248x16xbf16>, vector<16x32xbf16>, vector<248x32xf32> -> vector<248x32xf32>
    %69 = arith.addf %64, %68 : vector<248x32xf32>
    %c22 = arith.constant 22 : index
    %c0_69 = arith.constant 0 : index
    %70 = vector.load %arg11[%c22, %c0_69] : memref<324x16xbf16, #tpu.memory_space<vmem>>, vector<248x16xbf16>
    %c9 = arith.constant 9 : index
    %c0_70 = arith.constant 0 : index
    %c0_71 = arith.constant 0 : index
    %71 = vector.load %arg5[%c9, %c0_70, %c0_71] : memref<25x16x32xbf16, #tpu.memory_space<vmem>>, vector<1x16x32xbf16>
    %72 = vector.shape_cast %71 : vector<1x16x32xbf16> to vector<16x32xbf16>
    %cst_72 = arith.constant dense<0.000000e+00> : vector<248x32xf32>
    %73 = tpu.matmul %70, %72, %cst_72 {dimension_numbers = #tpu.dot_dimension_numbers<[1], [0], [0], [1], [0, 0, 1, 1], [], []>} : vector<248x16xbf16>, vector<16x32xbf16>, vector<248x32xf32> -> vector<248x32xf32>
    %74 = arith.addf %69, %73 : vector<248x32xf32>
    %c36 = arith.constant 36 : index
    %c0_73 = arith.constant 0 : index
    %75 = vector.load %arg11[%c36, %c0_73] : memref<324x16xbf16, #tpu.memory_space<vmem>>, vector<248x16xbf16>
    %c10 = arith.constant 10 : index
    %c0_74 = arith.constant 0 : index
    %c0_75 = arith.constant 0 : index
    %76 = vector.load %arg5[%c10, %c0_74, %c0_75] : memref<25x16x32xbf16, #tpu.memory_space<vmem>>, vector<1x16x32xbf16>
    %77 = vector.shape_cast %76 : vector<1x16x32xbf16> to vector<16x32xbf16>
    %cst_76 = arith.constant dense<0.000000e+00> : vector<248x32xf32>
    %78 = tpu.matmul %75, %77, %cst_76 {dimension_numbers = #tpu.dot_dimension_numbers<[1], [0], [0], [1], [0, 0, 1, 1], [], []>} : vector<248x16xbf16>, vector<16x32xbf16>, vector<248x32xf32> -> vector<248x32xf32>
    %79 = arith.addf %74, %78 : vector<248x32xf32>
    %c37 = arith.constant 37 : index
    %c0_77 = arith.constant 0 : index
    %80 = vector.load %arg11[%c37, %c0_77] : memref<324x16xbf16, #tpu.memory_space<vmem>>, vector<248x16xbf16>
    %c11 = arith.constant 11 : index
    %c0_78 = arith.constant 0 : index
    %c0_79 = arith.constant 0 : index
    %81 = vector.load %arg5[%c11, %c0_78, %c0_79] : memref<25x16x32xbf16, #tpu.memory_space<vmem>>, vector<1x16x32xbf16>
    %82 = vector.shape_cast %81 : vector<1x16x32xbf16> to vector<16x32xbf16>
    %cst_80 = arith.constant dense<0.000000e+00> : vector<248x32xf32>
    %83 = tpu.matmul %80, %82, %cst_80 {dimension_numbers = #tpu.dot_dimension_numbers<[1], [0], [0], [1], [0, 0, 1, 1], [], []>} : vector<248x16xbf16>, vector<16x32xbf16>, vector<248x32xf32> -> vector<248x32xf32>
    %84 = arith.addf %79, %83 : vector<248x32xf32>
    %c38 = arith.constant 38 : index
    %c0_81 = arith.constant 0 : index
    %85 = vector.load %arg11[%c38, %c0_81] : memref<324x16xbf16, #tpu.memory_space<vmem>>, vector<248x16xbf16>
    %c12 = arith.constant 12 : index
    %c0_82 = arith.constant 0 : index
    %c0_83 = arith.constant 0 : index
    %86 = vector.load %arg5[%c12, %c0_82, %c0_83] : memref<25x16x32xbf16, #tpu.memory_space<vmem>>, vector<1x16x32xbf16>
    %87 = vector.shape_cast %86 : vector<1x16x32xbf16> to vector<16x32xbf16>
    %cst_84 = arith.constant dense<0.000000e+00> : vector<248x32xf32>
    %88 = tpu.matmul %85, %87, %cst_84 {dimension_numbers = #tpu.dot_dimension_numbers<[1], [0], [0], [1], [0, 0, 1, 1], [], []>} : vector<248x16xbf16>, vector<16x32xbf16>, vector<248x32xf32> -> vector<248x32xf32>
    %89 = arith.addf %84, %88 : vector<248x32xf32>
    %c39 = arith.constant 39 : index
    %c0_85 = arith.constant 0 : index
    %90 = vector.load %arg11[%c39, %c0_85] : memref<324x16xbf16, #tpu.memory_space<vmem>>, vector<248x16xbf16>
    %c13 = arith.constant 13 : index
    %c0_86 = arith.constant 0 : index
    %c0_87 = arith.constant 0 : index
    %91 = vector.load %arg5[%c13, %c0_86, %c0_87] : memref<25x16x32xbf16, #tpu.memory_space<vmem>>, vector<1x16x32xbf16>
    %92 = vector.shape_cast %91 : vector<1x16x32xbf16> to vector<16x32xbf16>
    %cst_88 = arith.constant dense<0.000000e+00> : vector<248x32xf32>
    %93 = tpu.matmul %90, %92, %cst_88 {dimension_numbers = #tpu.dot_dimension_numbers<[1], [0], [0], [1], [0, 0, 1, 1], [], []>} : vector<248x16xbf16>, vector<16x32xbf16>, vector<248x32xf32> -> vector<248x32xf32>
    %94 = arith.addf %89, %93 : vector<248x32xf32>
    %c40 = arith.constant 40 : index
    %c0_89 = arith.constant 0 : index
    %95 = vector.load %arg11[%c40, %c0_89] : memref<324x16xbf16, #tpu.memory_space<vmem>>, vector<248x16xbf16>
    %c14 = arith.constant 14 : index
    %c0_90 = arith.constant 0 : index
    %c0_91 = arith.constant 0 : index
    %96 = vector.load %arg5[%c14, %c0_90, %c0_91] : memref<25x16x32xbf16, #tpu.memory_space<vmem>>, vector<1x16x32xbf16>
    %97 = vector.shape_cast %96 : vector<1x16x32xbf16> to vector<16x32xbf16>
    %cst_92 = arith.constant dense<0.000000e+00> : vector<248x32xf32>
    %98 = tpu.matmul %95, %97, %cst_92 {dimension_numbers = #tpu.dot_dimension_numbers<[1], [0], [0], [1], [0, 0, 1, 1], [], []>} : vector<248x16xbf16>, vector<16x32xbf16>, vector<248x32xf32> -> vector<248x32xf32>
    %99 = arith.addf %94, %98 : vector<248x32xf32>
    %c54 = arith.constant 54 : index
    %c0_93 = arith.constant 0 : index
    %100 = vector.load %arg11[%c54, %c0_93] : memref<324x16xbf16, #tpu.memory_space<vmem>>, vector<248x16xbf16>
    %c15 = arith.constant 15 : index
    %c0_94 = arith.constant 0 : index
    %c0_95 = arith.constant 0 : index
    %101 = vector.load %arg5[%c15, %c0_94, %c0_95] : memref<25x16x32xbf16, #tpu.memory_space<vmem>>, vector<1x16x32xbf16>
    %102 = vector.shape_cast %101 : vector<1x16x32xbf16> to vector<16x32xbf16>
    %cst_96 = arith.constant dense<0.000000e+00> : vector<248x32xf32>
    %103 = tpu.matmul %100, %102, %cst_96 {dimension_numbers = #tpu.dot_dimension_numbers<[1], [0], [0], [1], [0, 0, 1, 1], [], []>} : vector<248x16xbf16>, vector<16x32xbf16>, vector<248x32xf32> -> vector<248x32xf32>
    %104 = arith.addf %99, %103 : vector<248x32xf32>
    %c55 = arith.constant 55 : index
    %c0_97 = arith.constant 0 : index
    %105 = vector.load %arg11[%c55, %c0_97] : memref<324x16xbf16, #tpu.memory_space<vmem>>, vector<248x16xbf16>
    %c16 = arith.constant 16 : index
    %c0_98 = arith.constant 0 : index
    %c0_99 = arith.constant 0 : index
    %106 = vector.load %arg5[%c16, %c0_98, %c0_99] : memref<25x16x32xbf16, #tpu.memory_space<vmem>>, vector<1x16x32xbf16>
    %107 = vector.shape_cast %106 : vector<1x16x32xbf16> to vector<16x32xbf16>
    %cst_100 = arith.constant dense<0.000000e+00> : vector<248x32xf32>
    %108 = tpu.matmul %105, %107, %cst_100 {dimension_numbers = #tpu.dot_dimension_numbers<[1], [0], [0], [1], [0, 0, 1, 1], [], []>} : vector<248x16xbf16>, vector<16x32xbf16>, vector<248x32xf32> -> vector<248x32xf32>
    %109 = arith.addf %104, %108 : vector<248x32xf32>
    %c56 = arith.constant 56 : index
    %c0_101 = arith.constant 0 : index
    %110 = vector.load %arg11[%c56, %c0_101] : memref<324x16xbf16, #tpu.memory_space<vmem>>, vector<248x16xbf16>
    %c17 = arith.constant 17 : index
    %c0_102 = arith.constant 0 : index
    %c0_103 = arith.constant 0 : index
    %111 = vector.load %arg5[%c17, %c0_102, %c0_103] : memref<25x16x32xbf16, #tpu.memory_space<vmem>>, vector<1x16x32xbf16>
    %112 = vector.shape_cast %111 : vector<1x16x32xbf16> to vector<16x32xbf16>
    %cst_104 = arith.constant dense<0.000000e+00> : vector<248x32xf32>
    %113 = tpu.matmul %110, %112, %cst_104 {dimension_numbers = #tpu.dot_dimension_numbers<[1], [0], [0], [1], [0, 0, 1, 1], [], []>} : vector<248x16xbf16>, vector<16x32xbf16>, vector<248x32xf32> -> vector<248x32xf32>
    %114 = arith.addf %109, %113 : vector<248x32xf32>
    %c57 = arith.constant 57 : index
    %c0_105 = arith.constant 0 : index
    %115 = vector.load %arg11[%c57, %c0_105] : memref<324x16xbf16, #tpu.memory_space<vmem>>, vector<248x16xbf16>
    %c18_106 = arith.constant 18 : index
    %c0_107 = arith.constant 0 : index
    %c0_108 = arith.constant 0 : index
    %116 = vector.load %arg5[%c18_106, %c0_107, %c0_108] : memref<25x16x32xbf16, #tpu.memory_space<vmem>>, vector<1x16x32xbf16>
    %117 = vector.shape_cast %116 : vector<1x16x32xbf16> to vector<16x32xbf16>
    %cst_109 = arith.constant dense<0.000000e+00> : vector<248x32xf32>
    %118 = tpu.matmul %115, %117, %cst_109 {dimension_numbers = #tpu.dot_dimension_numbers<[1], [0], [0], [1], [0, 0, 1, 1], [], []>} : vector<248x16xbf16>, vector<16x32xbf16>, vector<248x32xf32> -> vector<248x32xf32>
    %119 = arith.addf %114, %118 : vector<248x32xf32>
    %c58 = arith.constant 58 : index
    %c0_110 = arith.constant 0 : index
    %120 = vector.load %arg11[%c58, %c0_110] : memref<324x16xbf16, #tpu.memory_space<vmem>>, vector<248x16xbf16>
    %c19_111 = arith.constant 19 : index
    %c0_112 = arith.constant 0 : index
    %c0_113 = arith.constant 0 : index
    %121 = vector.load %arg5[%c19_111, %c0_112, %c0_113] : memref<25x16x32xbf16, #tpu.memory_space<vmem>>, vector<1x16x32xbf16>
    %122 = vector.shape_cast %121 : vector<1x16x32xbf16> to vector<16x32xbf16>
    %cst_114 = arith.constant dense<0.000000e+00> : vector<248x32xf32>
    %123 = tpu.matmul %120, %122, %cst_114 {dimension_numbers = #tpu.dot_dimension_numbers<[1], [0], [0], [1], [0, 0, 1, 1], [], []>} : vector<248x16xbf16>, vector<16x32xbf16>, vector<248x32xf32> -> vector<248x32xf32>
    %124 = arith.addf %119, %123 : vector<248x32xf32>
    %c72 = arith.constant 72 : index
    %c0_115 = arith.constant 0 : index
    %125 = vector.load %arg11[%c72, %c0_115] : memref<324x16xbf16, #tpu.memory_space<vmem>>, vector<248x16xbf16>
    %c20_116 = arith.constant 20 : index
    %c0_117 = arith.constant 0 : index
    %c0_118 = arith.constant 0 : index
    %126 = vector.load %arg5[%c20_116, %c0_117, %c0_118] : memref<25x16x32xbf16, #tpu.memory_space<vmem>>, vector<1x16x32xbf16>
    %127 = vector.shape_cast %126 : vector<1x16x32xbf16> to vector<16x32xbf16>
    %cst_119 = arith.constant dense<0.000000e+00> : vector<248x32xf32>
    %128 = tpu.matmul %125, %127, %cst_119 {dimension_numbers = #tpu.dot_dimension_numbers<[1], [0], [0], [1], [0, 0, 1, 1], [], []>} : vector<248x16xbf16>, vector<16x32xbf16>, vector<248x32xf32> -> vector<248x32xf32>
    %129 = arith.addf %124, %128 : vector<248x32xf32>
    %c73 = arith.constant 73 : index
    %c0_120 = arith.constant 0 : index
    %130 = vector.load %arg11[%c73, %c0_120] : memref<324x16xbf16, #tpu.memory_space<vmem>>, vector<248x16xbf16>
    %c21_121 = arith.constant 21 : index
    %c0_122 = arith.constant 0 : index
    %c0_123 = arith.constant 0 : index
    %131 = vector.load %arg5[%c21_121, %c0_122, %c0_123] : memref<25x16x32xbf16, #tpu.memory_space<vmem>>, vector<1x16x32xbf16>
    %132 = vector.shape_cast %131 : vector<1x16x32xbf16> to vector<16x32xbf16>
    %cst_124 = arith.constant dense<0.000000e+00> : vector<248x32xf32>
    %133 = tpu.matmul %130, %132, %cst_124 {dimension_numbers = #tpu.dot_dimension_numbers<[1], [0], [0], [1], [0, 0, 1, 1], [], []>} : vector<248x16xbf16>, vector<16x32xbf16>, vector<248x32xf32> -> vector<248x32xf32>
    %134 = arith.addf %129, %133 : vector<248x32xf32>
    %c74 = arith.constant 74 : index
    %c0_125 = arith.constant 0 : index
    %135 = vector.load %arg11[%c74, %c0_125] : memref<324x16xbf16, #tpu.memory_space<vmem>>, vector<248x16xbf16>
    %c22_126 = arith.constant 22 : index
    %c0_127 = arith.constant 0 : index
    %c0_128 = arith.constant 0 : index
    %136 = vector.load %arg5[%c22_126, %c0_127, %c0_128] : memref<25x16x32xbf16, #tpu.memory_space<vmem>>, vector<1x16x32xbf16>
    %137 = vector.shape_cast %136 : vector<1x16x32xbf16> to vector<16x32xbf16>
    %cst_129 = arith.constant dense<0.000000e+00> : vector<248x32xf32>
    %138 = tpu.matmul %135, %137, %cst_129 {dimension_numbers = #tpu.dot_dimension_numbers<[1], [0], [0], [1], [0, 0, 1, 1], [], []>} : vector<248x16xbf16>, vector<16x32xbf16>, vector<248x32xf32> -> vector<248x32xf32>
    %139 = arith.addf %134, %138 : vector<248x32xf32>
    %c75 = arith.constant 75 : index
    %c0_130 = arith.constant 0 : index
    %140 = vector.load %arg11[%c75, %c0_130] : memref<324x16xbf16, #tpu.memory_space<vmem>>, vector<248x16xbf16>
    %c23 = arith.constant 23 : index
    %c0_131 = arith.constant 0 : index
    %c0_132 = arith.constant 0 : index
    %141 = vector.load %arg5[%c23, %c0_131, %c0_132] : memref<25x16x32xbf16, #tpu.memory_space<vmem>>, vector<1x16x32xbf16>
    %142 = vector.shape_cast %141 : vector<1x16x32xbf16> to vector<16x32xbf16>
    %cst_133 = arith.constant dense<0.000000e+00> : vector<248x32xf32>
    %143 = tpu.matmul %140, %142, %cst_133 {dimension_numbers = #tpu.dot_dimension_numbers<[1], [0], [0], [1], [0, 0, 1, 1], [], []>} : vector<248x16xbf16>, vector<16x32xbf16>, vector<248x32xf32> -> vector<248x32xf32>
    %144 = arith.addf %139, %143 : vector<248x32xf32>
    %c76 = arith.constant 76 : index
    %c0_134 = arith.constant 0 : index
    %145 = vector.load %arg11[%c76, %c0_134] : memref<324x16xbf16, #tpu.memory_space<vmem>>, vector<248x16xbf16>
    %c24 = arith.constant 24 : index
    %c0_135 = arith.constant 0 : index
    %c0_136 = arith.constant 0 : index
    %146 = vector.load %arg5[%c24, %c0_135, %c0_136] : memref<25x16x32xbf16, #tpu.memory_space<vmem>>, vector<1x16x32xbf16>
    %147 = vector.shape_cast %146 : vector<1x16x32xbf16> to vector<16x32xbf16>
    %cst_137 = arith.constant dense<0.000000e+00> : vector<248x32xf32>
    %148 = tpu.matmul %145, %147, %cst_137 {dimension_numbers = #tpu.dot_dimension_numbers<[1], [0], [0], [1], [0, 0, 1, 1], [], []>} : vector<248x16xbf16>, vector<16x32xbf16>, vector<248x32xf32> -> vector<248x32xf32>
    %149 = arith.addf %144, %148 : vector<248x32xf32>
    %150 = arith.truncf %149 : vector<248x32xf32> to vector<248x32xbf16>
    %c0_138 = arith.constant 0 : index
    %c0_139 = arith.constant 0 : index
    %c0_140 = arith.constant 0 : index
    %151 = vector.load %arg7[%c0_138, %c0_139, %c0_140] : memref<4x49x248xbf16, #tpu.memory_space<vmem>>, vector<1x49x248xbf16>
    %152 = vector.shape_cast %151 : vector<1x49x248xbf16> to vector<49x248xbf16>
    %cst_141 = arith.constant dense<0.000000e+00> : vector<49x32xf32>
    %153 = tpu.matmul %152, %150, %cst_141 {dimension_numbers = #tpu.dot_dimension_numbers<[1], [0], [0], [1], [0, 0, 1, 1], [], []>} : vector<49x248xbf16>, vector<248x32xbf16>, vector<49x32xf32> -> vector<49x32xf32>
    %c1_142 = arith.constant 1 : index
    %c0_143 = arith.constant 0 : index
    %c0_144 = arith.constant 0 : index
    %154 = vector.load %arg7[%c1_142, %c0_143, %c0_144] : memref<4x49x248xbf16, #tpu.memory_space<vmem>>, vector<1x49x248xbf16>
    %155 = vector.shape_cast %154 : vector<1x49x248xbf16> to vector<49x248xbf16>
    %cst_145 = arith.constant dense<0.000000e+00> : vector<49x32xf32>
    %156 = tpu.matmul %155, %150, %cst_145 {dimension_numbers = #tpu.dot_dimension_numbers<[1], [0], [0], [1], [0, 0, 1, 1], [], []>} : vector<49x248xbf16>, vector<248x32xbf16>, vector<49x32xf32> -> vector<49x32xf32>
    %157 = arith.maximumf %153, %156 : vector<49x32xf32>
    %c2_146 = arith.constant 2 : index
    %c0_147 = arith.constant 0 : index
    %c0_148 = arith.constant 0 : index
    %158 = vector.load %arg7[%c2_146, %c0_147, %c0_148] : memref<4x49x248xbf16, #tpu.memory_space<vmem>>, vector<1x49x248xbf16>
    %159 = vector.shape_cast %158 : vector<1x49x248xbf16> to vector<49x248xbf16>
    %cst_149 = arith.constant dense<0.000000e+00> : vector<49x32xf32>
    %160 = tpu.matmul %159, %150, %cst_149 {dimension_numbers = #tpu.dot_dimension_numbers<[1], [0], [0], [1], [0, 0, 1, 1], [], []>} : vector<49x248xbf16>, vector<248x32xbf16>, vector<49x32xf32> -> vector<49x32xf32>
    %161 = arith.maximumf %157, %160 : vector<49x32xf32>
    %c3_150 = arith.constant 3 : index
    %c0_151 = arith.constant 0 : index
    %c0_152 = arith.constant 0 : index
    %162 = vector.load %arg7[%c3_150, %c0_151, %c0_152] : memref<4x49x248xbf16, #tpu.memory_space<vmem>>, vector<1x49x248xbf16>
    %163 = vector.shape_cast %162 : vector<1x49x248xbf16> to vector<49x248xbf16>
    %cst_153 = arith.constant dense<0.000000e+00> : vector<49x32xf32>
    %164 = tpu.matmul %163, %150, %cst_153 {dimension_numbers = #tpu.dot_dimension_numbers<[1], [0], [0], [1], [0, 0, 1, 1], [], []>} : vector<49x248xbf16>, vector<248x32xbf16>, vector<49x32xf32> -> vector<49x32xf32>
    %165 = arith.maximumf %161, %164 : vector<49x32xf32>
    %c0_154 = arith.constant 0 : index
    %c0_155 = arith.constant 0 : index
    %166 = vector.load %arg6[%c0_154, %c0_155] : memref<1x32xf32, #tpu.memory_space<vmem>>, vector<1x32xf32>
    %167 = vector.broadcast %166 : vector<1x32xf32> to vector<49x32xf32>
    %168 = arith.addf %165, %167 : vector<49x32xf32>
    %cst_156 = arith.constant 0.000000e+00 : f32
    %169 = vector.broadcast %cst_156 : f32 to vector<49x32xf32>
    %170 = arith.maximumf %168, %169 : vector<49x32xf32>
    %171 = arith.truncf %170 : vector<49x32xf32> to vector<49x32xbf16>
    %c0_157 = arith.constant 0 : index
    %c0_158 = arith.constant 0 : index
    %172 = vector.load %arg12[%c0_157, %c0_158] : memref<49x32xbf16, #tpu.memory_space<vmem>>, vector<49x32xbf16>
    tpu.vector_store %arg12[%c0_157, %c0_158], %171 {strides = array<i32>} : memref<49x32xbf16, #tpu.memory_space<vmem>>, vector<49x32xbf16>,
    %cst_159 = arith.constant 0.000000e+00 : f32
    %173 = vector.broadcast %cst_159 : f32 to vector<1x128xf32>
    %c0_160 = arith.constant 0 : index
    %c0_161 = arith.constant 0 : index
    %174 = vector.load %arg12[%c0_160, %c0_161] : memref<49x32xbf16, #tpu.memory_space<vmem>>, vector<1x32xbf16>
    %c0_162 = arith.constant 0 : index
    %c0_163 = arith.constant 0 : index
    %c0_164 = arith.constant 0 : index
    %175 = vector.load %arg8[%c0_162, %c0_163, %c0_164] : memref<49x32x128xbf16, #tpu.memory_space<vmem>>, vector<1x32x128xbf16>
    %176 = vector.shape_cast %175 : vector<1x32x128xbf16> to vector<32x128xbf16>
    %cst_165 = arith.constant dense<0.000000e+00> : vector<1x128xf32>
    %177 = tpu.matmul %174, %176, %cst_165 {dimension_numbers = #tpu.dot_dimension_numbers<[1], [0], [0], [1], [0, 0, 1, 1], [], []>} : vector<1x32xbf16>, vector<32x128xbf16>, vector<1x128xf32> -> vector<1x128xf32>
    %178 = arith.addf %173, %177 : vector<1x128xf32>
    %c1_166 = arith.constant 1 : index
    %c0_167 = arith.constant 0 : index
    %179 = vector.load %arg12[%c1_166, %c0_167] : memref<49x32xbf16, #tpu.memory_space<vmem>>, vector<1x32xbf16>
    %c1_168 = arith.constant 1 : index
    %c0_169 = arith.constant 0 : index
    %c0_170 = arith.constant 0 : index
    %180 = vector.load %arg8[%c1_168, %c0_169, %c0_170] : memref<49x32x128xbf16, #tpu.memory_space<vmem>>, vector<1x32x128xbf16>
    %181 = vector.shape_cast %180 : vector<1x32x128xbf16> to vector<32x128xbf16>
    %cst_171 = arith.constant dense<0.000000e+00> : vector<1x128xf32>
    %182 = tpu.matmul %179, %181, %cst_171 {dimension_numbers = #tpu.dot_dimension_numbers<[1], [0], [0], [1], [0, 0, 1, 1], [], []>} : vector<1x32xbf16>, vector<32x128xbf16>, vector<1x128xf32> -> vector<1x128xf32>
    %183 = arith.addf %178, %182 : vector<1x128xf32>
    %c2_172 = arith.constant 2 : index
    %c0_173 = arith.constant 0 : index
    %184 = vector.load %arg12[%c2_172, %c0_173] : memref<49x32xbf16, #tpu.memory_space<vmem>>, vector<1x32xbf16>
    %c2_174 = arith.constant 2 : index
    %c0_175 = arith.constant 0 : index
    %c0_176 = arith.constant 0 : index
    %185 = vector.load %arg8[%c2_174, %c0_175, %c0_176] : memref<49x32x128xbf16, #tpu.memory_space<vmem>>, vector<1x32x128xbf16>
    %186 = vector.shape_cast %185 : vector<1x32x128xbf16> to vector<32x128xbf16>
    %cst_177 = arith.constant dense<0.000000e+00> : vector<1x128xf32>
    %187 = tpu.matmul %184, %186, %cst_177 {dimension_numbers = #tpu.dot_dimension_numbers<[1], [0], [0], [1], [0, 0, 1, 1], [], []>} : vector<1x32xbf16>, vector<32x128xbf16>, vector<1x128xf32> -> vector<1x128xf32>
    %188 = arith.addf %183, %187 : vector<1x128xf32>
    %c3_178 = arith.constant 3 : index
    %c0_179 = arith.constant 0 : index
    %189 = vector.load %arg12[%c3_178, %c0_179] : memref<49x32xbf16, #tpu.memory_space<vmem>>, vector<1x32xbf16>
    %c3_180 = arith.constant 3 : index
    %c0_181 = arith.constant 0 : index
    %c0_182 = arith.constant 0 : index
    %190 = vector.load %arg8[%c3_180, %c0_181, %c0_182] : memref<49x32x128xbf16, #tpu.memory_space<vmem>>, vector<1x32x128xbf16>
    %191 = vector.shape_cast %190 : vector<1x32x128xbf16> to vector<32x128xbf16>
    %cst_183 = arith.constant dense<0.000000e+00> : vector<1x128xf32>
    %192 = tpu.matmul %189, %191, %cst_183 {dimension_numbers = #tpu.dot_dimension_numbers<[1], [0], [0], [1], [0, 0, 1, 1], [], []>} : vector<1x32xbf16>, vector<32x128xbf16>, vector<1x128xf32> -> vector<1x128xf32>
    %193 = arith.addf %188, %192 : vector<1x128xf32>
    %c4_184 = arith.constant 4 : index
    %c0_185 = arith.constant 0 : index
    %194 = vector.load %arg12[%c4_184, %c0_185] : memref<49x32xbf16, #tpu.memory_space<vmem>>, vector<1x32xbf16>
    %c4_186 = arith.constant 4 : index
    %c0_187 = arith.constant 0 : index
    %c0_188 = arith.constant 0 : index
    %195 = vector.load %arg8[%c4_186, %c0_187, %c0_188] : memref<49x32x128xbf16, #tpu.memory_space<vmem>>, vector<1x32x128xbf16>
    %196 = vector.shape_cast %195 : vector<1x32x128xbf16> to vector<32x128xbf16>
    %cst_189 = arith.constant dense<0.000000e+00> : vector<1x128xf32>
    %197 = tpu.matmul %194, %196, %cst_189 {dimension_numbers = #tpu.dot_dimension_numbers<[1], [0], [0], [1], [0, 0, 1, 1], [], []>} : vector<1x32xbf16>, vector<32x128xbf16>, vector<1x128xf32> -> vector<1x128xf32>
    %198 = arith.addf %193, %197 : vector<1x128xf32>
    %c5_190 = arith.constant 5 : index
    %c0_191 = arith.constant 0 : index
    %199 = vector.load %arg12[%c5_190, %c0_191] : memref<49x32xbf16, #tpu.memory_space<vmem>>, vector<1x32xbf16>
    %c5_192 = arith.constant 5 : index
    %c0_193 = arith.constant 0 : index
    %c0_194 = arith.constant 0 : index
    %200 = vector.load %arg8[%c5_192, %c0_193, %c0_194] : memref<49x32x128xbf16, #tpu.memory_space<vmem>>, vector<1x32x128xbf16>
    %201 = vector.shape_cast %200 : vector<1x32x128xbf16> to vector<32x128xbf16>
    %cst_195 = arith.constant dense<0.000000e+00> : vector<1x128xf32>
    %202 = tpu.matmul %199, %201, %cst_195 {dimension_numbers = #tpu.dot_dimension_numbers<[1], [0], [0], [1], [0, 0, 1, 1], [], []>} : vector<1x32xbf16>, vector<32x128xbf16>, vector<1x128xf32> -> vector<1x128xf32>
    %203 = arith.addf %198, %202 : vector<1x128xf32>
    %c6_196 = arith.constant 6 : index
    %c0_197 = arith.constant 0 : index
    %204 = vector.load %arg12[%c6_196, %c0_197] : memref<49x32xbf16, #tpu.memory_space<vmem>>, vector<1x32xbf16>
    %c6_198 = arith.constant 6 : index
    %c0_199 = arith.constant 0 : index
    %c0_200 = arith.constant 0 : index
    %205 = vector.load %arg8[%c6_198, %c0_199, %c0_200] : memref<49x32x128xbf16, #tpu.memory_space<vmem>>, vector<1x32x128xbf16>
    %206 = vector.shape_cast %205 : vector<1x32x128xbf16> to vector<32x128xbf16>
    %cst_201 = arith.constant dense<0.000000e+00> : vector<1x128xf32>
    %207 = tpu.matmul %204, %206, %cst_201 {dimension_numbers = #tpu.dot_dimension_numbers<[1], [0], [0], [1], [0, 0, 1, 1], [], []>} : vector<1x32xbf16>, vector<32x128xbf16>, vector<1x128xf32> -> vector<1x128xf32>
    %208 = arith.addf %203, %207 : vector<1x128xf32>
    %c7_202 = arith.constant 7 : index
    %c0_203 = arith.constant 0 : index
    %209 = vector.load %arg12[%c7_202, %c0_203] : memref<49x32xbf16, #tpu.memory_space<vmem>>, vector<1x32xbf16>
    %c7_204 = arith.constant 7 : index
    %c0_205 = arith.constant 0 : index
    %c0_206 = arith.constant 0 : index
    %210 = vector.load %arg8[%c7_204, %c0_205, %c0_206] : memref<49x32x128xbf16, #tpu.memory_space<vmem>>, vector<1x32x128xbf16>
    %211 = vector.shape_cast %210 : vector<1x32x128xbf16> to vector<32x128xbf16>
    %cst_207 = arith.constant dense<0.000000e+00> : vector<1x128xf32>
    %212 = tpu.matmul %209, %211, %cst_207 {dimension_numbers = #tpu.dot_dimension_numbers<[1], [0], [0], [1], [0, 0, 1, 1], [], []>} : vector<1x32xbf16>, vector<32x128xbf16>, vector<1x128xf32> -> vector<1x128xf32>
    %213 = arith.addf %208, %212 : vector<1x128xf32>
    %c8_208 = arith.constant 8 : index
    %c0_209 = arith.constant 0 : index
    %214 = vector.load %arg12[%c8_208, %c0_209] : memref<49x32xbf16, #tpu.memory_space<vmem>>, vector<1x32xbf16>
    %c8_210 = arith.constant 8 : index
    %c0_211 = arith.constant 0 : index
    %c0_212 = arith.constant 0 : index
    %215 = vector.load %arg8[%c8_210, %c0_211, %c0_212] : memref<49x32x128xbf16, #tpu.memory_space<vmem>>, vector<1x32x128xbf16>
    %216 = vector.shape_cast %215 : vector<1x32x128xbf16> to vector<32x128xbf16>
    %cst_213 = arith.constant dense<0.000000e+00> : vector<1x128xf32>
    %217 = tpu.matmul %214, %216, %cst_213 {dimension_numbers = #tpu.dot_dimension_numbers<[1], [0], [0], [1], [0, 0, 1, 1], [], []>} : vector<1x32xbf16>, vector<32x128xbf16>, vector<1x128xf32> -> vector<1x128xf32>
    %218 = arith.addf %213, %217 : vector<1x128xf32>
    %c9_214 = arith.constant 9 : index
    %c0_215 = arith.constant 0 : index
    %219 = vector.load %arg12[%c9_214, %c0_215] : memref<49x32xbf16, #tpu.memory_space<vmem>>, vector<1x32xbf16>
    %c9_216 = arith.constant 9 : index
    %c0_217 = arith.constant 0 : index
    %c0_218 = arith.constant 0 : index
    %220 = vector.load %arg8[%c9_216, %c0_217, %c0_218] : memref<49x32x128xbf16, #tpu.memory_space<vmem>>, vector<1x32x128xbf16>
    %221 = vector.shape_cast %220 : vector<1x32x128xbf16> to vector<32x128xbf16>
    %cst_219 = arith.constant dense<0.000000e+00> : vector<1x128xf32>
    %222 = tpu.matmul %219, %221, %cst_219 {dimension_numbers = #tpu.dot_dimension_numbers<[1], [0], [0], [1], [0, 0, 1, 1], [], []>} : vector<1x32xbf16>, vector<32x128xbf16>, vector<1x128xf32> -> vector<1x128xf32>
    %223 = arith.addf %218, %222 : vector<1x128xf32>
    %c10_220 = arith.constant 10 : index
    %c0_221 = arith.constant 0 : index
    %224 = vector.load %arg12[%c10_220, %c0_221] : memref<49x32xbf16, #tpu.memory_space<vmem>>, vector<1x32xbf16>
    %c10_222 = arith.constant 10 : index
    %c0_223 = arith.constant 0 : index
    %c0_224 = arith.constant 0 : index
    %225 = vector.load %arg8[%c10_222, %c0_223, %c0_224] : memref<49x32x128xbf16, #tpu.memory_space<vmem>>, vector<1x32x128xbf16>
    %226 = vector.shape_cast %225 : vector<1x32x128xbf16> to vector<32x128xbf16>
    %cst_225 = arith.constant dense<0.000000e+00> : vector<1x128xf32>
    %227 = tpu.matmul %224, %226, %cst_225 {dimension_numbers = #tpu.dot_dimension_numbers<[1], [0], [0], [1], [0, 0, 1, 1], [], []>} : vector<1x32xbf16>, vector<32x128xbf16>, vector<1x128xf32> -> vector<1x128xf32>
    %228 = arith.addf %223, %227 : vector<1x128xf32>
    %c11_226 = arith.constant 11 : index
    %c0_227 = arith.constant 0 : index
    %229 = vector.load %arg12[%c11_226, %c0_227] : memref<49x32xbf16, #tpu.memory_space<vmem>>, vector<1x32xbf16>
    %c11_228 = arith.constant 11 : index
    %c0_229 = arith.constant 0 : index
    %c0_230 = arith.constant 0 : index
    %230 = vector.load %arg8[%c11_228, %c0_229, %c0_230] : memref<49x32x128xbf16, #tpu.memory_space<vmem>>, vector<1x32x128xbf16>
    %231 = vector.shape_cast %230 : vector<1x32x128xbf16> to vector<32x128xbf16>
    %cst_231 = arith.constant dense<0.000000e+00> : vector<1x128xf32>
    %232 = tpu.matmul %229, %231, %cst_231 {dimension_numbers = #tpu.dot_dimension_numbers<[1], [0], [0], [1], [0, 0, 1, 1], [], []>} : vector<1x32xbf16>, vector<32x128xbf16>, vector<1x128xf32> -> vector<1x128xf32>
    %233 = arith.addf %228, %232 : vector<1x128xf32>
    %c12_232 = arith.constant 12 : index
    %c0_233 = arith.constant 0 : index
    %234 = vector.load %arg12[%c12_232, %c0_233] : memref<49x32xbf16, #tpu.memory_space<vmem>>, vector<1x32xbf16>
    %c12_234 = arith.constant 12 : index
    %c0_235 = arith.constant 0 : index
    %c0_236 = arith.constant 0 : index
    %235 = vector.load %arg8[%c12_234, %c0_235, %c0_236] : memref<49x32x128xbf16, #tpu.memory_space<vmem>>, vector<1x32x128xbf16>
    %236 = vector.shape_cast %235 : vector<1x32x128xbf16> to vector<32x128xbf16>
    %cst_237 = arith.constant dense<0.000000e+00> : vector<1x128xf32>
    %237 = tpu.matmul %234, %236, %cst_237 {dimension_numbers = #tpu.dot_dimension_numbers<[1], [0], [0], [1], [0, 0, 1, 1], [], []>} : vector<1x32xbf16>, vector<32x128xbf16>, vector<1x128xf32> -> vector<1x128xf32>
    %238 = arith.addf %233, %237 : vector<1x128xf32>
    %c13_238 = arith.constant 13 : index
    %c0_239 = arith.constant 0 : index
    %239 = vector.load %arg12[%c13_238, %c0_239] : memref<49x32xbf16, #tpu.memory_space<vmem>>, vector<1x32xbf16>
    %c13_240 = arith.constant 13 : index
    %c0_241 = arith.constant 0 : index
    %c0_242 = arith.constant 0 : index
    %240 = vector.load %arg8[%c13_240, %c0_241, %c0_242] : memref<49x32x128xbf16, #tpu.memory_space<vmem>>, vector<1x32x128xbf16>
    %241 = vector.shape_cast %240 : vector<1x32x128xbf16> to vector<32x128xbf16>
    %cst_243 = arith.constant dense<0.000000e+00> : vector<1x128xf32>
    %242 = tpu.matmul %239, %241, %cst_243 {dimension_numbers = #tpu.dot_dimension_numbers<[1], [0], [0], [1], [0, 0, 1, 1], [], []>} : vector<1x32xbf16>, vector<32x128xbf16>, vector<1x128xf32> -> vector<1x128xf32>
    %243 = arith.addf %238, %242 : vector<1x128xf32>
    %c14_244 = arith.constant 14 : index
    %c0_245 = arith.constant 0 : index
    %244 = vector.load %arg12[%c14_244, %c0_245] : memref<49x32xbf16, #tpu.memory_space<vmem>>, vector<1x32xbf16>
    %c14_246 = arith.constant 14 : index
    %c0_247 = arith.constant 0 : index
    %c0_248 = arith.constant 0 : index
    %245 = vector.load %arg8[%c14_246, %c0_247, %c0_248] : memref<49x32x128xbf16, #tpu.memory_space<vmem>>, vector<1x32x128xbf16>
    %246 = vector.shape_cast %245 : vector<1x32x128xbf16> to vector<32x128xbf16>
    %cst_249 = arith.constant dense<0.000000e+00> : vector<1x128xf32>
    %247 = tpu.matmul %244, %246, %cst_249 {dimension_numbers = #tpu.dot_dimension_numbers<[1], [0], [0], [1], [0, 0, 1, 1], [], []>} : vector<1x32xbf16>, vector<32x128xbf16>, vector<1x128xf32> -> vector<1x128xf32>
    %248 = arith.addf %243, %247 : vector<1x128xf32>
    %c15_250 = arith.constant 15 : index
    %c0_251 = arith.constant 0 : index
    %249 = vector.load %arg12[%c15_250, %c0_251] : memref<49x32xbf16, #tpu.memory_space<vmem>>, vector<1x32xbf16>
    %c15_252 = arith.constant 15 : index
    %c0_253 = arith.constant 0 : index
    %c0_254 = arith.constant 0 : index
    %250 = vector.load %arg8[%c15_252, %c0_253, %c0_254] : memref<49x32x128xbf16, #tpu.memory_space<vmem>>, vector<1x32x128xbf16>
    %251 = vector.shape_cast %250 : vector<1x32x128xbf16> to vector<32x128xbf16>
    %cst_255 = arith.constant dense<0.000000e+00> : vector<1x128xf32>
    %252 = tpu.matmul %249, %251, %cst_255 {dimension_numbers = #tpu.dot_dimension_numbers<[1], [0], [0], [1], [0, 0, 1, 1], [], []>} : vector<1x32xbf16>, vector<32x128xbf16>, vector<1x128xf32> -> vector<1x128xf32>
    %253 = arith.addf %248, %252 : vector<1x128xf32>
    %c16_256 = arith.constant 16 : index
    %c0_257 = arith.constant 0 : index
    %254 = vector.load %arg12[%c16_256, %c0_257] : memref<49x32xbf16, #tpu.memory_space<vmem>>, vector<1x32xbf16>
    %c16_258 = arith.constant 16 : index
    %c0_259 = arith.constant 0 : index
    %c0_260 = arith.constant 0 : index
    %255 = vector.load %arg8[%c16_258, %c0_259, %c0_260] : memref<49x32x128xbf16, #tpu.memory_space<vmem>>, vector<1x32x128xbf16>
    %256 = vector.shape_cast %255 : vector<1x32x128xbf16> to vector<32x128xbf16>
    %cst_261 = arith.constant dense<0.000000e+00> : vector<1x128xf32>
    %257 = tpu.matmul %254, %256, %cst_261 {dimension_numbers = #tpu.dot_dimension_numbers<[1], [0], [0], [1], [0, 0, 1, 1], [], []>} : vector<1x32xbf16>, vector<32x128xbf16>, vector<1x128xf32> -> vector<1x128xf32>
    %258 = arith.addf %253, %257 : vector<1x128xf32>
    %c17_262 = arith.constant 17 : index
    %c0_263 = arith.constant 0 : index
    %259 = vector.load %arg12[%c17_262, %c0_263] : memref<49x32xbf16, #tpu.memory_space<vmem>>, vector<1x32xbf16>
    %c17_264 = arith.constant 17 : index
    %c0_265 = arith.constant 0 : index
    %c0_266 = arith.constant 0 : index
    %260 = vector.load %arg8[%c17_264, %c0_265, %c0_266] : memref<49x32x128xbf16, #tpu.memory_space<vmem>>, vector<1x32x128xbf16>
    %261 = vector.shape_cast %260 : vector<1x32x128xbf16> to vector<32x128xbf16>
    %cst_267 = arith.constant dense<0.000000e+00> : vector<1x128xf32>
    %262 = tpu.matmul %259, %261, %cst_267 {dimension_numbers = #tpu.dot_dimension_numbers<[1], [0], [0], [1], [0, 0, 1, 1], [], []>} : vector<1x32xbf16>, vector<32x128xbf16>, vector<1x128xf32> -> vector<1x128xf32>
    %263 = arith.addf %258, %262 : vector<1x128xf32>
    %c18_268 = arith.constant 18 : index
    %c0_269 = arith.constant 0 : index
    %264 = vector.load %arg12[%c18_268, %c0_269] : memref<49x32xbf16, #tpu.memory_space<vmem>>, vector<1x32xbf16>
    %c18_270 = arith.constant 18 : index
    %c0_271 = arith.constant 0 : index
    %c0_272 = arith.constant 0 : index
    %265 = vector.load %arg8[%c18_270, %c0_271, %c0_272] : memref<49x32x128xbf16, #tpu.memory_space<vmem>>, vector<1x32x128xbf16>
    %266 = vector.shape_cast %265 : vector<1x32x128xbf16> to vector<32x128xbf16>
    %cst_273 = arith.constant dense<0.000000e+00> : vector<1x128xf32>
    %267 = tpu.matmul %264, %266, %cst_273 {dimension_numbers = #tpu.dot_dimension_numbers<[1], [0], [0], [1], [0, 0, 1, 1], [], []>} : vector<1x32xbf16>, vector<32x128xbf16>, vector<1x128xf32> -> vector<1x128xf32>
    %268 = arith.addf %263, %267 : vector<1x128xf32>
    %c19_274 = arith.constant 19 : index
    %c0_275 = arith.constant 0 : index
    %269 = vector.load %arg12[%c19_274, %c0_275] : memref<49x32xbf16, #tpu.memory_space<vmem>>, vector<1x32xbf16>
    %c19_276 = arith.constant 19 : index
    %c0_277 = arith.constant 0 : index
    %c0_278 = arith.constant 0 : index
    %270 = vector.load %arg8[%c19_276, %c0_277, %c0_278] : memref<49x32x128xbf16, #tpu.memory_space<vmem>>, vector<1x32x128xbf16>
    %271 = vector.shape_cast %270 : vector<1x32x128xbf16> to vector<32x128xbf16>
    %cst_279 = arith.constant dense<0.000000e+00> : vector<1x128xf32>
    %272 = tpu.matmul %269, %271, %cst_279 {dimension_numbers = #tpu.dot_dimension_numbers<[1], [0], [0], [1], [0, 0, 1, 1], [], []>} : vector<1x32xbf16>, vector<32x128xbf16>, vector<1x128xf32> -> vector<1x128xf32>
    %273 = arith.addf %268, %272 : vector<1x128xf32>
    %c20_280 = arith.constant 20 : index
    %c0_281 = arith.constant 0 : index
    %274 = vector.load %arg12[%c20_280, %c0_281] : memref<49x32xbf16, #tpu.memory_space<vmem>>, vector<1x32xbf16>
    %c20_282 = arith.constant 20 : index
    %c0_283 = arith.constant 0 : index
    %c0_284 = arith.constant 0 : index
    %275 = vector.load %arg8[%c20_282, %c0_283, %c0_284] : memref<49x32x128xbf16, #tpu.memory_space<vmem>>, vector<1x32x128xbf16>
    %276 = vector.shape_cast %275 : vector<1x32x128xbf16> to vector<32x128xbf16>
    %cst_285 = arith.constant dense<0.000000e+00> : vector<1x128xf32>
    %277 = tpu.matmul %274, %276, %cst_285 {dimension_numbers = #tpu.dot_dimension_numbers<[1], [0], [0], [1], [0, 0, 1, 1], [], []>} : vector<1x32xbf16>, vector<32x128xbf16>, vector<1x128xf32> -> vector<1x128xf32>
    %278 = arith.addf %273, %277 : vector<1x128xf32>
    %c21_286 = arith.constant 21 : index
    %c0_287 = arith.constant 0 : index
    %279 = vector.load %arg12[%c21_286, %c0_287] : memref<49x32xbf16, #tpu.memory_space<vmem>>, vector<1x32xbf16>
    %c21_288 = arith.constant 21 : index
    %c0_289 = arith.constant 0 : index
    %c0_290 = arith.constant 0 : index
    %280 = vector.load %arg8[%c21_288, %c0_289, %c0_290] : memref<49x32x128xbf16, #tpu.memory_space<vmem>>, vector<1x32x128xbf16>
    %281 = vector.shape_cast %280 : vector<1x32x128xbf16> to vector<32x128xbf16>
    %cst_291 = arith.constant dense<0.000000e+00> : vector<1x128xf32>
    %282 = tpu.matmul %279, %281, %cst_291 {dimension_numbers = #tpu.dot_dimension_numbers<[1], [0], [0], [1], [0, 0, 1, 1], [], []>} : vector<1x32xbf16>, vector<32x128xbf16>, vector<1x128xf32> -> vector<1x128xf32>
    %283 = arith.addf %278, %282 : vector<1x128xf32>
    %c22_292 = arith.constant 22 : index
    %c0_293 = arith.constant 0 : index
    %284 = vector.load %arg12[%c22_292, %c0_293] : memref<49x32xbf16, #tpu.memory_space<vmem>>, vector<1x32xbf16>
    %c22_294 = arith.constant 22 : index
    %c0_295 = arith.constant 0 : index
    %c0_296 = arith.constant 0 : index
    %285 = vector.load %arg8[%c22_294, %c0_295, %c0_296] : memref<49x32x128xbf16, #tpu.memory_space<vmem>>, vector<1x32x128xbf16>
    %286 = vector.shape_cast %285 : vector<1x32x128xbf16> to vector<32x128xbf16>
    %cst_297 = arith.constant dense<0.000000e+00> : vector<1x128xf32>
    %287 = tpu.matmul %284, %286, %cst_297 {dimension_numbers = #tpu.dot_dimension_numbers<[1], [0], [0], [1], [0, 0, 1, 1], [], []>} : vector<1x32xbf16>, vector<32x128xbf16>, vector<1x128xf32> -> vector<1x128xf32>
    %288 = arith.addf %283, %287 : vector<1x128xf32>
    %c23_298 = arith.constant 23 : index
    %c0_299 = arith.constant 0 : index
    %289 = vector.load %arg12[%c23_298, %c0_299] : memref<49x32xbf16, #tpu.memory_space<vmem>>, vector<1x32xbf16>
    %c23_300 = arith.constant 23 : index
    %c0_301 = arith.constant 0 : index
    %c0_302 = arith.constant 0 : index
    %290 = vector.load %arg8[%c23_300, %c0_301, %c0_302] : memref<49x32x128xbf16, #tpu.memory_space<vmem>>, vector<1x32x128xbf16>
    %291 = vector.shape_cast %290 : vector<1x32x128xbf16> to vector<32x128xbf16>
    %cst_303 = arith.constant dense<0.000000e+00> : vector<1x128xf32>
    %292 = tpu.matmul %289, %291, %cst_303 {dimension_numbers = #tpu.dot_dimension_numbers<[1], [0], [0], [1], [0, 0, 1, 1], [], []>} : vector<1x32xbf16>, vector<32x128xbf16>, vector<1x128xf32> -> vector<1x128xf32>
    %293 = arith.addf %288, %292 : vector<1x128xf32>
    %c24_304 = arith.constant 24 : index
    %c0_305 = arith.constant 0 : index
    %294 = vector.load %arg12[%c24_304, %c0_305] : memref<49x32xbf16, #tpu.memory_space<vmem>>, vector<1x32xbf16>
    %c24_306 = arith.constant 24 : index
    %c0_307 = arith.constant 0 : index
    %c0_308 = arith.constant 0 : index
    %295 = vector.load %arg8[%c24_306, %c0_307, %c0_308] : memref<49x32x128xbf16, #tpu.memory_space<vmem>>, vector<1x32x128xbf16>
    %296 = vector.shape_cast %295 : vector<1x32x128xbf16> to vector<32x128xbf16>
    %cst_309 = arith.constant dense<0.000000e+00> : vector<1x128xf32>
    %297 = tpu.matmul %294, %296, %cst_309 {dimension_numbers = #tpu.dot_dimension_numbers<[1], [0], [0], [1], [0, 0, 1, 1], [], []>} : vector<1x32xbf16>, vector<32x128xbf16>, vector<1x128xf32> -> vector<1x128xf32>
    %298 = arith.addf %293, %297 : vector<1x128xf32>
    %c25 = arith.constant 25 : index
    %c0_310 = arith.constant 0 : index
    %299 = vector.load %arg12[%c25, %c0_310] : memref<49x32xbf16, #tpu.memory_space<vmem>>, vector<1x32xbf16>
    %c25_311 = arith.constant 25 : index
    %c0_312 = arith.constant 0 : index
    %c0_313 = arith.constant 0 : index
    %300 = vector.load %arg8[%c25_311, %c0_312, %c0_313] : memref<49x32x128xbf16, #tpu.memory_space<vmem>>, vector<1x32x128xbf16>
    %301 = vector.shape_cast %300 : vector<1x32x128xbf16> to vector<32x128xbf16>
    %cst_314 = arith.constant dense<0.000000e+00> : vector<1x128xf32>
    %302 = tpu.matmul %299, %301, %cst_314 {dimension_numbers = #tpu.dot_dimension_numbers<[1], [0], [0], [1], [0, 0, 1, 1], [], []>} : vector<1x32xbf16>, vector<32x128xbf16>, vector<1x128xf32> -> vector<1x128xf32>
    %303 = arith.addf %298, %302 : vector<1x128xf32>
    %c26 = arith.constant 26 : index
    %c0_315 = arith.constant 0 : index
    %304 = vector.load %arg12[%c26, %c0_315] : memref<49x32xbf16, #tpu.memory_space<vmem>>, vector<1x32xbf16>
    %c26_316 = arith.constant 26 : index
    %c0_317 = arith.constant 0 : index
    %c0_318 = arith.constant 0 : index
    %305 = vector.load %arg8[%c26_316, %c0_317, %c0_318] : memref<49x32x128xbf16, #tpu.memory_space<vmem>>, vector<1x32x128xbf16>
    %306 = vector.shape_cast %305 : vector<1x32x128xbf16> to vector<32x128xbf16>
    %cst_319 = arith.constant dense<0.000000e+00> : vector<1x128xf32>
    %307 = tpu.matmul %304, %306, %cst_319 {dimension_numbers = #tpu.dot_dimension_numbers<[1], [0], [0], [1], [0, 0, 1, 1], [], []>} : vector<1x32xbf16>, vector<32x128xbf16>, vector<1x128xf32> -> vector<1x128xf32>
    %308 = arith.addf %303, %307 : vector<1x128xf32>
    %c27 = arith.constant 27 : index
    %c0_320 = arith.constant 0 : index
    %309 = vector.load %arg12[%c27, %c0_320] : memref<49x32xbf16, #tpu.memory_space<vmem>>, vector<1x32xbf16>
    %c27_321 = arith.constant 27 : index
    %c0_322 = arith.constant 0 : index
    %c0_323 = arith.constant 0 : index
    %310 = vector.load %arg8[%c27_321, %c0_322, %c0_323] : memref<49x32x128xbf16, #tpu.memory_space<vmem>>, vector<1x32x128xbf16>
    %311 = vector.shape_cast %310 : vector<1x32x128xbf16> to vector<32x128xbf16>
    %cst_324 = arith.constant dense<0.000000e+00> : vector<1x128xf32>
    %312 = tpu.matmul %309, %311, %cst_324 {dimension_numbers = #tpu.dot_dimension_numbers<[1], [0], [0], [1], [0, 0, 1, 1], [], []>} : vector<1x32xbf16>, vector<32x128xbf16>, vector<1x128xf32> -> vector<1x128xf32>
    %313 = arith.addf %308, %312 : vector<1x128xf32>
    %c28 = arith.constant 28 : index
    %c0_325 = arith.constant 0 : index
    %314 = vector.load %arg12[%c28, %c0_325] : memref<49x32xbf16, #tpu.memory_space<vmem>>, vector<1x32xbf16>
    %c28_326 = arith.constant 28 : index
    %c0_327 = arith.constant 0 : index
    %c0_328 = arith.constant 0 : index
    %315 = vector.load %arg8[%c28_326, %c0_327, %c0_328] : memref<49x32x128xbf16, #tpu.memory_space<vmem>>, vector<1x32x128xbf16>
    %316 = vector.shape_cast %315 : vector<1x32x128xbf16> to vector<32x128xbf16>
    %cst_329 = arith.constant dense<0.000000e+00> : vector<1x128xf32>
    %317 = tpu.matmul %314, %316, %cst_329 {dimension_numbers = #tpu.dot_dimension_numbers<[1], [0], [0], [1], [0, 0, 1, 1], [], []>} : vector<1x32xbf16>, vector<32x128xbf16>, vector<1x128xf32> -> vector<1x128xf32>
    %318 = arith.addf %313, %317 : vector<1x128xf32>
    %c29 = arith.constant 29 : index
    %c0_330 = arith.constant 0 : index
    %319 = vector.load %arg12[%c29, %c0_330] : memref<49x32xbf16, #tpu.memory_space<vmem>>, vector<1x32xbf16>
    %c29_331 = arith.constant 29 : index
    %c0_332 = arith.constant 0 : index
    %c0_333 = arith.constant 0 : index
    %320 = vector.load %arg8[%c29_331, %c0_332, %c0_333] : memref<49x32x128xbf16, #tpu.memory_space<vmem>>, vector<1x32x128xbf16>
    %321 = vector.shape_cast %320 : vector<1x32x128xbf16> to vector<32x128xbf16>
    %cst_334 = arith.constant dense<0.000000e+00> : vector<1x128xf32>
    %322 = tpu.matmul %319, %321, %cst_334 {dimension_numbers = #tpu.dot_dimension_numbers<[1], [0], [0], [1], [0, 0, 1, 1], [], []>} : vector<1x32xbf16>, vector<32x128xbf16>, vector<1x128xf32> -> vector<1x128xf32>
    %323 = arith.addf %318, %322 : vector<1x128xf32>
    %c30 = arith.constant 30 : index
    %c0_335 = arith.constant 0 : index
    %324 = vector.load %arg12[%c30, %c0_335] : memref<49x32xbf16, #tpu.memory_space<vmem>>, vector<1x32xbf16>
    %c30_336 = arith.constant 30 : index
    %c0_337 = arith.constant 0 : index
    %c0_338 = arith.constant 0 : index
    %325 = vector.load %arg8[%c30_336, %c0_337, %c0_338] : memref<49x32x128xbf16, #tpu.memory_space<vmem>>, vector<1x32x128xbf16>
    %326 = vector.shape_cast %325 : vector<1x32x128xbf16> to vector<32x128xbf16>
    %cst_339 = arith.constant dense<0.000000e+00> : vector<1x128xf32>
    %327 = tpu.matmul %324, %326, %cst_339 {dimension_numbers = #tpu.dot_dimension_numbers<[1], [0], [0], [1], [0, 0, 1, 1], [], []>} : vector<1x32xbf16>, vector<32x128xbf16>, vector<1x128xf32> -> vector<1x128xf32>
    %328 = arith.addf %323, %327 : vector<1x128xf32>
    %c31 = arith.constant 31 : index
    %c0_340 = arith.constant 0 : index
    %329 = vector.load %arg12[%c31, %c0_340] : memref<49x32xbf16, #tpu.memory_space<vmem>>, vector<1x32xbf16>
    %c31_341 = arith.constant 31 : index
    %c0_342 = arith.constant 0 : index
    %c0_343 = arith.constant 0 : index
    %330 = vector.load %arg8[%c31_341, %c0_342, %c0_343] : memref<49x32x128xbf16, #tpu.memory_space<vmem>>, vector<1x32x128xbf16>
    %331 = vector.shape_cast %330 : vector<1x32x128xbf16> to vector<32x128xbf16>
    %cst_344 = arith.constant dense<0.000000e+00> : vector<1x128xf32>
    %332 = tpu.matmul %329, %331, %cst_344 {dimension_numbers = #tpu.dot_dimension_numbers<[1], [0], [0], [1], [0, 0, 1, 1], [], []>} : vector<1x32xbf16>, vector<32x128xbf16>, vector<1x128xf32> -> vector<1x128xf32>
    %333 = arith.addf %328, %332 : vector<1x128xf32>
    %c32 = arith.constant 32 : index
    %c0_345 = arith.constant 0 : index
    %334 = vector.load %arg12[%c32, %c0_345] : memref<49x32xbf16, #tpu.memory_space<vmem>>, vector<1x32xbf16>
    %c32_346 = arith.constant 32 : index
    %c0_347 = arith.constant 0 : index
    %c0_348 = arith.constant 0 : index
    %335 = vector.load %arg8[%c32_346, %c0_347, %c0_348] : memref<49x32x128xbf16, #tpu.memory_space<vmem>>, vector<1x32x128xbf16>
    %336 = vector.shape_cast %335 : vector<1x32x128xbf16> to vector<32x128xbf16>
    %cst_349 = arith.constant dense<0.000000e+00> : vector<1x128xf32>
    %337 = tpu.matmul %334, %336, %cst_349 {dimension_numbers = #tpu.dot_dimension_numbers<[1], [0], [0], [1], [0, 0, 1, 1], [], []>} : vector<1x32xbf16>, vector<32x128xbf16>, vector<1x128xf32> -> vector<1x128xf32>
    %338 = arith.addf %333, %337 : vector<1x128xf32>
    %c33 = arith.constant 33 : index
    %c0_350 = arith.constant 0 : index
    %339 = vector.load %arg12[%c33, %c0_350] : memref<49x32xbf16, #tpu.memory_space<vmem>>, vector<1x32xbf16>
    %c33_351 = arith.constant 33 : index
    %c0_352 = arith.constant 0 : index
    %c0_353 = arith.constant 0 : index
    %340 = vector.load %arg8[%c33_351, %c0_352, %c0_353] : memref<49x32x128xbf16, #tpu.memory_space<vmem>>, vector<1x32x128xbf16>
    %341 = vector.shape_cast %340 : vector<1x32x128xbf16> to vector<32x128xbf16>
    %cst_354 = arith.constant dense<0.000000e+00> : vector<1x128xf32>
    %342 = tpu.matmul %339, %341, %cst_354 {dimension_numbers = #tpu.dot_dimension_numbers<[1], [0], [0], [1], [0, 0, 1, 1], [], []>} : vector<1x32xbf16>, vector<32x128xbf16>, vector<1x128xf32> -> vector<1x128xf32>
    %343 = arith.addf %338, %342 : vector<1x128xf32>
    %c34 = arith.constant 34 : index
    %c0_355 = arith.constant 0 : index
    %344 = vector.load %arg12[%c34, %c0_355] : memref<49x32xbf16, #tpu.memory_space<vmem>>, vector<1x32xbf16>
    %c34_356 = arith.constant 34 : index
    %c0_357 = arith.constant 0 : index
    %c0_358 = arith.constant 0 : index
    %345 = vector.load %arg8[%c34_356, %c0_357, %c0_358] : memref<49x32x128xbf16, #tpu.memory_space<vmem>>, vector<1x32x128xbf16>
    %346 = vector.shape_cast %345 : vector<1x32x128xbf16> to vector<32x128xbf16>
    %cst_359 = arith.constant dense<0.000000e+00> : vector<1x128xf32>
    %347 = tpu.matmul %344, %346, %cst_359 {dimension_numbers = #tpu.dot_dimension_numbers<[1], [0], [0], [1], [0, 0, 1, 1], [], []>} : vector<1x32xbf16>, vector<32x128xbf16>, vector<1x128xf32> -> vector<1x128xf32>
    %348 = arith.addf %343, %347 : vector<1x128xf32>
    %c35 = arith.constant 35 : index
    %c0_360 = arith.constant 0 : index
    %349 = vector.load %arg12[%c35, %c0_360] : memref<49x32xbf16, #tpu.memory_space<vmem>>, vector<1x32xbf16>
    %c35_361 = arith.constant 35 : index
    %c0_362 = arith.constant 0 : index
    %c0_363 = arith.constant 0 : index
    %350 = vector.load %arg8[%c35_361, %c0_362, %c0_363] : memref<49x32x128xbf16, #tpu.memory_space<vmem>>, vector<1x32x128xbf16>
    %351 = vector.shape_cast %350 : vector<1x32x128xbf16> to vector<32x128xbf16>
    %cst_364 = arith.constant dense<0.000000e+00> : vector<1x128xf32>
    %352 = tpu.matmul %349, %351, %cst_364 {dimension_numbers = #tpu.dot_dimension_numbers<[1], [0], [0], [1], [0, 0, 1, 1], [], []>} : vector<1x32xbf16>, vector<32x128xbf16>, vector<1x128xf32> -> vector<1x128xf32>
    %353 = arith.addf %348, %352 : vector<1x128xf32>
    %c36_365 = arith.constant 36 : index
    %c0_366 = arith.constant 0 : index
    %354 = vector.load %arg12[%c36_365, %c0_366] : memref<49x32xbf16, #tpu.memory_space<vmem>>, vector<1x32xbf16>
    %c36_367 = arith.constant 36 : index
    %c0_368 = arith.constant 0 : index
    %c0_369 = arith.constant 0 : index
    %355 = vector.load %arg8[%c36_367, %c0_368, %c0_369] : memref<49x32x128xbf16, #tpu.memory_space<vmem>>, vector<1x32x128xbf16>
    %356 = vector.shape_cast %355 : vector<1x32x128xbf16> to vector<32x128xbf16>
    %cst_370 = arith.constant dense<0.000000e+00> : vector<1x128xf32>
    %357 = tpu.matmul %354, %356, %cst_370 {dimension_numbers = #tpu.dot_dimension_numbers<[1], [0], [0], [1], [0, 0, 1, 1], [], []>} : vector<1x32xbf16>, vector<32x128xbf16>, vector<1x128xf32> -> vector<1x128xf32>
    %358 = arith.addf %353, %357 : vector<1x128xf32>
    %c37_371 = arith.constant 37 : index
    %c0_372 = arith.constant 0 : index
    %359 = vector.load %arg12[%c37_371, %c0_372] : memref<49x32xbf16, #tpu.memory_space<vmem>>, vector<1x32xbf16>
    %c37_373 = arith.constant 37 : index
    %c0_374 = arith.constant 0 : index
    %c0_375 = arith.constant 0 : index
    %360 = vector.load %arg8[%c37_373, %c0_374, %c0_375] : memref<49x32x128xbf16, #tpu.memory_space<vmem>>, vector<1x32x128xbf16>
    %361 = vector.shape_cast %360 : vector<1x32x128xbf16> to vector<32x128xbf16>
    %cst_376 = arith.constant dense<0.000000e+00> : vector<1x128xf32>
    %362 = tpu.matmul %359, %361, %cst_376 {dimension_numbers = #tpu.dot_dimension_numbers<[1], [0], [0], [1], [0, 0, 1, 1], [], []>} : vector<1x32xbf16>, vector<32x128xbf16>, vector<1x128xf32> -> vector<1x128xf32>
    %363 = arith.addf %358, %362 : vector<1x128xf32>
    %c38_377 = arith.constant 38 : index
    %c0_378 = arith.constant 0 : index
    %364 = vector.load %arg12[%c38_377, %c0_378] : memref<49x32xbf16, #tpu.memory_space<vmem>>, vector<1x32xbf16>
    %c38_379 = arith.constant 38 : index
    %c0_380 = arith.constant 0 : index
    %c0_381 = arith.constant 0 : index
    %365 = vector.load %arg8[%c38_379, %c0_380, %c0_381] : memref<49x32x128xbf16, #tpu.memory_space<vmem>>, vector<1x32x128xbf16>
    %366 = vector.shape_cast %365 : vector<1x32x128xbf16> to vector<32x128xbf16>
    %cst_382 = arith.constant dense<0.000000e+00> : vector<1x128xf32>
    %367 = tpu.matmul %364, %366, %cst_382 {dimension_numbers = #tpu.dot_dimension_numbers<[1], [0], [0], [1], [0, 0, 1, 1], [], []>} : vector<1x32xbf16>, vector<32x128xbf16>, vector<1x128xf32> -> vector<1x128xf32>
    %368 = arith.addf %363, %367 : vector<1x128xf32>
    %c39_383 = arith.constant 39 : index
    %c0_384 = arith.constant 0 : index
    %369 = vector.load %arg12[%c39_383, %c0_384] : memref<49x32xbf16, #tpu.memory_space<vmem>>, vector<1x32xbf16>
    %c39_385 = arith.constant 39 : index
    %c0_386 = arith.constant 0 : index
    %c0_387 = arith.constant 0 : index
    %370 = vector.load %arg8[%c39_385, %c0_386, %c0_387] : memref<49x32x128xbf16, #tpu.memory_space<vmem>>, vector<1x32x128xbf16>
    %371 = vector.shape_cast %370 : vector<1x32x128xbf16> to vector<32x128xbf16>
    %cst_388 = arith.constant dense<0.000000e+00> : vector<1x128xf32>
    %372 = tpu.matmul %369, %371, %cst_388 {dimension_numbers = #tpu.dot_dimension_numbers<[1], [0], [0], [1], [0, 0, 1, 1], [], []>} : vector<1x32xbf16>, vector<32x128xbf16>, vector<1x128xf32> -> vector<1x128xf32>
    %373 = arith.addf %368, %372 : vector<1x128xf32>
    %c40_389 = arith.constant 40 : index
    %c0_390 = arith.constant 0 : index
    %374 = vector.load %arg12[%c40_389, %c0_390] : memref<49x32xbf16, #tpu.memory_space<vmem>>, vector<1x32xbf16>
    %c40_391 = arith.constant 40 : index
    %c0_392 = arith.constant 0 : index
    %c0_393 = arith.constant 0 : index
    %375 = vector.load %arg8[%c40_391, %c0_392, %c0_393] : memref<49x32x128xbf16, #tpu.memory_space<vmem>>, vector<1x32x128xbf16>
    %376 = vector.shape_cast %375 : vector<1x32x128xbf16> to vector<32x128xbf16>
    %cst_394 = arith.constant dense<0.000000e+00> : vector<1x128xf32>
    %377 = tpu.matmul %374, %376, %cst_394 {dimension_numbers = #tpu.dot_dimension_numbers<[1], [0], [0], [1], [0, 0, 1, 1], [], []>} : vector<1x32xbf16>, vector<32x128xbf16>, vector<1x128xf32> -> vector<1x128xf32>
    %378 = arith.addf %373, %377 : vector<1x128xf32>
    %c41 = arith.constant 41 : index
    %c0_395 = arith.constant 0 : index
    %379 = vector.load %arg12[%c41, %c0_395] : memref<49x32xbf16, #tpu.memory_space<vmem>>, vector<1x32xbf16>
    %c41_396 = arith.constant 41 : index
    %c0_397 = arith.constant 0 : index
    %c0_398 = arith.constant 0 : index
    %380 = vector.load %arg8[%c41_396, %c0_397, %c0_398] : memref<49x32x128xbf16, #tpu.memory_space<vmem>>, vector<1x32x128xbf16>
    %381 = vector.shape_cast %380 : vector<1x32x128xbf16> to vector<32x128xbf16>
    %cst_399 = arith.constant dense<0.000000e+00> : vector<1x128xf32>
    %382 = tpu.matmul %379, %381, %cst_399 {dimension_numbers = #tpu.dot_dimension_numbers<[1], [0], [0], [1], [0, 0, 1, 1], [], []>} : vector<1x32xbf16>, vector<32x128xbf16>, vector<1x128xf32> -> vector<1x128xf32>
    %383 = arith.addf %378, %382 : vector<1x128xf32>
    %c42 = arith.constant 42 : index
    %c0_400 = arith.constant 0 : index
    %384 = vector.load %arg12[%c42, %c0_400] : memref<49x32xbf16, #tpu.memory_space<vmem>>, vector<1x32xbf16>
    %c42_401 = arith.constant 42 : index
    %c0_402 = arith.constant 0 : index
    %c0_403 = arith.constant 0 : index
    %385 = vector.load %arg8[%c42_401, %c0_402, %c0_403] : memref<49x32x128xbf16, #tpu.memory_space<vmem>>, vector<1x32x128xbf16>
    %386 = vector.shape_cast %385 : vector<1x32x128xbf16> to vector<32x128xbf16>
    %cst_404 = arith.constant dense<0.000000e+00> : vector<1x128xf32>
    %387 = tpu.matmul %384, %386, %cst_404 {dimension_numbers = #tpu.dot_dimension_numbers<[1], [0], [0], [1], [0, 0, 1, 1], [], []>} : vector<1x32xbf16>, vector<32x128xbf16>, vector<1x128xf32> -> vector<1x128xf32>
    %388 = arith.addf %383, %387 : vector<1x128xf32>
    %c43 = arith.constant 43 : index
    %c0_405 = arith.constant 0 : index
    %389 = vector.load %arg12[%c43, %c0_405] : memref<49x32xbf16, #tpu.memory_space<vmem>>, vector<1x32xbf16>
    %c43_406 = arith.constant 43 : index
    %c0_407 = arith.constant 0 : index
    %c0_408 = arith.constant 0 : index
    %390 = vector.load %arg8[%c43_406, %c0_407, %c0_408] : memref<49x32x128xbf16, #tpu.memory_space<vmem>>, vector<1x32x128xbf16>
    %391 = vector.shape_cast %390 : vector<1x32x128xbf16> to vector<32x128xbf16>
    %cst_409 = arith.constant dense<0.000000e+00> : vector<1x128xf32>
    %392 = tpu.matmul %389, %391, %cst_409 {dimension_numbers = #tpu.dot_dimension_numbers<[1], [0], [0], [1], [0, 0, 1, 1], [], []>} : vector<1x32xbf16>, vector<32x128xbf16>, vector<1x128xf32> -> vector<1x128xf32>
    %393 = arith.addf %388, %392 : vector<1x128xf32>
    %c44 = arith.constant 44 : index
    %c0_410 = arith.constant 0 : index
    %394 = vector.load %arg12[%c44, %c0_410] : memref<49x32xbf16, #tpu.memory_space<vmem>>, vector<1x32xbf16>
    %c44_411 = arith.constant 44 : index
    %c0_412 = arith.constant 0 : index
    %c0_413 = arith.constant 0 : index
    %395 = vector.load %arg8[%c44_411, %c0_412, %c0_413] : memref<49x32x128xbf16, #tpu.memory_space<vmem>>, vector<1x32x128xbf16>
    %396 = vector.shape_cast %395 : vector<1x32x128xbf16> to vector<32x128xbf16>
    %cst_414 = arith.constant dense<0.000000e+00> : vector<1x128xf32>
    %397 = tpu.matmul %394, %396, %cst_414 {dimension_numbers = #tpu.dot_dimension_numbers<[1], [0], [0], [1], [0, 0, 1, 1], [], []>} : vector<1x32xbf16>, vector<32x128xbf16>, vector<1x128xf32> -> vector<1x128xf32>
    %398 = arith.addf %393, %397 : vector<1x128xf32>
    %c45 = arith.constant 45 : index
    %c0_415 = arith.constant 0 : index
    %399 = vector.load %arg12[%c45, %c0_415] : memref<49x32xbf16, #tpu.memory_space<vmem>>, vector<1x32xbf16>
    %c45_416 = arith.constant 45 : index
    %c0_417 = arith.constant 0 : index
    %c0_418 = arith.constant 0 : index
    %400 = vector.load %arg8[%c45_416, %c0_417, %c0_418] : memref<49x32x128xbf16, #tpu.memory_space<vmem>>, vector<1x32x128xbf16>
    %401 = vector.shape_cast %400 : vector<1x32x128xbf16> to vector<32x128xbf16>
    %cst_419 = arith.constant dense<0.000000e+00> : vector<1x128xf32>
    %402 = tpu.matmul %399, %401, %cst_419 {dimension_numbers = #tpu.dot_dimension_numbers<[1], [0], [0], [1], [0, 0, 1, 1], [], []>} : vector<1x32xbf16>, vector<32x128xbf16>, vector<1x128xf32> -> vector<1x128xf32>
    %403 = arith.addf %398, %402 : vector<1x128xf32>
    %c46 = arith.constant 46 : index
    %c0_420 = arith.constant 0 : index
    %404 = vector.load %arg12[%c46, %c0_420] : memref<49x32xbf16, #tpu.memory_space<vmem>>, vector<1x32xbf16>
    %c46_421 = arith.constant 46 : index
    %c0_422 = arith.constant 0 : index
    %c0_423 = arith.constant 0 : index
    %405 = vector.load %arg8[%c46_421, %c0_422, %c0_423] : memref<49x32x128xbf16, #tpu.memory_space<vmem>>, vector<1x32x128xbf16>
    %406 = vector.shape_cast %405 : vector<1x32x128xbf16> to vector<32x128xbf16>
    %cst_424 = arith.constant dense<0.000000e+00> : vector<1x128xf32>
    %407 = tpu.matmul %404, %406, %cst_424 {dimension_numbers = #tpu.dot_dimension_numbers<[1], [0], [0], [1], [0, 0, 1, 1], [], []>} : vector<1x32xbf16>, vector<32x128xbf16>, vector<1x128xf32> -> vector<1x128xf32>
    %408 = arith.addf %403, %407 : vector<1x128xf32>
    %c47 = arith.constant 47 : index
    %c0_425 = arith.constant 0 : index
    %409 = vector.load %arg12[%c47, %c0_425] : memref<49x32xbf16, #tpu.memory_space<vmem>>, vector<1x32xbf16>
    %c47_426 = arith.constant 47 : index
    %c0_427 = arith.constant 0 : index
    %c0_428 = arith.constant 0 : index
    %410 = vector.load %arg8[%c47_426, %c0_427, %c0_428] : memref<49x32x128xbf16, #tpu.memory_space<vmem>>, vector<1x32x128xbf16>
    %411 = vector.shape_cast %410 : vector<1x32x128xbf16> to vector<32x128xbf16>
    %cst_429 = arith.constant dense<0.000000e+00> : vector<1x128xf32>
    %412 = tpu.matmul %409, %411, %cst_429 {dimension_numbers = #tpu.dot_dimension_numbers<[1], [0], [0], [1], [0, 0, 1, 1], [], []>} : vector<1x32xbf16>, vector<32x128xbf16>, vector<1x128xf32> -> vector<1x128xf32>
    %413 = arith.addf %408, %412 : vector<1x128xf32>
    %c48 = arith.constant 48 : index
    %c0_430 = arith.constant 0 : index
    %414 = vector.load %arg12[%c48, %c0_430] : memref<49x32xbf16, #tpu.memory_space<vmem>>, vector<1x32xbf16>
    %c48_431 = arith.constant 48 : index
    %c0_432 = arith.constant 0 : index
    %c0_433 = arith.constant 0 : index
    %415 = vector.load %arg8[%c48_431, %c0_432, %c0_433] : memref<49x32x128xbf16, #tpu.memory_space<vmem>>, vector<1x32x128xbf16>
    %416 = vector.shape_cast %415 : vector<1x32x128xbf16> to vector<32x128xbf16>
    %cst_434 = arith.constant dense<0.000000e+00> : vector<1x128xf32>
    %417 = tpu.matmul %414, %416, %cst_434 {dimension_numbers = #tpu.dot_dimension_numbers<[1], [0], [0], [1], [0, 0, 1, 1], [], []>} : vector<1x32xbf16>, vector<32x128xbf16>, vector<1x128xf32> -> vector<1x128xf32>
    %418 = arith.addf %413, %417 : vector<1x128xf32>
    %c0_435 = arith.constant 0 : index
    %c0_436 = arith.constant 0 : index
    %419 = vector.load %arg9[%c0_435, %c0_436] : memref<1x128xf32, #tpu.memory_space<vmem>>, vector<1x128xf32>
    %420 = arith.addf %418, %419 : vector<1x128xf32>
    %c0_437 = arith.constant 0 : index
    %c0_438 = arith.constant 0 : index
    %c0_439 = arith.constant 0 : index
    %421 = vector.load %arg10[%c0_437, %c0_438, %c0_439] : memref<1x1x128xf32, #tpu.memory_space<vmem>>, vector<1x1x128xf32>
    %422 = vector.shape_cast %421 : vector<1x1x128xf32> to vector<1x128xf32>
    %423 = vector.shape_cast %420 : vector<1x128xf32> to vector<1x1x128xf32>
    tpu.vector_store %arg10[%c0_437, %c0_438, %c0_439], %423 {strides = array<i32>} : memref<1x1x128xf32, #tpu.memory_space<vmem>>, vector<1x1x128xf32>,
    return
  }
  func.func @transform_0(%arg0: i32) -> (i32, i32, i32, i32) {
    %c0_i32 = arith.constant 0 : i32
    %c0_i32_0 = arith.constant 0 : i32
    %c0_i32_1 = arith.constant 0 : i32
    %c0_i32_2 = arith.constant 0 : i32
    return %arg0, %c0_i32, %c0_i32_0, %c0_i32_1 : i32, i32, i32, i32
  }
  func.func @transform_1(%arg0: i32) -> (i32, i32) {
    %c0_i32 = arith.constant 0 : i32
    %c0_i32_0 = arith.constant 0 : i32
    %c0_i32_1 = arith.constant 0 : i32
    return %c0_i32, %c0_i32_0 : i32, i32
  }
  func.func @transform_2(%arg0: i32) -> (i32, i32) {
    %c0_i32 = arith.constant 0 : i32
    %c0_i32_0 = arith.constant 0 : i32
    %c0_i32_1 = arith.constant 0 : i32
    return %c0_i32, %c0_i32_0 : i32, i32
  }
  func.func @transform_3(%arg0: i32) -> (i32, i32) {
    %c0_i32 = arith.constant 0 : i32
    %c0_i32_0 = arith.constant 0 : i32
    %c0_i32_1 = arith.constant 0 : i32
    return %c0_i32, %c0_i32_0 : i32, i32
  }
  func.func @transform_4(%arg0: i32) -> (i32, i32, i32) {
    %c0_i32 = arith.constant 0 : i32
    %c0_i32_0 = arith.constant 0 : i32
    %c0_i32_1 = arith.constant 0 : i32
    %c0_i32_2 = arith.constant 0 : i32
    return %c0_i32, %c0_i32_0, %c0_i32_1 : i32, i32, i32
  }
  func.func @transform_5(%arg0: i32) -> (i32, i32) {
    %c0_i32 = arith.constant 0 : i32
    %c0_i32_0 = arith.constant 0 : i32
    %c0_i32_1 = arith.constant 0 : i32
    return %c0_i32, %c0_i32_0 : i32, i32
  }
  func.func @transform_6(%arg0: i32) -> (i32, i32, i32) {
    %c0_i32 = arith.constant 0 : i32
    %c0_i32_0 = arith.constant 0 : i32
    %c0_i32_1 = arith.constant 0 : i32
    %c0_i32_2 = arith.constant 0 : i32
    return %c0_i32, %c0_i32_0, %c0_i32_1 : i32, i32, i32
  }
  func.func @transform_7(%arg0: i32) -> (i32, i32, i32) {
    %c0_i32 = arith.constant 0 : i32
    %c0_i32_0 = arith.constant 0 : i32
    %c0_i32_1 = arith.constant 0 : i32
    %c0_i32_2 = arith.constant 0 : i32
    return %c0_i32, %c0_i32_0, %c0_i32_1 : i32, i32, i32
  }
  func.func @transform_8(%arg0: i32) -> (i32, i32) {
    %c0_i32 = arith.constant 0 : i32
    %c0_i32_0 = arith.constant 0 : i32
    %c0_i32_1 = arith.constant 0 : i32
    return %c0_i32, %c0_i32_0 : i32, i32
  }
  func.func @transform_9(%arg0: i32) -> (i32, i32, i32) {
    %c0_i32 = arith.constant 0 : i32
    %c0_i32_0 = arith.constant 0 : i32
    %c0_i32_1 = arith.constant 0 : i32
    return %arg0, %c0_i32, %c0_i32_0 : i32, i32, i32
  }
}

</mosaic_0001>

<bundles_post_ra>
// kernel: cnn_forward.1
= control target key start
LH: loop header
LB: loop body
LE: loop exit
PB: predicated region body
PF: predicated region fallthrough
CT: control target
= control target key end

     0   :  { %14 = vsyncpa [#allocation5], 0  ;;  %s25495_s0 = inlined_call_operand.vmem [shape: bf16[2,4,324,25], index: 0, kind: input, shape index: {}]   ;;  %s25496_s1 = inlined_call_operand.vmem [shape: bf16[25,16], index: 1, kind: input, shape index: {}]   ;;  %s25497_s2 = inlined_call_operand.vmem [shape: f32[1,16], index: 2, kind: input, shape index: {}]   ;;  %s25498_s3 = inlined_call_operand.vmem [shape: f32[324,1], index: 3, kind: input, shape index: {}]   ;;  %s25499_s4 = inlined_call_operand.vmem [shape: bf16[25,16,32], index: 4, kind: input, shape index: {}]   ;;  %s25500_s5 = inlined_call_operand.vmem [shape: f32[1,32], index: 5, kind: input, shape index: {}]   ;;  %s25501_s6 = inlined_call_operand.vmem [shape: bf16[4,49,248], index: 6, kind: input, shape index: {}]   ;;  %s25502_s7 = inlined_call_operand.vmem [shape: bf16[49,32,128], index: 7, kind: input, shape index: {}]   ;;  %s25503_s8 = inlined_call_operand.vmem [shape: f32[1,128], index: 8, kind: input, shape index: {}]   ;;  %s25504_s9 = inlined_call_operand.hbm [shape: f32[2,1,128], index: 9, kind: output, shape index: {}]  }
   0x1   :  { %16 = vsyncpa [#allocation5 + $0x1], 0  ;;  %s19514_s30 = smov 0   ;;  %s19516_s10 = smov 0  }
   0x2   :  { %s19518_s11 = smov 0   ;;  %s19520_s12 = smov 0  }
   0x3 LB: > { %s19535_s13 = sadd.s32 4294967295, %s19457_s12   ;;  %s14973_s14 = sadd.s32 4294967294, %s19457_s12   ;;  %s19457_s12 = sphi %s19520_s12, %s26563_s12   ;;  %s19453_s11 = sphi %s19518_s11, %s26562_s11   ;;  %s19449_s10 = sphi %s19516_s10, %s26561_s10   ;;  %s19445_s30 = sphi %s19514_s30, %s26560_s30  }
   0x4   : > { %s19539_s15 = sadd.s32 1, %s19457_s12   ;;  %s223_s16 = sadd.s32 1, %s19453_s11 }
   0x5   : > { %s220_s17 = ssub.s32 %s19457_s12, %s19539_s15  ;;  %p233_p0 = scmp.ne.s32.totalorder %s19453_s11, %s19449_s10 }
   0x6   : > { %p221_p1 = scmp.eq.s32.totalorder %s220_s17, 0  ;;  %p234_p2 = scmp.eq.s32.totalorder %s19535_s13, 1 }
   0x7   : > { %p239_p3 = scmp.ne.s32.totalorder %s19449_s10, %s19445_s30  ;;  %p240_p4 = scmp.eq.s32.totalorder %s14973_s14, 1 }
   0x8   : > { %s19550_s18 = scalar_select %p221_p1, %s19453_s11, %s223_s16  }
   0x9   : > { %p19552_p5 = por %p234_p2, %p233_p0  ;;  %p19556_p6 = por %p240_p4, %p239_p3 }
   0xa   : > { %p14976_p7 = scmp.ge.s32.totalorder %s19457_s12, 1  ;;  %p290_p8 = scmp.lt.s32.totalorder %s19457_s12, 3 }
   0xc   : > { %p291_p9 = pnand %p14976_p7, %p290_p8 }
   0xe   : > { %294 = sbr.rel (%p291_p9) target bundleno = 2237 (0x8bd), region = 56 }
  0x13   : > { %vm554_vm0 = vcmask 1043456   ;;  %v25519_v0 = vmov 0.0   ;;  %v18905_v1 = vld [vmem:[%s25496_s1 + $0x8] sm:$0x1f]   ;;  %vm555_vm1 = vcmask 1044480   ;;  %v19460_v2 = vmov 65535  }
  0x14   : > { %17261 = vmatprep.subr.bf16.mxu0 %v25519_v0  ;;  %17349 = vmatprep.subr.bf16.mxu1 %v25519_v0  ;;  %v556_v3 = vsel %vm554_vm0, 4294967295, %v19460_v2  ;;  %p325_p10 = scmp.lt.s32.totalorder %s19535_s13, 1  ;;  %vm19461_vm2 = vmmov 0   ;;  %v18906_v6 = vld [vmem:[%s25496_s1] sm:$0xff]   ;;  %vm490_vm3 = vcmask 203776   ;;  %v19462_v36 = vmov 0  }
  0x15   : > { %v557_v4 = vsel %vm555_vm1, %v556_v3, 0  ;;  %17265 = vmatprep.mubr.msk.bf16.mxu0 %vm19461_vm2, %v25519_v0  ;;  %17353 = vmatprep.mubr.msk.bf16.mxu1 %vm19461_vm2, %v25519_v0  ;;  %v2108_v33 = vld [vmem:[%s25498_s3] sm:$0xff]  ;;  %v2110_v37 = vld [vmem:[%s25498_s3 + $0x10] sm:$0xff]  ;;  %v2109_v38 = vld [vmem:[%s25498_s3 + $0x8] sm:$0xff]  ;;  %vm2649_vm4 = vcmask 125952   ;;  %vm2943_vm5 = vcmask 130048  }
  0x16   : > { %v559_v5 = vand.u32 %v18905_v1, %v557_v4  ;;  %s326_s25 = scalar_select %p325_p10, %s19535_s13, 1  ;;  %18903 = vset.pattern.permute.xlu0 %v19462_v36  ;;  %18904 = vset.pattern.permute.xlu1 %v19462_v36  ;;  %v2111_v39 = vld [vmem:[%s25498_s3 + $0x18] sm:$0xff]  ;;  %v2112_v40 = vld [vmem:[%s25498_s3 + $0x20] sm:$0xff]  ;;  %v2113_v43 = vld [vmem:[%s25498_s3 + $0x28] sm:$0xff]  ;;  %vm3359_vm6 = vcmask 1046528   ;;  %vm3969_vm9 = vcmask 1045504  }
  0x17   : > { %2240 = vperm.xlu0 %18903, %v2108_v33   ;;  %2250 = vperm.xlu1 %18904, %v2110_v37   ;;  %v2114_v44 = vld [vmem:[%s25498_s3 + $0x30] sm:$0xff]  ;;  %v2115_v45 = vld [vmem:[%s25498_s3 + $0x38] sm:$0xff]  ;;  %v2116_v46 = vld [vmem:[%s25498_s3 + $0x40] sm:$0xff]  ;;  %vm2809_vm7 = vsmask.f32 7424  ;;  %vm2690_vm10 = vcmask 123904  }
  0x18   : > { %17262 = vmatpush3.bf16.msra.mxu0 %v559_v5  ;;  %17350 = vmatpush3.bf16.msra.mxu1 %v559_v5  ;;  %s18859_s26 = smul.u32 656, %s326_s25  ;;  %v2117_v49 = vld [vmem:[%s25498_s3 + $0x48] sm:$0xff]  ;;  %v2118_v50 = vld [vmem:[%s25498_s3 + $0x50] sm:$0xff]  ;;  %v2119_v51 = vld [vmem:[%s25498_s3 + $0x58] sm:$0xff]  ;;  %vm3643_vm8 = vsmask.f32 6400 }
  0x19   : > { %17263 = vmatprep.subr.bf16.mxu0 %v25519_v0  ;;  %17351 = vmatprep.subr.bf16.mxu1 %v25519_v0  ;;  %v2120_v52 = vld [vmem:[%s25498_s3 + $0x60] sm:$0xff]  ;;  %v2121_v55 = vld [vmem:[%s25498_s3 + $0x68] sm:$0xff]  ;;  %v2122_v56 = vld [vmem:[%s25498_s3 + $0x70] sm:$0xff]  ;;  %vm5322_vm11 = vsmask.f32 5376  ;;  %vm11195_vm13 = vcmask 982016  }
  0x1a   : > { %s19583_s29 = scalar_lea.vmem %s25495_s0, %s18859_s26  ;;  %v2123_v57 = vld [vmem:[%s25498_s3 + $0x78] sm:$0xff]  ;;  %v2124_v58 = vld [vmem:[%s25498_s3 + $0x80] sm:$0xff]  ;;  %v2125_v61 = vld [vmem:[%s25498_s3 + $0x88] sm:$0xff]  ;;  %vm7001_vm12 = vsmask.f32 4352  ;;  %vm11697_vm14 = vcmask 257024  }
  0x1b   : > { %v18907_v7 = vld [vmem:[%s19583_s29] sm:$0xff]   ;;  %v18909_v9 = vld [vmem:[%s19583_s29 + $0x8] sm:$0xff]   ;;  %v18911_v11 = vld [vmem:[%s19583_s29 + $0x10] sm:$0xff]   ;;  %2245 = vperm.xlu0 %18903, %v2109_v38   ;;  %2255 = vperm.xlu1 %18904, %v2111_v39   ;;  %vm11738_vm15 = vcmask 261120   ;;  %s323_s21 = sand.u32 1, %s19449_s10   ;;  %s16386_s24 = sshll.u32 %s19535_s13, 4 }
  0x1c   : > { %17264 = vmatpush3.bf16.msra.mxu0 %v18906_v6  ;;  %17352 = vmatpush3.bf16.msra.mxu1 %v18906_v6  ;;  %v18908_v8 = vld [vmem:[%s19583_s29 + $0xa4] sm:$0xff]   ;;  %v18910_v10 = vld [vmem:[%s19583_s29 + $0xac] sm:$0xff]   ;;  %v18912_v12 = vld [vmem:[%s19583_s29 + $0xb4] sm:$0xff]   ;;  %s324_s25 = scalar_lea.vmem [#allocation4], %s323_s21  ;;  %s25454_s28 = scalar_lea.hbm %s25504_s9, %s16386_s24 }
  0x1d   : > { %17437 = vmatprep.subr.bf16.mxu0 %v25519_v0  ;;  %17525 = vmatprep.subr.bf16.mxu1 %v25519_v0  ;;  %v18913_v13 = vld [vmem:[%s19583_s29 + $0x18] sm:$0xff]   ;;  %v18915_v15 = vld [vmem:[%s19583_s29 + $0x20] sm:$0xff]   ;;  %v18917_v17 = vld [vmem:[%s19583_s29 + $0x28] sm:$0xff]   ;;  %s14918_s26 = sshll.u32 %s324_s25, 4  ;;  %s14906_s14 = scalar_lea.sflag [#allocation5], %s323_s21  ;;  %s25456_s26 = int_to_ptr.vmem [resolvable:$true] %s14918_s26 }
  0x1e   : > { %v18914_v14 = vld [vmem:[%s19583_s29 + $0xbc] sm:$0xff]   ;;  %v18916_v16 = vld [vmem:[%s19583_s29 + $0xc4] sm:$0xff]   ;;  %v18918_v18 = vld [vmem:[%s19583_s29 + $0xcc] sm:$0xff]   ;;  %s19397_s13 = scalar_lea.vmem %s25456_s26, 16  ;;  %s19463_s16 = smov [#allocation4]  }
  0x1f   : > { %17266 = vmatmul.mubr.msk.bf16.vlgmr.msra.gmra.mxu0 %vm490_vm3, %v18907_v7  ;;  %17354 = vmatmul.mubr.msk.bf16.vlgmr.msra.gmra.mxu1 %vm490_vm3, %v18908_v8  ;;  %v18919_v19 = vld [vmem:[%s19583_s29 + $0x30] sm:$0xff]   ;;  %v18921_v21 = vld [vmem:[%s19583_s29 + $0x38] sm:$0xff]   ;;  %v18923_v23 = vld [vmem:[%s19583_s29 + $0x40] sm:$0xff]   ;;  %p19398_p11 = scmp.ne.s32.totalorder %s25456_s26, %s19397_s13  ;;  %s19401_s17 = sshll.u32 %s19463_s16, 4  ;;  %s19402_s17 = int_to_ptr.vmem [resolvable:$false] %s19401_s17 }
  0x20   : > { %17269 = vmatprep.mubr.msk.bf16.mxu0 %vm19461_vm2, %v25519_v0  ;;  %17357 = vmatprep.mubr.msk.bf16.mxu1 %vm19461_vm2, %v25519_v0  ;;  %v18920_v20 = vld [vmem:[%s19583_s29 + $0xd4] sm:$0xff]   ;;  %v18922_v22 = vld [vmem:[%s19583_s29 + $0xdc] sm:$0xff]   ;;  %v18924_v24 = vld [vmem:[%s19583_s29 + $0xe4] sm:$0xff]   ;;  %s19403_s22 = scalar_lea.vmem %s19402_s17, 32  ;;  %p19404_p0 = scmp.lt.s32.totalorder %s25456_s26, %s19402_s17 }
  0x21   : > { %17438 = vmatpush3.bf16.msra.mxu0 %v559_v5  ;;  %17526 = vmatpush3.bf16.msra.mxu1 %v559_v5  ;;  %v18925_v25 = vld [vmem:[%s19583_s29 + $0x48] sm:$0xff]   ;;  %v18927_v27 = vld [vmem:[%s19583_s29 + $0x50] sm:$0xff]   ;;  %v18929_v29 = vld [vmem:[%s19583_s29 + $0x58] sm:$0xff]   ;;  %p19399_p12 = pnand %p19398_p11, %p19552_p5  ;;  %p19405_p1 = scmp.lt.s32.totalorder %s19403_s22, %s19397_s13 }
  0x22   : > { %17439 = vmatprep.subr.bf16.mxu0 %v25519_v0  ;;  %17527 = vmatprep.subr.bf16.mxu1 %v25519_v0  ;;  %v18926_v26 = vld [vmem:[%s19583_s29 + $0xec] sm:$0xff]   ;;  %v18928_v28 = vld [vmem:[%s19583_s29 + $0xf4] sm:$0xff]   ;;  %v18930_v30 = vld [vmem:[%s19583_s29 + $0xfc] sm:$0xff]  }
  0x23   : > { %v18931_v31 = vld [vmem:[%s19583_s29 + $0x60] sm:$0xff]   ;;  %v18933_v34 = vld [vmem:[%s19583_s29 + $0x68] sm:$0xff]   ;;  %v18935_v41 = vld [vmem:[%s19583_s29 + $0x70] sm:$0xff]   ;;  %2260 = vperm.xlu0 %18903, %v2112_v40   ;;  %2265 = vperm.xlu1 %18904, %v2113_v43   ;;  %p19400_p13 = pneg %p19399_p12  ;;  %p19406_p2 = por %p19405_p1, %p19404_p0 }
  0x24   : > { %v18932_v32 = vld [vmem:[%s19583_s29 + $0x104] sm:$0xff]   ;;  %v18934_v35 = vld [vmem:[%s19583_s29 + $0x10c] sm:$0xff]   ;;  %v18936_v42 = vld [vmem:[%s19583_s29 + $0x114] sm:$0xff]  }
  0x25   : > { %17440 = vmatpush3.bf16.msra.mxu0 %v18906_v6  ;;  %17528 = vmatpush3.bf16.msra.mxu1 %v18906_v6  ;;  %v18937_v47 = vld [vmem:[%s19583_s29 + $0x78] sm:$0xff]   ;;  %v18939_v53 = vld [vmem:[%s19583_s29 + $0x80] sm:$0xff]   ;;  %v18941_v59 = vld [vmem:[%s19583_s29 + $0x88] sm:$0xff]   ;;  %p19407_p3 = pnand %p19406_p2, %p19400_p13 }
  0x26   : > { %v18938_v48 = vld [vmem:[%s19583_s29 + $0x11c] sm:$0xff]   ;;  %v18940_v54 = vld [vmem:[%s19583_s29 + $0x124] sm:$0xff]   ;;  %v18942_v60 = vld [vmem:[%s19583_s29 + $0x12c] sm:$0xff]  }
  0x27   : > { %17270 = vmatmul.mubr.msk.bf16.gmra.mxu0 %vm490_vm3, %v18909_v9  ;;  %17358 = vmatmul.mubr.msk.bf16.gmra.mxu1 %vm490_vm3, %v18910_v10  ;;  %v2126_v62 = vld [vmem:[%s25498_s3 + $0x90] sm:$0xff]  ;;  %v2127_v63 = vld [vmem:[%s25498_s3 + $0x98] sm:$0xff]  ;;  %v2128_v1 = vld [vmem:[%s25498_s3 + $0xa0] sm:$0xff] }
  0x28   : > { %17273 = vmatprep.mubr.msk.bf16.mxu0 %vm19461_vm2, %v25519_v0  ;;  %17361 = vmatprep.mubr.msk.bf16.mxu1 %vm19461_vm2, %v25519_v0  ;;  %v18943_v2 = vld [vmem:[%s19583_s29 + $0x90] sm:$0xff]   ;;  %v2129_v4 = vld [vmem:[%s25498_s3 + $0xa8] sm:$0xff]  ;;  %v2131_v6 = vld [vmem:[%s25498_s3 + $0xb8] sm:$0xff] }
  0x29   : > { %2270 = vperm.xlu0 %18903, %v2114_v44   ;;  %2275 = vperm.xlu1 %18904, %v2115_v45   ;;  %v18944_v3 = vld [vmem:[%s19583_s29 + $0x134] sm:$0xff]   ;;  %v2132_v7 = vld [vmem:[%s25498_s3 + $0xc0] sm:$0xff]  ;;  %v2133_v10 = vld [vmem:[%s25498_s3 + $0xc8] sm:$0xff] }
  0x2a   : > { %v2130_v5 = vld [vmem:[%s25498_s3 + $0xb0] sm:$0xff]  ;;  %v18945_v8 = vld [vmem:[%s19583_s29 + $0x98] sm:$0xff]   ;;  %v18987_v36 = vld [vmem:[%s25499_s4 + $0x8] sm:$0xff]  }
  0x2b   : > { %v18946_v9 = vld [vmem:[%s19583_s29 + $0x13c] sm:$0xff]   ;;  %17613 = vmatprep.subr.bf16.mxu0 %v18987_v36  ;;  %v18957_v44 = vld [vmem:[%s19583_s29 + $0x168] sm:$0xff]  }
  0x2c   : > { %v18954_v33 = vld [vmem:[%s19583_s29 + $0x1fc] sm:$0xff]   ;;  %v18958_v45 = vld [vmem:[%s19583_s29 + $0x20c] sm:$0xff]  }
  0x2d   : > { %2280 = vperm.xlu0 %18903, %v2116_v46   ;;  %2285 = vperm.xlu1 %18904, %v2117_v49   ;;  %v18983_v46 = vld [vmem:[%s19583_s29 + $0x1d0] sm:$0xff]  }
  0x2f   : > { %17274 = vmatmul.mubr.msk.bf16.gmra.mxu0 %vm490_vm3, %v18911_v11  ;;  %17362 = vmatmul.mubr.msk.bf16.gmra.mxu1 %vm490_vm3, %v18912_v12  ;;  %v2134_v11 = vld [vmem:[%s25498_s3 + $0xd0] sm:$0xff]  ;;  %v2135_v12 = vld [vmem:[%s25498_s3 + $0xd8] sm:$0xff] }
  0x30   : > { %17277 = vmatprep.mubr.msk.bf16.mxu0 %vm19461_vm2, %v25519_v0  ;;  %17365 = vmatprep.mubr.msk.bf16.mxu1 %vm19461_vm2, %v25519_v0 }
  0x31   : > { %2290 = vperm.xlu0 %18903, %v2118_v50   ;;  %2295 = vperm.xlu1 %18904, %v2119_v51  }
  0x35   : > { %2300 = vperm.xlu0 %18903, %v2120_v52   ;;  %2305 = vperm.xlu1 %18904, %v2121_v55  }
  0x37   : > { %17278 = vmatmul.mubr.msk.bf16.gmra.mxu0 %vm490_vm3, %v18913_v13  ;;  %17366 = vmatmul.mubr.msk.bf16.gmra.mxu1 %vm490_vm3, %v18914_v14  ;;  %v2136_v13 = vld [vmem:[%s25498_s3 + $0xe0] sm:$0xff] }
  0x38   : > { %17281 = vmatprep.mubr.msk.bf16.mxu0 %vm19461_vm2, %v25519_v0  ;;  %17369 = vmatprep.mubr.msk.bf16.mxu1 %vm19461_vm2, %v25519_v0  ;;  %v18947_v14 = vld [vmem:[%s19583_s29 + $0xa0] ss:$0 sps:$4 sm:$0x33]  }
  0x39   : > { %2310 = vperm.xlu0 %18903, %v2122_v56   ;;  %2315 = vperm.xlu1 %18904, %v2123_v57   ;;  %v18959_v56 = vld [vmem:[%s19583_s29 + $0x170] sm:$0xff]  }
  0x3a   : > { %v18960_v57 = vld [vmem:[%s19583_s29 + $0x214] sm:$0xff]  }
  0x3d   : > { %2320 = vperm.xlu0 %18903, %v2124_v58   ;;  %2325 = vperm.xlu1 %18904, %v2125_v61  }
  0x3f   : > { %17282 = vmatmul.mubr.msk.bf16.gmra.mxu0 %vm490_vm3, %v18915_v15  ;;  %17370 = vmatmul.mubr.msk.bf16.gmra.mxu1 %vm490_vm3, %v18916_v16  ;;  %v18948_v15 = vld [vmem:[%s19583_s29 + $0x144] ss:$0 sps:$4 sm:$0x33]   ;;  %v2137_v16 = vld [vmem:[%s25498_s3 + $0xe8] sm:$0xff] }
  0x40   : > { %17285 = vmatprep.mubr.msk.bf16.mxu0 %vm19461_vm2, %v25519_v0  ;;  %17373 = vmatprep.mubr.msk.bf16.mxu1 %vm19461_vm2, %v25519_v0 }
  0x41   : > { %2330 = vperm.xlu0 %18903, %v2126_v62   ;;  %2335 = vperm.xlu1 %18904, %v2127_v63  }
  0x45   : > { %2340 = vperm.xlu0 %18903, %v2128_v1   ;;  %2345 = vperm.xlu1 %18904, %v2129_v4  }
  0x47   : > { %17286 = vmatmul.mubr.msk.bf16.gmra.mxu0 %vm490_vm3, %v18917_v17  ;;  %17374 = vmatmul.mubr.msk.bf16.gmra.mxu1 %vm490_vm3, %v18918_v18  ;;  %v2138_v17 = vld [vmem:[%s25498_s3 + $0xf0] sm:$0xff]  ;;  %v2139_v18 = vld [vmem:[%s25498_s3 + $0xf8] sm:$0xff] }
  0x48   : > { %17289 = vmatprep.mubr.msk.bf16.mxu0 %vm19461_vm2, %v25519_v0  ;;  %17377 = vmatprep.mubr.msk.bf16.mxu1 %vm19461_vm2, %v25519_v0 }
  0x49   : > { %2350 = vperm.xlu0 %18903, %v2130_v5   ;;  %2355 = vperm.xlu1 %18904, %v2131_v6   ;;  %v18961_v5 = vld [vmem:[%s19583_s29 + $0x178] sm:$0xff]  }
  0x4a   : > { %v18962_v6 = vld [vmem:[%s19583_s29 + $0x21c] sm:$0xff]  }
  0x4d   : > { %2360 = vperm.xlu0 %18903, %v2132_v7   ;;  %2365 = vperm.xlu1 %18904, %v2133_v10   ;;  %v18981_v7 = vld [vmem:[%s19583_s29 + $0x1c8] sm:$0xff]  }
  0x4f   : > { %17290 = vmatmul.mubr.msk.bf16.gmra.mxu0 %vm490_vm3, %v18919_v19  ;;  %17378 = vmatmul.mubr.msk.bf16.gmra.mxu1 %vm490_vm3, %v18920_v20  ;;  %v2140_v19 = vld [vmem:[%s25498_s3 + $0x100] sm:$0xff]  ;;  %v18949_v20 = vld [vmem:[%s19583_s29 + $0x148] sm:$0xff]  }
  0x50   : > { %17293 = vmatprep.mubr.msk.bf16.mxu0 %vm19461_vm2, %v25519_v0  ;;  %17381 = vmatprep.mubr.msk.bf16.mxu1 %vm19461_vm2, %v25519_v0 }
  0x51   : > { %2370 = vperm.xlu0 %18903, %v2134_v11   ;;  %2375 = vperm.xlu1 %18904, %v2135_v12  }
  0x55   : > { %2380 = vperm.xlu0 %18903, %v2136_v13   ;;  %2385 = vperm.xlu1 %18904, %v2137_v16  }
  0x57   : > { %17294 = vmatmul.mubr.msk.bf16.gmra.mxu0 %vm490_vm3, %v18921_v21  ;;  %17382 = vmatmul.mubr.msk.bf16.gmra.mxu1 %vm490_vm3, %v18922_v22  ;;  %v18950_v21 = vld [vmem:[%s19583_s29 + $0x1ec] sm:$0xff]  }
  0x58   : > { %17297 = vmatprep.mubr.msk.bf16.mxu0 %vm19461_vm2, %v25519_v0  ;;  %17385 = vmatprep.mubr.msk.bf16.mxu1 %vm19461_vm2, %v25519_v0  ;;  %v2141_v22 = vld [vmem:[%s25498_s3 + $0x108] sm:$0xff] }
  0x59   : > { %2390 = vperm.xlu0 %18903, %v2138_v17   ;;  %2395 = vperm.xlu1 %18904, %v2139_v18   ;;  %v18963_v17 = vld [vmem:[%s19583_s29 + $0x180] sm:$0xff]  }
  0x5a   : > { %v18964_v18 = vld [vmem:[%s19583_s29 + $0x224] sm:$0xff]  }
  0x5d   : > { %2400 = vperm.xlu0 %18903, %v2140_v19   ;;  %2405 = vperm.xlu1 %18904, %v2141_v22  }
  0x5f   : > { %17298 = vmatmul.mubr.msk.bf16.gmra.mxu0 %vm490_vm3, %v18923_v23  ;;  %17386 = vmatmul.mubr.msk.bf16.gmra.mxu1 %vm490_vm3, %v18924_v24  ;;  %v2142_v23 = vld [vmem:[%s25498_s3 + $0x110] sm:$0xff]  ;;  %v2143_v24 = vld [vmem:[%s25498_s3 + $0x118] sm:$0xff] }
  0x60   : > { %17301 = vmatprep.mubr.msk.bf16.mxu0 %vm19461_vm2, %v25519_v0  ;;  %17389 = vmatprep.mubr.msk.bf16.mxu1 %vm19461_vm2, %v25519_v0 }
  0x61   : > { %2410 = vperm.xlu0 %18903, %v2142_v23   ;;  %2415 = vperm.xlu1 %18904, %v2143_v24  }
  0x67   : > { %17302 = vmatmul.mubr.msk.bf16.gmra.mxu0 %vm490_vm3, %v18925_v25  ;;  %17390 = vmatmul.mubr.msk.bf16.gmra.mxu1 %vm490_vm3, %v18926_v26  ;;  %v2144_v25 = vld [vmem:[%s25498_s3 + $0x120] sm:$0xff]  ;;  %v18951_v26 = vld [vmem:[%s19583_s29 + $0x150] sm:$0xff]  }
  0x68   : > { %17305 = vmatprep.mubr.msk.bf16.mxu0 %vm19461_vm2, %v25519_v0  ;;  %17393 = vmatprep.mubr.msk.bf16.mxu1 %vm19461_vm2, %v25519_v0 }
  0x69   : > { %2420 = vperm.xlu0 %18903, %v2144_v25  }
  0x6f   : > { %17306 = vmatmul.mubr.msk.bf16.gmra.mxu0 %vm490_vm3, %v18927_v27  ;;  %17394 = vmatmul.mubr.msk.bf16.gmra.mxu1 %vm490_vm3, %v18928_v28  ;;  %v18952_v27 = vld [vmem:[%s19583_s29 + $0x1f4] sm:$0xff]   ;;  %v2145_v28 = vld [vmem:[%s25498_s3 + $0x128] sm:$0xff] }
  0x70   : > { %17309 = vmatprep.mubr.msk.bf16.mxu0 %vm19461_vm2, %v25519_v0  ;;  %17397 = vmatprep.mubr.msk.bf16.mxu1 %vm19461_vm2, %v25519_v0 }
  0x71   : > { %2425 = vperm.xlu1 %18904, %v2145_v28  }
  0x77   : > { %17310 = vmatmul.mubr.msk.bf16.gmra.mxu0 %vm490_vm3, %v18929_v29  ;;  %17398 = vmatmul.mubr.msk.bf16.gmra.mxu1 %vm490_vm3, %v18930_v30  ;;  %v2146_v29 = vld [vmem:[%s25498_s3 + $0x130] sm:$0xff]  ;;  %v2147_v30 = vld [vmem:[%s25498_s3 + $0x138] sm:$0xff] }
  0x78   : > { %17313 = vmatprep.mubr.msk.bf16.mxu0 %vm19461_vm2, %v25519_v0  ;;  %17401 = vmatprep.mubr.msk.bf16.mxu1 %vm19461_vm2, %v25519_v0 }
  0x79   : > { %2430 = vperm.xlu0 %18903, %v2146_v29   ;;  %2435 = vperm.xlu1 %18904, %v2147_v30   ;;  %v18965_v29 = vld [vmem:[%s19583_s29 + $0x188] sm:$0xff]  }
  0x7a   : > { %v18966_v30 = vld [vmem:[%s19583_s29 + $0x22c] sm:$0xff]  }
  0x7f   : > { %17314 = vmatmul.mubr.msk.bf16.gmra.mxu0 %vm490_vm3, %v18931_v31  ;;  %17402 = vmatmul.mubr.msk.bf16.gmra.mxu1 %vm490_vm3, %v18932_v32  ;;  %v2148_v31 = vld [vmem:[%s25498_s3 + $0x140] sm:$0xf]  ;;  %v18953_v32 = vld [vmem:[%s19583_s29 + $0x158] sm:$0xff]  }
  0x80   : > { %17317 = vmatprep.mubr.msk.bf16.mxu0 %vm19461_vm2, %v25519_v0  ;;  %17405 = vmatprep.mubr.msk.bf16.mxu1 %vm19461_vm2, %v25519_v0 }
  0x81   : > { %2440 = vperm.xlu0 %18903, %v2148_v31   ;;  %v18979_v31 = vld [vmem:[%s19583_s29 + $0x1c0] sm:$0xff]  }
  0x87   : > { %17318 = vmatmul.mubr.msk.bf16.gmra.mxu0 %vm490_vm3, %v18933_v34  ;;  %17406 = vmatmul.mubr.msk.bf16.gmra.mxu1 %vm490_vm3, %v18934_v35  ;;  %v18955_v34 = vld [vmem:[%s19583_s29 + $0x160] sm:$0xff]  }
  0x88   : > { %17321 = vmatprep.mubr.msk.bf16.mxu0 %vm19461_vm2, %v25519_v0  ;;  %17409 = vmatprep.mubr.msk.bf16.mxu1 %vm19461_vm2, %v25519_v0  ;;  %v18956_v35 = vld [vmem:[%s19583_s29 + $0x204] sm:$0xff]  }
  0x8f   : > { %17322 = vmatmul.mubr.msk.bf16.gmra.mxu0 %vm490_vm3, %v18935_v41  ;;  %17410 = vmatmul.mubr.msk.bf16.gmra.mxu1 %vm490_vm3, %v18936_v42 }
  0x90   : > { %17325 = vmatprep.mubr.msk.bf16.mxu0 %vm19461_vm2, %v25519_v0  ;;  %17413 = vmatprep.mubr.msk.bf16.mxu1 %vm19461_vm2, %v25519_v0 }
  0x97   : > { %17326 = vmatmul.mubr.msk.bf16.gmra.mxu0 %vm490_vm3, %v18937_v47  ;;  %17414 = vmatmul.mubr.msk.bf16.gmra.mxu1 %vm490_vm3, %v18938_v48 }
  0x98   : > { %17329 = vmatprep.mubr.msk.bf16.mxu0 %vm19461_vm2, %v25519_v0  ;;  %17417 = vmatprep.mubr.msk.bf16.mxu1 %vm19461_vm2, %v25519_v0 }
  0x9f   : > { %17330 = vmatmul.mubr.msk.bf16.gmra.mxu0 %vm490_vm3, %v18939_v53  ;;  %17418 = vmatmul.mubr.msk.bf16.gmra.mxu1 %vm490_vm3, %v18940_v54 }
  0xa0   : > { %17333 = vmatprep.mubr.msk.bf16.mxu0 %vm19461_vm2, %v25519_v0  ;;  %17421 = vmatprep.mubr.msk.bf16.mxu1 %vm19461_vm2, %v25519_v0 }
  0xa7   : > { %17334 = vmatmul.mubr.msk.bf16.gmra.mxu0 %vm490_vm3, %v18941_v59  ;;  %17422 = vmatmul.mubr.msk.bf16.gmra.mxu1 %vm490_vm3, %v18942_v60 }
  0xa8   : > { %17337 = vmatprep.mubr.msk.bf16.mxu0 %vm19461_vm2, %v25519_v0  ;;  %17425 = vmatprep.mubr.msk.bf16.mxu1 %vm19461_vm2, %v25519_v0 }
  0xaf   : > { %17338 = vmatmul.mubr.msk.bf16.gmra.mxu0 %vm490_vm3, %v18943_v2  ;;  %17426 = vmatmul.mubr.msk.bf16.gmra.mxu1 %vm490_vm3, %v18944_v3 }
  0xb0   : > { %17341 = vmatprep.mubr.msk.bf16.mxu0 %vm19461_vm2, %v25519_v0  ;;  %17429 = vmatprep.mubr.msk.bf16.mxu1 %vm19461_vm2, %v25519_v0 }
  0xb7   : > { %17342 = vmatmul.mubr.msk.bf16.gmra.mxu0 %vm490_vm3, %v18945_v8  ;;  %17430 = vmatmul.mubr.msk.bf16.gmra.mxu1 %vm490_vm3, %v18946_v9 }
  0xb8   : > { %17345 = vmatprep.mubr.msk.bf16.mxu0 %vm19461_vm2, %v25519_v0  ;;  %17433 = vmatprep.mubr.msk.bf16.mxu1 %vm19461_vm2, %v25519_v0 }
  0xbf   : > { %17346 = vmatmul.mubr.msk.bf16.gmra.mxu0 %vm490_vm3, %v18947_v14  ;;  %17434 = vmatmul.mubr.msk.bf16.gmra.mxu1 %vm490_vm3, %v18948_v15 }
  0xc0   : > { %17441 = vmatprep.mubr.msk.bf16.mxu0 %vm19461_vm2, %v25519_v0  ;;  %17529 = vmatprep.mubr.msk.bf16.mxu1 %vm19461_vm2, %v25519_v0 }
  0xc7   : > { %17442 = vmatmul.mubr.msk.bf16.vlgmr.msra.gmra.mxu0 %vm490_vm3, %v18949_v20  ;;  %17530 = vmatmul.mubr.msk.bf16.vlgmr.msra.gmra.mxu1 %vm490_vm3, %v18950_v21 }
  0xc8   : > { %17445 = vmatprep.mubr.msk.bf16.mxu0 %vm19461_vm2, %v25519_v0  ;;  %17533 = vmatprep.mubr.msk.bf16.mxu1 %vm19461_vm2, %v25519_v0 }
  0xc9   : > { %17614 = vmatpush3.bf16.msra.mxu0 %v18987_v36 }
  0xcf   : > { %17446 = vmatmul.mubr.msk.bf16.gmra.mxu0 %vm490_vm3, %v18951_v26  ;;  %17534 = vmatmul.mubr.msk.bf16.gmra.mxu1 %vm490_vm3, %v18952_v27 }
  0xd0   : > { %17449 = vmatprep.mubr.msk.bf16.mxu0 %vm19461_vm2, %v25519_v0  ;;  %17537 = vmatprep.mubr.msk.bf16.mxu1 %vm19461_vm2, %v25519_v0 }
  0xd7   : > { %17450 = vmatmul.mubr.msk.bf16.gmra.mxu0 %vm490_vm3, %v18953_v32  ;;  %17538 = vmatmul.mubr.msk.bf16.gmra.mxu1 %vm490_vm3, %v18954_v33 }
  0xd8   : > { %17453 = vmatprep.mubr.msk.bf16.mxu0 %vm19461_vm2, %v25519_v0  ;;  %17541 = vmatprep.mubr.msk.bf16.mxu1 %vm19461_vm2, %v25519_v0 }
  0xdf   : > { %v19909_v37 = vpop.f32.mrf.mxu0  ;;  %v19911_v38 = vpop.f32.mrf.mxu1  ;;  %17454 = vmatmul.mubr.msk.bf16.gmra.mxu0 %vm490_vm3, %v18955_v34  ;;  %17542 = vmatmul.mubr.msk.bf16.gmra.mxu1 %vm490_vm3, %v18956_v35 }
  0xe0   : > { %17457 = vmatprep.mubr.msk.bf16.mxu0 %vm19461_vm2, %v25519_v0  ;;  %17545 = vmatprep.mubr.msk.bf16.mxu1 %vm19461_vm2, %v25519_v0 }
  0xe1   : > { %v17267_v40 = vpop.f32.mrf.mxu0  ;;  %v17355_v41 = vpop.f32.mrf.mxu1 }
  0xe3   : > { %v19921_v42 = vpop.f32.mrf.mxu0  ;;  %v19923_v43 = vpop.f32.mrf.mxu1 }
  0xe5   : > { %v17268_v47 = vpop.f32.mrf.mxu0  ;;  %v17356_v48 = vpop.f32.mrf.mxu1 }
  0xe6   : > { %v18967_v47 = vld [vmem:[%s19583_s29 + $0x190] sm:$0xff]  }
  0xe7   : > { %v19929_v49 = vpop.f32.mrf.mxu0  ;;  %v19931_v50 = vpop.f32.mrf.mxu1  ;;  %17458 = vmatmul.mubr.msk.bf16.gmra.mxu0 %vm490_vm3, %v18957_v44  ;;  %17546 = vmatmul.mubr.msk.bf16.gmra.mxu1 %vm490_vm3, %v18958_v45  ;;  %v18968_v48 = vld [vmem:[%s19583_s29 + $0x234] sm:$0xff]  }
  0xe8   : > { %17461 = vmatprep.mubr.msk.bf16.mxu0 %vm19461_vm2, %v25519_v0  ;;  %17549 = vmatprep.mubr.msk.bf16.mxu1 %vm19461_vm2, %v25519_v0 }
  0xe9   : > { %v17271_v52 = vpop.f32.mrf.mxu0  ;;  %v17359_v53 = vpop.f32.mrf.mxu1 }
  0xeb   : > { %v19941_v54 = vpop.f32.mrf.mxu0  ;;  %v19943_v55 = vpop.f32.mrf.mxu1 }
  0xed   : > { %v17272_v59 = vpop.f32.mrf.mxu0  ;;  %v17360_v60 = vpop.f32.mrf.mxu1 }
  0xef   : > { %v19949_v61 = vpop.f32.mrf.mxu0  ;;  %v19951_v62 = vpop.f32.mrf.mxu1  ;;  %17462 = vmatmul.mubr.msk.bf16.gmra.mxu0 %vm490_vm3, %v18959_v56  ;;  %17550 = vmatmul.mubr.msk.bf16.gmra.mxu1 %vm490_vm3, %v18960_v57 }
  0xf0   : > { %17465 = vmatprep.mubr.msk.bf16.mxu0 %vm19461_vm2, %v25519_v0  ;;  %17553 = vmatprep.mubr.msk.bf16.mxu1 %vm19461_vm2, %v25519_v0 }
  0xf1   : > { %v17275_v1 = vpop.f32.mrf.mxu0  ;;  %v17363_v2 = vpop.f32.mrf.mxu1 }
  0xf3   : > { %v19961_v3 = vpop.f32.mrf.mxu0  ;;  %v19963_v4 = vpop.f32.mrf.mxu1 }
  0xf5   : > { %v17276_v8 = vpop.f32.mrf.mxu0  ;;  %v17364_v9 = vpop.f32.mrf.mxu1 }
  0xf6   : > { %v18969_v8 = vld [vmem:[%s19583_s29 + $0x198] sm:$0xff]  }
  0xf7   : > { %v19969_v10 = vpop.f32.mrf.mxu0  ;;  %v19971_v11 = vpop.f32.mrf.mxu1  ;;  %17466 = vmatmul.mubr.msk.bf16.gmra.mxu0 %vm490_vm3, %v18961_v5  ;;  %17554 = vmatmul.mubr.msk.bf16.gmra.mxu1 %vm490_vm3, %v18962_v6  ;;  %v18970_v9 = vld [vmem:[%s19583_s29 + $0x23c] sm:$0xff]  }
  0xf8   : > { %17469 = vmatprep.mubr.msk.bf16.mxu0 %vm19461_vm2, %v25519_v0  ;;  %17557 = vmatprep.mubr.msk.bf16.mxu1 %vm19461_vm2, %v25519_v0 }
  0xf9   : > { %v17279_v13 = vpop.f32.mrf.mxu0  ;;  %v17367_v14 = vpop.f32.mrf.mxu1 }
  0xfa   : > { %v18977_v13 = vld [vmem:[%s19583_s29 + $0x1b8] sm:$0xff]  }
  0xfb   : > { %v19981_v15 = vpop.f32.mrf.mxu0  ;;  %v19983_v16 = vpop.f32.mrf.mxu1 }
  0xfd   : > { %v17280_v20 = vpop.f32.mrf.mxu0  ;;  %v17368_v21 = vpop.f32.mrf.mxu1 }
  0xff   : > { %v19989_v22 = vpop.f32.mrf.mxu0  ;;  %v19991_v23 = vpop.f32.mrf.mxu1  ;;  %17470 = vmatmul.mubr.msk.bf16.gmra.mxu0 %vm490_vm3, %v18963_v17  ;;  %17558 = vmatmul.mubr.msk.bf16.gmra.mxu1 %vm490_vm3, %v18964_v18 }
 0x100   : > { %17473 = vmatprep.mubr.msk.bf16.mxu0 %vm19461_vm2, %v25519_v0  ;;  %17561 = vmatprep.mubr.msk.bf16.mxu1 %vm19461_vm2, %v25519_v0 }
 0x101   : > { %v17283_v25 = vpop.f32.mrf.mxu0  ;;  %v17371_v26 = vpop.f32.mrf.mxu1 }
 0x103   : > { %v20001_v27 = vpop.f32.mrf.mxu0  ;;  %v20003_v28 = vpop.f32.mrf.mxu1 }
 0x105   : > { %v17284_v32 = vpop.f32.mrf.mxu0  ;;  %v17372_v33 = vpop.f32.mrf.mxu1 }
 0x106   : > { %v18971_v32 = vld [vmem:[%s19583_s29 + $0x1a0] sm:$0xff]  }
 0x107   : > { %v20009_v34 = vpop.f32.mrf.mxu0  ;;  %v20011_v35 = vpop.f32.mrf.mxu1  ;;  %17474 = vmatmul.mubr.msk.bf16.gmra.mxu0 %vm490_vm3, %v18965_v29  ;;  %17562 = vmatmul.mubr.msk.bf16.gmra.mxu1 %vm490_vm3, %v18966_v30  ;;  %v18972_v33 = vld [vmem:[%s19583_s29 + $0x244] sm:$0xff]  }
 0x108   : > { %17477 = vmatprep.mubr.msk.bf16.mxu0 %vm19461_vm2, %v25519_v0  ;;  %17565 = vmatprep.mubr.msk.bf16.mxu1 %vm19461_vm2, %v25519_v0 }
 0x109   : > { %v17287_v40 = vpop.f32.mrf.mxu0  ;;  %v17375_v41 = vpop.f32.mrf.mxu1 }
 0x10b   : > { %v20021_v44 = vpop.f32.mrf.mxu0  ;;  %v20023_v45 = vpop.f32.mrf.mxu1 }
 0x10d   : > { %v17288_v53 = vpop.f32.mrf.mxu0  ;;  %v17376_v56 = vpop.f32.mrf.mxu1 }
 0x10f   : > { %v20029_v57 = vpop.f32.mrf.mxu0  ;;  %v20031_v59 = vpop.f32.mrf.mxu1  ;;  %17478 = vmatmul.mubr.msk.bf16.gmra.mxu0 %vm490_vm3, %v18967_v47  ;;  %17566 = vmatmul.mubr.msk.bf16.gmra.mxu1 %vm490_vm3, %v18968_v48 }
 0x110   : > { %17481 = vmatprep.mubr.msk.bf16.mxu0 %vm19461_vm2, %v25519_v0  ;;  %17569 = vmatprep.mubr.msk.bf16.mxu1 %vm19461_vm2, %v25519_v0 }
 0x111   : > { %v17291_v1 = vpop.f32.mrf.mxu0  ;;  %v17379_v2 = vpop.f32.mrf.mxu1 }
 0x113   : > { %v20041_v5 = vpop.f32.mrf.mxu0  ;;  %v20043_v6 = vpop.f32.mrf.mxu1 }
 0x115   : > { %v17292_v14 = vpop.f32.mrf.mxu0  ;;  %v17380_v17 = vpop.f32.mrf.mxu1 }
 0x116   : > { %v18973_v14 = vld [vmem:[%s19583_s29 + $0x1a8] sm:$0xff]  }
 0x117   : > { %v20049_v18 = vpop.f32.mrf.mxu0  ;;  %v20051_v20 = vpop.f32.mrf.mxu1  ;;  %17482 = vmatmul.mubr.msk.bf16.gmra.mxu0 %vm490_vm3, %v18969_v8  ;;  %17570 = vmatmul.mubr.msk.bf16.gmra.mxu1 %vm490_vm3, %v18970_v9  ;;  %v18974_v17 = vld [vmem:[%s19583_s29 + $0x24c] sm:$0xff]  }
 0x118   : > { %17485 = vmatprep.mubr.msk.bf16.mxu0 %vm19461_vm2, %v25519_v0  ;;  %17573 = vmatprep.mubr.msk.bf16.mxu1 %vm19461_vm2, %v25519_v0 }
 0x119   : > { %v17295_v25 = vpop.f32.mrf.mxu0  ;;  %v17383_v26 = vpop.f32.mrf.mxu1 }
 0x11a   : > { %v18992_v25 = vld [vmem:[%s25499_s4] sm:$0xff]   ;;  %v18975_v26 = vld [vmem:[%s19583_s29 + $0x1b0] sm:$0xff]  }
 0x11b   : > { %v20061_v29 = vpop.f32.mrf.mxu0  ;;  %v20063_v30 = vpop.f32.mrf.mxu1  ;;  %17647 = vmatprep.subr.bf16.mxu1 %v18992_v25 }
 0x11c   : > { %17648 = vmatpush3.bf16.msra.mxu1 %v18992_v25 }
 0x11d   : > { %v17296_v41 = vpop.f32.mrf.mxu0  ;;  %v17384_v47 = vpop.f32.mrf.mxu1 }
 0x11f   : > { %v20069_v48 = vpop.f32.mrf.mxu0  ;;  %v20071_v53 = vpop.f32.mrf.mxu1  ;;  %17486 = vmatmul.mubr.msk.bf16.gmra.mxu0 %vm490_vm3, %v18971_v32  ;;  %17574 = vmatmul.mubr.msk.bf16.gmra.mxu1 %vm490_vm3, %v18972_v33 }
 0x120   : > { %17489 = vmatprep.mubr.msk.bf16.mxu0 %vm19461_vm2, %v25519_v0  ;;  %17577 = vmatprep.mubr.msk.bf16.mxu1 %vm19461_vm2, %v25519_v0 }
 0x121   : > { %v17299_v1 = vpop.f32.mrf.mxu0  ;;  %v17387_v2 = vpop.f32.mrf.mxu1 }
 0x123   : > { %v20081_v8 = vpop.f32.mrf.mxu0  ;;  %v20083_v9 = vpop.f32.mrf.mxu1 }
 0x125   : > { %v17300_v32 = vpop.f32.mrf.mxu0  ;;  %v17388_v33 = vpop.f32.mrf.mxu1 }
 0x127   : > { %v20092_v41 = vpop.f32.mrf.mxu0  ;;  %v20094_v47 = vpop.f32.mrf.mxu1  ;;  %17490 = vmatmul.mubr.msk.bf16.gmra.mxu0 %vm490_vm3, %v18973_v14  ;;  %17578 = vmatmul.mubr.msk.bf16.gmra.mxu1 %vm490_vm3, %v18974_v17  ;;  %v18976_v14 = vld [vmem:[%s19583_s29 + $0x254] sm:$0xff]  }
 0x128   : > { %17493 = vmatprep.mubr.msk.bf16.mxu0 %vm19461_vm2, %v25519_v0  ;;  %17581 = vmatprep.mubr.msk.bf16.mxu1 %vm19461_vm2, %v25519_v0 }
 0x129   : > { %v17303_v2 = vpop.f32.mrf.mxu0  ;;  %v17391_v32 = vpop.f32.mrf.mxu1 }
 0x12b   : > { %v20104_v25 = vpop.f32.mrf.mxu0  ;;  %v20106_v33 = vpop.f32.mrf.mxu1 }
 0x12d   : > { %v17304_v1 = vpop.f32.mrf.mxu0  ;;  %v17392_v56 = vpop.f32.mrf.mxu1 }
 0x12f   : > { %v20112_v40 = vpop.f32.mrf.mxu0  ;;  %v20114_v21 = vpop.f32.mrf.mxu1  ;;  %17494 = vmatmul.mubr.msk.bf16.gmra.mxu0 %vm490_vm3, %v18975_v26  ;;  %17582 = vmatmul.mubr.msk.bf16.gmra.mxu1 %vm490_vm3, %v18976_v14  ;;  %v18978_v26 = vld [vmem:[%s19583_s29 + $0x25c] sm:$0xff]  }
 0x130   : > { %17497 = vmatprep.mubr.msk.bf16.mxu0 %vm19461_vm2, %v25519_v0  ;;  %17585 = vmatprep.mubr.msk.bf16.mxu1 %vm19461_vm2, %v25519_v0 }
 0x131   : > { %v17307_v32 = vpop.f32.mrf.mxu0  ;;  %v17395_v1 = vpop.f32.mrf.mxu1 }
 0x133   : > { %v20124_v56 = vpop.f32.mrf.mxu0  ;;  %v20126_v17 = vpop.f32.mrf.mxu1 }
 0x135   : > { %v17308_v2 = vpop.f32.mrf.mxu0  ;;  %v17396_v60 = vpop.f32.mrf.mxu1 }
 0x137   : > { %v20132_v52 = vpop.f32.mrf.mxu0  ;;  %v20134_v36 = vpop.f32.mrf.mxu1  ;;  %17498 = vmatmul.mubr.msk.bf16.gmra.mxu0 %vm490_vm3, %v18977_v13  ;;  %17586 = vmatmul.mubr.msk.bf16.gmra.mxu1 %vm490_vm3, %v18978_v26  ;;  %v18980_v13 = vld [vmem:[%s19583_s29 + $0x264] sm:$0xff]  }
 0x138   : > { %17501 = vmatprep.mubr.msk.bf16.mxu0 %vm19461_vm2, %v25519_v0  ;;  %17589 = vmatprep.mubr.msk.bf16.mxu1 %vm19461_vm2, %v25519_v0 }
 0x139   : > { %v17311_v1 = vpop.f32.mrf.mxu0  ;;  %v17399_v2 = vpop.f32.mrf.mxu1 }
 0x13b   : > { %v20144_v60 = vpop.f32.mrf.mxu0  ;;  %v20146_v14 = vpop.f32.mrf.mxu1 }
 0x13c   : > { %25726 = vst [vmem:[#allocation7_spill] sm:$0xff] %v20146_v14 }
 0x13d   : > { %v17312_v32 = vpop.f32.mrf.mxu0  ;;  %v17400_v24 = vpop.f32.mrf.mxu1 }
 0x13f   : > { %v20152_v19 = vpop.f32.mrf.mxu0  ;;  %v20154_v12 = vpop.f32.mrf.mxu1  ;;  %17502 = vmatmul.mubr.msk.bf16.gmra.mxu0 %vm490_vm3, %v18979_v31  ;;  %17590 = vmatmul.mubr.msk.bf16.gmra.mxu1 %vm490_vm3, %v18980_v13  ;;  %v18982_v31 = vld [vmem:[%s19583_s29 + $0x26c] sm:$0xff]  }
 0x140   : > { %25727 = vst [vmem:[#allocation8_spill] sm:$0xff] %v20152_v19  ;;  %25728 = vst [vmem:[#allocation9_spill] sm:$0xff] %v20154_v12  ;;  %17505 = vmatprep.mubr.msk.bf16.mxu0 %vm19461_vm2, %v25519_v0  ;;  %17593 = vmatprep.mubr.msk.bf16.mxu1 %vm19461_vm2, %v25519_v0 }
 0x141   : > { %v17315_v2 = vpop.f32.mrf.mxu0  ;;  %v17403_v32 = vpop.f32.mrf.mxu1 }
 0x143   : > { %v20164_v24 = vpop.f32.mrf.mxu0  ;;  %v20166_v26 = vpop.f32.mrf.mxu1 }
 0x144   : > { %25729 = vst [vmem:[#allocation10_spill] sm:$0xff] %v20164_v24  ;;  %25730 = vst [vmem:[#allocation11_spill] sm:$0xff] %v20166_v26 }
 0x145   : > { %v17316_v1 = vpop.f32.mrf.mxu0  ;;  %v17404_v63 = vpop.f32.mrf.mxu1 }
 0x147   : > { %v20172_v58 = vpop.f32.mrf.mxu0  ;;  %v20174_v51 = vpop.f32.mrf.mxu1  ;;  %17506 = vmatmul.mubr.msk.bf16.gmra.mxu0 %vm490_vm3, %v18981_v7  ;;  %17594 = vmatmul.mubr.msk.bf16.gmra.mxu1 %vm490_vm3, %v18982_v31  ;;  %v18984_v7 = vld [vmem:[%s19583_s29 + $0x274] sm:$0xff]  }
 0x148   : > { %25731 = vst [vmem:[#allocation12_spill] sm:$0xff] %v20172_v58  ;;  %25732 = vst [vmem:[#allocation13_spill] sm:$0xff] %v20174_v51  ;;  %17509 = vmatprep.mubr.msk.bf16.mxu0 %vm19461_vm2, %v25519_v0  ;;  %17597 = vmatprep.mubr.msk.bf16.mxu1 %vm19461_vm2, %v25519_v0 }
 0x149   : > { %v17319_v32 = vpop.f32.mrf.mxu0  ;;  %v17407_v1 = vpop.f32.mrf.mxu1 }
 0x14b   : > { %v20184_v63 = vpop.f32.mrf.mxu0  ;;  %v20186_v13 = vpop.f32.mrf.mxu1 }
 0x14c   : > { %25733 = vst [vmem:[#allocation14_spill] sm:$0xff] %v20184_v63  ;;  %25734 = vst [vmem:[#allocation15_spill] sm:$0xff] %v20186_v13  ;;  %v18985_v13 = vld [vmem:[%s19583_s29 + $0x1d8] sm:$0xff]  }
 0x14d   : > { %v17320_v2 = vpop.f32.mrf.mxu0  ;;  %v17408_v39 = vpop.f32.mrf.mxu1 }
 0x14f   : > { %v20192_v51 = vpop.f32.mrf.mxu0  ;;  %v20194_v58 = vpop.f32.mrf.mxu1  ;;  %17510 = vmatmul.mubr.msk.bf16.gmra.mxu0 %vm490_vm3, %v18983_v46  ;;  %17598 = vmatmul.mubr.msk.bf16.gmra.mxu1 %vm490_vm3, %v18984_v7  ;;  %v18986_v46 = vld [vmem:[%s19583_s29 + $0x27c] sm:$0xff]  }
 0x150   : > { %25735 = vst [vmem:[#allocation16_spill] sm:$0xff] %v20192_v51  ;;  %25736 = vst [vmem:[#allocation17_spill] sm:$0xff] %v20194_v58  ;;  %17513 = vmatprep.mubr.msk.bf16.mxu0 %vm19461_vm2, %v25519_v0  ;;  %17601 = vmatprep.mubr.msk.bf16.mxu1 %vm19461_vm2, %v25519_v0 }
 0x151   : > { %v17323_v1 = vpop.f32.mrf.mxu0  ;;  %v17411_v2 = vpop.f32.mrf.mxu1 }
 0x153   : > { %v20204_v39 = vpop.f32.mrf.mxu0  ;;  %v20206_v31 = vpop.f32.mrf.mxu1 }
 0x154   : > { %25737 = vst [vmem:[#allocation18_spill] sm:$0xff] %v20204_v39  ;;  %25738 = vst [vmem:[#allocation19_spill] sm:$0xff] %v20206_v31  ;;  %v18988_v31 = vld [vmem:[%s19583_s29 + $0x1e0] sm:$0xff]  }
 0x155   : > { %v17324_v32 = vpop.f32.mrf.mxu0  ;;  %v17412_v58 = vpop.f32.mrf.mxu1 }
 0x157   : > { %v20212_v51 = vpop.f32.mrf.mxu0  ;;  %v20214_v63 = vpop.f32.mrf.mxu1  ;;  %17514 = vmatmul.mubr.msk.bf16.gmra.mxu0 %vm490_vm3, %v18985_v13  ;;  %17602 = vmatmul.mubr.msk.bf16.gmra.mxu1 %vm490_vm3, %v18986_v46  ;;  %v18989_v13 = vld [vmem:[%s19583_s29 + $0x284] sm:$0xff]  }
 0x158   : > { %25739 = vst [vmem:[#allocation20_spill] sm:$0xff] %v20212_v51  ;;  %25740 = vst [vmem:[#allocation21_spill] sm:$0xff] %v20214_v63  ;;  %17517 = vmatprep.mubr.msk.bf16.mxu0 %vm19461_vm2, %v25519_v0  ;;  %17605 = vmatprep.mubr.msk.bf16.mxu1 %vm19461_vm2, %v25519_v0 }
 0x159   : > { %v17327_v2 = vpop.f32.mrf.mxu0  ;;  %v17415_v32 = vpop.f32.mrf.mxu1 }
 0x15b   : > { %v20224_v58 = vpop.f32.mrf.mxu0  ;;  %v20226_v7 = vpop.f32.mrf.mxu1 }
 0x15c   : > { %25741 = vst [vmem:[#allocation22_spill] sm:$0xff] %v20224_v58  ;;  %25742 = vst [vmem:[#allocation23_spill] sm:$0xff] %v20226_v7  ;;  %v18990_v7 = vld [vmem:[%s19583_s29 + $0x1e8] ss:$0 sps:$4 sm:$0x33]  }
 0x15d   : > { %v17328_v1 = vpop.f32.mrf.mxu0  ;;  %v17416_v63 = vpop.f32.mrf.mxu1  ;;  %v18991_v58 = vld [vmem:[%s19583_s29 + $0x28c] ss:$0 sps:$4 sm:$0x33]  }
 0x15f   : > { %v20232_v51 = vpop.f32.mrf.mxu0  ;;  %v20234_v39 = vpop.f32.mrf.mxu1  ;;  %17518 = vmatmul.mubr.msk.bf16.gmra.mxu0 %vm490_vm3, %v18988_v31  ;;  %17606 = vmatmul.mubr.msk.bf16.gmra.mxu1 %vm490_vm3, %v18989_v13 }
 0x160   : > { %25743 = vst [vmem:[#allocation24_spill] sm:$0xff] %v20232_v51  ;;  %25744 = vst [vmem:[#allocation25_spill] sm:$0xff] %v20234_v39  ;;  %17521 = vmatprep.mubr.msk.bf16.mxu0 %vm19461_vm2, %v25519_v0  ;;  %17609 = vmatprep.mubr.msk.bf16.mxu1 %vm19461_vm2, %v25519_v0 }
 0x161   : > { %v17331_v32 = vpop.f32.mrf.mxu0  ;;  %v17419_v1 = vpop.f32.mrf.mxu1 }
 0x163   : > { %v20244_v63 = vpop.f32.mrf.mxu0  ;;  %v20246_v46 = vpop.f32.mrf.mxu1 }
 0x164   : > { %25745 = vst [vmem:[#allocation26_spill] sm:$0xff] %v20244_v63  ;;  %25746 = vst [vmem:[#allocation27_spill] sm:$0xff] %v20246_v46 }
 0x165   : > { %v17332_v13 = vpop.f32.mrf.mxu0  ;;  %v17420_v26 = vpop.f32.mrf.mxu1 }
 0x167   : > { %v20252_v2 = vpop.f32.mrf.mxu0  ;;  %v20254_v39 = vpop.f32.mrf.mxu1  ;;  %17522 = vmatmul.mubr.msk.bf16.gmra.mxu0 %vm490_vm3, %v18990_v7  ;;  %17610 = vmatmul.mubr.msk.bf16.gmra.mxu1 %vm490_vm3, %v18991_v58 }
 0x168   : > { %25747 = vst [vmem:[#allocation28_spill] sm:$0xff] %v20252_v2  ;;  %25748 = vst [vmem:[#allocation29_spill] sm:$0xff] %v20254_v39 }
 0x169   : > { %v17335_v1 = vpop.f32.mrf.mxu0  ;;  %v17423_v0 = vpop.f32.mrf.mxu1 }
 0x16b   : > { %v20260_v51 = vpop.f32.mrf.mxu0  ;;  %v20262_v24 = vpop.f32.mrf.mxu1 }
 0x16c   : > { %25749 = vst [vmem:[#allocation30_spill] sm:$0xff] %v20260_v51  ;;  %25750 = vst [vmem:[#allocation31_spill] sm:$0xff] %v20262_v24 }
 0x16d   : > { %v17336_v13 = vpop.f32.mrf.mxu0  ;;  %v17424_v31 = vpop.f32.mrf.mxu1 }
 0x16f   : > { %v20266_v46 = vpop.f32.mrf.mxu0  ;;  %v20268_v63 = vpop.f32.mrf.mxu1 }
 0x170   : > { %25751 = vst [vmem:[#allocation32_spill] sm:$0xff] %v20266_v46  ;;  %25752 = vst [vmem:[#allocation33_spill] sm:$0xff] %v20268_v63  ;;  %v25761_v63 = vmax.f32 %v19909_v37, %v19911_v38 }
 0x171   : > { %v17339_v58 = vpop.f32.mrf.mxu0  ;;  %v17427_v32 = vpop.f32.mrf.mxu1 }
 0x173   : > { %v20272_v1 = vpop.f32.mrf.mxu0  ;;  %v20274_v0 = vpop.f32.mrf.mxu1 }
 0x174   : > { %25753 = vst [vmem:[#allocation34_spill] sm:$0xff] %v20272_v1  ;;  %25754 = vst [vmem:[#allocation35_spill] sm:$0xff] %v20274_v0 }
 0x175   : > { %v17340_v2 = vpop.f32.mrf.mxu0  ;;  %v17428_v26 = vpop.f32.mrf.mxu1 }
 0x177   : > { %v20278_v13 = vpop.f32.mrf.mxu0  ;;  %v20280_v31 = vpop.f32.mrf.mxu1 }
 0x178   : > { %25755 = vst [vmem:[#allocation36_spill] sm:$0xff] %v20278_v13  ;;  %25756 = vst [vmem:[#allocation37_spill] sm:$0xff] %v20280_v31 }
 0x179   : > { %v17343_v51 = vpop.f32.mrf.mxu0  ;;  %v17431_v7 = vpop.f32.mrf.mxu1 }
 0x17b   : > { %v20284_v58 = vpop.f32.mrf.mxu0  ;;  %v20286_v32 = vpop.f32.mrf.mxu1 }
 0x17c   : > { %25757 = vst [vmem:[#allocation38_spill] sm:$0xff] %v20284_v58  ;;  %25758 = vst [vmem:[#allocation39_spill] sm:$0xff] %v20286_v32 }
 0x17d   : > { %v17344_v46 = vpop.f32.mrf.mxu0  ;;  %v17432_v39 = vpop.f32.mrf.mxu1 }
 0x17e   : > { %v20302_v39 = vld [vmem:[%s25497_s2] ss:$0 sm:$0xff] }
 0x17f   : > { %v20290_v2 = vpop.f32.mrf.mxu0  ;;  %v20292_v26 = vpop.f32.mrf.mxu1 }
 0x180   : > { %25759 = vst [vmem:[#allocation40_spill] sm:$0xff] %v20290_v2  ;;  %25760 = vst [vmem:[#allocation41_spill] sm:$0xff] %v20292_v26 }
 0x181   : > { %v17347_v1 = vpop.f32.mrf.mxu0  ;;  %v17435_v24 = vpop.f32.mrf.mxu1 }
 0x183   : > { %v758_v51 = vpop.f32.mrf.mxu0  ;;  %v1166_v7 = vpop.f32.mrf.mxu1 }
 0x184   : > { %v2241_v51 = vpop.permute.xlu0 %2240 }
 0x185   : > { %v17348_v31 = vpop.f32.mrf.mxu0  ;;  %v17436_v13 = vpop.f32.mrf.mxu1 }
 0x186   : > { %v25762_v13 = vmax.f32 %v19921_v42, %v19923_v43 }
 0x187   : > { %v1452_v12 = vpop.f32.mrf.mxu0  ;;  %v1901_v19 = vpop.f32.mrf.mxu1 }
 0x188   : > { %v1618_v46 = vmax.f32 %v25761_v63, %v1452_v12 }
 0x189   : > { %v17443_v32 = vpop.f32.mrf.mxu0  ;;  %v17531_v58 = vpop.f32.mrf.mxu1 }
 0x18a   : > { %v2067_v0 = vmax.f32 %v1618_v46, %v1901_v19  ;;  %v25763_v19 = vmax.f32 %v19929_v49, %v19931_v50 }
 0x18b   : > { %v1455_v1 = vpop.f32.mrf.mxu0  ;;  %v1904_v24 = vpop.f32.mrf.mxu1 }
 0x18c   : > { %v2156_v31 = vadd.f32 %v20302_v39, %v2067_v0  ;;  %v1619_v7 = vmax.f32 %v25762_v13, %v1455_v1  ;;  %v20315_v0 = vld [vmem:[%s25499_s4 + $0x10] sm:$0xff]   ;;  %v2251_v13 = vpop.permute.xlu1 %2250 }
 0x18d   : > { %v17444_v26 = vpop.f32.mrf.mxu0  ;;  %v17532_v37 = vpop.f32.mrf.mxu1  ;;  %17681 = vmatprep.subr.bf16.mxu0 %v20315_v0 }
 0x18e   : > { %v2197_v38 = vmax.f32 %v2156_v31, 0.0  ;;  %v2068_v12 = vmax.f32 %v1619_v7, %v1904_v24  ;;  %v2246_v26 = vpop.permute.xlu0 %2245  ;;  %v25764_v7 = vmax.f32 %v19941_v54, %v19943_v55  ;;  %v20331_v54 = vld [vmem:[%s25499_s4 + $0x18] sm:$0xff]  }
 0x18f   : > { %v1460_v63 = vpop.f32.mrf.mxu0  ;;  %v1909_v2 = vpop.f32.mrf.mxu1  ;;  %17715 = vmatprep.subr.bf16.mxu1 %v20331_v54 }
 0x190   : > { %v2443_v14 = vmul.f32 %v2241_v51, %v2197_v38  ;;  %v2157_v32 = vadd.f32 %v20302_v39, %v2068_v12  ;;  %v1620_v58 = vmax.f32 %v25763_v19, %v1460_v63  ;;  %v2256_v55 = vpop.permute.xlu1 %2255 }
 0x191   : > { %v17447_v42 = vpop.f32.mrf.mxu0  ;;  %v17535_v43 = vpop.f32.mrf.mxu1 }
 0x192   : > { %v16389_v46 = vpack.c.bf16 %v2443_v14, %v2443_v14  ;;  %v2198_v1 = vmax.f32 %v2157_v32, 0.0  ;;  %v2069_v24 = vmax.f32 %v1620_v58, %v1909_v2  ;;  %v25765_v43 = vmax.f32 %v19949_v61, %v19951_v62 }
 0x193   : > { %v1463_v51 = vpop.f32.mrf.mxu0  ;;  %v1912_v31 = vpop.f32.mrf.mxu1  ;;  %v25766_v62 = vmax.f32 %v19961_v3, %v19963_v4  ;;  %v25767_v3 = vmax.f32 %v19969_v10, %v19971_v11 }
 0x194   : > { %2650 = vst.msk [vmem:[#allocation2] sm:$0xf] %vm2649_vm4, %v16389_v46  ;;  %v2444_v49 = vmul.f32 %v2246_v26, %v2198_v1  ;;  %v2158_v50 = vadd.f32 %v20302_v39, %v2069_v24  ;;  %v1621_v37 = vmax.f32 %v25764_v7, %v1463_v51 }
 0x195   : > { %v17448_v38 = vpop.f32.mrf.mxu0  ;;  %v17536_v12 = vpop.f32.mrf.mxu1 }
 0x196   : > { %v16390_v63 = vpack.c.bf16 %v2444_v49, %v2444_v49  ;;  %v2199_v14 = vmax.f32 %v2158_v50, 0.0  ;;  %v2070_v32 = vmax.f32 %v1621_v37, %v1912_v31  ;;  %v2261_v12 = vpop.permute.xlu0 %2260 }
 0x197   : > { %v1468_v2 = vpop.f32.mrf.mxu0  ;;  %v1917_v19 = vpop.f32.mrf.mxu1 }
 0x198   : > { %2651 = vst.msk [vmem:[#allocation2 + $0x4] sm:$0xf] %vm2649_vm4, %v16390_v63  ;;  %v2445_v58 = vmul.f32 %v2251_v13, %v2199_v14  ;;  %v2159_v42 = vadd.f32 %v20302_v39, %v2070_v32  ;;  %v1622_v26 = vmax.f32 %v25765_v43, %v1468_v2 }
 0x199   : > { %v17451_v46 = vpop.f32.mrf.mxu0  ;;  %v17539_v1 = vpop.f32.mrf.mxu1 }
 0x19a   : > { %v16391_v24 = vpack.c.bf16 %v2445_v58, %v2445_v58  ;;  %v2200_v51 = vmax.f32 %v2159_v42, 0.0  ;;  %v2071_v31 = vmax.f32 %v1622_v26, %v1917_v19 }
 0x19b   : > { %v1471_v49 = vpop.f32.mrf.mxu0  ;;  %v1920_v50 = vpop.f32.mrf.mxu1  ;;  %v2692_v58 = vld [vmem:[#allocation2] sm:$0xf] }
 0x19c   : > { %2652 = vst.msk [vmem:[#allocation2 + $0x8] sm:$0xf] %vm2649_vm4, %v16391_v24  ;;  %v2446_v13 = vmul.f32 %v2256_v55, %v2200_v51  ;;  %v2160_v61 = vadd.f32 %v20302_v39, %v2071_v31  ;;  %v1623_v7 = vmax.f32 %v25766_v62, %v1471_v49  ;;  %v3352_v1 = vld [vmem:[#allocation2] sm:$0xe]  ;;  %v2266_v31 = vpop.permute.xlu1 %2265 }
 0x19d   : > { %v17452_v37 = vpop.f32.mrf.mxu0  ;;  %v17540_v38 = vpop.f32.mrf.mxu1 }
 0x19e   : > { %v16392_v63 = vpack.c.bf16 %v2446_v13, %v2446_v13  ;;  %v2201_v14 = vmax.f32 %v2160_v61, 0.0  ;;  %v2072_v32 = vmax.f32 %v1623_v7, %v1920_v50  ;;  %v3962_v61 = vld [vmem:[#allocation2] sm:$0xc] }
 0x19f   : > { %v1476_v2 = vpop.f32.mrf.mxu0  ;;  %v1925_v19 = vpop.f32.mrf.mxu1  ;;  %v2693_v42 = vld [vmem:[#allocation2 + $0x4] sm:$0xf] }
 0x1a0   : > { %2653 = vst.msk [vmem:[#allocation2 + $0xc] sm:$0xf] %vm2649_vm4, %v16392_v63  ;;  %v2447_v43 = vmul.f32 %v2261_v12, %v2201_v14  ;;  %v2161_v26 = vadd.f32 %v20302_v39, %v2072_v32  ;;  %v1624_v4 = vmax.f32 %v25767_v3, %v1476_v2  ;;  %v15315_v46 = vcombine.low %v2692_v58, %v2693_v42 }
 0x1a1   : > { %v17455_v55 = vpop.f32.mrf.mxu0  ;;  %v17543_v24 = vpop.f32.mrf.mxu1  ;;  %v15368_v51 = vcombine.low %v3352_v1, %v2693_v42  ;;  %v15408_v12 = vcombine.low %v3962_v61, %v2693_v42  ;;  %v25768_v63 = vmax.f32 %v19981_v15, %v19983_v16 }
 0x1a2   : > { %v16393_v49 = vpack.c.bf16 %v2447_v43, %v2447_v43  ;;  %v2202_v50 = vmax.f32 %v2161_v26, 0.0  ;;  %v2073_v13 = vmax.f32 %v1624_v4, %v1925_v19  ;;  %17649 = vmatprep.mubr.msk.bf16.mxu1 %vm2943_vm5, %v15315_v46  ;;  %v2813_v37 = vshll.u32 %v15315_v46, 16  ;;  %v2271_v43 = vpop.permute.xlu0 %2270 }
 0x1a3   : > { %v1479_v62 = vpop.f32.mrf.mxu0  ;;  %v1928_v7 = vpop.f32.mrf.mxu1  ;;  %v3645_v38 = vshrl.u32 %v15368_v51, 16  ;;  %v3648_v32 = vshll.u32 %v15368_v51, 16  ;;  %v2811_v58 = vshrl.u32 %v15315_v46, 16  ;;  %v3970_v15 = vrot.slane %v15408_v12, 2 }
 0x1a4   : > { %2654 = vst.msk [vmem:[#allocation2 + $0x10] sm:$0xf] %vm2649_vm4, %v16393_v49  ;;  %v2448_v10 = vmul.f32 %v2266_v31, %v2202_v50  ;;  %v2162_v11 = vadd.f32 %v20302_v39, %v2073_v13  ;;  %v1625_v14 = vmax.f32 %v25768_v63, %v1479_v62  ;;  %v2815_v4 = vrot.slane %v2813_v37, 1 }
 0x1a5   : > { %v17456_v2 = vpop.f32.mrf.mxu0  ;;  %v17544_v19 = vpop.f32.mrf.mxu1  ;;  %v3647_v31 = vrot.slane %v3645_v38, 1  ;;  %v3360_v49 = vrot.slane %v15368_v51, 1  ;;  %v25769_v46 = vmax.f32 %v19989_v22, %v19991_v23  ;;  %v3650_v61 = vrot.slane %v3648_v32, 2 }
 0x1a6   : > { %v16394_v26 = vpack.c.bf16 %v2448_v10, %v2448_v10  ;;  %v2203_v3 = vmax.f32 %v2162_v11, 0.0  ;;  %v2074_v42 = vmax.f32 %v1625_v14, %v1928_v7  ;;  %v2276_v10 = vpop.permute.xlu1 %2275  ;;  %v2816_v22 = vor.u32 %v2815_v4, %v2811_v58 }
 0x1a7   : > { %v1484_v1 = vpop.f32.mrf.mxu0  ;;  %v1933_v55 = vpop.f32.mrf.mxu1  ;;  %v20350_v24 = vld [vmem:[#allocation2 + $0x8] sm:$0xff]  }
 0x1a8   : > { %2655 = vst.msk [vmem:[#allocation2 + $0x14] sm:$0xf] %vm2649_vm4, %v16394_v26  ;;  %v2449_v16 = vmul.f32 %v2271_v43, %v2203_v3  ;;  %v2163_v50 = vadd.f32 %v20302_v39, %v2074_v42  ;;  %v1626_v13 = vmax.f32 %v25769_v46, %v1484_v1  ;;  %17650 = vmatmul.mubr.msk.bf16.vlgmr.msra.gmra.mxu1 %vm2943_vm5, %v20350_v24  ;;  %v2818_v37 = vshll.u32 %v20350_v24, 16  ;;  %v2281_v46 = vpop.permute.xlu0 %2280 }
 0x1a9   : > { %v17459_v62 = vpop.f32.mrf.mxu0  ;;  %v17547_v7 = vpop.f32.mrf.mxu1  ;;  %v2822_v51 = vshrl.u32 %v20350_v24, 16  ;;  %v3361_v38 = vrot.slane %v20350_v24, 1  ;;  %v3971_v12 = vrot.slane %v20350_v24, 2  ;;  %17716 = vmatpush3.bf16.msra.mxu1 %v20331_v54  ;;  %v25770_v1 = vmax.f32 %v20001_v27, %v20003_v28 }
 0x1aa   : > { %v16395_v11 = vpack.c.bf16 %v2449_v16, %v2449_v16  ;;  %v2204_v63 = vmax.f32 %v2163_v50, 0.0  ;;  %v2075_v14 = vmax.f32 %v1626_v13, %v1933_v55  ;;  %v2820_v2 = vrot.slane %v2818_v37, 1 }
 0x1ab   : > { %v1487_v23 = vpop.f32.mrf.mxu0  ;;  %v1936_v32 = vpop.f32.mrf.mxu1  ;;  %v3652_v19 = vrot.slane %v2822_v51, 1  ;;  %v3653_v43 = vrot.slane %v2818_v37, 2  ;;  %v20365_v26 = vsel %vm3359_vm6, %v3360_v49, %v3361_v38  ;;  %v20375_v54 = vsel %vm3969_vm9, %v3970_v15, %v3971_v12 }
 0x1ac   : > { %2656 = vst.msk [vmem:[#allocation2 + $0x18] sm:$0xf] %vm2649_vm4, %v16395_v11  ;;  %v2450_v3 = vmul.f32 %v2276_v10, %v2204_v63  ;;  %v2164_v42 = vadd.f32 %v20302_v39, %v2075_v14  ;;  %v1627_v55 = vmax.f32 %v25770_v1, %v1487_v23  ;;  %v2821_v16 = vsel %vm2809_vm7, %v2816_v22, %v2820_v2 }
 0x1ad   : > { %v17460_v58 = vpop.f32.mrf.mxu0  ;;  %v17548_v4 = vpop.f32.mrf.mxu1  ;;  %v3651_v49 = vor.u32 %v3650_v61, %v3647_v31  ;;  %v3654_v50 = vor.u32 %v3653_v43, %v3652_v19  ;;  %17615 = vmatprep.mubr.msk.bf16.mxu0 %vm2943_vm5, %v2821_v16  ;;  %v25771_v31 = vmax.f32 %v20009_v34, %v20011_v35 }
 0x1ae   : > { %v16396_v13 = vpack.c.bf16 %v2450_v3, %v2450_v3  ;;  %v2205_v62 = vmax.f32 %v2164_v42, 0.0  ;;  %v2076_v7 = vmax.f32 %v1627_v55, %v1936_v32  ;;  %v2286_v43 = vpop.permute.xlu1 %2285  ;;  %v2824_v55 = vor.u32 %v2822_v51, %v2820_v2 }
 0x1af   : > { %v1492_v37 = vpop.f32.mrf.mxu0  ;;  %v1941_v27 = vpop.f32.mrf.mxu1  ;;  %v20379_v28 = vld [vmem:[#allocation2 + $0x10] sm:$0xff]   ;;  %v20382_v10 = vsel %vm3643_vm8, %v3651_v49, %v3654_v50 }
 0x1b0   : > { %2657 = vst.msk [vmem:[#allocation2 + $0x1c] sm:$0xf] %vm2649_vm4, %v16396_v13  ;;  %v2451_v15 = vmul.f32 %v2281_v46, %v2205_v62  ;;  %v2165_v11 = vadd.f32 %v20302_v39, %v2076_v7  ;;  %v1628_v61 = vmax.f32 %v25771_v31, %v1492_v37  ;;  %17653 = vmatprep.mubr.msk.bf16.mxu1 %vm2943_vm5, %v20379_v28  ;;  %v2826_v22 = vshll.u32 %v20379_v28, 16 }
 0x1b1   : > { %v17463_v63 = vpop.f32.mrf.mxu0  ;;  %v17551_v14 = vpop.f32.mrf.mxu1  ;;  %v2830_v23 = vshrl.u32 %v20379_v28, 16  ;;  %v3363_v32 = vrot.slane %v20379_v28, 1  ;;  %v3973_v19 = vrot.slane %v20379_v28, 2  ;;  %v25772_v62 = vmax.f32 %v20021_v44, %v20023_v45 }
 0x1b2   : > { %v16397_v3 = vpack.c.bf16 %v2451_v15, %v2451_v15  ;;  %v2206_v42 = vmax.f32 %v2165_v11, 0.0  ;;  %v2077_v1 = vmax.f32 %v1628_v61, %v1941_v27  ;;  %v2828_v58 = vrot.slane %v2826_v22, 1 }
 0x1b3   : > { %v1495_v34 = vpop.f32.mrf.mxu0  ;;  %v1944_v35 = vpop.f32.mrf.mxu1  ;;  %v3656_v4 = vrot.slane %v2830_v23, 1  ;;  %v3657_v16 = vrot.slane %v2826_v22, 2  ;;  %v20396_v49 = vsel %vm3359_vm6, %v3361_v38, %v3363_v32  ;;  %v20407_v28 = vsel %vm3969_vm9, %v3971_v12, %v3973_v19 }
 0x1b4   : > { %2658 = vst.msk [vmem:[#allocation2 + $0x20] sm:$0xf] %vm2649_vm4, %v16397_v3  ;;  %v2452_v46 = vmul.f32 %v2286_v43, %v2206_v42  ;;  %v2166_v13 = vadd.f32 %v20302_v39, %v2077_v1  ;;  %v1629_v7 = vmax.f32 %v25772_v62, %v1495_v34  ;;  %v2829_v51 = vsel %vm2809_vm7, %v2824_v55, %v2828_v58  ;;  %v2291_v38 = vpop.permute.xlu0 %2290  ;;  %v2296_v55 = vpop.permute.xlu1 %2295 }
 0x1b5   : > { %v17464_v37 = vpop.f32.mrf.mxu0  ;;  %v17552_v27 = vpop.f32.mrf.mxu1  ;;  %v3658_v2 = vor.u32 %v3657_v16, %v3656_v4  ;;  %17616 = vmatmul.mubr.msk.bf16.vlgmr.msra.gmra.mxu0 %vm2943_vm5, %v2829_v51  ;;  %v25773_v14 = vmax.f32 %v20029_v57, %v20031_v59  ;;  %v2832_v16 = vor.u32 %v2830_v23, %v2828_v58  ;;  %v25774_v51 = vmax.f32 %v20041_v5, %v20043_v6 }
 0x1b6   : > { %v16398_v15 = vpack.c.bf16 %v2452_v46, %v2452_v46  ;;  %v2207_v11 = vmax.f32 %v2166_v13, 0.0  ;;  %v2078_v31 = vmax.f32 %v1629_v7, %v1944_v35  ;;  %17682 = vmatpush3.bf16.msra.mxu0 %v20315_v0 }
 0x1b7   : > { %v1500_v61 = vpop.f32.mrf.mxu0  ;;  %v1949_v63 = vpop.f32.mrf.mxu1  ;;  %v20410_v44 = vld [vmem:[#allocation2 + $0x18] sm:$0xff]   ;;  %v20414_v45 = vsel %vm3643_vm8, %v3654_v50, %v3658_v2 }
 0x1b8   : > { %2659 = vst.msk [vmem:[#allocation2 + $0x24] sm:$0xf] %vm2649_vm4, %v16398_v15  ;;  %v2453_v24 = vmul.f32 %v2291_v38, %v2207_v11  ;;  %v2167_v12 = vadd.f32 %v20302_v39, %v2078_v31  ;;  %v1630_v22 = vmax.f32 %v25773_v14, %v1500_v61  ;;  %17654 = vmatmul.mubr.msk.bf16.gmra.mxu1 %vm2943_vm5, %v20410_v44  ;;  %v2834_v42 = vshll.u32 %v20410_v44, 16  ;;  %v2301_v61 = vpop.permute.xlu0 %2300 }
 0x1b9   : > { %v17467_v43 = vpop.f32.mrf.mxu0  ;;  %v17555_v3 = vpop.f32.mrf.mxu1  ;;  %v2838_v0 = vshrl.u32 %v20410_v44, 16  ;;  %v3365_v50 = vrot.slane %v20410_v44, 1  ;;  %v3975_v1 = vrot.slane %v20410_v44, 2 }
 0x1ba   : > { %v16399_v34 = vpack.c.bf16 %v2453_v24, %v2453_v24  ;;  %v2208_v35 = vmax.f32 %v2167_v12, 0.0  ;;  %v2079_v4 = vmax.f32 %v1630_v22, %v1949_v63  ;;  %v2836_v46 = vrot.slane %v2834_v42, 1 }
 0x1bb   : > { %v1503_v57 = vpop.f32.mrf.mxu0  ;;  %v1952_v59 = vpop.f32.mrf.mxu1  ;;  %v3660_v13 = vrot.slane %v2838_v0, 1  ;;  %v3661_v62 = vrot.slane %v2834_v42, 2  ;;  %v20428_v7 = vsel %vm3359_vm6, %v3363_v32, %v3365_v50  ;;  %v20437_v31 = vsel %vm3969_vm9, %v3973_v19, %v3975_v1 }
 0x1bc   : > { %2660 = vst.msk [vmem:[#allocation2 + $0x28] sm:$0xf] %vm2649_vm4, %v16399_v34  ;;  %v2454_v37 = vmul.f32 %v2296_v55, %v2208_v35  ;;  %v2168_v27 = vadd.f32 %v20302_v39, %v2079_v4  ;;  %v1631_v38 = vmax.f32 %v25774_v51, %v1503_v57  ;;  %v2837_v23 = vsel %vm2809_vm7, %v2832_v16, %v2836_v46  ;;  %v2306_v4 = vpop.permute.xlu1 %2305 }
 0x1bd   : > { %v17468_v15 = vpop.f32.mrf.mxu0  ;;  %v17556_v11 = vpop.f32.mrf.mxu1  ;;  %v3662_v58 = vor.u32 %v3661_v62, %v3660_v13  ;;  %17619 = vmatprep.mubr.msk.bf16.mxu0 %vm2943_vm5, %v2837_v23  ;;  %v25775_v19 = vmax.f32 %v20049_v18, %v20051_v20  ;;  %v2840_v13 = vor.u32 %v2838_v0, %v2836_v46 }
 0x1be   : > { %v16400_v32 = vpack.c.bf16 %v2454_v37, %v2454_v37  ;;  %v2209_v63 = vmax.f32 %v2168_v27, 0.0  ;;  %v2080_v44 = vmax.f32 %v1631_v38, %v1952_v59  ;;  %v25776_v11 = vmax.f32 %v20061_v29, %v20063_v30  ;;  %v19012_v29 = vld [vmem:[%s25499_s4 + $0x20] sm:$0xff]  }
 0x1bf   : > { %v1508_v24 = vpop.f32.mrf.mxu0  ;;  %v1957_v12 = vpop.f32.mrf.mxu1  ;;  %v20440_v14 = vld [vmem:[#allocation2 + $0x20] sm:$0xff]   ;;  %v20443_v5 = vsel %vm3643_vm8, %v3658_v2, %v3662_v58  ;;  %17749 = vmatprep.subr.bf16.mxu0 %v19012_v29 }
 0x1c0   : > { %2661 = vst.msk [vmem:[#allocation2 + $0x2c] sm:$0xf] %vm2649_vm4, %v16400_v32  ;;  %v2455_v6 = vmul.f32 %v2301_v61, %v2209_v63  ;;  %v2169_v22 = vadd.f32 %v20302_v39, %v2080_v44  ;;  %v1632_v43 = vmax.f32 %v25775_v19, %v1508_v24  ;;  %17657 = vmatprep.mubr.msk.bf16.mxu1 %vm2943_vm5, %v20440_v14  ;;  %v2842_v55 = vshll.u32 %v20440_v14, 16 }
 0x1c1   : > { %v17471_v3 = vpop.f32.mrf.mxu0  ;;  %v17559_v42 = vpop.f32.mrf.mxu1  ;;  %v2846_v34 = vshrl.u32 %v20440_v14, 16  ;;  %v3367_v2 = vrot.slane %v20440_v14, 1  ;;  %v3977_v35 = vrot.slane %v20440_v14, 2 }
 0x1c2   : > { %v16401_v16 = vpack.c.bf16 %v2455_v6, %v2455_v6  ;;  %v2210_v57 = vmax.f32 %v2169_v22, 0.0  ;;  %v2081_v59 = vmax.f32 %v1632_v43, %v1957_v12  ;;  %v2844_v62 = vrot.slane %v2842_v55, 1 }
 0x1c3   : > { %v1511_v18 = vpop.f32.mrf.mxu0  ;;  %v1960_v20 = vpop.f32.mrf.mxu1  ;;  %v3664_v37 = vrot.slane %v2846_v34, 1  ;;  %v3665_v27 = vrot.slane %v2842_v55, 2  ;;  %v20457_v51 = vsel %vm3359_vm6, %v3365_v50, %v3367_v2  ;;  %v20468_v63 = vsel %vm3969_vm9, %v3975_v1, %v3977_v35 }
 0x1c4   : > { %2662 = vst.msk [vmem:[#allocation2 + $0x30] sm:$0xf] %vm2649_vm4, %v16401_v16  ;;  %v2456_v38 = vmul.f32 %v2306_v4, %v2210_v57  ;;  %v2170_v15 = vadd.f32 %v20302_v39, %v2081_v59  ;;  %v1633_v23 = vmax.f32 %v25776_v11, %v1511_v18  ;;  %v2845_v0 = vsel %vm2809_vm7, %v2840_v13, %v2844_v62  ;;  %v2311_v50 = vpop.permute.xlu0 %2310  ;;  %v2316_v13 = vpop.permute.xlu1 %2315 }
 0x1c5   : > { %v17472_v61 = vpop.f32.mrf.mxu0  ;;  %v17560_v32 = vpop.f32.mrf.mxu1  ;;  %v3666_v46 = vor.u32 %v3665_v27, %v3664_v37  ;;  %17620 = vmatmul.mubr.msk.bf16.gmra.mxu0 %vm2943_vm5, %v2845_v0  ;;  %v25777_v3 = vmax.f32 %v20069_v48, %v20071_v53  ;;  %v2848_v48 = vor.u32 %v2846_v34, %v2844_v62  ;;  %v25778_v0 = vmax.f32 %v20081_v8, %v20083_v9 }
 0x1c6   : > { %v16402_v44 = vpack.c.bf16 %v2456_v38, %v2456_v38  ;;  %v2211_v24 = vmax.f32 %v2170_v15, 0.0  ;;  %v2082_v12 = vmax.f32 %v1633_v23, %v1960_v20 }
 0x1c7   : > { %v1516_v30 = vpop.f32.mrf.mxu0  ;;  %v1965_v6 = vpop.f32.mrf.mxu1  ;;  %v20474_v22 = vld [vmem:[#allocation2 + $0x28] sm:$0xff]   ;;  %v20477_v19 = vsel %vm3643_vm8, %v3662_v58, %v3666_v46 }
 0x1c8   : > { %2663 = vst.msk [vmem:[#allocation2 + $0x34] sm:$0xf] %vm2649_vm4, %v16402_v44  ;;  %v2457_v1 = vmul.f32 %v2311_v50, %v2211_v24  ;;  %v2171_v43 = vadd.f32 %v20302_v39, %v2082_v12  ;;  %v1634_v42 = vmax.f32 %v25777_v3, %v1516_v30  ;;  %17658 = vmatmul.mubr.msk.bf16.gmra.mxu1 %vm2943_vm5, %v20474_v22  ;;  %v2850_v16 = vshll.u32 %v20474_v22, 16 }
 0x1c9   : > { %v17475_v55 = vpop.f32.mrf.mxu0  ;;  %v17563_v4 = vpop.f32.mrf.mxu1  ;;  %v2854_v58 = vshrl.u32 %v20474_v22, 16  ;;  %v3369_v57 = vrot.slane %v20474_v22, 1  ;;  %v3979_v59 = vrot.slane %v20474_v22, 2 }
 0x1ca   : > { %v16403_v18 = vpack.c.bf16 %v2457_v1, %v2457_v1  ;;  %v2212_v20 = vmax.f32 %v2171_v43, 0.0  ;;  %v2083_v37 = vmax.f32 %v1634_v42, %v1965_v6  ;;  %v2852_v38 = vrot.slane %v2850_v16, 1 }
 0x1cb   : > { %v1519_v53 = vpop.f32.mrf.mxu0  ;;  %v1968_v27 = vpop.f32.mrf.mxu1  ;;  %v3668_v15 = vrot.slane %v2854_v58, 1  ;;  %v3669_v11 = vrot.slane %v2850_v16, 2  ;;  %v20491_v23 = vsel %vm3359_vm6, %v3367_v2, %v3369_v57  ;;  %v20502_v12 = vsel %vm3969_vm9, %v3977_v35, %v3979_v59 }
 0x1cc   : > { %2664 = vst.msk [vmem:[#allocation2 + $0x38] sm:$0xf] %vm2649_vm4, %v16403_v18  ;;  %v2458_v61 = vmul.f32 %v2316_v13, %v2212_v20  ;;  %v2172_v32 = vadd.f32 %v20302_v39, %v2083_v37  ;;  %v1635_v50 = vmax.f32 %v25778_v0, %v1519_v53  ;;  %v2853_v34 = vsel %vm2809_vm7, %v2848_v48, %v2852_v38  ;;  %v2321_v2 = vpop.permute.xlu0 %2320  ;;  %v2326_v18 = vpop.permute.xlu1 %2325 }
 0x1cd   : > { %v17476_v44 = vpop.f32.mrf.mxu0  ;;  %v17564_v24 = vpop.f32.mrf.mxu1  ;;  %v3670_v62 = vor.u32 %v3669_v11, %v3668_v15  ;;  %17623 = vmatprep.mubr.msk.bf16.mxu0 %vm2943_vm5, %v2853_v34  ;;  %v25779_v35 = vmax.f32 %v20092_v41, %v20094_v47  ;;  %v2856_v53 = vor.u32 %v2854_v58, %v2852_v38 }
 0x1ce   : > { %v16404_v29 = vpack.c.bf16 %v2458_v61, %v2458_v61  ;;  %v2213_v30 = vmax.f32 %v2172_v32, 0.0  ;;  %v2084_v6 = vmax.f32 %v1635_v50, %v1968_v27  ;;  %v25780_v50 = vmax.f32 %v20104_v25, %v20106_v33 }
 0x1cf   : > { %v1524_v22 = vpop.f32.mrf.mxu0  ;;  %v1973_v1 = vpop.f32.mrf.mxu1  ;;  %v20505_v8 = vld [vmem:[#allocation2 + $0x30] sm:$0xff]   ;;  %v20508_v9 = vsel %vm3643_vm8, %v3666_v46, %v3670_v62 }
 0x1d0   : > { %2665 = vst.msk [vmem:[#allocation2 + $0x3c] sm:$0xf] %vm2649_vm4, %v16404_v29  ;;  %v2459_v43 = vmul.f32 %v2321_v2, %v2213_v30  ;;  %v2173_v14 = vadd.f32 %v20302_v39, %v2084_v6  ;;  %v1636_v3 = vmax.f32 %v25779_v35, %v1524_v22  ;;  %17661 = vmatprep.mubr.msk.bf16.mxu1 %vm2943_vm5, %v20505_v8  ;;  %v2858_v4 = vshll.u32 %v20505_v8, 16 }
 0x1d1   : > { %v17479_v42 = vpop.f32.mrf.mxu0  ;;  %v17567_v55 = vpop.f32.mrf.mxu1  ;;  %v2862_v16 = vshrl.u32 %v20505_v8, 16  ;;  %v3371_v46 = vrot.slane %v20505_v8, 1  ;;  %v3981_v13 = vrot.slane %v20505_v8, 2 }
 0x1d2   : > { %v16405_v20 = vpack.c.bf16 %v2459_v43, %v2459_v43  ;;  %v2214_v37 = vmax.f32 %v2173_v14, 0.0  ;;  %v2085_v48 = vmax.f32 %v1636_v3, %v1973_v1  ;;  %v2860_v27 = vrot.slane %v2858_v4, 1 }
 0x1d3   : > { %v1527_v41 = vpop.f32.mrf.mxu0  ;;  %v1976_v47 = vpop.f32.mrf.mxu1  ;;  %v3672_v15 = vrot.slane %v2862_v16, 1  ;;  %v3673_v11 = vrot.slane %v2858_v4, 2  ;;  %v20522_v61 = vsel %vm3359_vm6, %v3369_v57, %v3371_v46  ;;  %v20533_v2 = vsel %vm3969_vm9, %v3979_v59, %v3981_v13 }
 0x1d4   : > { %2666 = vst.msk [vmem:[#allocation2 + $0x40] sm:$0xf] %vm2649_vm4, %v16405_v20  ;;  %v2460_v32 = vmul.f32 %v2326_v18, %v2214_v37  ;;  %v2174_v0 = vadd.f32 %v20302_v39, %v2085_v48  ;;  %v1637_v44 = vmax.f32 %v25780_v50, %v1527_v41  ;;  %v2861_v58 = vsel %vm2809_vm7, %v2856_v53, %v2860_v27  ;;  %v2331_v57 = vpop.permute.xlu0 %2330  ;;  %v2336_v20 = vpop.permute.xlu1 %2335 }
 0x1d5   : > { %v17480_v24 = vpop.f32.mrf.mxu0  ;;  %v17568_v34 = vpop.f32.mrf.mxu1  ;;  %v3674_v38 = vor.u32 %v3673_v11, %v3672_v15  ;;  %17624 = vmatmul.mubr.msk.bf16.gmra.mxu0 %vm2943_vm5, %v2861_v58  ;;  %v25781_v59 = vmax.f32 %v20112_v40, %v20114_v21  ;;  %v2864_v41 = vor.u32 %v2862_v16, %v2860_v27  ;;  %v20555_v21 = vld [vmem:[%s25499_s4 + $0x28] sm:$0xff]   ;;  %v20557_v40 = vld [vmem:[#allocation2 + $0x20] sm:$0xf]  ;;  %v25783_v27 = vmax.f32 %v20124_v56, %v20126_v17  ;;  %v20577_v17 = vld [vmem:[#allocation2 + $0x1c] sm:$0xf] }
 0x1d6   : > { %v16406_v29 = vpack.c.bf16 %v2460_v32, %v2460_v32  ;;  %v2215_v30 = vmax.f32 %v2174_v0, 0.0  ;;  %v2086_v6 = vmax.f32 %v1637_v44, %v1976_v47  ;;  %25782 = vst [vmem:[#allocation42_spill] sm:$0xff] %v20557_v40  ;;  %17783 = vmatprep.subr.bf16.mxu1 %v20555_v21  ;;  %25784 = vst [vmem:[#allocation43_spill] sm:$0xff] %v20577_v17 }
 0x1d7   : > { %v1532_v22 = vpop.f32.mrf.mxu0  ;;  %v1981_v1 = vpop.f32.mrf.mxu1  ;;  %v20536_v25 = vld [vmem:[#allocation2 + $0x38] sm:$0xff]   ;;  %v20539_v33 = vsel %vm3643_vm8, %v3670_v62, %v3674_v38 }
 0x1d8   : > { %2667 = vst.msk [vmem:[#allocation2 + $0x44] sm:$0xf] %vm2649_vm4, %v16406_v29  ;;  %v2461_v43 = vmul.f32 %v2331_v57, %v2215_v30  ;;  %v2175_v14 = vadd.f32 %v20302_v39, %v2086_v6  ;;  %v1638_v35 = vmax.f32 %v25781_v59, %v1532_v22  ;;  %17662 = vmatmul.mubr.msk.bf16.gmra.mxu1 %vm2943_vm5, %v20536_v25  ;;  %v2866_v55 = vshll.u32 %v20536_v25, 16  ;;  %v2341_v30 = vpop.permute.xlu0 %2340 }
 0x1d9   : > { %v17483_v3 = vpop.f32.mrf.mxu0  ;;  %v17571_v42 = vpop.f32.mrf.mxu1  ;;  %v2870_v4 = vshrl.u32 %v20536_v25, 16  ;;  %v3373_v62 = vrot.slane %v20536_v25, 1  ;;  %v3983_v18 = vrot.slane %v20536_v25, 2 }
 0x1da   : > { %v16407_v37 = vpack.c.bf16 %v2461_v43, %v2461_v43  ;;  %v2216_v48 = vmax.f32 %v2175_v14, 0.0  ;;  %v2087_v53 = vmax.f32 %v1638_v35, %v1981_v1  ;;  %v2868_v11 = vrot.slane %v2866_v55, 1 }
 0x1db   : > { %v1535_v47 = vpop.f32.mrf.mxu0  ;;  %v1984_v15 = vpop.f32.mrf.mxu1  ;;  %v3676_v32 = vrot.slane %v2870_v4, 1  ;;  %v3677_v0 = vrot.slane %v2866_v55, 2  ;;  %v20560_v50 = vsel %vm3359_vm6, %v3371_v46, %v3373_v62  ;;  %v20574_v46 = vsel %vm3969_vm9, %v3981_v13, %v3983_v18 }
 0x1dc   : > { %2668 = vst.msk [vmem:[#allocation2 + $0x48] sm:$0xf] %vm2649_vm4, %v16407_v37  ;;  %v2462_v44 = vmul.f32 %v2336_v20, %v2216_v48  ;;  %v2176_v16 = vadd.f32 %v20302_v39, %v2087_v53  ;;  %v1639_v24 = vmax.f32 %v25783_v27, %v1535_v47  ;;  %v2869_v57 = vsel %vm2809_vm7, %v2864_v41, %v2868_v11  ;;  %v2346_v41 = vpop.permute.xlu1 %2345 }
 0x1dd   : > { %v17484_v34 = vpop.f32.mrf.mxu0  ;;  %v17572_v58 = vpop.f32.mrf.mxu1  ;;  %v3678_v29 = vor.u32 %v3677_v0, %v3676_v32  ;;  %17627 = vmatprep.mubr.msk.bf16.mxu0 %vm2943_vm5, %v2869_v57  ;;  %v25785_v3 = vmax.f32 %v20132_v52, %v20134_v36  ;;  %v2872_v0 = vor.u32 %v2870_v4, %v2868_v11  ;;  %v25786_v57 = vld [vmem:[#allocation7_spill] sm:$0xff] }
 0x1de   : > { %v16408_v6 = vpack.c.bf16 %v2462_v44, %v2462_v44  ;;  %v2217_v22 = vmax.f32 %v2176_v16, 0.0  ;;  %v2088_v1 = vmax.f32 %v1639_v24, %v1984_v15 }
 0x1df   : > { %v1540_v56 = vpop.f32.mrf.mxu0  ;;  %v1989_v43 = vpop.f32.mrf.mxu1  ;;  %v20579_v14 = vld [vmem:[#allocation2 + $0x40] sm:$0xff]   ;;  %v20582_v59 = vsel %vm3643_vm8, %v3674_v38, %v3678_v29 }
 0x1e0   : > { %2669 = vst.msk [vmem:[#allocation2 + $0x4c] sm:$0xf] %vm2649_vm4, %v16408_v6  ;;  %v2463_v13 = vmul.f32 %v2341_v30, %v2217_v22  ;;  %v2177_v35 = vadd.f32 %v20302_v39, %v2088_v1  ;;  %v1640_v42 = vmax.f32 %v25785_v3, %v1540_v56  ;;  %17665 = vmatprep.mubr.msk.bf16.mxu1 %vm2943_vm5, %v20579_v14  ;;  %v2874_v38 = vshll.u32 %v20579_v14, 16 }
 0x1e1   : > { %v17487_v55 = vpop.f32.mrf.mxu0  ;;  %v17575_v20 = vpop.f32.mrf.mxu1  ;;  %v2878_v37 = vshrl.u32 %v20579_v14, 16  ;;  %v3375_v48 = vrot.slane %v20579_v14, 1  ;;  %v3985_v53 = vrot.slane %v20579_v14, 2  ;;  %v25787_v30 = vmax.f32 %v20144_v60, %v25786_v57 }
 0x1e2   : > { %v16409_v47 = vpack.c.bf16 %v2463_v13, %v2463_v13  ;;  %v2218_v15 = vmax.f32 %v2177_v35, 0.0  ;;  %v2089_v32 = vmax.f32 %v1640_v42, %v1989_v43  ;;  %v2876_v44 = vrot.slane %v2874_v38, 1  ;;  %v25790_v20 = vld [vmem:[#allocation9_spill] sm:$0xff] }
 0x1e3   : > { %v1543_v36 = vpop.f32.mrf.mxu0  ;;  %v1992_v52 = vpop.f32.mrf.mxu1  ;;  %v3680_v16 = vrot.slane %v2878_v37, 1  ;;  %v3681_v27 = vrot.slane %v2874_v38, 2  ;;  %v20598_v24 = vsel %vm3359_vm6, %v3373_v62, %v3375_v48  ;;  %v20609_v56 = vsel %vm3969_vm9, %v3983_v18, %v3985_v53  ;;  %v25789_v18 = vld [vmem:[#allocation8_spill] sm:$0xff] }
 0x1e4   : > { %2670 = vst.msk [vmem:[#allocation2 + $0x50] sm:$0xf] %vm2649_vm4, %v16409_v47  ;;  %v2464_v34 = vmul.f32 %v2346_v41, %v2218_v15  ;;  %v2178_v58 = vadd.f32 %v20302_v39, %v2089_v32  ;;  %v1641_v6 = vmax.f32 %v25787_v30, %v1543_v36  ;;  %v2877_v4 = vsel %vm2809_vm7, %v2872_v0, %v2876_v44  ;;  %v2351_v62 = vpop.permute.xlu0 %2350 }
 0x1e5   : > { %v17488_v22 = vpop.f32.mrf.mxu0  ;;  %v17576_v1 = vpop.f32.mrf.mxu1  ;;  %v3682_v11 = vor.u32 %v3681_v27, %v3680_v16  ;;  %25788 = vst [vmem:[#allocation7_spill] sm:$0xff] %v20609_v56  ;;  %17628 = vmatmul.mubr.msk.bf16.gmra.mxu0 %vm2943_vm5, %v2877_v4  ;;  %v25791_v38 = vmax.f32 %v25789_v18, %v25790_v20 }
 0x1e6   : > { %v16410_v43 = vpack.c.bf16 %v2464_v34, %v2464_v34  ;;  %v2219_v14 = vmax.f32 %v2178_v58, 0.0  ;;  %v2090_v13 = vmax.f32 %v1641_v6, %v1992_v52  ;;  %v2356_v52 = vpop.permute.xlu1 %2355  ;;  %v2880_v34 = vor.u32 %v2878_v37, %v2876_v44  ;;  %v25793_v37 = vld [vmem:[#allocation11_spill] sm:$0xff] }
 0x1e7   : > { %v1548_v35 = vpop.f32.mrf.mxu0  ;;  %v1997_v3 = vpop.f32.mrf.mxu1  ;;  %v20612_v60 = vld [vmem:[#allocation2 + $0x48] sm:$0xff]   ;;  %v20615_v42 = vsel %vm3643_vm8, %v3678_v29, %v3682_v11 }
 0x1e8   : > { %2671 = vst.msk [vmem:[#allocation2 + $0x54] sm:$0xf] %vm2649_vm4, %v16410_v43  ;;  %v2465_v55 = vmul.f32 %v2351_v62, %v2219_v14  ;;  %v2179_v25 = vadd.f32 %v20302_v39, %v2090_v13  ;;  %v1642_v41 = vmax.f32 %v25791_v38, %v1548_v35  ;;  %17666 = vmatmul.mubr.msk.bf16.gmra.mxu1 %vm2943_vm5, %v20612_v60  ;;  %v2882_v32 = vshll.u32 %v20612_v60, 16  ;;  %v20635_v62 = vld [vmem:[%s25497_s2] ss:$0 sm:$0xff] }
 0x1e9   : > { %v17491_v47 = vpop.f32.mrf.mxu0  ;;  %v17579_v15 = vpop.f32.mrf.mxu1  ;;  %v2886_v0 = vshrl.u32 %v20612_v60, 16  ;;  %v3377_v29 = vrot.slane %v20612_v60, 1  ;;  %v3987_v36 = vrot.slane %v20612_v60, 2  ;;  %v25792_v14 = vld [vmem:[#allocation10_spill] sm:$0xff] }
 0x1ea   : > { %v16411_v16 = vpack.c.bf16 %v2465_v55, %v2465_v55  ;;  %v2220_v39 = vmax.f32 %v2179_v25, 0.0  ;;  %v2091_v27 = vmax.f32 %v1642_v41, %v1997_v3  ;;  %v2884_v30 = vrot.slane %v2882_v32, 1  ;;  %v2361_v25 = vpop.permute.xlu0 %2360 }
 0x1eb   : > { %v1551_v58 = vpop.f32.mrf.mxu0  ;;  %v2000_v57 = vpop.f32.mrf.mxu1  ;;  %v3684_v6 = vrot.slane %v2886_v0, 1  ;;  %v3685_v22 = vrot.slane %v2882_v32, 2  ;;  %v20629_v1 = vsel %vm3359_vm6, %v3375_v48, %v3377_v29  ;;  %v25794_v44 = vmax.f32 %v25792_v14, %v25793_v37 }
 0x1ec   : > { %2672 = vst.msk [vmem:[#allocation2 + $0x58] sm:$0xf] %vm2649_vm4, %v16411_v16  ;;  %v2466_v4 = vmul.f32 %v2356_v52, %v2220_v39  ;;  %v2180_v43 = vadd.f32 %v20635_v62, %v2091_v27  ;;  %v2885_v60 = vsel %vm2809_vm7, %v2880_v34, %v2884_v30  ;;  %v20643_v55 = vsel %vm3969_vm9, %v3985_v53, %v3987_v36  ;;  %v25796_v53 = vld [vmem:[#allocation12_spill] sm:$0xff]  ;;  %v25797_v39 = vld [vmem:[#allocation13_spill] sm:$0xff] }
 0x1ed   : > { %v1643_v13 = vmax.f32 %v25794_v44, %v1551_v58  ;;  %v17492_v35 = vpop.f32.mrf.mxu0  ;;  %v17580_v3 = vpop.f32.mrf.mxu1  ;;  %v3686_v48 = vor.u32 %v3685_v22, %v3684_v6  ;;  %25795 = vst [vmem:[#allocation8_spill] sm:$0xff] %v20643_v55  ;;  %17631 = vmatprep.mubr.msk.bf16.mxu0 %vm2943_vm5, %v2885_v60  ;;  %v25798_v27 = vmax.f32 %v25796_v53, %v25797_v39  ;;  %v25799_v53 = vld [vmem:[#allocation14_spill] sm:$0xff] }
 0x1ee   : > { %v16412_v18 = vpack.c.bf16 %v2466_v4, %v2466_v4  ;;  %v2221_v20 = vmax.f32 %v2180_v43, 0.0  ;;  %v2366_v43 = vpop.permute.xlu1 %2365 }
 0x1ef   : > { %v2092_v38 = vmax.f32 %v1643_v13, %v2000_v57  ;;  %v1556_v41 = vpop.f32.mrf.mxu0  ;;  %v2005_v47 = vpop.f32.mrf.mxu1  ;;  %v20646_v15 = vld [vmem:[#allocation2 + $0x50] sm:$0xff]   ;;  %v20649_v32 = vsel %vm3643_vm8, %v3682_v11, %v3686_v48  ;;  %v2888_v13 = vor.u32 %v2886_v0, %v2884_v30 }
 0x1f0   : > { %2673 = vst.msk [vmem:[#allocation2 + $0x5c] sm:$0xf] %vm2649_vm4, %v16412_v18  ;;  %v2467_v52 = vmul.f32 %v2361_v25, %v2221_v20  ;;  %v1644_v34 = vmax.f32 %v25798_v27, %v1556_v41  ;;  %17669 = vmatprep.mubr.msk.bf16.mxu1 %vm2943_vm5, %v20646_v15  ;;  %v2890_v6 = vshll.u32 %v20646_v15, 16  ;;  %v2894_v22 = vshrl.u32 %v20646_v15, 16 }
 0x1f1   : > { %v2181_v16 = vadd.f32 %v20635_v62, %v2092_v38  ;;  %v17495_v58 = vpop.f32.mrf.mxu0  ;;  %v17583_v57 = vpop.f32.mrf.mxu1  ;;  %v3379_v11 = vrot.slane %v20646_v15, 1  ;;  %v3989_v4 = vrot.slane %v20646_v15, 2  ;;  %v25800_v15 = vld [vmem:[#allocation15_spill] sm:$0xff] }
 0x1f2   : > { %v16413_v14 = vpack.c.bf16 %v2467_v52, %v2467_v52  ;;  %v2093_v44 = vmax.f32 %v1644_v34, %v2005_v47  ;;  %v2892_v60 = vrot.slane %v2890_v6, 1  ;;  %v3688_v25 = vrot.slane %v2894_v22, 1  ;;  %v2371_v34 = vpop.permute.xlu0 %2370 }
 0x1f3   : > { %v2222_v37 = vmax.f32 %v2181_v16, 0.0  ;;  %v1559_v35 = vpop.f32.mrf.mxu0  ;;  %v2008_v3 = vpop.f32.mrf.mxu1  ;;  %v3689_v18 = vrot.slane %v2890_v6, 2  ;;  %v20663_v20 = vsel %vm3359_vm6, %v3377_v29, %v3379_v11  ;;  %v25801_v39 = vmax.f32 %v25799_v53, %v25800_v15 }
 0x1f4   : > { %2674 = vst.msk [vmem:[#allocation2 + $0x60] sm:$0xf] %vm2649_vm4, %v16413_v14  ;;  %v2182_v41 = vadd.f32 %v20635_v62, %v2093_v44  ;;  %v2893_v0 = vsel %vm2809_vm7, %v2888_v13, %v2892_v60  ;;  %v20672_v27 = vsel %vm3969_vm9, %v3987_v36, %v3989_v4  ;;  %v25803_v36 = vld [vmem:[#allocation16_spill] sm:$0xff] }
 0x1f5   : > { %v2468_v38 = vmul.f32 %v2366_v43, %v2222_v37  ;;  %v1645_v52 = vmax.f32 %v25801_v39, %v1559_v35  ;;  %v17496_v16 = vpop.f32.mrf.mxu0  ;;  %v17584_v47 = vpop.f32.mrf.mxu1  ;;  %v3690_v30 = vor.u32 %v3689_v18, %v3688_v25  ;;  %25802 = vst [vmem:[#allocation9_spill] sm:$0xff] %v20672_v27  ;;  %17632 = vmatmul.mubr.msk.bf16.gmra.mxu0 %vm2943_vm5, %v2893_v0  ;;  %v25804_v35 = vld [vmem:[#allocation17_spill] sm:$0xff] }
 0x1f6   : > { %v2223_v58 = vmax.f32 %v2182_v41, 0.0  ;;  %v25805_v25 = vmax.f32 %v25803_v36, %v25804_v35  ;;  %v2376_v39 = vpop.permute.xlu1 %2375  ;;  %v2896_v0 = vor.u32 %v2894_v22, %v2892_v60 }
 0x1f7   : > { %v16414_v29 = vpack.c.bf16 %v2468_v38, %v2468_v38  ;;  %v2094_v57 = vmax.f32 %v1645_v52, %v2008_v3  ;;  %v1564_v6 = vpop.f32.mrf.mxu0  ;;  %v2013_v43 = vpop.f32.mrf.mxu1  ;;  %v20675_v14 = vld [vmem:[#allocation2 + $0x58] sm:$0xff]   ;;  %v20678_v37 = vsel %vm3643_vm8, %v3686_v48, %v3690_v30 }
 0x1f8   : > { %v2469_v44 = vmul.f32 %v2371_v34, %v2223_v58  ;;  %v1646_v18 = vmax.f32 %v25805_v25, %v1564_v6  ;;  %17670 = vmatmul.mubr.msk.bf16.gmra.mxu1 %vm2943_vm5, %v20675_v14  ;;  %v2898_v41 = vshll.u32 %v20675_v14, 16  ;;  %v2902_v53 = vshrl.u32 %v20675_v14, 16 }
 0x1f9   : > { %2675 = vst.msk [vmem:[#allocation2 + $0x64] sm:$0xf] %vm2649_vm4, %v16414_v29  ;;  %v2183_v13 = vadd.f32 %v20635_v62, %v2094_v57  ;;  %v17499_v38 = vpop.f32.mrf.mxu0  ;;  %v17587_v3 = vpop.f32.mrf.mxu1  ;;  %v3381_v48 = vrot.slane %v20675_v14, 1  ;;  %v3991_v15 = vrot.slane %v20675_v14, 2  ;;  %v25807_v14 = vld [vmem:[#allocation19_spill] sm:$0xff] }
 0x1fa   : > { %v16415_v52 = vpack.c.bf16 %v2469_v44, %v2469_v44  ;;  %v2095_v47 = vmax.f32 %v1646_v18, %v2013_v43  ;;  %v2900_v58 = vrot.slane %v2898_v41, 1  ;;  %v3692_v57 = vrot.slane %v2902_v53, 1  ;;  %v25806_v38 = vld [vmem:[#allocation18_spill] sm:$0xff] }
 0x1fb   : > { %v2224_v16 = vmax.f32 %v2183_v13, 0.0  ;;  %v1567_v34 = vpop.f32.mrf.mxu0  ;;  %v2016_v29 = vpop.f32.mrf.mxu1  ;;  %v3693_v6 = vrot.slane %v2898_v41, 2  ;;  %v20692_v36 = vsel %vm3359_vm6, %v3379_v11, %v3381_v48  ;;  %v25808_v3 = vmax.f32 %v25806_v38, %v25807_v14 }
 0x1fc   : > { %2676 = vst.msk [vmem:[#allocation2 + $0x68] sm:$0xf] %vm2649_vm4, %v16415_v52  ;;  %v2184_v25 = vadd.f32 %v20635_v62, %v2095_v47  ;;  %v2901_v22 = vsel %vm2809_vm7, %v2896_v0, %v2900_v58  ;;  %v20703_v18 = vsel %vm3969_vm9, %v3989_v4, %v3991_v15  ;;  %v2381_v11 = vpop.permute.xlu0 %2380 }
 0x1fd   : > { %v2470_v35 = vmul.f32 %v2376_v39, %v2224_v16  ;;  %v1647_v44 = vmax.f32 %v25808_v3, %v1567_v34  ;;  %v17500_v13 = vpop.f32.mrf.mxu0  ;;  %v17588_v43 = vpop.f32.mrf.mxu1  ;;  %v20700_v60 = vor.u32 %v3693_v6, %v3692_v57  ;;  %25809 = vst [vmem:[#allocation10_spill] sm:$0xff] %v20703_v18  ;;  %17635 = vmatprep.mubr.msk.bf16.mxu0 %vm2943_vm5, %v2901_v22  ;;  %v25810_v57 = vld [vmem:[#allocation20_spill] sm:$0xff]  ;;  %v25811_v6 = vld [vmem:[#allocation21_spill] sm:$0xff] }
 0x1fe   : > { %v2225_v8 = vmax.f32 %v2184_v25, 0.0  ;;  %v2904_v22 = vor.u32 %v2902_v53, %v2900_v58 }
 0x1ff   : > { %v16416_v41 = vpack.c.bf16 %v2470_v35, %v2470_v35  ;;  %v2096_v52 = vmax.f32 %v1647_v44, %v2016_v29  ;;  %v1572_v39 = vpop.f32.mrf.mxu0  ;;  %v2021_v16 = vpop.f32.mrf.mxu1  ;;  %v20710_v34 = vsel %vm3643_vm8, %v3690_v30, %v20700_v60  ;;  %v25812_v35 = vmax.f32 %v25810_v57, %v25811_v6 }
 0x200   : > { %v20706_v47 = vld [vmem:[#allocation2 + $0x60] sm:$0xff]   ;;  %v2471_v0 = vmul.f32 %v2381_v11, %v2225_v8  ;;  %v2386_v44 = vpop.permute.xlu1 %2385 }
 0x201   : > { %2677 = vst.msk [vmem:[#allocation2 + $0x6c] sm:$0xf] %vm2649_vm4, %v16416_v41  ;;  %v2185_v4 = vadd.f32 %v20635_v62, %v2096_v52  ;;  %v1648_v25 = vmax.f32 %v25812_v35, %v1572_v39  ;;  %v17503_v29 = vpop.f32.mrf.mxu0  ;;  %v17591_v38 = vpop.f32.mrf.mxu1  ;;  %17673 = vmatprep.mubr.msk.bf16.mxu1 %vm2943_vm5, %v20706_v47  ;;  %v25542_v14 = vshll.u32 %v20706_v47, 16  ;;  %v3383_v3 = vrot.slane %v20706_v47, 1  ;;  %v25813_v35 = vld [vmem:[#allocation22_spill] sm:$0xff] }
 0x202   : > { %v3993_v30 = vrot.slane %v20706_v47, 2  ;;  %v16417_v13 = vpack.c.bf16 %v2471_v0, %v2471_v0  ;;  %v25814_v29 = vld [vmem:[#allocation23_spill] sm:$0xff] }
 0x203   : > { %v2226_v8 = vmax.f32 %v2185_v4, 0.0  ;;  %v2097_v43 = vmax.f32 %v1648_v25, %v2021_v16  ;;  %v1575_v11 = vpop.f32.mrf.mxu0  ;;  %v2024_v41 = vpop.f32.mrf.mxu1  ;;  %v2908_v52 = vrot.slane %v25542_v14, 1  ;;  %v20725_v39 = vsel %vm3359_vm6, %v3381_v48, %v3383_v3 }
 0x204   : > { %2678 = vst.msk [vmem:[#allocation2 + $0x70] sm:$0xf] %vm2649_vm4, %v16417_v13  ;;  %v25815_v38 = vmax.f32 %v25813_v35, %v25814_v29  ;;  %v20734_v58 = vsel %vm3969_vm9, %v3991_v15, %v3993_v30  ;;  %v2391_v25 = vpop.permute.xlu0 %2390  ;;  %v25817_v35 = vld [vmem:[#allocation24_spill] sm:$0xff] }
 0x205   : > { %v2472_v57 = vmul.f32 %v2386_v44, %v2226_v8  ;;  %v2186_v6 = vadd.f32 %v20635_v62, %v2097_v43  ;;  %v17504_v4 = vpop.f32.mrf.mxu0  ;;  %v17592_v16 = vpop.f32.mrf.mxu1  ;;  %v2909_v53 = vsel %vm2809_vm7, %v2904_v22, %v2908_v52  ;;  %25816 = vst [vmem:[#allocation11_spill] sm:$0xff] %v20734_v58  ;;  %v25818_v22 = vld [vmem:[#allocation25_spill] sm:$0xff] }
 0x206   : > { %v1649_v0 = vmax.f32 %v25815_v38, %v1575_v11  ;;  %17636 = vmatmul.mubr.msk.bf16.gmra.mxu0 %vm2943_vm5, %v2909_v53  ;;  %v25819_v29 = vmax.f32 %v25817_v35, %v25818_v22  ;;  %v2396_v4 = vpop.permute.xlu1 %2395 }
 0x207   : > { %v16418_v14 = vpack.c.bf16 %v2472_v57, %v2472_v57  ;;  %v2227_v48 = vmax.f32 %v2186_v6, 0.0  ;;  %v1580_v44 = vpop.f32.mrf.mxu0  ;;  %v2029_v13 = vpop.f32.mrf.mxu1  ;;  %v25546_v57 = vshrl.u32 %v20706_v47, 16 }
 0x208   : > { %v2098_v40 = vmax.f32 %v1649_v0, %v2024_v41  ;;  %v20737_v8 = vld [vmem:[#allocation2 + $0x68] sm:$0xff]   ;;  %v1650_v15 = vmax.f32 %v25819_v29, %v1580_v44 }
 0x209   : > { %2679 = vst.msk [vmem:[#allocation2 + $0x74] sm:$0xf] %vm2649_vm4, %v16418_v14  ;;  %v2473_v43 = vmul.f32 %v2391_v25, %v2227_v48  ;;  %v17507_v38 = vpop.f32.mrf.mxu0  ;;  %17674 = vmatmul.mubr.msk.bf16.gmra.mxu1 %vm2943_vm5, %v20737_v8  ;;  %v17595_v41 = vpop.f32.mrf.mxu1  ;;  %v25545_v6 = vshll.u32 %v20737_v8, 16  ;;  %v3385_v0 = vrot.slane %v20737_v8, 1  ;;  %v3995_v14 = vrot.slane %v20737_v8, 2 }
 0x20a   : > { %v2187_v11 = vadd.f32 %v20635_v62, %v2098_v40  ;;  %v2099_v53 = vmax.f32 %v1650_v15, %v2029_v13  ;;  %v2912_v44 = vor.u32 %v25546_v57, %v2908_v52  ;;  %v25820_v41 = vld [vmem:[#allocation26_spill] sm:$0xff] }
 0x20b   : > { %v16419_v16 = vpack.c.bf16 %v2473_v43, %v2473_v43  ;;  %v1583_v25 = vpop.f32.mrf.mxu0  ;;  %v2032_v48 = vpop.f32.mrf.mxu1  ;;  %v2916_v35 = vrot.slane %v25545_v6, 1  ;;  %v20755_v22 = vsel %vm3359_vm6, %v3383_v3, %v3385_v0  ;;  %v25821_v43 = vld [vmem:[#allocation27_spill] sm:$0xff]  ;;  %v20764_v52 = vsel %vm3969_vm9, %v3993_v30, %v3995_v14 }
 0x20c   : > { %v2228_v40 = vmax.f32 %v2187_v11, 0.0  ;;  %v2188_v38 = vadd.f32 %v20635_v62, %v2099_v53  ;;  %v25822_v11 = vmax.f32 %v25820_v41, %v25821_v43  ;;  %25823 = vst [vmem:[#allocation12_spill] sm:$0xff] %v20764_v52  ;;  %v2401_v6 = vpop.permute.xlu0 %2400  ;;  %v25547_v43 = vshrl.u32 %v20737_v8, 16 }
 0x20d   : > { %2680 = vst.msk [vmem:[#allocation2 + $0x78] sm:$0xf] %vm2649_vm4, %v16419_v16  ;;  %v17508_v15 = vpop.f32.mrf.mxu0  ;;  %v17596_v17 = vpop.f32.mrf.mxu1  ;;  %v2917_v58 = vsel %vm2809_vm7, %v2912_v44, %v2916_v35  ;;  %v25825_v44 = vld [vmem:[#allocation29_spill] sm:$0xff] }
 0x20e   : > { %v2474_v29 = vmul.f32 %v2396_v4, %v2228_v40  ;;  %v1651_v13 = vmax.f32 %v25822_v11, %v1583_v25  ;;  %v2229_v3 = vmax.f32 %v2188_v38, 0.0  ;;  %17639 = vmatprep.mubr.msk.bf16.mxu0 %vm2943_vm5, %v2917_v58  ;;  %v25824_v25 = vld [vmem:[#allocation28_spill] sm:$0xff]  ;;  %v2406_v11 = vpop.permute.xlu1 %2405  ;;  %v2920_v15 = vor.u32 %v25547_v43, %v2916_v35 }
 0x20f   : > { %v1588_v4 = vpop.f32.mrf.mxu0  ;;  %v2037_v16 = vpop.f32.mrf.mxu1  ;;  %v25826_v41 = vmax.f32 %v25824_v25, %v25825_v44 }
 0x210   : > { %v16420_v57 = vpack.c.bf16 %v2474_v29, %v2474_v29  ;;  %v2100_v18 = vmax.f32 %v1651_v13, %v2032_v48  ;;  %v20767_v40 = vld [vmem:[#allocation2 + $0x70] sm:$0xff]   ;;  %v2475_v53 = vmul.f32 %v2401_v6, %v2229_v3 }
 0x211   : > { %v1652_v30 = vmax.f32 %v25826_v41, %v1588_v4  ;;  %v17511_v29 = vpop.f32.mrf.mxu0  ;;  %17677 = vmatprep.mubr.msk.bf16.mxu1 %vm2943_vm5, %v20767_v40  ;;  %v17599_v58 = vpop.f32.mrf.mxu1  ;;  %v25548_v48 = vshll.u32 %v20767_v40, 16  ;;  %v25552_v38 = vrot.slane %v20767_v40, 1 }
 0x212   : > { %2681 = vst.msk [vmem:[#allocation2 + $0x7c] sm:$0xf] %vm2649_vm4, %v16420_v57  ;;  %v2189_v17 = vadd.f32 %v20635_v62, %v2100_v18  ;;  %v16421_v57 = vpack.c.bf16 %v2475_v53, %v2475_v53 }
 0x213   : > { %v2101_v13 = vmax.f32 %v1652_v30, %v2037_v16  ;;  %v1591_v3 = vpop.f32.mrf.mxu0  ;;  %v2040_v4 = vpop.f32.mrf.mxu1  ;;  %v2924_v44 = vrot.slane %v25548_v48, 1  ;;  %v20787_v41 = vsel %vm3359_vm6, %v3385_v0, %v25552_v38  ;;  %v25828_v30 = vld [vmem:[#allocation31_spill] sm:$0xff]  ;;  %v25830_v0 = vrot.slane %v20767_v40, 2 }
 0x214   : > { %v2230_v6 = vmax.f32 %v2189_v17, 0.0  ;;  %v2722_v25 = vld [vmem:[#allocation2 + $0x78] sm:$0xf]  ;;  %2682 = vst.msk [vmem:[#allocation2 + $0x80] sm:$0xf] %vm2649_vm4, %v16421_v57  ;;  %v2411_v48 = vpop.permute.xlu0 %2410 }
 0x215   : > { %v2190_v16 = vadd.f32 %v20635_v62, %v2101_v13  ;;  %v25827_v17 = vld [vmem:[#allocation30_spill] sm:$0xff]  ;;  %v15348_v58 = vcombine.low %v2722_v25, %v2722_v25  ;;  %v17512_v43 = vpop.f32.mrf.mxu0  ;;  %v17600_v18 = vpop.f32.mrf.mxu1  ;;  %v2925_v52 = vsel %vm2809_vm7, %v2920_v15, %v2924_v44  ;;  %v25831_v15 = vld [vmem:[#allocation32_spill] sm:$0xff] }
 0x216   : > { %v2476_v53 = vmul.f32 %v2406_v11, %v2230_v6  ;;  %v25829_v29 = vmax.f32 %v25827_v17, %v25828_v30  ;;  %17640 = vmatmul.mubr.msk.bf16.gmra.mxu0 %vm2943_vm5, %v2925_v52  ;;  %v20800_v11 = vsel %vm3969_vm9, %v3995_v14, %v25830_v0  ;;  %v2926_v30 = vshrl.u32 %v20767_v40, 16 }
 0x217   : > { %v2231_v55 = vmax.f32 %v2190_v16, 0.0  ;;  %17678 = vmatmul.mubr.msk.bf16.gmra.mxu1 %vm2943_vm5, %v15348_v58  ;;  %v1596_v57 = vpop.f32.mrf.mxu0  ;;  %v2045_v43 = vpop.f32.mrf.mxu1 }
 0x218   : > { %v1653_v35 = vmax.f32 %v25829_v29, %v1591_v3  ;;  %v16422_v27 = vpack.c.bf16 %v2476_v53, %v2476_v53  ;;  %17717 = vmatprep.mubr.msk.bf16.mxu1 %vm2943_vm5, %v20382_v10  ;;  %v25832_v3 = vld [vmem:[#allocation33_spill] sm:$0xff]  ;;  %v2416_v29 = vpop.permute.xlu1 %2415 }
 0x219   : > { %v2725_v6 = vld [vmem:[#allocation2 + $0x7c] sm:$0x1]  ;;  %v2477_v13 = vmul.f32 %v2411_v48, %v2231_v55  ;;  %v17515_v14 = vpop.f32.mrf.mxu0  ;;  %v17603_v17 = vpop.f32.mrf.mxu1 }
 0x21a   : > { %v2102_v56 = vmax.f32 %v1653_v35, %v2040_v4  ;;  %2683 = vst.msk [vmem:[#allocation2 + $0x84] sm:$0xf] %vm2649_vm4, %v16422_v27  ;;  %v25833_v4 = vmax.f32 %v25831_v15, %v25832_v3  ;;  %v20809_v53 = vcombine.low %v2722_v25, %v2725_v6  ;;  %v3636_v16 = vld [vmem:[#allocation2 + $0x7c] sm:$0x3]  ;;  %v25836_v3 = vld [vmem:[#allocation35_spill] sm:$0xff] }
 0x21b   : > { %v16423_v10 = vpack.c.bf16 %v2477_v13, %v2477_v13  ;;  %v1599_v55 = vpop.f32.mrf.mxu0  ;;  %v2048_v48 = vpop.f32.mrf.mxu1  ;;  %v20815_v0 = vcombine.low %v2722_v25, %v3636_v16  ;;  %v25835_v15 = vld [vmem:[#allocation34_spill] sm:$0xff] }
 0x21c   : > { %v2191_v18 = vadd.f32 %v20635_v62, %v2102_v56  ;;  %v1654_v52 = vmax.f32 %v25833_v4, %v1596_v57  ;;  %v2930_v27 = vshll.u32 %v20809_v53, 16  ;;  %v2928_v56 = vor.u32 %v2926_v30, %v2924_v44  ;;  %v20826_v44 = vld [vmem:[%s25499_s4 + $0x38] sm:$0xff]   ;;  %v2421_v25 = vpop.permute.xlu0 %2420 }
 0x21d   : > { %25834 = vst [vmem:[#allocation13_spill] sm:$0xff] %v20815_v0  ;;  %2684 = vst.msk [vmem:[#allocation2 + $0x88] sm:$0xf] %vm2649_vm4, %v16423_v10  ;;  %v25837_v4 = vmax.f32 %v25835_v15, %v25836_v3  ;;  %v2934_v14 = vshrl.u32 %v20809_v53, 16  ;;  %v25839_v15 = vld [vmem:[#allocation37_spill] sm:$0xff] }
 0x21e   : > { %v2232_v35 = vmax.f32 %v2191_v18, 0.0  ;;  %v2103_v58 = vmax.f32 %v1654_v52, %v2045_v43  ;;  %v2932_v18 = vrot.slane %v2930_v27, 1  ;;  %v17516_v43 = vpop.f32.mrf.mxu0  ;;  %v17604_v52 = vpop.f32.mrf.mxu1 }
 0x21f   : > { %v1655_v13 = vmax.f32 %v25837_v4, %v1599_v55  ;;  %17718 = vmatmul.mubr.msk.bf16.vlgmr.msra.gmra.mxu1 %vm2943_vm5, %v20414_v45  ;;  %v25551_v55 = vrot.slane %v20815_v0, 2 }
 0x220   : > { %v2478_v57 = vmul.f32 %v2416_v29, %v2232_v35  ;;  %v2192_v6 = vadd.f32 %v20635_v62, %v2103_v58  ;;  %v2933_v10 = vsel %vm2809_vm7, %v2928_v56, %v2932_v18  ;;  %v1604_v35 = vpop.f32.mrf.mxu0  ;;  %v2936_v58 = vor.u32 %v2934_v14, %v2932_v18  ;;  %17721 = vmatprep.mubr.msk.bf16.mxu1 %vm2943_vm5, %v20443_v5  ;;  %v2053_v27 = vpop.f32.mrf.mxu1 }
 0x221   : > { %v2104_v29 = vmax.f32 %v1655_v13, %v2048_v48  ;;  %17643 = vmatprep.mubr.msk.bf16.mxu0 %vm2943_vm5, %v2933_v10  ;;  %17784 = vmatpush3.bf16.msra.mxu1 %v20555_v21  ;;  %v25841_v5 = vrot.slane %v20767_v40, 2  ;;  %v2426_v18 = vpop.permute.xlu1 %2425  ;;  %v25843_v10 = vld [vmem:[#allocation39_spill] sm:$0xff] }
 0x222   : > { %v16424_v16 = vpack.c.bf16 %v2478_v57, %v2478_v57  ;;  %v2233_v17 = vmax.f32 %v2192_v6, 0.0  ;;  %v25838_v6 = vld [vmem:[#allocation36_spill] sm:$0xff]  ;;  %17644 = vmatmul.mubr.msk.bf16.gmra.mxu0 %vm2943_vm5, %v2936_v58  ;;  %v17519_v56 = vpop.f32.mrf.mxu0  ;;  %v17607_v4 = vpop.f32.mrf.mxu1  ;;  %17851 = vmatprep.subr.bf16.mxu1 %v20826_v44 }
 0x223   : > { %v2193_v48 = vadd.f32 %v20635_v62, %v2104_v29  ;;  %v25840_v45 = vmax.f32 %v25838_v6, %v25839_v15  ;;  %v20847_v13 = vsel %vm3969_vm9, %v25841_v5, %v25551_v55  ;;  %17683 = vmatprep.mubr.msk.bf16.mxu0 %vm2943_vm5, %v20365_v26  ;;  %v25842_v29 = vld [vmem:[#allocation38_spill] sm:$0xff]  ;;  %v20864_v56 = vld [vmem:[%s25499_s4 + $0x30] sm:$0xff]  }
 0x224   : > { %2685 = vst.msk [vmem:[#allocation2 + $0x8c] sm:$0xf] %vm2649_vm4, %v16424_v16  ;;  %v2479_v57 = vmul.f32 %v2421_v25, %v2233_v17  ;;  %v1607_v21 = vpop.f32.mrf.mxu0  ;;  %v2056_v25 = vpop.f32.mrf.mxu1 }
 0x225   : > { %v1656_v3 = vmax.f32 %v25840_v45, %v1604_v35  ;;  %v2234_v52 = vmax.f32 %v2193_v48, 0.0  ;;  %v25844_v35 = vmax.f32 %v25842_v29, %v25843_v10  ;;  %v2431_v45 = vpop.permute.xlu0 %2430  ;;  %v19340_v29 = vld [vmem:[%s25499_s4 + $0x20] sm:$0xff]  }
 0x226   : > { %v16425_v43 = vpack.c.bf16 %v2479_v57, %v2479_v57  ;;  %v17520_v6 = vpop.f32.mrf.mxu0  ;;  %v17608_v15 = vpop.f32.mrf.mxu1 }
 0x227   : > { %v2105_v14 = vmax.f32 %v1656_v3, %v2053_v27  ;;  %v2480_v16 = vmul.f32 %v2426_v18, %v2234_v52  ;;  %v1657_v58 = vmax.f32 %v25844_v35, %v1607_v21  ;;  %17722 = vmatmul.mubr.msk.bf16.gmra.mxu1 %vm2943_vm5, %v20477_v19  ;;  %v25845_v18 = vld [vmem:[#allocation40_spill] sm:$0xff]  ;;  %v2436_v21 = vpop.permute.xlu1 %2435 }
 0x228   : > { %2686 = vst.msk [vmem:[#allocation2 + $0x90] sm:$0xf] %vm2649_vm4, %v16425_v43  ;;  %v1612_v26 = vpop.f32.mrf.mxu0  ;;  %17725 = vmatprep.mubr.msk.bf16.mxu1 %vm2943_vm5, %v20508_v9  ;;  %v2061_v3 = vpop.f32.mrf.mxu1  ;;  %v25846_v43 = vld [vmem:[#allocation41_spill] sm:$0xff] }
 0x229   : > { %v2194_v17 = vadd.f32 %v20635_v62, %v2105_v14  ;;  %v16426_v57 = vpack.c.bf16 %v2480_v16, %v2480_v16  ;;  %v2106_v27 = vmax.f32 %v1657_v58, %v2056_v25  ;;  %v25847_v52 = vmax.f32 %v25845_v18, %v25846_v43  ;;  %v20900_v43 = vld [vmem:[#allocation2 + $0x18] sm:$0xff]  }
 0x22a   : > { %17684 = vmatmul.mubr.msk.bf16.vlgmr.msra.gmra.mxu0 %vm2943_vm5, %v20396_v49  ;;  %v17611_v19 = vpop.f32.mrf.mxu1  ;;  %v17523_v9 = vpop.f32.mrf.mxu0 }
 0x22b   : > { %v2235_v48 = vmax.f32 %v2194_v17, 0.0  ;;  %2687 = vst.msk [vmem:[#allocation2 + $0x94] sm:$0xf] %vm2649_vm4, %v16426_v57  ;;  %v2195_v5 = vadd.f32 %v20635_v62, %v2106_v27  ;;  %v1658_v14 = vmax.f32 %v25847_v52, %v1612_v26  ;;  %17687 = vmatprep.mubr.msk.bf16.mxu0 %vm2943_vm5, %v20428_v7  ;;  %17750 = vmatpush3.bf16.msra.mxu0 %v19340_v29  ;;  %v20883_v7 = vld [vmem:[#allocation2 + $0x10] sm:$0xff]   ;;  %v20889_v26 = vld [vmem:[#allocation2 + $0x78] sm:$0xff]   ;;  %v20902_v52 = vld [vmem:[#allocation2 + $0x20] sm:$0xff]  }
 0x22c   : > { %v2064_v10 = vpop.f32.mrf.mxu1  ;;  %v1615_v35 = vpop.f32.mrf.mxu0  ;;  %17817 = vmatprep.subr.bf16.mxu0 %v20864_v56  ;;  %v20887_v27 = vld [vmem:[#allocation2 + $0x70] sm:$0xff]  }
 0x22d   : > { %v2481_v4 = vmul.f32 %v2431_v45, %v2235_v48  ;;  %v2236_v16 = vmax.f32 %v2195_v5, 0.0  ;;  %v2107_v17 = vmax.f32 %v1658_v14, %v2061_v3  ;;  %v2441_v48 = vpop.permute.xlu0 %2440  ;;  %25848 = vst [vmem:[#allocation14_spill] sm:$0xff] %v20887_v27  ;;  %v4637_v3 = vld [vmem:[#allocation2 + $0x84] sm:$0x3]  ;;  %v20904_v14 = vld [vmem:[#allocation2 + $0x80] sm:$0xf] }
 0x22e   : > { %v17612_v6 = vpop.f32.mrf.mxu1  ;;  %v17524_v15 = vpop.f32.mrf.mxu0  ;;  %v25550_v19 = vrot.slane %v20887_v27, 2  ;;  %v20909_v9 = vcombine.low %v20904_v14, %v4637_v3  ;;  %v25854_v10 = vshll.u32 %v20737_v8, 16 }
 0x22f   : > { %v16427_v25 = vpack.c.bf16 %v2481_v4, %v2481_v4  ;;  %v2482_v49 = vmul.f32 %v2436_v21, %v2236_v16  ;;  %v2196_v58 = vadd.f32 %v20635_v62, %v2107_v17  ;;  %17726 = vmatmul.mubr.msk.bf16.gmra.mxu1 %vm2943_vm5, %v20539_v33  ;;  %v25849_v33 = vshrl.u32 %v20706_v47, 16 }
 0x230   : > { %17729 = vmatprep.mubr.msk.bf16.mxu1 %vm2943_vm5, %v20582_v59  ;;  %v25850_v59 = vshll.u32 %v20706_v47, 16  ;;  %25851 = vst [vmem:[#allocation15_spill] sm:$0xff] %v20909_v9  ;;  %v25559_v21 = vshrl.u32 %v20883_v7, 16  ;;  %v25549_v47 = vrot.slane %v20909_v9, 2  ;;  %v25553_v16 = vshll.u32 %v20887_v27, 16 }
 0x231   : > { %2688 = vst.msk [vmem:[#allocation2 + $0x98] sm:$0xf] %vm2649_vm4, %v16427_v25  ;;  %v16428_v45 = vpack.c.bf16 %v2482_v49, %v2482_v49  ;;  %v2237_v57 = vmax.f32 %v2196_v58, 0.0  ;;  %v3696_v4 = vrot.slane %v25849_v33, 1  ;;  %v25555_v25 = vshrl.u32 %v20887_v27, 16 }
 0x232   : > { %17688 = vmatmul.mubr.msk.bf16.gmra.mxu0 %vm2943_vm5, %v20457_v51  ;;  %v3697_v18 = vrot.slane %v25850_v59, 2  ;;  %v5066_v51 = vrot.slane %v20889_v26, 2  ;;  %v25853_v17 = vshrl.u32 %v20737_v8, 16  ;;  %v3701_v35 = vrot.slane %v25854_v10, 2  ;;  %v20961_v10 = vld [vmem:[#allocation2 + $0x30] sm:$0xff]  }
 0x233   : > { %2689 = vst.msk [vmem:[#allocation2 + $0x9c] sm:$0xf] %vm2649_vm4, %v16428_v45  ;;  %v2483_v62 = vmul.f32 %v2441_v48, %v2237_v57  ;;  %17691 = vmatprep.mubr.msk.bf16.mxu0 %vm2943_vm5, %v20491_v23  ;;  %v25558_v49 = vshll.u32 %v20883_v7, 16  ;;  %v25557_v58 = vshrl.u32 %v20900_v43, 16  ;;  %v25556_v15 = vshll.u32 %v20900_v43, 16  ;;  %v20939_v48 = vld [vmem:[#allocation2 + $0x28] sm:$0xff]  }
 0x234   : > { %v20915_v23 = vsel %vm3969_vm9, %v25550_v19, %v5066_v51  ;;  %v3700_v29 = vrot.slane %v25853_v17, 1  ;;  %v3698_v6 = vor.u32 %v3697_v18, %v3696_v4  ;;  %v25560_v45 = vshrl.u32 %v20902_v52, 16 }
 0x235   : > { %v16429_v5 = vpack.c.bf16 %v2483_v62, %v2483_v62  ;;  %25852 = vst [vmem:[#allocation16_spill] sm:$0xff] %v20915_v23  ;;  %v3709_v8 = vshrl.u32 %v20815_v0, 16  ;;  %v3712_v57 = vshll.u32 %v20815_v0, 16  ;;  %v4763_v62 = vrot.slane %v25555_v25, 1 }
 0x236   : > { %v4766_v3 = vrot.slane %v25553_v16, 2  ;;  %v25561_v33 = vshll.u32 %v20889_v26, 16  ;;  %v4779_v4 = vshrl.u32 %v20909_v9, 16  ;;  %v3704_v59 = vrot.slane %v2926_v30, 1 }
 0x237   : > { %2691 = vst.msk [vmem:[#allocation2 + $0xa0] sm:$0x3] %vm2690_vm10, %v16429_v5  ;;  %17730 = vmatmul.mubr.msk.bf16.gmra.mxu1 %vm2943_vm5, %v20615_v42  ;;  %v20935_v42 = vsel %vm3969_vm9, %v5066_v51, %v25549_v47  ;;  %v4782_v5 = vshll.u32 %v20909_v9, 16  ;;  %v20955_v18 = vor.u32 %v3701_v35, %v3700_v29  ;;  %v25856_v51 = vshll.u32 %v20767_v40, 16 }
 0x238   : > { %17733 = vmatprep.mubr.msk.bf16.mxu1 %vm2943_vm5, %v20649_v32  ;;  %25855 = vst [vmem:[#allocation17_spill] sm:$0xff] %v20935_v42  ;;  %v25554_v32 = vshrl.u32 %v20889_v26, 16  ;;  %v4775_v19 = vrot.slane %v25561_v33, 2  ;;  %v4781_v55 = vrot.slane %v4779_v4, 1  ;;  %v3711_v29 = vrot.slane %v3709_v8, 1  ;;  %v21032_v33 = vld [vmem:[#allocation2 + $0x60] sm:$0xff]  }
 0x239   : > { %v4784_v30 = vrot.slane %v4782_v5, 2  ;;  %v3714_v35 = vrot.slane %v3712_v57, 2  ;;  %v25564_v38 = vshrl.u32 %v20939_v48, 16  ;;  %v20971_v16 = vor.u32 %v4766_v3, %v4763_v62  ;;  %v20983_v57 = vld [vmem:[#allocation2 + $0x40] sm:$0xff]   ;;  %v21002_v5 = vld [vmem:[#allocation2 + $0x48] sm:$0xff]   ;;  %25864 = vst [vmem:[#allocation24_spill] sm:$0xff] %v21032_v33 }
 0x23a   : > { %17692 = vmatmul.mubr.msk.bf16.gmra.mxu0 %vm2943_vm5, %v20522_v61  ;;  %v3705_v61 = vrot.slane %v25856_v51, 2  ;;  %v4772_v17 = vrot.slane %v25554_v32, 1  ;;  %v20969_v51 = vld [vmem:[#allocation2 + $0x38] sm:$0xff]   ;;  %v5331_v47 = vrot.slane %v25559_v21, 2  ;;  %v25562_v4 = vshll.u32 %v20939_v48, 16 }
 0x23b   : > { %17695 = vmatprep.mubr.msk.bf16.mxu0 %vm2943_vm5, %v20560_v50  ;;  %v3699_v50 = vsel %vm3643_vm8, %v20700_v60, %v3698_v6  ;;  %25857 = vst [vmem:[#allocation18_spill] sm:$0xff] %v20971_v16  ;;  %v20973_v25 = vor.u32 %v4784_v30, %v4781_v55  ;;  %v3703_v60 = vsel %vm3643_vm8, %v3698_v6, %v20955_v18  ;;  %v25563_v55 = vshrl.u32 %v20961_v10, 16 }
 0x23c   : > { %v4776_v32 = vor.u32 %v4775_v19, %v4772_v17  ;;  %v20981_v8 = vor.u32 %v3705_v61, %v3704_v59  ;;  %v5332_v19 = vrot.slane %v25558_v49, 3  ;;  %v25565_v62 = vshll.u32 %v20961_v10, 16  ;;  %v21012_v17 = vld [vmem:[#allocation2 + $0x50] sm:$0xff]   ;;  %v21026_v49 = vld [vmem:[#allocation2 + $0x58] sm:$0xff]  }
 0x23d   : > { %25858 = vst [vmem:[#allocation19_spill] sm:$0xff] %v20973_v25  ;;  %v21000_v3 = vor.u32 %v3714_v35, %v3711_v29  ;;  %v5336_v61 = vrot.slane %v25556_v15, 3  ;;  %v25567_v30 = vshll.u32 %v20969_v51, 16  ;;  %v5339_v29 = vrot.slane %v25560_v45, 2  ;;  %25863 = vst [vmem:[#allocation23_spill] sm:$0xff] %v21026_v49 }
 0x23e   : > { %v20998_v6 = vsel %vm3643_vm8, %v4776_v32, %v20973_v25  ;;  %v21004_v59 = vor.u32 %v5332_v19, %v5331_v47  ;;  %v25862_v47 = vshll.u32 %v20902_v52, 16  ;;  %v25566_v19 = vshrl.u32 %v20983_v57, 16 }
 0x23f   : > { %17734 = vmatmul.mubr.msk.bf16.gmra.mxu1 %vm2943_vm5, %v20678_v37  ;;  %v20994_v37 = vsel %vm3643_vm8, %v20971_v16, %v4776_v32  ;;  %25860 = vst [vmem:[#allocation21_spill] sm:$0xff] %v20998_v6  ;;  %v25568_v32 = vshrl.u32 %v20969_v51, 16  ;;  %v5344_v45 = vrot.slane %v25562_v4, 3  ;;  %v21324_v16 = vld [vmem:[#allocation2 + $0x68] sm:$0xf] }
 0x240   : > { %17737 = vmatprep.mubr.msk.bf16.mxu1 %vm2943_vm5, %v20710_v34  ;;  %25859 = vst [vmem:[#allocation20_spill] sm:$0xff] %v20994_v37  ;;  %25861 = vst [vmem:[#allocation22_spill] sm:$0xff] %v21004_v59  ;;  %v5335_v34 = vrot.slane %v25557_v58, 2  ;;  %v5340_v35 = vrot.slane %v25862_v47, 3  ;;  %v5343_v58 = vrot.slane %v25564_v38, 2  ;;  %v5347_v47 = vrot.slane %v25563_v55, 2 }
 0x241   : > { %v5351_v15 = vrot.slane %v25568_v32, 2  ;;  %v4246_v32 = vld [vmem:[#allocation2 + $0x8] sm:$0xe]  ;;  %v5935_v37 = vld [vmem:[#allocation2 + $0x38] sm:$0xf]  ;;  %25922 = vst [vmem:[#allocation61_spill] sm:$0xff] %v21324_v16 }
 0x242   : > { %17696 = vmatmul.mubr.msk.bf16.gmra.mxu0 %vm2943_vm5, %v20598_v24  ;;  %v5337_v24 = vor.u32 %v5336_v61, %v5335_v34  ;;  %v5341_v21 = vor.u32 %v5340_v35, %v5339_v29  ;;  %v5348_v61 = vrot.slane %v25565_v62, 3  ;;  %v5345_v55 = vor.u32 %v5344_v45, %v5343_v58  ;;  %v21055_v29 = vld [vmem:[#allocation2 + $0xc] sm:$0xf] }
 0x243   : > { %17699 = vmatprep.mubr.msk.bf16.mxu0 %vm2943_vm5, %v20629_v1  ;;  %v5352_v1 = vrot.slane %v25567_v30, 3  ;;  %v5355_v62 = vrot.slane %v25566_v19, 2  ;;  %v21057_v35 = vld [vmem:[#allocation2 + $0x68] sm:$0xff]   ;;  %v25871_v45 = vshrl.u32 %v21002_v5, 16 }
 0x244   : > { %v21038_v34 = vsel %vm5322_vm11, %v21004_v59, %v5337_v24  ;;  %v21045_v4 = vsel %vm5322_vm11, %v5337_v24, %v5341_v21  ;;  %v5349_v38 = vor.u32 %v5348_v61, %v5347_v47  ;;  %25867 = vst [vmem:[#allocation27_spill] sm:$0xff] %v21057_v35  ;;  %v25869_v24 = vshll.u32 %v20983_v57, 16 }
 0x245   : > { %25865 = vst [vmem:[#allocation25_spill] sm:$0xff] %v21038_v34  ;;  %25866 = vst [vmem:[#allocation26_spill] sm:$0xff] %v21045_v4  ;;  %v5353_v30 = vor.u32 %v5352_v1, %v5351_v15  ;;  %v3707_v15 = vsel %vm3643_vm8, %v20955_v18, %v20981_v8  ;;  %v25877_v18 = vshrl.u32 %v21026_v49, 16 }
 0x246   : > { %v5356_v47 = vrot.slane %v25869_v24, 3  ;;  %v25873_v24 = vshrl.u32 %v21012_v17, 16 }
 0x247   : > { %17738 = vmatmul.mubr.msk.bf16.gmra.mxu1 %vm2943_vm5, %v3699_v50  ;;  %v21062_v50 = vsel %vm5322_vm11, %v5341_v21, %v5345_v55  ;;  %v5359_v21 = vrot.slane %v25871_v45, 2  ;;  %v25569_v45 = vshrl.u32 %v21057_v35, 16 }
 0x248   : > { %17741 = vmatprep.mubr.msk.bf16.mxu1 %vm2943_vm5, %v3703_v60  ;;  %25868 = vst [vmem:[#allocation28_spill] sm:$0xff] %v21062_v50  ;;  %v21069_v60 = vsel %vm5322_vm11, %v5345_v55, %v5349_v38  ;;  %v5357_v58 = vor.u32 %v5356_v47, %v5355_v62  ;;  %v25872_v50 = vshll.u32 %v21002_v5, 16  ;;  %v5363_v61 = vrot.slane %v25873_v24, 2  ;;  %v5315_v24 = vld [vmem:[#allocation2 + $0x84] sm:$0x7] }
 0x249   : > { %25870 = vst [vmem:[#allocation29_spill] sm:$0xff] %v21069_v60  ;;  %v21088_v55 = vsel %vm5322_vm11, %v5349_v38, %v5353_v30  ;;  %v25875_v62 = vshll.u32 %v21012_v17, 16  ;;  %v25878_v60 = vshll.u32 %v21026_v49, 16 }
 0x24a   : > { %17700 = vmatmul.mubr.msk.bf16.gmra.mxu0 %vm2943_vm5, %v20663_v20  ;;  %v5360_v4 = vrot.slane %v25872_v50, 3  ;;  %v21085_v20 = vcombine.low %v4246_v32, %v21055_v29  ;;  %25874 = vst [vmem:[#allocation30_spill] sm:$0xff] %v21088_v55  ;;  %v21095_v47 = vsel %vm5322_vm11, %v5353_v30, %v5357_v58  ;;  %v5367_v32 = vrot.slane %v25877_v18, 2 }
 0x24b   : > { %17703 = vmatprep.mubr.msk.bf16.mxu0 %vm2943_vm5, %v20692_v36  ;;  %v5364_v1 = vrot.slane %v25875_v62, 3  ;;  %25876 = vst [vmem:[#allocation31_spill] sm:$0xff] %v21095_v47  ;;  %v5368_v38 = vrot.slane %v25878_v60, 3  ;;  %v25879_v55 = vshrl.u32 %v21032_v33, 16  ;;  %v3716_v62 = vsel %vm3643_vm8, %v20981_v8, %v21000_v3  ;;  %v5942_v47 = vld [vmem:[#allocation2 + $0x54] sm:$0xf] }
 0x24c   : > { %v5361_v36 = vor.u32 %v5360_v4, %v5359_v21  ;;  %v25881_v30 = vshll.u32 %v21032_v33, 16  ;;  %v25884_v18 = vshll.u32 %v21057_v35, 16 }
 0x24d   : > { %v5365_v19 = vor.u32 %v5364_v1, %v5363_v61  ;;  %v5371_v34 = vrot.slane %v25879_v55, 2  ;;  %v5369_v60 = vor.u32 %v5368_v38, %v5367_v32  ;;  %v5676_v55 = vrot.slane %v20889_v26, 3 }
 0x24e   : > { %v21107_v50 = vsel %vm5322_vm11, %v5357_v58, %v5361_v36  ;;  %v5372_v61 = vrot.slane %v25881_v30, 3  ;;  %v21118_v1 = vcombine.low %v20904_v14, %v5315_v24  ;;  %v5375_v58 = vrot.slane %v25569_v45, 2 }
 0x24f   : > { %25880 = vst [vmem:[#allocation32_spill] sm:$0xff] %v21107_v50  ;;  %17742 = vmatmul.mubr.msk.bf16.gmra.mxu1 %vm2943_vm5, %v3707_v15  ;;  %v21114_v21 = vsel %vm5322_vm11, %v5361_v36, %v5365_v19  ;;  %v5376_v30 = vrot.slane %v25884_v18, 3  ;;  %v25885_v15 = vshrl.u32 %v20887_v27, 16  ;;  %v21128_v36 = vsel %vm5322_vm11, %v5365_v19, %v5369_v60 }
 0x250   : > { %25882 = vst [vmem:[#allocation33_spill] sm:$0xff] %v21114_v21  ;;  %25883 = vst [vmem:[#allocation34_spill] sm:$0xff] %v21118_v1  ;;  %17745 = vmatprep.mubr.msk.bf16.mxu1 %vm2943_vm5, %v3716_v62  ;;  %v5373_v8 = vor.u32 %v5372_v61, %v5371_v34  ;;  %v25887_v32 = vrot.slane %v20887_v27, 3  ;;  %v25570_v38 = vrot.slane %v21118_v1, 3  ;;  %v25889_v34 = vshll.u32 %v20887_v27, 16 }
 0x251   : > { %v5379_v4 = vrot.slane %v25885_v15, 2  ;;  %25886 = vst [vmem:[#allocation35_spill] sm:$0xff] %v21128_v36  ;;  %v5377_v18 = vor.u32 %v5376_v30, %v5375_v58  ;;  %v4362_v19 = vrot.slane %v20883_v7, 1  ;;  %v5938_v36 = vld [vmem:[#allocation2 + $0x44] sm:$0xf] }
 0x252   : > { %v21133_v24 = vsel %vm555_vm1, %v25887_v32, %v5676_v55  ;;  %v5380_v62 = vrot.slane %v25889_v34, 3  ;;  %17704 = vmatmul.mubr.msk.bf16.gmra.mxu0 %vm2943_vm5, %v20725_v39  ;;  %v21141_v61 = vsel %vm5322_vm11, %v5369_v60, %v5373_v8  ;;  %v21149_v15 = vsel %vm555_vm1, %v5676_v55, %v25570_v38 }
 0x253   : > { %25888 = vst [vmem:[#allocation36_spill] sm:$0xff] %v21133_v24  ;;  %25890 = vst [vmem:[#allocation37_spill] sm:$0xff] %v21141_v61  ;;  %17707 = vmatprep.mubr.msk.bf16.mxu0 %vm2943_vm5, %v20755_v22  ;;  %v21152_v34 = vsel %vm5322_vm11, %v5373_v8, %v5377_v18  ;;  %v25893_v39 = vshrl.u32 %v20889_v26, 16  ;;  %v4361_v60 = vrot.slane %v21085_v20, 1  ;;  %v25895_v22 = vshll.u32 %v20889_v26, 16 }
 0x254   : > { %25891 = vst [vmem:[#allocation38_spill] sm:$0xff] %v21149_v15  ;;  %v5381_v32 = vor.u32 %v5380_v62, %v5379_v4  ;;  %25892 = vst [vmem:[#allocation39_spill] sm:$0xff] %v21152_v34  ;;  %v3389_v24 = vrot.slane %v20809_v53, 1  ;;  %v5388_v55 = vshrl.u32 %v21118_v1, 16  ;;  %v5391_v4 = vshll.u32 %v21118_v1, 16 }
 0x255   : > { %v5383_v45 = vrot.slane %v25893_v39, 2  ;;  %v5384_v30 = vrot.slane %v25895_v22, 3  ;;  %v4363_v8 = vsel %vm3359_vm6, %v4361_v60, %v4362_v19  ;;  %v25897_v53 = vrot.slane %v20767_v40, 1  ;;  %v5931_v15 = vld [vmem:[#allocation2 + $0x28] sm:$0xf] }
 0x256   : > { %v21158_v58 = vsel %vm5322_vm11, %v5377_v18, %v5381_v32  ;;  %v5390_v39 = vrot.slane %v5388_v55, 2  ;;  %v5393_v18 = vrot.slane %v5391_v4, 3  ;;  %v4364_v1 = vrot.slane %v20900_v43, 1 }
 0x257   : > { %25894 = vst [vmem:[#allocation40_spill] sm:$0xff] %v21158_v58  ;;  %17746 = vmatmul.mubr.msk.bf16.gmra.mxu1 %vm2943_vm5, %v21000_v3  ;;  %v5385_v62 = vor.u32 %v5384_v30, %v5383_v45  ;;  %v3390_v22 = vsel %vm3359_vm6, %v25897_v53, %v3389_v24  ;;  %v4366_v45 = vrot.slane %v20902_v52, 1  ;;  %v5032_v30 = vld [vmem:[#allocation2 + $0x8] sm:$0xc]  ;;  %v4368_v55 = vrot.slane %v20939_v48, 1 }
 0x258   : > { %17785 = vmatprep.mubr.msk.bf16.mxu1 %vm2943_vm5, %v4363_v8  ;;  %v21178_v3 = vor.u32 %v5393_v18, %v5390_v39  ;;  %v4365_v40 = vsel %vm3359_vm6, %v4362_v19, %v4364_v1  ;;  %v21200_v4 = vcombine.low %v5032_v30, %v21055_v29  ;;  %v4370_v19 = vrot.slane %v20961_v10, 1  ;;  %v19342_v58 = vld [vmem:[#allocation2 + $0x20] sm:$0xf] }
 0x259   : > { %v21170_v38 = vsel %vm5322_vm11, %v5381_v32, %v5385_v62  ;;  %v4367_v32 = vsel %vm3359_vm6, %v4364_v1, %v4366_v45  ;;  %v4645_v1 = vshrl.u32 %v21085_v20, 16  ;;  %v5040_v8 = vrot.slane %v20883_v7, 2 }
 0x25a   : > { %25896 = vst [vmem:[#allocation41_spill] sm:$0xff] %v21170_v38  ;;  %17708 = vmatmul.mubr.msk.bf16.gmra.mxu0 %vm2943_vm5, %v20787_v41  ;;  %25898 = vst [vmem:[#allocation44_spill] sm:$0xff] %v21178_v3  ;;  %v21184_v60 = vsel %vm5322_vm11, %v5385_v62, %v21178_v3  ;;  %v21189_v41 = vld [vmem:[%s25499_s4 + $0x48] sm:$0xff]   ;;  %v25573_v62 = vrot.slane %v20900_v43, 2  ;;  %v5039_v39 = vrot.slane %v21200_v4, 2  ;;  %v25902_v29 = vshrl.u32 %v20883_v7, 16 }
 0x25b   : > { %17711 = vmatprep.mubr.msk.bf16.mxu0 %vm2943_vm5, %v3390_v22  ;;  %25899 = vst [vmem:[#allocation45_spill] sm:$0xff] %v21184_v60  ;;  %25900 = vst [vmem:[#allocation46_spill] sm:$0xff] %v21189_v41  ;;  %v25903_v53 = vshll.u32 %v20883_v7, 16  ;;  %v4371_v22 = vsel %vm3359_vm6, %v4368_v55, %v4370_v19  ;;  %v21230_v7 = vld [vmem:[%s25499_s4 + $0x40] sm:$0xff]   ;;  %v19341_v60 = vld [vmem:[#allocation2 + $0x1c] sm:$0xf] }
 0x25c   : > { %25901 = vst [vmem:[#allocation47_spill] sm:$0xff] %v21200_v4  ;;  %v4655_v18 = vrot.slane %v25902_v29, 1  ;;  %v21223_v30 = vsel %vm3969_vm9, %v5039_v39, %v5040_v8  ;;  %25904 = vst [vmem:[#allocation48_spill] sm:$0xff] %v21230_v7  ;;  %v5927_v39 = vld [vmem:[#allocation2 + $0x18] sm:$0xf]  ;;  %v25911_v61 = vshrl.u32 %v20902_v52, 16 }
 0x25d   : > { %v21245_v38 = vcombine.low %v5927_v39, %v19341_v60  ;;  %v25909_v60 = vshll.u32 %v20900_v43, 16  ;;  %v5941_v4 = vld [vmem:[#allocation2 + $0x50] sm:$0xf] }
 0x25e   : > { %v21281_v25 = vrot.slane %v25911_v61, 1 }
 0x25f   : > { %17786 = vmatmul.mubr.msk.bf16.vlgmr.msra.gmra.mxu1 %vm2943_vm5, %v4365_v40  ;;  %v21217_v40 = vrot.slane %v4645_v1, 1  ;;  %v4378_v1 = vrot.slane %v21012_v17, 1  ;;  %25906 = vst [vmem:[#allocation50_spill] sm:$0xff] %v21245_v38  ;;  %v21260_v39 = vrot.slane %v25909_v60, 2 }
 0x260   : > { %17789 = vmatprep.mubr.msk.bf16.mxu1 %vm2943_vm5, %v4367_v32  ;;  %17852 = vmatpush3.bf16.msra.mxu1 %v20826_v44  ;;  %v4648_v44 = vshll.u32 %v21085_v20, 16  ;;  %v5930_v32 = vld [vmem:[#allocation2 + $0x24] sm:$0xf]  ;;  %v4372_v20 = vrot.slane %v20969_v51, 1 }
 0x261   : > { %17919 = vmatprep.subr.bf16.mxu1 %v21189_v41  ;;  %v21247_v34 = vcombine.low %v19342_v58, %v5930_v32  ;;  %v5934_v58 = vld [vmem:[#allocation2 + $0x34] sm:$0xf] }
 0x262   : > { %17712 = vmatmul.mubr.msk.bf16.gmra.mxu0 %vm2943_vm5, %v3389_v24  ;;  %v4369_v24 = vsel %vm3359_vm6, %v4366_v45, %v4368_v55  ;;  %v4374_v45 = vrot.slane %v20983_v57, 1  ;;  %v21225_v29 = vrot.slane %v4648_v44, 2  ;;  %v4376_v55 = vrot.slane %v21002_v5, 1 }
 0x263   : > { %17751 = vmatprep.mubr.msk.bf16.mxu0 %vm2943_vm5, %v20375_v54  ;;  %v4658_v54 = vrot.slane %v25903_v53, 2  ;;  %v4380_v44 = vrot.slane %v21026_v49, 1  ;;  %25907 = vst [vmem:[#allocation51_spill] sm:$0xff] %v21247_v34  ;;  %v4373_v32 = vsel %vm3359_vm6, %v4370_v19, %v4372_v20  ;;  %v5933_v19 = vld [vmem:[#allocation2 + $0x30] sm:$0xf] }
 0x264   : > { %v4375_v53 = vsel %vm3359_vm6, %v4372_v20, %v4374_v45  ;;  %v21271_v21 = vsel %vm3359_vm6, %v4376_v55, %v4378_v1  ;;  %v5940_v20 = vld [vmem:[#allocation2 + $0x4c] sm:$0xf] }
 0x265   : > { %v21243_v3 = vor.u32 %v4658_v54, %v4655_v18  ;;  %v25908_v18 = vshrl.u32 %v20900_v43, 16  ;;  %v21277_v59 = vsel %vm3359_vm6, %v4378_v1, %v4380_v44 }
 0x267   : > { %17790 = vmatmul.mubr.msk.bf16.gmra.mxu1 %vm2943_vm5, %v4369_v24  ;;  %v21237_v24 = vsel %vm3969_vm9, %v5040_v8, %v25573_v62  ;;  %v5932_v8 = vld [vmem:[#allocation2 + $0x2c] sm:$0xf]  ;;  %v4382_v62 = vrot.slane %v21032_v33, 1  ;;  %v21256_v54 = vrot.slane %v25908_v18, 1  ;;  %v21268_v18 = vsel %vm3359_vm6, %v4374_v45, %v4376_v55 }
 0x268   : > { %17793 = vmatprep.mubr.msk.bf16.mxu1 %vm2943_vm5, %v4371_v22  ;;  %25905 = vst [vmem:[#allocation49_spill] sm:$0xff] %v21237_v24  ;;  %v4277_v22 = vld [vmem:[#allocation2 + $0x84] sm:$0x1]  ;;  %v21274_v50 = vcombine.low %v5931_v15, %v5932_v8  ;;  %v25912_v45 = vshll.u32 %v20902_v52, 16  ;;  %v21287_v55 = vcombine.low %v5933_v19, %v5934_v58  ;;  %v5939_v8 = vld [vmem:[#allocation2 + $0x48] sm:$0xf]  ;;  %v17651_v9 = vpop.f32.mrf.mxu1 }
 0x269   : > { %v15443_v60 = vcombine.low %v20904_v14, %v4277_v22  ;;  %v5937_v14 = vld [vmem:[#allocation2 + $0x40] sm:$0xf]  ;;  %v21291_v15 = vsel %vm3359_vm6, %v4380_v44, %v4382_v62  ;;  %v21317_v19 = vld [vmem:[#allocation2 + $0x64] sm:$0xf]  ;;  %v25934_v33 = vshrl.u32 %v21245_v38, 16 }
 0x26a   : > { %17752 = vmatmul.mubr.msk.bf16.vlgmr.msra.gmra.mxu0 %vm2943_vm5, %v20407_v28  ;;  %v4384_v28 = vrot.slane %v21057_v35, 1  ;;  %25910 = vst [vmem:[#allocation52_spill] sm:$0xff] %v21274_v50  ;;  %v21285_v6 = vrot.slane %v25912_v45, 2  ;;  %25913 = vst [vmem:[#allocation53_spill] sm:$0xff] %v21287_v55  ;;  %v21298_v61 = vcombine.low %v5937_v14, %v5938_v36  ;;  %v21300_v45 = vld [vmem:[#allocation2 + $0x5c] sm:$0xf]  ;;  %v3226_v0 = vpop.f32.mrf.mxu1 }
 0x26b   : > { %17755 = vmatprep.mubr.msk.bf16.mxu0 %vm2943_vm5, %v20437_v31  ;;  %17818 = vmatpush3.bf16.msra.mxu0 %v20864_v56  ;;  %v4386_v31 = vrot.slane %v20887_v27, 1  ;;  %v5936_v56 = vld [vmem:[#allocation2 + $0x3c] sm:$0xf]  ;;  %25916 = vst [vmem:[#allocation56_spill] sm:$0xff] %v21300_v45  ;;  %v5943_v36 = vld [vmem:[#allocation2 + $0x58] sm:$0xf] }
 0x26c   : > { %17885 = vmatprep.subr.bf16.mxu0 %v21230_v7  ;;  %v21294_v1 = vsel %vm3359_vm6, %v4382_v62, %v4384_v28  ;;  %v21296_v22 = vcombine.low %v5935_v37, %v5936_v56  ;;  %25915 = vst [vmem:[#allocation55_spill] sm:$0xff] %v21298_v61  ;;  %v21311_v62 = vcombine.low %v5939_v8, %v5940_v20  ;;  %v21315_v56 = vld [vmem:[#allocation2 + $0x60] sm:$0xf]  ;;  %25921 = vst [vmem:[#allocation60_spill] sm:$0xff] %v21317_v19  ;;  %v21336_v8 = vld [vmem:[#allocation2 + $0x70] sm:$0xf] }
 0x26d   : > { %v21304_v58 = vsel %vm3359_vm6, %v4384_v28, %v4386_v31  ;;  %v21313_v37 = vcombine.low %v5941_v4, %v5942_v47  ;;  %25920 = vst [vmem:[#allocation59_spill] sm:$0xff] %v21315_v56  ;;  %v21319_v14 = vrot.slane %v15443_v60, 1  ;;  %v21334_v20 = vcombine.low %v5943_v36, %v21300_v45  ;;  %25925 = vst [vmem:[#allocation64_spill] sm:$0xff] %v21336_v8  ;;  %v21349_v36 = vld [vmem:[#allocation2 + $0x7c] sm:$0xf] }
 0x26e   : > { %25914 = vst [vmem:[#allocation54_spill] sm:$0xff] %v21296_v22  ;;  %25918 = vst [vmem:[#allocation57_spill] sm:$0xff] %v21311_v62  ;;  %v21347_v60 = vcombine.low %v21315_v56, %v21317_v19  ;;  %v21358_v28 = vld [vmem:[#allocation2 + $0x84] sm:$0xf]  ;;  %v21367_v4 = vld [vmem:[#allocation2 + $0x78] sm:$0xf] }
 0x26f   : > { %17794 = vmatmul.mubr.msk.bf16.gmra.mxu1 %vm2943_vm5, %v4373_v32  ;;  %v25917_v32 = vrot.slane %v20889_v26, 1  ;;  %25919 = vst [vmem:[#allocation58_spill] sm:$0xff] %v21313_v37  ;;  %25924 = vst [vmem:[#allocation63_spill] sm:$0xff] %v21334_v20  ;;  %v21371_v27 = vld [vmem:[#allocation2 + $0x80] sm:$0xf]  ;;  %v7010_v7 = vrot.slane %v25934_v33, 3 }
 0x270   : > { %17797 = vmatprep.mubr.msk.bf16.mxu1 %vm2943_vm5, %v4375_v53  ;;  %25927 = vst [vmem:[#allocation66_spill] sm:$0xff] %v21347_v60  ;;  %25928 = vst [vmem:[#allocation67_spill] sm:$0xff] %v21349_v36  ;;  %v25935_v47 = vshll.u32 %v21245_v38, 16  ;;  %v21383_v53 = vcombine.low %v21367_v4, %v21349_v36  ;;  %v21387_v42 = vcombine.low %v21371_v27, %v21358_v28  ;;  %v17652_v36 = vpop.f32.mrf.mxu1  ;;  %v26055_v56 = vld [vmem:[#allocation49_spill] sm:$0xff] }
 0x271   : > { %v21309_v44 = vsel %vm3359_vm6, %v4386_v31, %v25917_v32  ;;  %v21326_v31 = vld [vmem:[#allocation2 + $0x6c] sm:$0xf]  ;;  %v21338_v32 = vld [vmem:[#allocation2 + $0x74] sm:$0xf]  ;;  %25930 = vst [vmem:[#allocation69_spill] sm:$0xff] %v21358_v28  ;;  %25932 = vst [vmem:[#allocation71_spill] sm:$0xff] %v21367_v4 }
 0x272   : > { %25923 = vst [vmem:[#allocation62_spill] sm:$0xff] %v21326_v31  ;;  %17756 = vmatmul.mubr.msk.bf16.gmra.mxu0 %vm2943_vm5, %v20468_v63  ;;  %25926 = vst [vmem:[#allocation65_spill] sm:$0xff] %v21338_v32  ;;  %v21365_v35 = vcombine.low %v21336_v8, %v21338_v32  ;;  %v7011_v63 = vrot.slane %v25935_v47, 4  ;;  %v25940_v28 = vshrl.u32 %v21247_v34, 16  ;;  %v25948_v8 = vshrl.u32 %v21296_v22, 16 }
 0x273   : > { %17759 = vmatprep.mubr.msk.bf16.mxu0 %vm2943_vm5, %v20502_v12  ;;  %v21356_v12 = vcombine.low %v21324_v16, %v21326_v31  ;;  %25933 = vst [vmem:[#allocation72_spill] sm:$0xff] %v21371_v27  ;;  %25936 = vst [vmem:[#allocation73_spill] sm:$0xff] %v21383_v53  ;;  %v25944_v31 = vshll.u32 %v21274_v50, 16  ;;  %v25947_v27 = vshll.u32 %v21287_v55, 16  ;;  %v26080_v16 = vld [vmem:[#allocation13_spill] sm:$0xff] }
 0x274   : > { %25931 = vst [vmem:[#allocation70_spill] sm:$0xff] %v21365_v35  ;;  %25937 = vst [vmem:[#allocation74_spill] sm:$0xff] %v21387_v42  ;;  %v21395_v32 = vor.u32 %v7011_v63, %v7010_v7  ;;  %v25943_v7 = vshrl.u32 %v21274_v50, 16 }
 0x275   : > { %25929 = vst [vmem:[#allocation68_spill] sm:$0xff] %v21356_v12  ;;  %v17617_v23 = vpop.f32.mrf.mxu0 }
 0x276   : > { %v21389_v33 = vadd.f32 %v17651_v9, %v17617_v23  ;;  %25939 = vst [vmem:[#allocation76_spill] sm:$0xff] %v21395_v32  ;;  %v7014_v9 = vrot.slane %v25940_v28, 3  ;;  %v7018_v63 = vrot.slane %v25943_v7, 3  ;;  %v7026_v28 = vrot.slane %v25948_v8, 3 }
 0x277   : > { %17798 = vmatmul.mubr.msk.bf16.gmra.mxu1 %vm2943_vm5, %v21268_v18  ;;  %v3026_v41 = vpop.f32.mrf.mxu0  ;;  %v7019_v18 = vrot.slane %v25944_v31, 4  ;;  %v6723_v8 = vrot.slane %v21274_v50, 3  ;;  %v26064_v50 = vld [vmem:[#allocation46_spill] sm:$0xff] }
 0x278   : > { %25938 = vst [vmem:[#allocation75_spill] sm:$0xff] %v21389_v33  ;;  %17801 = vmatprep.mubr.msk.bf16.mxu1 %vm2943_vm5, %v21271_v21  ;;  %v21404_v23 = vadd.f32 %v3226_v0, %v3026_v41  ;;  %v25942_v21 = vshll.u32 %v21247_v34, 16  ;;  %v25946_v33 = vshrl.u32 %v21287_v55, 16  ;;  %v6725_v0 = vrot.slane %v21287_v55, 3  ;;  %v21770_v55 = vld [vmem:[#allocation2 + $0x64] sm:$0xf] }
 0x279   : > { %v17618_v4 = vpop.f32.mrf.mxu0  ;;  %v7020_v7 = vor.u32 %v7019_v18, %v7018_v63  ;;  %v25954_v63 = vshll.u32 %v21298_v61, 16  ;;  %26053 = vst [vmem:[#allocation136_spill] sm:$0xff] %v21770_v55 }
 0x27a   : > { %17760 = vmatmul.mubr.msk.bf16.gmra.mxu0 %vm2943_vm5, %v20533_v2  ;;  %25941 = vst [vmem:[#allocation77_spill] sm:$0xff] %v21404_v23  ;;  %v7015_v47 = vrot.slane %v25942_v21, 4  ;;  %v21418_v21 = vadd.f32 %v17652_v36, %v17618_v4  ;;  %v7022_v31 = vrot.slane %v25946_v33, 3  ;;  %v25949_v2 = vshll.u32 %v21296_v22, 16 }
 0x27b   : > { %17763 = vmatprep.mubr.msk.bf16.mxu0 %vm2943_vm5, %v20574_v46  ;;  %v7023_v46 = vrot.slane %v25947_v27, 4  ;;  %v25603_v36 = vrot.slane %v21245_v38, 3  ;;  %v6721_v33 = vrot.slane %v21247_v34, 3 }
 0x27c   : > { %25945 = vst [vmem:[#allocation78_spill] sm:$0xff] %v21418_v21  ;;  %v7016_v23 = vor.u32 %v7015_v47, %v7014_v9  ;;  %v7027_v24 = vrot.slane %v25949_v2, 4  ;;  %v25952_v47 = vshrl.u32 %v21298_v61, 16  ;;  %v7031_v2 = vrot.slane %v25954_v63, 4  ;;  %v25961_v63 = vld [vmem:[#allocation7_spill] sm:$0xff] }
 0x27d   : > { %v7024_v27 = vor.u32 %v7023_v46, %v7022_v31  ;;  %v21455_v46 = vpop.f32.mrf.mxu1  ;;  %v26081_v21 = vrot.slane %v26080_v16, 2 }
 0x27e   : > { %v21430_v41 = vsel %vm7001_vm12, %v21395_v32, %v7016_v23  ;;  %v21433_v4 = vsel %vm7001_vm12, %v7016_v23, %v7020_v7  ;;  %v7028_v18 = vor.u32 %v7027_v24, %v7026_v28  ;;  %v7030_v9 = vrot.slane %v25952_v47, 3  ;;  %25957 = vst [vmem:[#allocation82_spill] sm:$0xff] %v21455_v46 }
 0x27f   : > { %25950 = vst [vmem:[#allocation79_spill] sm:$0xff] %v21430_v41  ;;  %25951 = vst [vmem:[#allocation80_spill] sm:$0xff] %v21433_v4  ;;  %17802 = vmatmul.mubr.msk.bf16.gmra.mxu1 %vm2943_vm5, %v21277_v59  ;;  %v21447_v23 = vsel %vm555_vm1, %v25603_v36, %v6721_v33  ;;  %v25955_v59 = vshrl.u32 %v21311_v62, 16  ;;  %v25956_v24 = vshll.u32 %v21311_v62, 16  ;;  %v21458_v47 = vsel %vm7001_vm12, %v7020_v7, %v7024_v27  ;;  %v17655_v7 = vpop.f32.mrf.mxu1 }
 0x280   : > { %17805 = vmatprep.mubr.msk.bf16.mxu1 %vm2943_vm5, %v21291_v15  ;;  %25953 = vst [vmem:[#allocation81_spill] sm:$0xff] %v21447_v23  ;;  %25958 = vst [vmem:[#allocation83_spill] sm:$0xff] %v21458_v47  ;;  %v21461_v15 = vsel %vm7001_vm12, %v7024_v27, %v7028_v18  ;;  %v21464_v36 = vsel %vm555_vm1, %v6721_v33, %v6723_v8  ;;  %v25962_v4 = vshrl.u32 %v21313_v37, 16  ;;  %v25963_v47 = vld [vmem:[#allocation8_spill] sm:$0xff]  ;;  %v25965_v33 = vshll.u32 %v21313_v37, 16 }
 0x281   : > { %v7034_v31 = vrot.slane %v25955_v59, 3  ;;  %v7035_v28 = vrot.slane %v25956_v24, 4  ;;  %25959 = vst [vmem:[#allocation84_spill] sm:$0xff] %v21461_v15  ;;  %25960 = vst [vmem:[#allocation85_spill] sm:$0xff] %v21464_v36  ;;  %v7032_v59 = vor.u32 %v7031_v2, %v7030_v9  ;;  %v6727_v24 = vrot.slane %v21296_v22, 3  ;;  %v3242_v22 = vpop.f32.mrf.mxu1 }
 0x282   : > { %17764 = vmatmul.mubr.msk.bf16.gmra.mxu0 %vm2943_vm5, %v25961_v63  ;;  %v7038_v41 = vrot.slane %v25962_v4, 3  ;;  %v21475_v27 = vsel %vm555_vm1, %v6723_v8, %v6725_v0  ;;  %v7039_v36 = vrot.slane %v25965_v33, 4  ;;  %v25966_v15 = vshrl.u32 %v21334_v20, 16 }
 0x283   : > { %v7036_v23 = vor.u32 %v7035_v28, %v7034_v31  ;;  %17767 = vmatprep.mubr.msk.bf16.mxu0 %vm2943_vm5, %v25963_v47  ;;  %25964 = vst [vmem:[#allocation7_spill] sm:$0xff] %v21475_v27  ;;  %v25967_v9 = vshll.u32 %v21334_v20, 16  ;;  %v21484_v31 = vsel %vm7001_vm12, %v7028_v18, %v7032_v59  ;;  %v21490_v28 = vsel %vm555_vm1, %v6725_v0, %v6727_v24  ;;  %v21493_v47 = vpop.f32.mrf.mxu0 }
 0x284   : > { %v7042_v63 = vrot.slane %v25966_v15, 3  ;;  %25968 = vst [vmem:[#allocation8_spill] sm:$0xff] %v21484_v31  ;;  %25970 = vst [vmem:[#allocation87_spill] sm:$0xff] %v21490_v28  ;;  %v6729_v8 = vrot.slane %v21298_v61, 3  ;;  %v7040_v33 = vor.u32 %v7039_v36, %v7038_v41  ;;  %v6731_v15 = vrot.slane %v21311_v62, 3 }
 0x285   : > { %v7043_v2 = vrot.slane %v25967_v9, 4  ;;  %v21487_v4 = vsel %vm7001_vm12, %v7032_v59, %v7036_v23  ;;  %25971 = vst [vmem:[#allocation88_spill] sm:$0xff] %v21493_v47  ;;  %v25972_v32 = vshrl.u32 %v21347_v60, 16  ;;  %v25974_v59 = vshll.u32 %v21347_v60, 16  ;;  %v17621_v41 = vpop.f32.mrf.mxu0  ;;  %v21768_v62 = vld [vmem:[#allocation2 + $0x58] sm:$0xf] }
 0x286   : > { %25969 = vst [vmem:[#allocation86_spill] sm:$0xff] %v21487_v4  ;;  %v21499_v18 = vsel %vm555_vm1, %v6727_v24, %v6729_v8  ;;  %v25975_v0 = vshrl.u32 %v21356_v12, 16  ;;  %v25976_v31 = vshll.u32 %v21356_v12, 16  ;;  %v21510_v36 = vsel %vm7001_vm12, %v7036_v23, %v7040_v33  ;;  %26052 = vst [vmem:[#allocation135_spill] sm:$0xff] %v21768_v62 }
 0x287   : > { %v7044_v27 = vor.u32 %v7043_v2, %v7042_v63  ;;  %v7046_v9 = vrot.slane %v25972_v32, 3  ;;  %25973 = vst [vmem:[#allocation89_spill] sm:$0xff] %v21499_v18  ;;  %v7047_v4 = vrot.slane %v25974_v59, 4  ;;  %17806 = vmatmul.mubr.msk.bf16.gmra.mxu1 %vm2943_vm5, %v21294_v1  ;;  %25977 = vst [vmem:[#allocation90_spill] sm:$0xff] %v21510_v36  ;;  %v21516_v24 = vsel %vm555_vm1, %v6729_v8, %v6731_v15  ;;  %v25985_v36 = vld [vmem:[#allocation9_spill] sm:$0xff] }
 0x288   : > { %v7050_v28 = vrot.slane %v25975_v0, 3  ;;  %v7051_v61 = vrot.slane %v25976_v31, 4  ;;  %25979 = vst [vmem:[#allocation92_spill] sm:$0xff] %v21516_v24  ;;  %v6733_v63 = vrot.slane %v21313_v37, 3  ;;  %v21519_v2 = vadd.f32 %v17655_v7, %v17621_v41  ;;  %17809 = vmatprep.mubr.msk.bf16.mxu1 %vm2943_vm5, %v21304_v58  ;;  %v3042_v0 = vpop.f32.mrf.mxu0  ;;  %v21537_v58 = vld [vmem:[#allocation2 + $0x88] sm:$0xf] }
 0x289   : > { %v21513_v32 = vsel %vm7001_vm12, %v7040_v33, %v7044_v27  ;;  %v7048_v31 = vor.u32 %v7047_v4, %v7046_v9  ;;  %v6735_v1 = vrot.slane %v21334_v20, 3  ;;  %v25982_v33 = vshrl.u32 %v21365_v35, 16  ;;  %25987 = vst [vmem:[#allocation95_spill] sm:$0xff] %v21537_v58  ;;  %v17656_v9 = vpop.f32.mrf.mxu1 }
 0x28a   : > { %25978 = vst [vmem:[#allocation91_spill] sm:$0xff] %v21513_v32  ;;  %25980 = vst [vmem:[#allocation93_spill] sm:$0xff] %v21519_v2  ;;  %v7052_v59 = vor.u32 %v7051_v61, %v7050_v28  ;;  %v21525_v23 = vsel %vm555_vm1, %v6731_v15, %v6733_v63  ;;  %v25983_v8 = vshll.u32 %v21365_v35, 16  ;;  %v25984_v7 = vshrl.u32 %v21383_v53, 16  ;;  %v6994_v32 = vld [vmem:[#allocation2 + $0x8c] sm:$0xf]  ;;  %17768 = vmatmul.mubr.msk.bf16.gmra.mxu0 %vm2943_vm5, %v25985_v36 }
 0x28b   : > { %25981 = vst [vmem:[#allocation94_spill] sm:$0xff] %v21525_v23  ;;  %v7054_v18 = vrot.slane %v25982_v33, 3  ;;  %v21535_v61 = vadd.f32 %v3242_v22, %v3042_v0  ;;  %v21540_v4 = vsel %vm7001_vm12, %v7044_v27, %v7048_v31  ;;  %v21546_v15 = vsel %vm555_vm1, %v6733_v63, %v6735_v1  ;;  %v25991_v33 = vld [vmem:[#allocation10_spill] sm:$0xff]  ;;  %v21849_v2 = vld [vmem:[#allocation2 + $0x88] sm:$0xf] }
 0x28c   : > { %v7055_v24 = vrot.slane %v25983_v8, 4  ;;  %v7058_v41 = vrot.slane %v25984_v7, 3  ;;  %25988 = vst [vmem:[#allocation96_spill] sm:$0xff] %v21540_v4  ;;  %v21543_v28 = vsel %vm7001_vm12, %v7048_v31, %v7052_v59  ;;  %25990 = vst [vmem:[#allocation98_spill] sm:$0xff] %v21546_v15  ;;  %17771 = vmatprep.mubr.msk.bf16.mxu0 %vm2943_vm5, %v25991_v33  ;;  %v17622_v8 = vpop.f32.mrf.mxu0  ;;  %v6316_v7 = vld [vmem:[#allocation2 + $0x8c] sm:$0x7]  ;;  %v15618_v33 = vcombine.low %v21537_v58, %v6994_v32 }
 0x28d   : > { %25986 = vst [vmem:[#allocation9_spill] sm:$0xff] %v21535_v61  ;;  %25989 = vst [vmem:[#allocation97_spill] sm:$0xff] %v21543_v28  ;;  %v25992_v22 = vshll.u32 %v21383_v53, 16  ;;  %v6737_v23 = vrot.slane %v21347_v60, 3  ;;  %v6739_v27 = vrot.slane %v21356_v12, 3  ;;  %v21554_v4 = vadd.f32 %v17656_v9, %v17622_v8  ;;  %v21573_v60 = vpop.f32.mrf.mxu1 }
 0x28e   : > { %v7056_v36 = vor.u32 %v7055_v24, %v7054_v18  ;;  %v25994_v31 = vshrl.u32 %v21387_v42, 16  ;;  %v25995_v15 = vshll.u32 %v21387_v42, 16  ;;  %v21571_v9 = vcombine.low %v21537_v58, %v6316_v7  ;;  %26000 = vst [vmem:[#allocation103_spill] sm:$0xff] %v21573_v60  ;;  %v21828_v60 = vld [vmem:[#allocation2 + $0x80] sm:$0xf]  ;;  %26085 = vst [vmem:[#allocation154_spill] sm:$0xff] %v21849_v2 }
 0x28f   : > { %v7059_v0 = vrot.slane %v25992_v22, 4  ;;  %25993 = vst [vmem:[#allocation10_spill] sm:$0xff] %v21554_v4  ;;  %v21565_v24 = vsel %vm555_vm1, %v6735_v1, %v6737_v23  ;;  %v21568_v22 = vsel %vm555_vm1, %v6737_v23, %v6739_v27  ;;  %v7070_v12 = vshll.u32 %v15618_v33, 16  ;;  %17810 = vmatmul.mubr.msk.bf16.gmra.mxu1 %vm2943_vm5, %v21309_v44  ;;  %v21826_v4 = vld [vmem:[#allocation2 + $0x78] sm:$0xf]  ;;  %26076 = vst [vmem:[#allocation151_spill] sm:$0xff] %v21828_v60 }
 0x290   : > { %v7062_v63 = vrot.slane %v25994_v31, 3  ;;  %v7063_v28 = vrot.slane %v25995_v15, 4  ;;  %v21562_v20 = vsel %vm7001_vm12, %v7052_v59, %v7056_v36  ;;  %25997 = vst [vmem:[#allocation100_spill] sm:$0xff] %v21565_v24  ;;  %25998 = vst [vmem:[#allocation101_spill] sm:$0xff] %v21568_v22  ;;  %v7067_v31 = vshrl.u32 %v15618_v33, 16 }
 0x291   : > { %25996 = vst [vmem:[#allocation99_spill] sm:$0xff] %v21562_v20  ;;  %v7060_v18 = vor.u32 %v7059_v0, %v7058_v41  ;;  %25999 = vst [vmem:[#allocation102_spill] sm:$0xff] %v21571_v9  ;;  %v26001_v32 = vrot.slane %v20889_v26, 1  ;;  %v6741_v23 = vrot.slane %v21365_v35, 3  ;;  %v6743_v41 = vrot.slane %v21383_v53, 3  ;;  %v17659_v26 = vpop.f32.mrf.mxu1 }
 0x292   : > { %v7064_v8 = vor.u32 %v7063_v28, %v7062_v63  ;;  %v4651_v28 = vor.u32 %v21225_v29, %v21217_v40  ;;  %v7069_v44 = vrot.slane %v7067_v31, 3  ;;  %v7072_v7 = vrot.slane %v7070_v12, 4  ;;  %v26008_v29 = vld [vmem:[#allocation11_spill] sm:$0xff]  ;;  %26075 = vst [vmem:[#allocation150_spill] sm:$0xff] %v21826_v4 }
 0x293   : > { %v4391_v59 = vsel %vm3359_vm6, %v26001_v32, %v21319_v14  ;;  %v21582_v1 = vsel %vm7001_vm12, %v7056_v36, %v7060_v18  ;;  %v26004_v0 = vrot.slane %v20902_v52, 2  ;;  %v26005_v36 = vrot.slane %v20900_v43, 2  ;;  %17772 = vmatmul.mubr.msk.bf16.gmra.mxu0 %vm2943_vm5, %v26008_v29 }
 0x294   : > { %26002 = vst [vmem:[#allocation104_spill] sm:$0xff] %v21582_v1  ;;  %17813 = vmatprep.mubr.msk.bf16.mxu1 %vm2943_vm5, %v4391_v59  ;;  %v21590_v15 = vsel %vm7001_vm12, %v7060_v18, %v7064_v8  ;;  %v21600_v33 = vsel %vm555_vm1, %v6739_v27, %v6741_v23  ;;  %v21603_v32 = vsel %vm555_vm1, %v6741_v23, %v6743_v41  ;;  %v6745_v40 = vrot.slane %v21387_v42, 3  ;;  %v26010_v27 = vld [vmem:[#allocation12_spill] sm:$0xff]  ;;  %v21750_v42 = vld [vmem:[#allocation2 + $0x5c] sm:$0xf] }
 0x295   : > { %26003 = vst [vmem:[#allocation105_spill] sm:$0xff] %v21590_v15  ;;  %v21597_v63 = vsel %vm3969_vm9, %v26005_v36, %v26004_v0  ;;  %26006 = vst [vmem:[#allocation106_spill] sm:$0xff] %v21600_v33  ;;  %v21610_v12 = vsel %vm3643_vm8, %v4651_v28, %v21243_v3  ;;  %v5046_v43 = vrot.slane %v20939_v48, 2  ;;  %v21613_v18 = vor.u32 %v7072_v7, %v7069_v44  ;;  %v7585_v15 = vld [vmem:[#allocation2 + $0x1c] sm:$0xf] }
 0x296   : > { %26007 = vst [vmem:[#allocation107_spill] sm:$0xff] %v21603_v32  ;;  %v25616_v31 = vrot.slane %v21571_v9, 3  ;;  %17775 = vmatprep.mubr.msk.bf16.mxu0 %vm2943_vm5, %v26010_v27  ;;  %v5048_v59 = vrot.slane %v20961_v10, 2  ;;  %v4668_v23 = vor.u32 %v21260_v39, %v21256_v54  ;;  %v4677_v0 = vor.u32 %v21285_v6, %v21281_v25  ;;  %v3258_v39 = vpop.f32.mrf.mxu1  ;;  %v21639_v25 = vpop.f32.mrf.mxu0  ;;  %26048 = vst [vmem:[#allocation131_spill] sm:$0xff] %v21750_v42  ;;  %v21772_v9 = vld [vmem:[#allocation2 + $0x6c] sm:$0xf] }
 0x297   : > { %26009 = vst [vmem:[#allocation11_spill] sm:$0xff] %v21613_v18  ;;  %v21624_v28 = vsel %vm555_vm1, %v6743_v41, %v6745_v40  ;;  %v26012_v36 = vshrl.u32 %v20939_v48, 16  ;;  %v26013_v7 = vshll.u32 %v20939_v48, 16  ;;  %v21632_v27 = vsel %vm7001_vm12, %v7064_v8, %v21613_v18  ;;  %26016 = vst [vmem:[#allocation110_spill] sm:$0xff] %v21639_v25  ;;  %17814 = vmatmul.mubr.msk.bf16.gmra.mxu1 %vm2943_vm5, %v21319_v14 }
 0x298   : > { %26011 = vst [vmem:[#allocation12_spill] sm:$0xff] %v21624_v28  ;;  %26014 = vst [vmem:[#allocation108_spill] sm:$0xff] %v21632_v27  ;;  %v21637_v54 = vsel %vm555_vm1, %v6745_v40, %v25616_v31  ;;  %v5050_v6 = vrot.slane %v20969_v51, 2  ;;  %v5052_v41 = vrot.slane %v20983_v57, 2  ;;  %v26019_v8 = vshrl.u32 %v20969_v51, 16  ;;  %17853 = vmatprep.mubr.msk.bf16.mxu1 %vm2943_vm5, %v21223_v30  ;;  %v17660_v22 = vpop.f32.mrf.mxu1 }
 0x299   : > { %v4682_v44 = vrot.slane %v26012_v36, 1  ;;  %v4685_v29 = vrot.slane %v26013_v7, 2  ;;  %26015 = vst [vmem:[#allocation109_spill] sm:$0xff] %v21637_v54  ;;  %v26017_v36 = vshrl.u32 %v20961_v10, 16  ;;  %v26018_v7 = vshll.u32 %v20961_v10, 16  ;;  %26054 = vst [vmem:[#allocation137_spill] sm:$0xff] %v21772_v9 }
 0x29a   : > { %v4700_v18 = vrot.slane %v26019_v8, 1  ;;  %v26020_v32 = vshll.u32 %v20969_v51, 16  ;;  %v26021_v31 = vshrl.u32 %v20983_v57, 16  ;;  %v26022_v33 = vshll.u32 %v20983_v57, 16 }
 0x29b   : > { %v4691_v48 = vrot.slane %v26017_v36, 1  ;;  %v4694_v28 = vrot.slane %v26018_v7, 2  ;;  %v17625_v36 = vpop.f32.mrf.mxu0  ;;  %v26023_v10 = vrot.slane %v20902_v52, 2  ;;  %v21663_v8 = vsel %vm3969_vm9, %v5046_v43, %v5048_v59  ;;  %17776 = vmatmul.mubr.msk.bf16.gmra.mxu0 %vm2943_vm5, %v20800_v11 }
 0x29c   : > { %v4703_v40 = vrot.slane %v26020_v32, 2  ;;  %v4709_v54 = vrot.slane %v26021_v31, 1  ;;  %v4712_v27 = vrot.slane %v26022_v33, 2  ;;  %v21667_v51 = vsel %vm3643_vm8, %v21243_v3, %v4668_v23  ;;  %v7587_v33 = vld [vmem:[#allocation2 + $0x24] sm:$0xf]  ;;  %17779 = vmatprep.mubr.msk.bf16.mxu0 %vm2943_vm5, %v20847_v13 }
 0x29d   : > { %v21660_v7 = vsel %vm3969_vm9, %v26023_v10, %v5046_v43  ;;  %v21670_v57 = vsel %vm3643_vm8, %v4668_v23, %v4677_v0  ;;  %v21672_v32 = vadd.f32 %v17659_v26, %v17625_v36  ;;  %v4686_v52 = vor.u32 %v4685_v29, %v4682_v44  ;;  %v7584_v43 = vld [vmem:[#allocation2 + $0x18] sm:$0x8]  ;;  %v7589_v10 = vld [vmem:[#allocation2 + $0x2c] sm:$0xf]  ;;  %v3058_v24 = vpop.f32.mrf.mxu0  ;;  %v7586_v36 = vld [vmem:[#allocation2 + $0x20] sm:$0xf] }
 0x29e   : > { %v5054_v14 = vrot.slane %v21002_v5, 2  ;;  %v21679_v3 = vsel %vm3969_vm9, %v5048_v59, %v5050_v6  ;;  %v21682_v23 = vsel %vm3969_vm9, %v5050_v6, %v5052_v41  ;;  %v4695_v26 = vor.u32 %v4694_v28, %v4691_v48  ;;  %v7588_v31 = vld [vmem:[#allocation2 + $0x28] sm:$0xf]  ;;  %v21694_v59 = vld [vmem:[#allocation2 + $0x34] sm:$0xf] }
 0x29f   : > { %26024 = vst [vmem:[#allocation111_spill] sm:$0xff] %v21672_v32  ;;  %v21684_v1 = vcombine.low %v7584_v43, %v7585_v15  ;;  %v21688_v30 = vadd.f32 %v3258_v39, %v3058_v24  ;;  %v4704_v44 = vor.u32 %v4703_v40, %v4700_v18  ;;  %v21690_v29 = vor.u32 %v4712_v27, %v4709_v54  ;;  %v17626_v28 = vpop.f32.mrf.mxu0  ;;  %v7590_v27 = vld [vmem:[#allocation2 + $0x30] sm:$0xf]  ;;  %v21709_v54 = vld [vmem:[#allocation2 + $0x3c] sm:$0xf] }
 0x2a0   : > { %v21692_v20 = vcombine.low %v7586_v36, %v7587_v33  ;;  %26029 = vst [vmem:[#allocation116_spill] sm:$0xff] %v21694_v59  ;;  %v26030_v6 = vshrl.u32 %v21002_v5, 16  ;;  %v26032_v11 = vshll.u32 %v21002_v5, 16  ;;  %v21707_v18 = vcombine.low %v7588_v31, %v7589_v10  ;;  %26035 = vst [vmem:[#allocation120_spill] sm:$0xff] %v21709_v54  ;;  %v21724_v5 = vld [vmem:[#allocation2 + $0x38] sm:$0xf]  ;;  %17854 = vmatmul.mubr.msk.bf16.vlgmr.msra.gmra.mxu1 %vm2943_vm5, %v26055_v56 }
 0x2a1   : > { %26025 = vst [vmem:[#allocation112_spill] sm:$0xff] %v21684_v1  ;;  %26026 = vst [vmem:[#allocation113_spill] sm:$0xff] %v21688_v30  ;;  %v21711_v39 = vadd.f32 %v17660_v22, %v17626_v28  ;;  %v21714_v13 = vsel %vm3643_vm8, %v4677_v0, %v4686_v52  ;;  %v21717_v40 = vsel %vm3969_vm9, %v5052_v41, %v5054_v14  ;;  %v26037_v33 = vrot.slane %v21012_v17, 2  ;;  %v21726_v31 = vld [vmem:[#allocation2 + $0x40] sm:$0xf]  ;;  %v3261_v0 = vpop.f32.mrf.mxu1  ;;  %v3061_v28 = vpop.f32.mrf.mxu0 }
 0x2a2   : > { %26027 = vst [vmem:[#allocation114_spill] sm:$0xff] %v21690_v29  ;;  %26028 = vst [vmem:[#allocation115_spill] sm:$0xff] %v21692_v20  ;;  %v21701_v48 = vrot.slane %v26030_v6, 1  ;;  %v21705_v24 = vrot.slane %v26032_v11, 2  ;;  %v21728_v10 = vld [vmem:[#allocation2 + $0x44] sm:$0xf]  ;;  %v21735_v41 = vsel %vm3643_vm8, %v4686_v52, %v4695_v26  ;;  %v21756_v53 = vadd.f32 %v3261_v0, %v3061_v28  ;;  %17857 = vmatprep.mubr.msk.bf16.mxu1 %vm2943_vm5, %v21597_v63 }
 0x2a3   : > { %26034 = vst [vmem:[#allocation119_spill] sm:$0xff] %v21707_v18  ;;  %26036 = vst [vmem:[#allocation121_spill] sm:$0xff] %v21711_v39  ;;  %v21722_v43 = vsel %vm3969_vm9, %v5054_v14, %v26037_v33  ;;  %v21730_v36 = vld [vmem:[#allocation2 + $0x48] sm:$0xf]  ;;  %v21732_v22 = vld [vmem:[#allocation2 + $0x4c] sm:$0xf]  ;;  %v21763_v35 = vsel %vm3643_vm8, %v4704_v44, %v21690_v29  ;;  %v21766_v37 = vcombine.low %v7590_v27, %v21694_v59  ;;  %v17663_v45 = vpop.f32.mrf.mxu1  ;;  %17920 = vmatpush3.bf16.msra.mxu1 %v26064_v50 }
 0x2a4   : > { %26031 = vst [vmem:[#allocation117_spill] sm:$0xff] %v21701_v48  ;;  %26033 = vst [vmem:[#allocation118_spill] sm:$0xff] %v21705_v24  ;;  %v26043_v6 = vshrl.u32 %v21012_v17, 16  ;;  %v21744_v14 = vld [vmem:[%s25499_s4 + $0x58] sm:$0xff]   ;;  %v21746_v33 = vld [vmem:[#allocation2 + $0x50] sm:$0xf]  ;;  %v21786_v27 = vcombine.low %v21730_v36, %v21732_v22  ;;  %v21805_v38 = vcombine.low %v21768_v62, %v21750_v42  ;;  %17780 = vmatmul.mubr.msk.bf16.gmra.mxu0 %vm2943_vm5, %v26081_v21 }
 0x2a5   : > { %26038 = vst [vmem:[#allocation122_spill] sm:$0xff] %v21724_v5  ;;  %26039 = vst [vmem:[#allocation123_spill] sm:$0xff] %v21726_v31  ;;  %v21748_v15 = vld [vmem:[#allocation2 + $0x54] sm:$0xf]  ;;  %v21790_v28 = vld [vmem:[#allocation2 + $0x7c] sm:$0xf]  ;;  %17987 = vmatprep.subr.bf16.mxu1 %v21744_v14  ;;  %17819 = vmatprep.mubr.msk.bf16.mxu0 %vm2943_vm5, %v21610_v12  ;;  %v3274_v25 = vpop.f32.mrf.mxu1  ;;  %v17629_v29 = vpop.f32.mrf.mxu0 }
 0x2a6   : > { %26040 = vst [vmem:[#allocation124_spill] sm:$0xff] %v21728_v10  ;;  %26041 = vst [vmem:[#allocation125_spill] sm:$0xff] %v21730_v36  ;;  %v21739_v11 = vrot.slane %v26043_v6, 1  ;;  %v21759_v6 = vsel %vm3643_vm8, %v4695_v26, %v4704_v44  ;;  %v21778_v26 = vcombine.low %v21724_v5, %v21709_v54  ;;  %v21782_v44 = vcombine.low %v21726_v31, %v21728_v10  ;;  %v21788_v0 = vld [vmem:[#allocation2 + $0x74] sm:$0xf] }
 0x2a7   : > { %26042 = vst [vmem:[#allocation126_spill] sm:$0xff] %v21732_v22  ;;  %26045 = vst [vmem:[#allocation128_spill] sm:$0xff] %v21744_v14  ;;  %v21792_v52 = vld [vmem:[#allocation2 + $0x84] sm:$0xf]  ;;  %v21801_v34 = vcombine.low %v21746_v33, %v21748_v15  ;;  %v21809_v39 = vld [vmem:[#allocation2 + $0x68] sm:$0xf]  ;;  %v21843_v47 = vcombine.low %v21826_v4, %v21790_v28 }
 0x2a8   : > { %26044 = vst [vmem:[#allocation127_spill] sm:$0xff] %v21739_v11  ;;  %26046 = vst [vmem:[#allocation129_spill] sm:$0xff] %v21746_v33  ;;  %v21811_v30 = vld [vmem:[#allocation2 + $0x8c] sm:$0xf]  ;;  %v21822_v63 = vcombine.low %v21809_v39, %v21772_v9  ;;  %v21824_v32 = vld [vmem:[#allocation2 + $0x70] sm:$0xf]  ;;  %v21847_v14 = vcombine.low %v21828_v60, %v21792_v52  ;;  %17858 = vmatmul.mubr.msk.bf16.gmra.mxu1 %vm2943_vm5, %v21660_v7 }
 0x2a9   : > { %26047 = vst [vmem:[#allocation130_spill] sm:$0xff] %v21748_v15  ;;  %26049 = vst [vmem:[#allocation132_spill] sm:$0xff] %v21756_v53  ;;  %v21807_v53 = vld [vmem:[#allocation2 + $0x60] sm:$0xf]  ;;  %v21839_v46 = vcombine.low %v21824_v32, %v21788_v0  ;;  %v7983_v19 = vshrl.u32 %v21684_v1, 16  ;;  %v21856_v16 = vcombine.low %v21849_v2, %v21811_v30  ;;  %v7986_v21 = vshll.u32 %v21684_v1, 16  ;;  %17861 = vmatprep.mubr.msk.bf16.mxu1 %vm2943_vm5, %v21663_v8 }
 0x2aa   : > { %26050 = vst [vmem:[#allocation133_spill] sm:$0xff] %v21763_v35  ;;  %26051 = vst [vmem:[#allocation134_spill] sm:$0xff] %v21766_v37  ;;  %v21818_v50 = vcombine.low %v21807_v53, %v21770_v55  ;;  %v7991_v58 = vshrl.u32 %v21692_v20, 16  ;;  %v7994_v56 = vshll.u32 %v21692_v20, 16  ;;  %v8000_v12 = vshrl.u32 %v21707_v18, 16 }
 0x2ab   : > { %26056 = vst [vmem:[#allocation49_spill] sm:$0xff] %v21778_v26  ;;  %26057 = vst [vmem:[#allocation138_spill] sm:$0xff] %v21782_v44  ;;  %v7985_v61 = vrot.slane %v7983_v19, 3  ;;  %v7988_v24 = vrot.slane %v7986_v21, 4  ;;  %v8009_v35 = vshrl.u32 %v21766_v37, 16  ;;  %v8012_v20 = vshll.u32 %v21766_v37, 16 }
 0x2ac   : > { %26058 = vst [vmem:[#allocation139_spill] sm:$0xff] %v21786_v27  ;;  %26059 = vst [vmem:[#allocation140_spill] sm:$0xff] %v21788_v0  ;;  %v7993_v48 = vrot.slane %v7991_v58, 3  ;;  %v7996_v49 = vrot.slane %v7994_v56, 4  ;;  %v8002_v1 = vrot.slane %v8000_v12, 3  ;;  %v17664_v56 = vpop.f32.mrf.mxu1  ;;  %v21875_v21 = vadd.f32 %v17663_v45, %v17629_v29  ;;  %v21882_v12 = vld [vmem:[%s25499_s4 + $0x50] sm:$0xff]   ;;  %17820 = vmatmul.mubr.msk.bf16.vlgmr.msra.gmra.mxu0 %vm2943_vm5, %v21667_v51 }
 0x2ad   : > { %26060 = vst [vmem:[#allocation141_spill] sm:$0xff] %v21790_v28  ;;  %26061 = vst [vmem:[#allocation142_spill] sm:$0xff] %v21792_v52  ;;  %v7989_v11 = vor.u32 %v7988_v24, %v7985_v61  ;;  %v8011_v19 = vrot.slane %v8009_v35, 3  ;;  %v8014_v7 = vrot.slane %v8012_v20, 4  ;;  %v8018_v61 = vshrl.u32 %v21778_v26, 16  ;;  %17823 = vmatprep.mubr.msk.bf16.mxu0 %vm2943_vm5, %v21670_v57 }
 0x2ae   : > { %26065 = vst [vmem:[#allocation46_spill] sm:$0xff] %v21801_v34  ;;  %26066 = vst [vmem:[#allocation143_spill] sm:$0xff] %v21805_v38  ;;  %v7997_v31 = vor.u32 %v7996_v49, %v7993_v48  ;;  %v3074_v49 = vpop.f32.mrf.mxu0  ;;  %v8021_v45 = vshll.u32 %v21778_v26, 16  ;;  %v8027_v29 = vshrl.u32 %v21782_v44, 16  ;;  %v8030_v35 = vshll.u32 %v21782_v44, 16 }
 0x2af   : > { %26067 = vst [vmem:[#allocation144_spill] sm:$0xff] %v21807_v53  ;;  %26068 = vst [vmem:[#allocation145_spill] sm:$0xff] %v21809_v39  ;;  %v21892_v8 = vadd.f32 %v3274_v25, %v3074_v49  ;;  %v8020_v58 = vrot.slane %v8018_v61, 3  ;;  %v3277_v25 = vpop.f32.mrf.mxu1  ;;  %v8048_v62 = vshll.u32 %v21801_v34, 16  ;;  %v26107_v39 = vld [vmem:[#allocation118_spill] sm:$0xff] }
 0x2b0   : > { %26069 = vst [vmem:[#allocation146_spill] sm:$0xff] %v21811_v30  ;;  %26072 = vst [vmem:[#allocation147_spill] sm:$0xff] %v21818_v50  ;;  %v21886_v48 = vsel %vm7001_vm12, %v7989_v11, %v7997_v31  ;;  %v17630_v20 = vpop.f32.mrf.mxu0  ;;  %v26088_v11 = vld [vmem:[#allocation48_spill] sm:$0xff]  ;;  %v8029_v33 = vrot.slane %v8027_v29, 3  ;;  %v8032_v57 = vrot.slane %v8030_v35, 4  ;;  %v8039_v29 = vshll.u32 %v21786_v27, 16  ;;  %17862 = vmatmul.mubr.msk.bf16.gmra.mxu1 %vm2943_vm5, %v21679_v3 }
 0x2b1   : > { %26073 = vst [vmem:[#allocation148_spill] sm:$0xff] %v21822_v63  ;;  %26074 = vst [vmem:[#allocation149_spill] sm:$0xff] %v21824_v32  ;;  %17886 = vmatpush3.bf16.msra.mxu0 %v26088_v11  ;;  %v21903_v49 = vadd.f32 %v17664_v56, %v17630_v20  ;;  %v8045_v11 = vshrl.u32 %v21801_v34, 16  ;;  %v17667_v51 = vpop.f32.mrf.mxu1  ;;  %17865 = vmatprep.mubr.msk.bf16.mxu1 %vm2943_vm5, %v21682_v23  ;;  %v8057_v3 = vshll.u32 %v21805_v38, 16  ;;  %v26100_v2 = vld [vmem:[#allocation133_spill] sm:$0xff] }
 0x2b2   : > { %26082 = vst [vmem:[#allocation13_spill] sm:$0xff] %v21839_v46  ;;  %26083 = vst [vmem:[#allocation152_spill] sm:$0xff] %v21843_v47  ;;  %17953 = vmatprep.subr.bf16.mxu0 %v21882_v12  ;;  %v3077_v61 = vpop.f32.mrf.mxu0  ;;  %v8033_v20 = vor.u32 %v8032_v57, %v8029_v33  ;;  %v8050_v33 = vrot.slane %v8048_v62, 4  ;;  %v26167_v34 = vld [vmem:[#allocation121_spill] sm:$0xff] }
 0x2b3   : > { %26084 = vst [vmem:[#allocation153_spill] sm:$0xff] %v21847_v14  ;;  %26086 = vst [vmem:[#allocation155_spill] sm:$0xff] %v21856_v16  ;;  %v8003_v16 = vshll.u32 %v21707_v18, 16  ;;  %v21914_v56 = vadd.f32 %v3277_v25, %v3077_v61  ;;  %v8054_v61 = vshrl.u32 %v21805_v38, 16  ;;  %v8059_v57 = vrot.slane %v8057_v3, 4 }
 0x2b4   : > { %26087 = vst [vmem:[#allocation156_spill] sm:$0xff] %v21886_v48  ;;  %17824 = vmatmul.mubr.msk.bf16.gmra.mxu0 %vm2943_vm5, %v21714_v13 }
 0x2b5   : > { %v8005_v54 = vrot.slane %v8003_v16, 4  ;;  %v8015_v16 = vor.u32 %v8014_v7, %v8011_v19  ;;  %v8047_v7 = vrot.slane %v8045_v11, 3  ;;  %17827 = vmatprep.mubr.msk.bf16.mxu0 %vm2943_vm5, %v21735_v41  ;;  %v8084_v41 = vshll.u32 %v21839_v46, 16  ;;  %v17633_v28 = vpop.f32.mrf.mxu0 }
 0x2b7   : > { %v8006_v24 = vor.u32 %v8005_v54, %v8002_v1  ;;  %v8023_v54 = vrot.slane %v8021_v45, 4  ;;  %v8036_v45 = vshrl.u32 %v21786_v27, 16  ;;  %v8051_v23 = vor.u32 %v8050_v33, %v8047_v7 }
 0x2b8   : > { %v8072_v7 = vshrl.u32 %v21822_v63, 16  ;;  %v8075_v33 = vshll.u32 %v21822_v63, 16  ;;  %17866 = vmatmul.mubr.msk.bf16.gmra.mxu1 %vm2943_vm5, %v21717_v40  ;;  %v8099_v40 = vshrl.u32 %v21847_v14, 16  ;;  %v26161_v63 = vld [vmem:[#allocation31_spill] sm:$0xff] }
 0x2b9   : > { %v21899_v1 = vsel %vm7001_vm12, %v7997_v31, %v8006_v24  ;;  %v21907_v19 = vsel %vm7001_vm12, %v8006_v24, %v8015_v16  ;;  %v8024_v31 = vor.u32 %v8023_v54, %v8020_v58  ;;  %v8038_v35 = vrot.slane %v8036_v45, 3  ;;  %17869 = vmatprep.mubr.msk.bf16.mxu1 %vm2943_vm5, %v21722_v43 }
 0x2ba   : > { %26089 = vst [vmem:[#allocation48_spill] sm:$0xff] %v21899_v1  ;;  %26090 = vst [vmem:[#allocation157_spill] sm:$0xff] %v21907_v19  ;;  %v8041_v54 = vrot.slane %v8039_v29, 4  ;;  %v8066_v45 = vshll.u32 %v21818_v50, 16  ;;  %v3290_v29 = vpop.f32.mrf.mxu1  ;;  %v8074_v3 = vrot.slane %v8072_v7, 3 }
 0x2bb   : > { %v21922_v58 = vsel %vm7001_vm12, %v8015_v16, %v8024_v31  ;;  %v21927_v25 = vsel %vm7001_vm12, %v8024_v31, %v8033_v20  ;;  %v8063_v16 = vshrl.u32 %v21818_v50, 16  ;;  %v8056_v31 = vrot.slane %v8054_v61, 3  ;;  %v26163_v50 = vld [vmem:[#allocation113_spill] sm:$0xff] }
 0x2bc   : > { %26091 = vst [vmem:[#allocation158_spill] sm:$0xff] %v21922_v58  ;;  %26092 = vst [vmem:[#allocation159_spill] sm:$0xff] %v21927_v25  ;;  %v8042_v24 = vor.u32 %v8041_v54, %v8038_v35  ;;  %v21943_v35 = vld [vmem:[#allocation2 + $0x90] sm:$0xf]  ;;  %v8068_v9 = vrot.slane %v8066_v45, 4  ;;  %v8081_v61 = vshrl.u32 %v21839_v46, 16  ;;  %v17668_v60 = vpop.f32.mrf.mxu1  ;;  %17828 = vmatmul.mubr.msk.bf16.gmra.mxu0 %vm2943_vm5, %v21759_v6 }
 0x2bd   : > { %26093 = vst [vmem:[#allocation160_spill] sm:$0xff] %v21943_v35  ;;  %v8065_v32 = vrot.slane %v8063_v16, 3  ;;  %v8060_v11 = vor.u32 %v8059_v57, %v8056_v31  ;;  %v8077_v16 = vrot.slane %v8075_v33, 4  ;;  %v8090_v57 = vshrl.u32 %v21843_v47, 16  ;;  %17831 = vmatprep.mubr.msk.bf16.mxu0 %vm2943_vm5, %v26100_v2  ;;  %v26105_v2 = vld [vmem:[#allocation155_spill] sm:$0xff] }
 0x2be   : > { %v21946_v54 = vsel %vm7001_vm12, %v8033_v20, %v8042_v24  ;;  %v21949_v13 = vsel %vm7001_vm12, %v8042_v24, %v8051_v23  ;;  %v8083_v45 = vrot.slane %v8081_v61, 3  ;;  %v21968_v31 = vadd.f32 %v17667_v51, %v17633_v28  ;;  %v3090_v61 = vpop.f32.mrf.mxu0  ;;  %v3293_v30 = vpop.f32.mrf.mxu1 }
 0x2bf   : > { %26094 = vst [vmem:[#allocation161_spill] sm:$0xff] %v21946_v54  ;;  %26095 = vst [vmem:[#allocation162_spill] sm:$0xff] %v21949_v13  ;;  %v8069_v62 = vor.u32 %v8068_v9, %v8065_v32  ;;  %v21962_v4 = vsel %vm7001_vm12, %v8051_v23, %v8060_v11  ;;  %v8086_v32 = vrot.slane %v8084_v41, 4  ;;  %v8078_v7 = vor.u32 %v8077_v16, %v8074_v3  ;;  %v7975_v16 = vld [vmem:[#allocation2 + $0x94] sm:$0xf] }
 0x2c0   : > { %26096 = vst [vmem:[#allocation163_spill] sm:$0xff] %v21962_v4  ;;  %v8093_v33 = vshll.u32 %v21843_v47, 16  ;;  %v26098_v23 = vshll.u32 %v21012_v17, 16  ;;  %v8102_v41 = vshll.u32 %v21847_v14, 16  ;;  %v21979_v28 = vadd.f32 %v3290_v29, %v3090_v61  ;;  %v17671_v29 = vpop.f32.mrf.mxu1  ;;  %v26106_v4 = vld [vmem:[#allocation117_spill] sm:$0xff]  ;;  %v26154_v14 = vld [vmem:[#allocation103_spill] sm:$0xff] }
 0x2c1   : > { %v21965_v9 = vsel %vm7001_vm12, %v8060_v11, %v8069_v62  ;;  %v8087_v20 = vor.u32 %v8086_v32, %v8083_v45  ;;  %v8092_v11 = vrot.slane %v8090_v57, 3  ;;  %v21982_v43 = vsel %vm7001_vm12, %v8069_v62, %v8078_v7  ;;  %v21986_v45 = vld [vmem:[#allocation2 + $0x60] sm:$0xff]  }
 0x2c2   : > { %26097 = vst [vmem:[#allocation164_spill] sm:$0xff] %v21965_v9  ;;  %v4730_v24 = vrot.slane %v26098_v23, 2  ;;  %26099 = vst [vmem:[#allocation165_spill] sm:$0xff] %v21982_v43  ;;  %v8095_v51 = vrot.slane %v8093_v33, 4  ;;  %v8101_v3 = vrot.slane %v8099_v40, 3  ;;  %v17634_v23 = vpop.f32.mrf.mxu0  ;;  %v5060_v32 = vrot.slane %v21986_v45, 2 }
 0x2c3   : > { %v21990_v57 = vsel %vm7001_vm12, %v8078_v7, %v8087_v20  ;;  %v8104_v6 = vrot.slane %v8102_v41, 4  ;;  %v21992_v61 = vadd.f32 %v17668_v60, %v17634_v23  ;;  %v26102_v62 = vld [vmem:[#allocation23_spill] sm:$0xff]  ;;  %v26104_v33 = vrot.slane %v21012_v17, 2  ;;  %v26155_v47 = vld [vmem:[#allocation10_spill] sm:$0xff] }
 0x2c4   : > { %26101 = vst [vmem:[#allocation133_spill] sm:$0xff] %v21990_v57  ;;  %v26103_v52 = vrot.slane %v26102_v62, 2  ;;  %v8096_v43 = vor.u32 %v8095_v51, %v8092_v11  ;;  %v8108_v0 = vshrl.u32 %v26105_v2, 16  ;;  %v3093_v9 = vpop.f32.mrf.mxu0  ;;  %v4722_v55 = vor.u32 %v26107_v39, %v26106_v4  ;;  %v26108_v23 = vld [vmem:[#allocation127_spill] sm:$0xff] }
 0x2c5   : > { %v8105_v13 = vor.u32 %v8104_v6, %v8101_v3  ;;  %v8111_v7 = vshll.u32 %v26105_v2, 16  ;;  %v15708_v41 = vcombine.low %v21943_v35, %v7975_v16  ;;  %v22004_v60 = vadd.f32 %v3293_v30, %v3093_v9  ;;  %v3306_v16 = vpop.f32.mrf.mxu1  ;;  %v22018_v30 = vld [vmem:[#allocation2 + $0x68] sm:$0xff]   ;;  %v26113_v6 = vld [vmem:[#allocation114_spill] sm:$0xff] }
 0x2c6   : > { %v5059_v40 = vsel %vm3969_vm9, %v26104_v33, %v26103_v52  ;;  %v4731_v57 = vor.u32 %v4730_v24, %v26108_v23  ;;  %v22008_v17 = vsel %vm7001_vm12, %v8087_v20, %v8096_v43  ;;  %v8110_v52 = vrot.slane %v8108_v0, 3 }
 0x2c7   : > { %26109 = vst [vmem:[#allocation23_spill] sm:$0xff] %v22008_v17  ;;  %17870 = vmatmul.mubr.msk.bf16.gmra.mxu1 %vm2943_vm5, %v5059_v40  ;;  %v26110_v11 = vrot.slane %v26102_v62, 2  ;;  %v22015_v4 = vsel %vm7001_vm12, %v8096_v43, %v8105_v13  ;;  %v8113_v39 = vrot.slane %v8111_v7, 4  ;;  %v8117_v3 = vshrl.u32 %v15708_v41, 16 }
 0x2c8   : > { %26111 = vst [vmem:[#allocation117_spill] sm:$0xff] %v22015_v4  ;;  %v5062_v20 = vrot.slane %v22018_v30, 2  ;;  %v26112_v0 = vshrl.u32 %v26102_v62, 16  ;;  %v8120_v9 = vshll.u32 %v15708_v41, 16  ;;  %v4723_v33 = vsel %vm3643_vm8, %v26113_v6, %v4722_v55 }
 0x2c9   : > { %v5061_v51 = vsel %vm3969_vm9, %v26110_v11, %v5060_v32  ;;  %v26114_v40 = vshll.u32 %v26102_v62, 16  ;;  %v8114_v23 = vor.u32 %v8113_v39, %v8110_v52  ;;  %v8119_v7 = vrot.slane %v8117_v3, 3  ;;  %17832 = vmatmul.mubr.msk.bf16.gmra.mxu0 %vm2943_vm5, %v4723_v33  ;;  %v17672_v62 = vpop.f32.mrf.mxu1 }
 0x2ca   : > { %17873 = vmatprep.mubr.msk.bf16.mxu1 %vm2943_vm5, %v5061_v51  ;;  %v4736_v24 = vrot.slane %v26112_v0, 1  ;;  %v4732_v11 = vsel %vm3643_vm8, %v4722_v55, %v4731_v57  ;;  %v26115_v51 = vld [vmem:[#allocation24_spill] sm:$0xff]  ;;  %v8122_v0 = vrot.slane %v8120_v9, 4  ;;  %v5063_v39 = vsel %vm3969_vm9, %v5060_v32, %v5062_v20 }
 0x2cb   : > { %v4739_v43 = vrot.slane %v26114_v40, 2  ;;  %v26116_v4 = vshrl.u32 %v26115_v51, 16  ;;  %v26117_v35 = vshll.u32 %v26115_v51, 16  ;;  %17835 = vmatprep.mubr.msk.bf16.mxu0 %vm2943_vm5, %v4732_v11  ;;  %v22035_v41 = vsel %vm7001_vm12, %v8105_v13, %v8114_v23  ;;  %v3309_v13 = vpop.f32.mrf.mxu1 }
 0x2cc   : > { %26118 = vst [vmem:[#allocation118_spill] sm:$0xff] %v22035_v41  ;;  %v22037_v6 = vor.u32 %v8122_v0, %v8119_v7  ;;  %v5672_v37 = vrot.slane %v22018_v30, 3 }
 0x2cd   : > { %v4745_v17 = vrot.slane %v26116_v4, 1  ;;  %v4748_v54 = vrot.slane %v26117_v35, 2  ;;  %v4740_v52 = vor.u32 %v4739_v43, %v4736_v24  ;;  %v17637_v35 = vpop.f32.mrf.mxu0  ;;  %v26121_v4 = vld [vmem:[#allocation14_spill] sm:$0xff]  ;;  %v17675_v51 = vpop.f32.mrf.mxu1 }
 0x2ce   : > { %26119 = vst [vmem:[#allocation127_spill] sm:$0xff] %v22037_v6  ;;  %v22042_v55 = vsel %vm7001_vm12, %v8114_v23, %v22037_v6  ;;  %v26122_v9 = vrot.slane %v26121_v4, 2  ;;  %v22048_v40 = vadd.f32 %v17671_v29, %v17637_v35  ;;  %v26133_v6 = vld [vmem:[#allocation21_spill] sm:$0xff] }
 0x2cf   : > { %v4749_v3 = vor.u32 %v4748_v54, %v4745_v17  ;;  %26120 = vst [vmem:[#allocation114_spill] sm:$0xff] %v22042_v55  ;;  %17874 = vmatmul.mubr.msk.bf16.gmra.mxu1 %vm2943_vm5, %v5063_v39  ;;  %v4741_v24 = vsel %vm3643_vm8, %v4731_v57, %v4740_v52  ;;  %v3106_v32 = vpop.f32.mrf.mxu0  ;;  %v26123_v54 = vld [vmem:[#allocation27_spill] sm:$0xff]  ;;  %v3322_v57 = vpop.f32.mrf.mxu1 }
 0x2d0   : > { %v5065_v33 = vsel %vm3969_vm9, %v5062_v20, %v26122_v9  ;;  %v26124_v17 = vshrl.u32 %v26123_v54, 16  ;;  %v26125_v23 = vshll.u32 %v26123_v54, 16  ;;  %v22057_v11 = vadd.f32 %v3306_v16, %v3106_v32  ;;  %v26127_v54 = vld [vmem:[#allocation17_spill] sm:$0xff]  ;;  %v5641_v16 = vld [vmem:[#allocation2 + $0x8] sm:$0x8] }
 0x2d1   : > { %17877 = vmatprep.mubr.msk.bf16.mxu1 %vm2943_vm5, %v5065_v33  ;;  %17836 = vmatmul.mubr.msk.bf16.gmra.mxu0 %vm2943_vm5, %v4741_v24  ;;  %v4750_v20 = vsel %vm3643_vm8, %v4740_v52, %v4749_v3  ;;  %v17638_v29 = vpop.f32.mrf.mxu0  ;;  %v26126_v33 = vld [vmem:[#allocation16_spill] sm:$0xff]  ;;  %v17676_v24 = vpop.f32.mrf.mxu1 }
 0x2d2   : > { %v4754_v43 = vrot.slane %v26124_v17, 1  ;;  %v4757_v7 = vrot.slane %v26125_v23, 2  ;;  %17839 = vmatprep.mubr.msk.bf16.mxu0 %vm2943_vm5, %v4750_v20  ;;  %v22061_v0 = vadd.f32 %v17672_v62, %v17638_v29  ;;  %v19345_v32 = vld [vmem:[#allocation2 + $0xc] sm:$0xf]  ;;  %v26128_v62 = vld [vmem:[#allocation18_spill] sm:$0xff] }
 0x2d3   : > { %v3109_v39 = vpop.f32.mrf.mxu0  ;;  %v15523_v17 = vcombine.low %v5641_v16, %v19345_v32 }
 0x2d4   : > { %v4758_v35 = vor.u32 %v4757_v7, %v4754_v43  ;;  %v22063_v9 = vadd.f32 %v3309_v13, %v3109_v39  ;;  %v19346_v13 = vld [vmem:[#allocation2 + $0x10] sm:$0xff]   ;;  %v3325_v7 = vpop.f32.mrf.mxu1  ;;  %v26129_v39 = vld [vmem:[#allocation15_spill] sm:$0xff] }
 0x2d5   : > { %v5650_v43 = vrot.slane %v19346_v13, 3  ;;  %v5649_v20 = vrot.slane %v15523_v17, 3  ;;  %v26132_v13 = vld [vmem:[#allocation20_spill] sm:$0xff] }
 0x2d6   : > { %v4759_v52 = vsel %vm3643_vm8, %v4749_v3, %v4758_v35  ;;  %v4768_v23 = vsel %vm3643_vm8, %v4758_v35, %v26128_v62 }
 0x2d7   : > { %17878 = vmatmul.mubr.msk.bf16.gmra.mxu1 %vm2943_vm5, %v26126_v33  ;;  %v17679_v29 = vpop.f32.mrf.mxu1  ;;  %v26130_v33 = vrot.slane %v26129_v39, 2  ;;  %v5651_v3 = vsel %vm555_vm1, %v5649_v20, %v5650_v43  ;;  %v19347_v39 = vld [vmem:[#allocation2 + $0x18] sm:$0xff]  }
 0x2d8   : > { %17881 = vmatprep.mubr.msk.bf16.mxu1 %vm2943_vm5, %v26127_v54  ;;  %v17641_v54 = vpop.f32.mrf.mxu0 }
 0x2d9   : > { %17840 = vmatmul.mubr.msk.bf16.gmra.mxu0 %vm2943_vm5, %v4759_v52  ;;  %v22078_v16 = vadd.f32 %v17675_v51, %v17641_v54  ;;  %v26131_v52 = vld [vmem:[#allocation47_spill] sm:$0xff]  ;;  %v3338_v62 = vpop.f32.mrf.mxu1 }
 0x2da   : > { %17843 = vmatprep.mubr.msk.bf16.mxu0 %vm2943_vm5, %v4768_v23  ;;  %v5324_v35 = vshrl.u32 %v26131_v52, 16  ;;  %v5327_v32 = vshll.u32 %v26131_v52, 16  ;;  %v3122_v23 = vpop.f32.mrf.mxu0  ;;  %v19348_v54 = vld [vmem:[#allocation2 + $0x20] sm:$0xff]  }
 0x2db   : > { %v22085_v17 = vadd.f32 %v3322_v57, %v3122_v23  ;;  %v17680_v51 = vpop.f32.mrf.mxu1  ;;  %v22094_v57 = vld [vmem:[%s25499_s4 + $0x68] sm:$0xff]  }
 0x2dc   : > { %v17642_v20 = vpop.f32.mrf.mxu0  ;;  %v5326_v41 = vrot.slane %v5324_v35, 2  ;;  %v5329_v52 = vrot.slane %v5327_v32, 3  ;;  %v26134_v35 = vld [vmem:[#allocation128_spill] sm:$0xff] }
 0x2dd   : > { %v22089_v55 = vadd.f32 %v17676_v24, %v17642_v20  ;;  %v3341_v53 = vpop.f32.mrf.mxu1  ;;  %v26135_v20 = vld [vmem:[#allocation19_spill] sm:$0xff] }
 0x2de   : > { %v3125_v42 = vpop.f32.mrf.mxu0  ;;  %v5330_v24 = vor.u32 %v5329_v52, %v5326_v41  ;;  %v19350_v41 = vld [vmem:[#allocation2 + $0x30] sm:$0xff]  }
 0x2df   : > { %17882 = vmatmul.mubr.msk.bf16.gmra.mxu1 %vm2943_vm5, %v26130_v33  ;;  %v5652_v33 = vrot.slane %v19347_v39, 3  ;;  %v22096_v23 = vadd.f32 %v3325_v7, %v3125_v42  ;;  %v26136_v42 = vld [vmem:[#allocation22_spill] sm:$0xff]  ;;  %v19349_v7 = vld [vmem:[#allocation2 + $0x28] sm:$0xff]   ;;  %v5658_v52 = vrot.slane %v19350_v41, 3 }
 0x2e0   : > { %17921 = vmatprep.mubr.msk.bf16.mxu1 %vm2943_vm5, %v5651_v3  ;;  %v5654_v3 = vrot.slane %v19348_v54, 3  ;;  %v5656_v54 = vrot.slane %v19349_v7, 3 }
 0x2e1   : > { %17844 = vmatmul.mubr.msk.bf16.gmra.mxu0 %vm2943_vm5, %v26132_v13  ;;  %v5653_v13 = vsel %vm555_vm1, %v5650_v43, %v5652_v33  ;;  %v5334_v43 = vsel %vm5322_vm11, %v5330_v24, %v26136_v42 }
 0x2e2   : > { %17847 = vmatprep.mubr.msk.bf16.mxu0 %vm2943_vm5, %v26133_v6  ;;  %v17719_v6 = vpop.f32.mrf.mxu1  ;;  %v5655_v39 = vsel %vm555_vm1, %v5652_v33, %v5654_v3  ;;  %v17645_v51 = vpop.f32.mrf.mxu0  ;;  %v5657_v58 = vsel %vm555_vm1, %v5654_v3, %v5656_v54  ;;  %v5659_v24 = vsel %vm555_vm1, %v5656_v54, %v5658_v52  ;;  %v19351_v3 = vld [vmem:[#allocation2 + $0x38] sm:$0xff]  }
 0x2e3   : > { %v5660_v7 = vrot.slane %v19351_v3, 3  ;;  %v26140_v54 = vld [vmem:[#allocation26_spill] sm:$0xff] }
 0x2e4   : > { %v3805_v32 = vpop.f32.mrf.mxu1 }
 0x2e5   : > { %v5661_v3 = vsel %vm555_vm1, %v5658_v52, %v5660_v7 }
 0x2e6   : > { %v17720_v33 = vpop.f32.mrf.mxu1 }
 0x2e7   : > { %17922 = vmatmul.mubr.msk.bf16.vlgmr.msra.gmra.mxu1 %vm2943_vm5, %v5653_v13  ;;  %v22108_v13 = vadd.f32 %v17679_v29, %v17645_v51  ;;  %v22120_v29 = vld [vmem:[%s25499_s4 + $0x60] sm:$0xff]  }
 0x2e8   : > { %17925 = vmatprep.mubr.msk.bf16.mxu1 %vm2943_vm5, %v5655_v39  ;;  %17988 = vmatpush3.bf16.msra.mxu1 %v26134_v35  ;;  %v3138_v39 = vpop.f32.mrf.mxu0  ;;  %v3808_v15 = vpop.f32.mrf.mxu1  ;;  %26137 = vst [vmem:[#allocation24_spill] sm:$0xff] %v22120_v29 }
 0x2e9   : > { %18055 = vmatprep.subr.bf16.mxu1 %v22094_v57  ;;  %17848 = vmatmul.mubr.msk.bf16.gmra.mxu0 %vm2943_vm5, %v26135_v20  ;;  %v22111_v35 = vadd.f32 %v3338_v62, %v3138_v39 }
 0x2ea   : > { %17887 = vmatprep.mubr.msk.bf16.mxu0 %vm2943_vm5, %v5334_v43  ;;  %v17646_v25 = vpop.f32.mrf.mxu0  ;;  %v17723_v20 = vpop.f32.mrf.mxu1 }
 0x2eb   : > { %v26138_v25 = vld [vmem:[#allocation25_spill] sm:$0xff] }
 0x2ec   : > { %v3141_v42 = vpop.f32.mrf.mxu0  ;;  %v3821_v62 = vpop.f32.mrf.mxu1 }
 0x2ed   : > { %v22122_v51 = vadd.f32 %v3341_v53, %v3141_v42  ;;  %v26141_v53 = vld [vmem:[#allocation77_spill] sm:$0xff] }
 0x2ee   : > { %v17685_v43 = vpop.f32.mrf.mxu0  ;;  %v17724_v39 = vpop.f32.mrf.mxu1 }
 0x2ef   : > { %17926 = vmatmul.mubr.msk.bf16.gmra.mxu1 %vm2943_vm5, %v5657_v58  ;;  %v26139_v58 = vld [vmem:[#allocation75_spill] sm:$0xff] }
 0x2f0   : > { %17929 = vmatprep.mubr.msk.bf16.mxu1 %vm2943_vm5, %v5659_v24  ;;  %v3607_v41 = vadd.f32 %v17685_v43, %v26139_v58  ;;  %v19352_v24 = vld [vmem:[#allocation2 + $0x40] sm:$0xff]   ;;  %v3479_v36 = vpop.f32.mrf.mxu0  ;;  %v3824_v10 = vpop.f32.mrf.mxu1  ;;  %v26142_v43 = vld [vmem:[#allocation88_spill] sm:$0xff] }
 0x2f1   : > { %17888 = vmatmul.mubr.msk.bf16.vlgmr.msra.gmra.mxu0 %vm2943_vm5, %v26138_v25  ;;  %v5662_v22 = vrot.slane %v19352_v24, 3  ;;  %v3605_v42 = vadd.f32 %v3479_v36, %v26141_v53  ;;  %v26143_v58 = vld [vmem:[#allocation82_spill] sm:$0xff]  ;;  %v26147_v53 = vld [vmem:[#allocation28_spill] sm:$0xff] }
 0x2f2   : > { %17891 = vmatprep.mubr.msk.bf16.mxu0 %vm2943_vm5, %v26140_v54  ;;  %17954 = vmatpush3.bf16.msra.mxu0 %v21882_v12  ;;  %v22132_v19 = vadd.f32 %v17719_v6, %v3607_v41  ;;  %v17686_v25 = vpop.f32.mrf.mxu0  ;;  %v3230_v1 = vadd.f32 %v26143_v58, %v26142_v43  ;;  %v26144_v54 = vld [vmem:[#allocation78_spill] sm:$0xff]  ;;  %v17727_v59 = vpop.f32.mrf.mxu1  ;;  %v19353_v43 = vld [vmem:[#allocation2 + $0x48] sm:$0xff]   ;;  %v26148_v58 = vld [vmem:[#allocation93_spill] sm:$0xff] }
 0x2f3   : > { %18021 = vmatprep.subr.bf16.mxu0 %v22120_v29  ;;  %v3608_v5 = vadd.f32 %v17686_v25, %v26144_v54  ;;  %v5663_v12 = vsel %vm555_vm1, %v5660_v7, %v5662_v22  ;;  %v22140_v24 = vadd.f32 %v3805_v32, %v3605_v42  ;;  %v5664_v25 = vrot.slane %v19353_v43, 3  ;;  %v19354_v7 = vld [vmem:[#allocation2 + $0x50] sm:$0xff]  }
 0x2f4   : > { %v3482_v48 = vpop.f32.mrf.mxu0  ;;  %v3837_v6 = vpop.f32.mrf.mxu1  ;;  %v5666_v42 = vrot.slane %v19354_v7, 3 }
 0x2f5   : > { %26145 = vst [vmem:[#allocation14_spill] sm:$0xff] %v22140_v24  ;;  %v3606_v36 = vadd.f32 %v3482_v48, %v3230_v1  ;;  %v22143_v41 = vadd.f32 %v17720_v33, %v3608_v5  ;;  %v26151_v1 = vld [vmem:[#allocation9_spill] sm:$0xff] }
 0x2f6   : > { %v17689_v52 = vpop.f32.mrf.mxu0  ;;  %v17728_v32 = vpop.f32.mrf.mxu1 }
 0x2f7   : > { %17930 = vmatmul.mubr.msk.bf16.gmra.mxu1 %vm2943_vm5, %v5661_v3  ;;  %26146 = vst [vmem:[#allocation27_spill] sm:$0xff] %v22143_v41  ;;  %v3611_v54 = vadd.f32 %v17689_v52, %v26148_v58  ;;  %v26149_v3 = vld [vmem:[#allocation29_spill] sm:$0xff]  ;;  %v22150_v2 = vadd.f32 %v3808_v15, %v3606_v36  ;;  %v5665_v52 = vsel %vm555_vm1, %v5662_v22, %v5664_v25  ;;  %v26153_v58 = vld [vmem:[#allocation110_spill] sm:$0xff] }
 0x2f8   : > { %17933 = vmatprep.mubr.msk.bf16.mxu1 %vm2943_vm5, %v5663_v12  ;;  %v3495_v48 = vpop.f32.mrf.mxu0  ;;  %v22153_v33 = vpop.f32.mrf.mxu1  ;;  %v5667_v15 = vsel %vm555_vm1, %v5664_v25, %v5666_v42  ;;  %v9792_v41 = vld [vmem:[#allocation2 + $0xa0] sm:$0x1] }
 0x2f9   : > { %17892 = vmatmul.mubr.msk.bf16.gmra.mxu0 %vm2943_vm5, %v26147_v53  ;;  %26150 = vst [vmem:[#allocation16_spill] sm:$0xff] %v22150_v2  ;;  %v3609_v5 = vadd.f32 %v3495_v48, %v26151_v1  ;;  %v22155_v12 = vadd.f32 %v17723_v20, %v3611_v54  ;;  %v22157_v53 = vld [vmem:[#allocation2 + $0x28] sm:$0xf]  ;;  %v10248_v20 = vld [vmem:[#allocation2 + $0x24] sm:$0xe]  ;;  %v22170_v48 = vld [vmem:[#allocation2 + $0x2c] sm:$0xff]  }
 0x2fa   : > { %17895 = vmatprep.mubr.msk.bf16.mxu0 %vm2943_vm5, %v26149_v3  ;;  %v17690_v43 = vpop.f32.mrf.mxu0  ;;  %v3246_v3 = vadd.f32 %v26154_v14, %v26153_v58  ;;  %v22163_v7 = vpop.f32.mrf.mxu1  ;;  %v22173_v22 = vcombine.low %v10248_v20, %v22157_v53  ;;  %v5670_v20 = vrot.slane %v21986_v45, 3 }
 0x2fb   : > { %26152 = vst [vmem:[#allocation17_spill] sm:$0xff] %v22155_v12  ;;  %v3612_v46 = vadd.f32 %v17690_v43, %v26155_v47  ;;  %v22167_v36 = vadd.f32 %v3821_v62, %v3609_v5  ;;  %v19355_v62 = vld [vmem:[#allocation2 + $0x58] sm:$0xff]   ;;  %v26160_v5 = vld [vmem:[#allocation111_spill] sm:$0xff] }
 0x2fc   : > { %v3498_v54 = vpop.f32.mrf.mxu0  ;;  %26157 = vst [vmem:[#allocation15_spill] sm:$0xff] %v22173_v22  ;;  %v22175_v1 = vpop.f32.mrf.mxu1  ;;  %v5668_v25 = vrot.slane %v19355_v62, 3  ;;  %v10256_v62 = vrot.slane %v22170_v48, 1 }
 0x2fd   : > { %26156 = vst [vmem:[#allocation18_spill] sm:$0xff] %v22167_v36  ;;  %v3610_v14 = vadd.f32 %v3498_v54, %v3246_v3  ;;  %v22177_v47 = vadd.f32 %v17724_v39, %v3612_v46  ;;  %v22189_v54 = vld [vmem:[#allocation2 + $0x34] sm:$0xff]   ;;  %v22191_v39 = vld [vmem:[#allocation2 + $0x3c] sm:$0xff]  }
 0x2fe   : > { %v17693_v43 = vpop.f32.mrf.mxu0  ;;  %v5669_v45 = vsel %vm555_vm1, %v5666_v42, %v5668_v25  ;;  %v5925_v42 = vld [vmem:[#allocation2 + $0x10] sm:$0xc] }
 0x2ff   : > { %17934 = vmatmul.mubr.msk.bf16.gmra.mxu1 %vm2943_vm5, %v5665_v52  ;;  %26158 = vst [vmem:[#allocation47_spill] sm:$0xff] %v22177_v47  ;;  %v26159_v52 = vld [vmem:[#allocation30_spill] sm:$0xff]  ;;  %v3615_v58 = vadd.f32 %v17693_v43, %v26160_v5  ;;  %v22187_v3 = vadd.f32 %v3824_v10, %v3610_v14  ;;  %v22201_v10 = vld [vmem:[#allocation2 + $0x14] sm:$0xf] }
 0x300   : > { %17937 = vmatprep.mubr.msk.bf16.mxu1 %vm2943_vm5, %v5667_v15  ;;  %v22184_v15 = vpop.f32.mrf.mxu1  ;;  %v3511_v46 = vpop.f32.mrf.mxu0  ;;  %26165 = vst [vmem:[#allocation128_spill] sm:$0xff] %v22201_v10 }
 0x301   : > { %17896 = vmatmul.mubr.msk.bf16.gmra.mxu0 %vm2943_vm5, %v26159_v52  ;;  %26162 = vst [vmem:[#allocation20_spill] sm:$0xff] %v22187_v3  ;;  %v10255_v52 = vrot.slane %v22173_v22, 1  ;;  %v3613_v43 = vadd.f32 %v3511_v46, %v26163_v50  ;;  %v5671_v50 = vsel %vm555_vm1, %v5668_v25, %v5670_v20  ;;  %v22215_v22 = vld [vmem:[#allocation2 + $0x44] sm:$0xff]   ;;  %v22224_v25 = vcombine.low %v5925_v42, %v22201_v10 }
 0x302   : > { %17899 = vmatprep.mubr.msk.bf16.mxu0 %vm2943_vm5, %v26161_v63  ;;  %v22196_v5 = vpop.f32.mrf.mxu1  ;;  %v22198_v63 = vadd.f32 %v17727_v59, %v3615_v58  ;;  %v17694_v38 = vpop.f32.mrf.mxu0  ;;  %v10258_v59 = vrot.slane %v22189_v54, 1  ;;  %v10262_v30 = vrot.slane %v22215_v22, 1 }
 0x303   : > { %v22204_v14 = vsel %vm3359_vm6, %v10255_v52, %v10256_v62  ;;  %v3616_v27 = vadd.f32 %v17694_v38, %v26167_v34  ;;  %v22211_v46 = vadd.f32 %v3837_v6, %v3613_v43  ;;  %v22217_v52 = vld [vmem:[#allocation2 + $0x4c] sm:$0xff]   ;;  %v10260_v38 = vrot.slane %v22191_v39, 1 }
 0x304   : > { %26164 = vst [vmem:[#allocation21_spill] sm:$0xff] %v22198_v63  ;;  %26166 = vst [vmem:[#allocation19_spill] sm:$0xff] %v22204_v14  ;;  %v22207_v44 = vpop.f32.mrf.mxu1  ;;  %v3514_v58 = vpop.f32.mrf.mxu0  ;;  %v26169_v34 = vld [vmem:[#allocation132_spill] sm:$0xff]  ;;  %v22229_v43 = vsel %vm3359_vm6, %v10256_v62, %v10258_v59  ;;  %v26187_v63 = vld [vmem:[#allocation51_spill] sm:$0xff] }
 0x305   : > { %26168 = vst [vmem:[#allocation22_spill] sm:$0xff] %v22211_v46  ;;  %v3614_v14 = vadd.f32 %v3514_v58, %v26169_v34  ;;  %v22226_v6 = vadd.f32 %v17728_v32, %v3616_v27  ;;  %26171 = vst [vmem:[#allocation75_spill] sm:$0xff] %v22229_v43  ;;  %v22235_v18 = vsel %vm3359_vm6, %v10258_v59, %v10260_v38  ;;  %v26174_v34 = vld [vmem:[#allocation33_spill] sm:$0xff]  ;;  %v22247_v43 = vld [vmem:[#allocation2 + $0x5c] sm:$0xff]   ;;  %v10264_v59 = vrot.slane %v22217_v52, 1 }
 0x306   : > { %v22221_v26 = vpop.f32.mrf.mxu1  ;;  %26173 = vst [vmem:[#allocation26_spill] sm:$0xff] %v22235_v18  ;;  %v22245_v32 = vld [vmem:[#allocation2 + $0x54] sm:$0xff]   ;;  %v6327_v18 = vshll.u32 %v22224_v25, 16  ;;  %v22261_v10 = vsel %vm3359_vm6, %v10260_v38, %v10262_v30  ;;  %v22278_v38 = vld [vmem:[#allocation2 + $0x6c] sm:$0xff]   ;;  %v26186_v46 = vld [vmem:[#allocation35_spill] sm:$0xff]  ;;  %v26189_v47 = vshll.u32 %v26187_v63, 16 }
 0x307   : > { %17938 = vmatmul.mubr.msk.bf16.gmra.mxu1 %vm2943_vm5, %v5669_v45  ;;  %26170 = vst [vmem:[#allocation25_spill] sm:$0xff] %v22226_v6  ;;  %v17697_v45 = vpop.f32.mrf.mxu0  ;;  %v22243_v27 = vadd.f32 %v22153_v33, %v3614_v14  ;;  %v5673_v14 = vsel %vm555_vm1, %v5670_v20, %v5672_v37  ;;  %26177 = vst [vmem:[#allocation82_spill] sm:$0xff] %v22261_v10 }
 0x308   : > { %17941 = vmatprep.mubr.msk.bf16.mxu1 %vm2943_vm5, %v5671_v50  ;;  %v26172_v50 = vld [vmem:[#allocation32_spill] sm:$0xff]  ;;  %v3619_v58 = vadd.f32 %v17697_v45, %v21875_v21  ;;  %v22240_v42 = vpop.f32.mrf.mxu1  ;;  %v6324_v45 = vshrl.u32 %v22224_v25, 16 }
 0x309   : > { %17900 = vmatmul.mubr.msk.bf16.gmra.mxu0 %vm2943_vm5, %v26172_v50  ;;  %26175 = vst [vmem:[#allocation77_spill] sm:$0xff] %v22243_v27  ;;  %v3527_v62 = vpop.f32.mrf.mxu0  ;;  %v22264_v27 = vsel %vm3359_vm6, %v10262_v30, %v10264_v59  ;;  %v10266_v30 = vrot.slane %v22245_v32, 1 }
 0x30a   : > { %17903 = vmatprep.mubr.msk.bf16.mxu0 %vm2943_vm5, %v26174_v34  ;;  %v3617_v50 = vadd.f32 %v3527_v62, %v21892_v8  ;;  %v22252_v21 = vpop.f32.mrf.mxu1  ;;  %v22256_v34 = vadd.f32 %v22163_v7, %v3619_v58  ;;  %26178 = vst [vmem:[#allocation78_spill] sm:$0xff] %v22264_v27  ;;  %v26179_v7 = vrot.slane %v26121_v4, 3 }
 0x30b   : > { %v17698_v33 = vpop.f32.mrf.mxu0  ;;  %v22294_v6 = vsel %vm3359_vm6, %v10264_v59, %v10266_v30  ;;  %v26191_v59 = vld [vmem:[#allocation37_spill] sm:$0xff] }
 0x30c   : > { %26176 = vst [vmem:[#allocation88_spill] sm:$0xff] %v22256_v34  ;;  %v3620_v8 = vadd.f32 %v17698_v33, %v21903_v49  ;;  %v22267_v62 = vpop.f32.mrf.mxu1  ;;  %v5675_v58 = vsel %vm555_vm1, %v5672_v37, %v26179_v7  ;;  %v22274_v20 = vadd.f32 %v22175_v1, %v3617_v50  ;;  %v22276_v34 = vld [vmem:[#allocation2 + $0x64] sm:$0xff]   ;;  %v26181_v49 = vld [vmem:[#allocation50_spill] sm:$0xff]  ;;  %v10268_v37 = vrot.slane %v22247_v43, 1  ;;  %26185 = vst [vmem:[#allocation29_spill] sm:$0xff] %v22294_v6 }
 0x30d   : > { %v3530_v27 = vpop.f32.mrf.mxu0  ;;  %v26182_v33 = vshrl.u32 %v26181_v49, 16  ;;  %v6326_v7 = vrot.slane %v6324_v45, 2 }
 0x30e   : > { %26180 = vst [vmem:[#allocation28_spill] sm:$0xff] %v22274_v20  ;;  %v3618_v1 = vadd.f32 %v3530_v27, %v21914_v56  ;;  %v22288_v50 = vpop.f32.mrf.mxu1  ;;  %v22291_v20 = vadd.f32 %v22184_v15, %v3620_v8  ;;  %v6346_v56 = vrot.slane %v26189_v47, 3  ;;  %v22302_v27 = vld [vmem:[#allocation2 + $0x74] sm:$0xff]   ;;  %v22305_v45 = vsel %vm3359_vm6, %v10266_v30, %v10268_v37  ;;  %v26193_v30 = vld [vmem:[#allocation52_spill] sm:$0xff] }
 0x30f   : > { %17942 = vmatmul.mubr.msk.bf16.gmra.mxu1 %vm2943_vm5, %v5673_v14  ;;  %v6334_v10 = vrot.slane %v26182_v33, 2  ;;  %v26183_v14 = vshll.u32 %v26181_v49, 16  ;;  %v6329_v33 = vrot.slane %v6327_v18, 3  ;;  %26190 = vst [vmem:[#allocation9_spill] sm:$0xff] %v22305_v45  ;;  %v10272_v47 = vrot.slane %v22278_v38, 1 }
 0x310   : > { %17945 = vmatprep.mubr.msk.bf16.mxu1 %vm2943_vm5, %v5675_v58  ;;  %26184 = vst [vmem:[#allocation93_spill] sm:$0xff] %v22291_v20  ;;  %v17701_v58 = vpop.f32.mrf.mxu0  ;;  %v22310_v8 = vpop.f32.mrf.mxu1  ;;  %v22313_v18 = vadd.f32 %v22196_v5, %v3618_v1  ;;  %v26194_v45 = vshrl.u32 %v26193_v30, 16 }
 0x311   : > { %v6337_v4 = vrot.slane %v26183_v14, 3  ;;  %17904 = vmatmul.mubr.msk.bf16.gmra.mxu0 %vm2943_vm5, %v26186_v46  ;;  %v26188_v14 = vshrl.u32 %v26187_v63, 16  ;;  %v3623_v15 = vadd.f32 %v17701_v58, %v21968_v31  ;;  %v22315_v46 = vld [vmem:[#allocation2 + $0x7c] sm:$0xff]   ;;  %v26195_v31 = vshll.u32 %v26193_v30, 16 }
 0x312   : > { %17907 = vmatprep.mubr.msk.bf16.mxu0 %vm2943_vm5, %v26191_v59  ;;  %26192 = vst [vmem:[#allocation110_spill] sm:$0xff] %v22313_v18  ;;  %v3543_v6 = vpop.f32.mrf.mxu0  ;;  %v6352_v36 = vrot.slane %v26194_v45, 2  ;;  %v22324_v12 = vpop.f32.mrf.mxu1  ;;  %v22335_v45 = vld [vmem:[#allocation2 + $0x84] sm:$0xff]  }
 0x313   : > { %v6343_v3 = vrot.slane %v26188_v14, 2  ;;  %v10270_v14 = vrot.slane %v22276_v34, 1  ;;  %v6338_v20 = vor.u32 %v6337_v4, %v6334_v10  ;;  %v6355_v58 = vrot.slane %v26195_v31, 3 }
 0x314   : > { %v3621_v59 = vadd.f32 %v3543_v6, %v21979_v28  ;;  %v22327_v5 = vadd.f32 %v22207_v44, %v3623_v15  ;;  %v17702_v10 = vpop.f32.mrf.mxu0  ;;  %v6330_v4 = vor.u32 %v6329_v33, %v6326_v7  ;;  %v10274_v31 = vrot.slane %v22302_v27, 1  ;;  %v22339_v6 = vpop.f32.mrf.mxu1  ;;  %v26199_v44 = vld [vmem:[#allocation36_spill] sm:$0xff]  ;;  %v26201_v33 = vld [vmem:[#allocation38_spill] sm:$0xff] }
 0x315   : > { %v22330_v1 = vsel %vm3359_vm6, %v10268_v37, %v10270_v14  ;;  %v22333_v18 = vsel %vm3359_vm6, %v10270_v14, %v10272_v47  ;;  %v6347_v2 = vor.u32 %v6346_v56, %v6343_v3  ;;  %v3624_v28 = vadd.f32 %v17702_v10, %v21992_v61  ;;  %v22346_v15 = vld [vmem:[#allocation2 + $0x8c] sm:$0xff]   ;;  %v22354_v61 = vld [vmem:[#allocation2 + $0x94] sm:$0xff]   ;;  %v9791_v10 = vld [vmem:[#allocation2 + $0x9c] sm:$0xf] }
 0x316   : > { %26196 = vst [vmem:[#allocation103_spill] sm:$0xff] %v22327_v5  ;;  %26197 = vst [vmem:[#allocation10_spill] sm:$0xff] %v22330_v1  ;;  %v22344_v37 = vadd.f32 %v22221_v26, %v3621_v59  ;;  %v10276_v7 = vrot.slane %v22315_v46, 1  ;;  %v3546_v3 = vpop.f32.mrf.mxu0  ;;  %v6339_v56 = vsel %vm5322_vm11, %v6330_v4, %v6338_v20  ;;  %v22352_v14 = vor.u32 %v6355_v58, %v6352_v36  ;;  %v22360_v59 = vpop.f32.mrf.mxu1  ;;  %v26206_v58 = vld [vmem:[#allocation39_spill] sm:$0xff] }
 0x317   : > { %26198 = vst [vmem:[#allocation30_spill] sm:$0xff] %v22333_v18  ;;  %17946 = vmatmul.mubr.msk.bf16.gmra.mxu1 %vm2943_vm5, %v26199_v44  ;;  %v22357_v44 = vsel %vm3359_vm6, %v10272_v47, %v10274_v31  ;;  %v3622_v26 = vadd.f32 %v3546_v3, %v22004_v60  ;;  %v22363_v18 = vadd.f32 %v22240_v42, %v3624_v28  ;;  %v26207_v60 = vld [vmem:[#allocation53_spill] sm:$0xff]  ;;  %v10278_v42 = vrot.slane %v22335_v45, 1  ;;  %v26209_v28 = vld [vmem:[#allocation40_spill] sm:$0xff] }
 0x318   : > { %26200 = vst [vmem:[#allocation111_spill] sm:$0xff] %v22344_v37  ;;  %17949 = vmatprep.mubr.msk.bf16.mxu1 %vm2943_vm5, %v26201_v33  ;;  %26202 = vst [vmem:[#allocation31_spill] sm:$0xff] %v22357_v44  ;;  %v22365_v1 = vcombine.low %v9791_v10, %v9792_v41  ;;  %v22368_v33 = vsel %vm3359_vm6, %v10274_v31, %v10276_v7  ;;  %v17705_v36 = vpop.f32.mrf.mxu0  ;;  %v22373_v4 = vsel %vm5322_vm11, %v6338_v20, %v6347_v2  ;;  %v22384_v31 = vpop.f32.mrf.mxu1 }
 0x319   : > { %26203 = vst [vmem:[#allocation113_spill] sm:$0xff] %v22363_v18  ;;  %26205 = vst [vmem:[#allocation132_spill] sm:$0xff] %v22368_v33  ;;  %17908 = vmatmul.mubr.msk.bf16.gmra.mxu0 %vm2943_vm5, %v26206_v58  ;;  %v26208_v3 = vshrl.u32 %v26207_v60, 16  ;;  %v3627_v41 = vadd.f32 %v17705_v36, %v22048_v40  ;;  %v26210_v58 = vshll.u32 %v26207_v60, 16  ;;  %v22391_v20 = vadd.f32 %v22252_v21, %v3622_v26  ;;  %v26212_v40 = vld [vmem:[#allocation54_spill] sm:$0xff] }
 0x31a   : > { %26204 = vst [vmem:[#allocation121_spill] sm:$0xff] %v22365_v1  ;;  %17911 = vmatprep.mubr.msk.bf16.mxu0 %vm2943_vm5, %v26209_v28  ;;  %v10280_v47 = vrot.slane %v22346_v15, 1  ;;  %v22396_v18 = vsel %vm5322_vm11, %v6347_v2, %v22352_v14  ;;  %v26213_v36 = vshrl.u32 %v26212_v40, 16  ;;  %v22403_v28 = vsel %vm3359_vm6, %v10276_v7, %v10278_v42  ;;  %v22407_v21 = vpop.f32.mrf.mxu1 }
 0x31b   : > { %v22378_v44 = vrot.slane %v26208_v3, 2  ;;  %v22388_v33 = vrot.slane %v26210_v58, 3  ;;  %26211 = vst [vmem:[#allocation32_spill] sm:$0xff] %v22391_v20  ;;  %v3559_v3 = vpop.f32.mrf.mxu0  ;;  %26214 = vst [vmem:[#allocation33_spill] sm:$0xff] %v22403_v28  ;;  %v10282_v58 = vrot.slane %v22354_v61, 1  ;;  %v22410_v26 = vadd.f32 %v22267_v62, %v3627_v41 }
 0x31c   : > { %v22400_v37 = vrot.slane %v26213_v36, 2  ;;  %v3625_v5 = vadd.f32 %v3559_v3, %v22057_v11  ;;  %v10531_v20 = vld [vmem:[#allocation2 + $0xa0] sm:$0x3]  ;;  %v22413_v2 = vsel %vm3359_vm6, %v10278_v42, %v10280_v47  ;;  %v10856_v36 = vld [vmem:[#allocation2 + $0x24] sm:$0xc]  ;;  %v26216_v7 = vshll.u32 %v26212_v40, 16  ;;  %v22426_v3 = vpop.f32.mrf.mxu1 }
 0x31d   : > { %26215 = vst [vmem:[#allocation50_spill] sm:$0xff] %v22413_v2  ;;  %v17706_v24 = vpop.f32.mrf.mxu0  ;;  %v22421_v29 = vsel %vm3359_vm6, %v10280_v47, %v10282_v58  ;;  %v15928_v11 = vcombine.low %v10856_v36, %v22157_v53  ;;  %v10864_v62 = vrot.slane %v22170_v48, 2  ;;  %v26218_v42 = vld [vmem:[#allocation34_spill] sm:$0xff]  ;;  %v10866_v53 = vrot.slane %v22189_v54, 2 }
 0x31e   : > { %v22418_v28 = vrot.slane %v26216_v7, 3  ;;  %26217 = vst [vmem:[#allocation35_spill] sm:$0xff] %v22421_v29  ;;  %v3628_v41 = vadd.f32 %v17706_v24, %v22061_v0  ;;  %v26219_v2 = vrot.slane %v26218_v42, 3  ;;  %v22432_v60 = vadd.f32 %v22288_v50, %v3625_v5  ;;  %v22446_v5 = vpop.f32.mrf.mxu1 }
 0x31f   : > { %v26220_v7 = vrot.slane %v22365_v1, 1  ;;  %v3562_v36 = vpop.f32.mrf.mxu0  ;;  %v22441_v0 = vcombine.low %v9791_v10, %v10531_v20  ;;  %v10863_v24 = vrot.slane %v15928_v11, 2  ;;  %v10868_v48 = vrot.slane %v22191_v39, 2  ;;  %v26224_v10 = vld [vmem:[#allocation41_spill] sm:$0xff]  ;;  %v26288_v1 = vld [vmem:[#allocation128_spill] sm:$0xff] }
 0x320   : > { %17950 = vmatmul.mubr.msk.bf16.gmra.mxu1 %vm2943_vm5, %v26219_v2  ;;  %v10870_v2 = vrot.slane %v22215_v22, 2  ;;  %v3626_v50 = vadd.f32 %v3562_v36, %v22063_v9  ;;  %v22449_v42 = vadd.f32 %v22310_v8, %v3628_v41  ;;  %v10872_v54 = vrot.slane %v22217_v52, 2  ;;  %v26228_v11 = vld [vmem:[#allocation45_spill] sm:$0xff]  ;;  %v17748_v52 = vpop.f32.mrf.mxu1 }
 0x321   : > { %v22437_v47 = vsel %vm3359_vm6, %v10282_v58, %v26220_v7  ;;  %17989 = vmatprep.mubr.msk.bf16.mxu1 %vm2943_vm5, %v6339_v56  ;;  %26222 = vst [vmem:[#allocation37_spill] sm:$0xff] %v22441_v0  ;;  %v22452_v58 = vsel %vm3969_vm9, %v10864_v62, %v10866_v53  ;;  %v17709_v56 = vpop.f32.mrf.mxu0  ;;  %17912 = vmatmul.mubr.msk.bf16.gmra.mxu0 %vm2943_vm5, %v26224_v10  ;;  %v10874_v8 = vrot.slane %v22245_v32, 2  ;;  %v10876_v7 = vrot.slane %v22247_v43, 2  ;;  %v22492_v43 = vld [vmem:[%s25499_s4 + $0x78] sm:$0xff]  }
 0x322   : > { %26221 = vst [vmem:[#allocation51_spill] sm:$0xff] %v22437_v47  ;;  %26223 = vst [vmem:[#allocation52_spill] sm:$0xff] %v22452_v58  ;;  %v22458_v39 = vsel %vm3969_vm9, %v10863_v24, %v10864_v62  ;;  %v22461_v22 = vsel %vm3969_vm9, %v10866_v53, %v10868_v48  ;;  %v22464_v9 = vsel %vm3969_vm9, %v10868_v48, %v10870_v2  ;;  %17915 = vmatprep.mubr.msk.bf16.mxu0 %vm2943_vm5, %v26228_v11 }
 0x323   : > { %26225 = vst [vmem:[#allocation36_spill] sm:$0xff] %v22458_v39  ;;  %26226 = vst [vmem:[#allocation38_spill] sm:$0xff] %v22461_v22  ;;  %v3631_v20 = vadd.f32 %v17709_v56, %v22078_v16  ;;  %v22471_v41 = vadd.f32 %v22324_v12, %v3626_v50  ;;  %v22474_v62 = vsel %vm3969_vm9, %v10870_v2, %v10872_v54  ;;  %v3575_v53 = vpop.f32.mrf.mxu0  ;;  %v10878_v32 = vrot.slane %v22276_v34, 2  ;;  %v22484_v56 = vpop.f32.mrf.mxu1 }
 0x324   : > { %26227 = vst [vmem:[#allocation39_spill] sm:$0xff] %v22464_v9  ;;  %26229 = vst [vmem:[#allocation40_spill] sm:$0xff] %v22474_v62  ;;  %v22478_v36 = vsel %vm3969_vm9, %v10872_v54, %v10874_v8  ;;  %v10880_v16 = vrot.slane %v22278_v38, 2  ;;  %v10882_v24 = vrot.slane %v22302_v27, 2  ;;  %v3629_v48 = vadd.f32 %v3575_v53, %v22085_v17  ;;  %v26238_v53 = vld [vmem:[#allocation44_spill] sm:$0xff] }
 0x325   : > { %26230 = vst [vmem:[#allocation54_spill] sm:$0xff] %v22478_v36  ;;  %v22487_v12 = vadd.f32 %v22339_v6, %v3631_v20  ;;  %v22495_v2 = vsel %vm3969_vm9, %v10874_v8, %v10876_v7  ;;  %v10884_v34 = vrot.slane %v22315_v46, 2  ;;  %v17710_v38 = vpop.f32.mrf.mxu0  ;;  %v22499_v27 = vsel %vm3969_vm9, %v10876_v7, %v10878_v32  ;;  %v22509_v10 = vpop.f32.mrf.mxu1  ;;  %v26278_v36 = vld [vmem:[#allocation25_spill] sm:$0xff] }
 0x326   : > { %26231 = vst [vmem:[#allocation34_spill] sm:$0xff] %v22495_v2  ;;  %26232 = vst [vmem:[#allocation41_spill] sm:$0xff] %v22499_v27  ;;  %v22502_v17 = vsel %vm3969_vm9, %v10878_v32, %v10880_v16  ;;  %v22505_v6 = vsel %vm3969_vm9, %v10880_v16, %v10882_v24  ;;  %v10886_v50 = vrot.slane %v22335_v45, 2  ;;  %v3632_v54 = vadd.f32 %v17710_v38, %v22089_v55 }
 0x327   : > { %26233 = vst [vmem:[#allocation45_spill] sm:$0xff] %v22502_v17  ;;  %26234 = vst [vmem:[#allocation166_spill] sm:$0xff] %v22505_v6  ;;  %v22514_v46 = vadd.f32 %v22360_v59, %v3629_v48  ;;  %v22517_v8 = vsel %vm3969_vm9, %v10882_v24, %v10884_v34  ;;  %v10888_v20 = vrot.slane %v22346_v15, 2  ;;  %v3578_v11 = vpop.f32.mrf.mxu0  ;;  %v6040_v45 = vrot.slane %v22224_v25, 2  ;;  %v22530_v7 = vpop.f32.mrf.mxu1  ;;  %v26262_v6 = vld [vmem:[#allocation66_spill] sm:$0xff] }
 0x328   : > { %17990 = vmatmul.mubr.msk.bf16.vlgmr.msra.gmra.mxu1 %vm2943_vm5, %v22373_v4  ;;  %26235 = vst [vmem:[#allocation167_spill] sm:$0xff] %v22517_v8  ;;  %v22525_v55 = vsel %vm3969_vm9, %v10884_v34, %v10886_v50  ;;  %v10890_v4 = vrot.slane %v22354_v61, 2  ;;  %v25692_v59 = vrot.slane %v22441_v0, 2  ;;  %v3630_v52 = vadd.f32 %v3578_v11, %v22096_v23 }
 0x329   : > { %17993 = vmatprep.mubr.msk.bf16.mxu1 %vm2943_vm5, %v22396_v18  ;;  %18056 = vmatpush3.bf16.msra.mxu1 %v22094_v57  ;;  %26236 = vst [vmem:[#allocation168_spill] sm:$0xff] %v22525_v55  ;;  %v6365_v15 = vor.u32 %v22388_v33, %v22378_v44  ;;  %v22535_v18 = vadd.f32 %v22384_v31, %v3632_v54  ;;  %v17713_v25 = vpop.f32.mrf.mxu0  ;;  %v26239_v61 = vrot.slane %v26181_v49, 2  ;;  %v17788_v31 = vpop.f32.mrf.mxu1  ;;  %v6043_v34 = vrot.slane %v26187_v63, 2 }
 0x32a   : > { %18123 = vmatprep.subr.bf16.mxu1 %v22492_v43  ;;  %v22539_v57 = vsel %vm3969_vm9, %v10886_v50, %v10888_v20  ;;  %17916 = vmatmul.mubr.msk.bf16.gmra.mxu0 %vm2943_vm5, %v26238_v53  ;;  %v22547_v32 = vsel %vm3969_vm9, %v10888_v20, %v10890_v4  ;;  %v22552_v44 = vsel %vm3969_vm9, %v10890_v4, %v25692_v59  ;;  %v26251_v59 = vld [vmem:[#allocation53_spill] sm:$0xff]  ;;  %v26263_v17 = vshrl.u32 %v26262_v6, 16 }
 0x32b   : > { %26237 = vst [vmem:[#allocation169_spill] sm:$0xff] %v22539_v57  ;;  %v6042_v23 = vsel %vm3969_vm9, %v6040_v45, %v26239_v61  ;;  %26240 = vst [vmem:[#allocation44_spill] sm:$0xff] %v22547_v32  ;;  %v3635_v33 = vadd.f32 %v17713_v25, %v22108_v13  ;;  %v6374_v16 = vor.u32 %v22418_v28, %v22400_v37  ;;  %v3591_v48 = vpop.f32.mrf.mxu0  ;;  %v4483_v50 = vpop.f32.mrf.mxu1  ;;  %v6045_v13 = vrot.slane %v26193_v30, 2  ;;  %v26242_v45 = vld [vmem:[#allocation55_spill] sm:$0xff] }
 0x32c   : > { %26241 = vst [vmem:[#allocation170_spill] sm:$0xff] %v22552_v44  ;;  %17955 = vmatprep.mubr.msk.bf16.mxu0 %vm2943_vm5, %v6042_v23  ;;  %v22559_v24 = vadd.f32 %v22407_v21, %v3630_v52  ;;  %v3633_v38 = vadd.f32 %v3591_v48, %v22111_v35  ;;  %v6366_v54 = vsel %vm5322_vm11, %v22352_v14, %v6365_v15  ;;  %v26243_v37 = vshrl.u32 %v26242_v45, 16  ;;  %v26245_v52 = vld [vmem:[#allocation57_spill] sm:$0xff] }
 0x32d   : > { %v22567_v20 = vadd.f32 %v22426_v3, %v3635_v33  ;;  %v17714_v11 = vpop.f32.mrf.mxu0  ;;  %v26244_v21 = vshll.u32 %v26242_v45, 16  ;;  %v26246_v63 = vshrl.u32 %v26245_v52, 16  ;;  %v26247_v35 = vshll.u32 %v26245_v52, 16  ;;  %v17791_v61 = vpop.f32.mrf.mxu1  ;;  %v22586_v23 = vld [vmem:[%s25499_s4 + $0x70] sm:$0xff]  }
 0x32e   : > { %v6379_v28 = vrot.slane %v26243_v37, 2  ;;  %v6375_v30 = vsel %vm5322_vm11, %v6365_v15, %v6374_v16  ;;  %v22580_v14 = vadd.f32 %v22446_v5, %v3633_v38  ;;  %v26248_v11 = vrot.slane %v26181_v49, 2 }
 0x32f   : > { %v6382_v4 = vrot.slane %v26244_v21, 3  ;;  %v6388_v25 = vrot.slane %v26246_v63, 2  ;;  %v6391_v53 = vrot.slane %v26247_v35, 3  ;;  %v3594_v3 = vpop.f32.mrf.mxu0  ;;  %v4496_v48 = vpop.f32.mrf.mxu1  ;;  %v6046_v5 = vsel %vm3969_vm9, %v6043_v34, %v6045_v13  ;;  %v26249_v35 = vld [vmem:[#allocation24_spill] sm:$0xff] }
 0x330   : > { %17994 = vmatmul.mubr.msk.bf16.gmra.mxu1 %vm2943_vm5, %v6366_v54  ;;  %v3634_v33 = vadd.f32 %v3594_v3, %v22122_v51  ;;  %v6044_v54 = vsel %vm3969_vm9, %v26248_v11, %v6043_v34  ;;  %v26250_v3 = vld [vmem:[#allocation14_spill] sm:$0xff]  ;;  %v6047_v34 = vrot.slane %v26251_v59, 2 }
 0x331   : > { %17997 = vmatprep.mubr.msk.bf16.mxu1 %vm2943_vm5, %v6375_v30  ;;  %v17753_v37 = vpop.f32.mrf.mxu0  ;;  %v6383_v15 = vor.u32 %v6382_v4, %v6379_v28  ;;  %v6392_v38 = vor.u32 %v6391_v53, %v6388_v25  ;;  %v17792_v63 = vpop.f32.mrf.mxu1  ;;  %v6049_v28 = vrot.slane %v26212_v40, 2  ;;  %v26256_v40 = vld [vmem:[#allocation63_spill] sm:$0xff] }
 0x332   : > { %17956 = vmatmul.mubr.msk.bf16.vlgmr.msra.gmra.mxu0 %vm2943_vm5, %v6044_v54  ;;  %v4217_v21 = vadd.f32 %v17753_v37, %v22132_v19  ;;  %v22598_v51 = vadd.f32 %v22484_v56, %v3634_v33  ;;  %v26252_v56 = vld [vmem:[#allocation58_spill] sm:$0xff]  ;;  %v26257_v59 = vshrl.u32 %v26256_v40, 16 }
 0x333   : > { %17959 = vmatprep.mubr.msk.bf16.mxu0 %vm2943_vm5, %v6046_v5  ;;  %18022 = vmatpush3.bf16.msra.mxu0 %v26249_v35  ;;  %v4089_v30 = vpop.f32.mrf.mxu0  ;;  %v4499_v54 = vpop.f32.mrf.mxu1  ;;  %v6384_v25 = vsel %vm5322_vm11, %v6374_v16, %v6383_v15  ;;  %v6393_v53 = vsel %vm5322_vm11, %v6383_v15, %v6392_v38  ;;  %v26253_v33 = vshrl.u32 %v26252_v56, 16  ;;  %v26254_v5 = vshll.u32 %v26252_v56, 16 }
 0x334   : > { %18089 = vmatprep.subr.bf16.mxu0 %v22586_v23  ;;  %v4215_v11 = vadd.f32 %v4089_v30, %v26250_v3  ;;  %v22605_v19 = vadd.f32 %v22509_v10, %v4217_v21  ;;  %v26255_v30 = vld [vmem:[#allocation27_spill] sm:$0xff]  ;;  %v6406_v10 = vrot.slane %v26257_v59, 2  ;;  %v26258_v21 = vshll.u32 %v26256_v40, 16 }
 0x335   : > { %v17754_v4 = vpop.f32.mrf.mxu0  ;;  %v6397_v37 = vrot.slane %v26253_v33, 2  ;;  %v6400_v35 = vrot.slane %v26254_v5, 3  ;;  %v17795_v44 = vpop.f32.mrf.mxu1  ;;  %v26259_v33 = vld [vmem:[#allocation16_spill] sm:$0xff]  ;;  %v6050_v59 = vsel %vm3969_vm9, %v6047_v34, %v6049_v28 }
 0x336   : > { %v4218_v3 = vadd.f32 %v17754_v4, %v26255_v30  ;;  %v6409_v32 = vrot.slane %v26258_v21, 3  ;;  %v22620_v16 = vadd.f32 %v22530_v7, %v4215_v11  ;;  %v6048_v4 = vsel %vm3969_vm9, %v6045_v13, %v6047_v34  ;;  %v26260_v21 = vld [vmem:[#allocation17_spill] sm:$0xff]  ;;  %v26261_v13 = vld [vmem:[#allocation18_spill] sm:$0xff] }
 0x337   : > { %v4092_v15 = vpop.f32.mrf.mxu0  ;;  %v4512_v5 = vpop.f32.mrf.mxu1  ;;  %v6401_v55 = vor.u32 %v6400_v35, %v6397_v37  ;;  %v26264_v34 = vshll.u32 %v26262_v6, 16 }
 0x338   : > { %17998 = vmatmul.mubr.msk.bf16.gmra.mxu1 %vm2943_vm5, %v6384_v25  ;;  %v4216_v57 = vadd.f32 %v4092_v15, %v26259_v33  ;;  %v22625_v30 = vadd.f32 %v17788_v31, %v4218_v3  ;;  %v6410_v11 = vor.u32 %v6409_v32, %v6406_v10  ;;  %v6051_v33 = vrot.slane %v26242_v45, 2  ;;  %v26265_v32 = vld [vmem:[#allocation68_spill] sm:$0xff]  ;;  %v26267_v45 = vld [vmem:[#allocation47_spill] sm:$0xff] }
 0x339   : > { %18001 = vmatprep.mubr.msk.bf16.mxu1 %vm2943_vm5, %v6393_v53  ;;  %v17757_v25 = vpop.f32.mrf.mxu0  ;;  %v17796_v7 = vpop.f32.mrf.mxu1  ;;  %v6418_v37 = vrot.slane %v26264_v34, 3 }
 0x33a   : > { %17960 = vmatmul.mubr.msk.bf16.gmra.mxu0 %vm2943_vm5, %v6048_v4  ;;  %v4221_v8 = vadd.f32 %v17757_v25, %v26260_v21  ;;  %v22631_v53 = vadd.f32 %v4483_v50, %v4216_v57  ;;  %v6415_v4 = vrot.slane %v26263_v17, 2  ;;  %v6053_v57 = vrot.slane %v26245_v52, 2 }
 0x33b   : > { %17963 = vmatprep.mubr.msk.bf16.mxu0 %vm2943_vm5, %v6050_v59  ;;  %v4105_v15 = vpop.f32.mrf.mxu0  ;;  %v4515_v3 = vpop.f32.mrf.mxu1  ;;  %v6402_v59 = vsel %vm5322_vm11, %v6392_v38, %v6401_v55  ;;  %v26266_v50 = vshrl.u32 %v26265_v32, 16  ;;  %v6411_v17 = vsel %vm5322_vm11, %v6401_v55, %v6410_v11  ;;  %v26269_v38 = vld [vmem:[#allocation20_spill] sm:$0xff] }
 0x33c   : > { %v4219_v31 = vadd.f32 %v4105_v15, %v26261_v13  ;;  %v22639_v35 = vadd.f32 %v17791_v61, %v4221_v8  ;;  %v26268_v13 = vshll.u32 %v26265_v32, 16  ;;  %v6419_v2 = vor.u32 %v6418_v37, %v6415_v4 }
 0x33d   : > { %v17758_v25 = vpop.f32.mrf.mxu0  ;;  %v6424_v10 = vrot.slane %v26266_v50, 2  ;;  %v17799_v15 = vpop.f32.mrf.mxu1  ;;  %v6052_v50 = vsel %vm3969_vm9, %v6049_v28, %v6051_v33  ;;  %v6054_v55 = vsel %vm3969_vm9, %v6051_v33, %v6053_v57  ;;  %v26271_v28 = vld [vmem:[#allocation22_spill] sm:$0xff] }
 0x33e   : > { %v4222_v21 = vadd.f32 %v17758_v25, %v26267_v45  ;;  %v6427_v34 = vrot.slane %v26268_v13, 3  ;;  %v22650_v8 = vadd.f32 %v4496_v48, %v4219_v31  ;;  %v6420_v37 = vsel %vm5322_vm11, %v6410_v11, %v6419_v2 }
 0x33f   : > { %v4108_v61 = vpop.f32.mrf.mxu0  ;;  %v4528_v27 = vpop.f32.mrf.mxu1 }
 0x340   : > { %18002 = vmatmul.mubr.msk.bf16.gmra.mxu1 %vm2943_vm5, %v6402_v59  ;;  %v4220_v52 = vadd.f32 %v4108_v61, %v26269_v38  ;;  %v22655_v25 = vadd.f32 %v17792_v63, %v4222_v21  ;;  %v26270_v59 = vld [vmem:[#allocation21_spill] sm:$0xff]  ;;  %v6428_v31 = vor.u32 %v6427_v34, %v6424_v10  ;;  %v6055_v38 = vrot.slane %v26252_v56, 2 }
 0x341   : > { %18005 = vmatprep.mubr.msk.bf16.mxu1 %vm2943_vm5, %v6411_v17  ;;  %v17761_v45 = vpop.f32.mrf.mxu0  ;;  %v17800_v48 = vpop.f32.mrf.mxu1  ;;  %v6057_v21 = vrot.slane %v26256_v40, 2  ;;  %v26275_v34 = vld [vmem:[#allocation73_spill] sm:$0xff] }
 0x342   : > { %17964 = vmatmul.mubr.msk.bf16.gmra.mxu0 %vm2943_vm5, %v6052_v50  ;;  %v4225_v13 = vadd.f32 %v17761_v45, %v26270_v59  ;;  %v22661_v17 = vadd.f32 %v4499_v54, %v4220_v52  ;;  %v26272_v45 = vld [vmem:[#allocation70_spill] sm:$0xff]  ;;  %v26276_v52 = vshrl.u32 %v26275_v34, 16 }
 0x343   : > { %17967 = vmatprep.mubr.msk.bf16.mxu0 %vm2943_vm5, %v6054_v55  ;;  %v4121_v61 = vpop.f32.mrf.mxu0  ;;  %v22665_v63 = vpop.f32.mrf.mxu1  ;;  %v26273_v55 = vshrl.u32 %v26272_v45, 16  ;;  %v26274_v54 = vshll.u32 %v26272_v45, 16 }
 0x344   : > { %v4223_v4 = vadd.f32 %v4121_v61, %v26271_v28  ;;  %v22669_v33 = vadd.f32 %v17795_v44, %v4225_v13  ;;  %v6442_v56 = vrot.slane %v26276_v52, 2  ;;  %v26277_v61 = vshll.u32 %v26275_v34, 16 }
 0x345   : > { %v17762_v50 = vpop.f32.mrf.mxu0  ;;  %v6433_v59 = vrot.slane %v26273_v55, 2  ;;  %v6436_v10 = vrot.slane %v26274_v54, 3  ;;  %v17803_v11 = vpop.f32.mrf.mxu1  ;;  %v6429_v44 = vsel %vm5322_vm11, %v6419_v2, %v6428_v31  ;;  %v26279_v55 = vld [vmem:[#allocation77_spill] sm:$0xff]  ;;  %v6056_v52 = vsel %vm3969_vm9, %v6053_v57, %v6055_v38 }
 0x346   : > { %v6445_v28 = vrot.slane %v26277_v61, 3  ;;  %v4226_v62 = vadd.f32 %v17762_v50, %v26278_v36  ;;  %v22682_v40 = vadd.f32 %v4512_v5, %v4223_v4  ;;  %v6058_v36 = vsel %vm3969_vm9, %v6055_v38, %v6057_v21  ;;  %v26280_v5 = vld [vmem:[#allocation88_spill] sm:$0xff] }
 0x347   : > { %v4124_v13 = vpop.f32.mrf.mxu0  ;;  %v22686_v9 = vpop.f32.mrf.mxu1  ;;  %v6059_v38 = vrot.slane %v26262_v6, 2 }
 0x348   : > { %18006 = vmatmul.mubr.msk.bf16.gmra.mxu1 %vm2943_vm5, %v6420_v37  ;;  %v4224_v54 = vadd.f32 %v4124_v13, %v26279_v55  ;;  %v22689_v22 = vadd.f32 %v17796_v7, %v4226_v62  ;;  %v6437_v37 = vor.u32 %v6436_v10, %v6433_v59  ;;  %v6446_v2 = vor.u32 %v6445_v28, %v6442_v56  ;;  %v26282_v7 = vld [vmem:[#allocation28_spill] sm:$0xff] }
 0x349   : > { %18009 = vmatprep.mubr.msk.bf16.mxu1 %vm2943_vm5, %v6429_v44  ;;  %v17765_v61 = vpop.f32.mrf.mxu0  ;;  %v17804_v50 = vpop.f32.mrf.mxu1  ;;  %v26281_v44 = vld [vmem:[#allocation102_spill] sm:$0xff]  ;;  %v6061_v59 = vrot.slane %v26265_v32, 2 }
 0x34a   : > { %17968 = vmatmul.mubr.msk.bf16.gmra.mxu0 %vm2943_vm5, %v6056_v52  ;;  %v4229_v4 = vadd.f32 %v17765_v61, %v26280_v5  ;;  %v6458_v13 = vshrl.u32 %v26281_v44, 16  ;;  %v6461_v55 = vshll.u32 %v26281_v44, 16  ;;  %v22697_v58 = vadd.f32 %v4515_v3, %v4224_v54  ;;  %v26283_v61 = vld [vmem:[#allocation74_spill] sm:$0xff] }
 0x34b   : > { %17971 = vmatprep.mubr.msk.bf16.mxu0 %vm2943_vm5, %v6058_v36  ;;  %v4137_v62 = vpop.f32.mrf.mxu0  ;;  %v22700_v39 = vpop.f32.mrf.mxu1  ;;  %v6438_v28 = vsel %vm5322_vm11, %v6428_v31, %v6437_v37  ;;  %v6447_v52 = vsel %vm5322_vm11, %v6437_v37, %v6446_v2  ;;  %v26284_v36 = vshrl.u32 %v26283_v61, 16  ;;  %v26285_v54 = vshll.u32 %v26283_v61, 16  ;;  %v6711_v31 = vld [vmem:[#allocation2 + $0x10] sm:$0x8]  ;;  %v26287_v37 = vld [vmem:[#allocation110_spill] sm:$0xff] }
 0x34c   : > { %v4227_v57 = vadd.f32 %v4137_v62, %v26282_v7  ;;  %v22704_v10 = vadd.f32 %v17799_v15, %v4229_v4  ;;  %v26286_v62 = vld [vmem:[#allocation93_spill] sm:$0xff]  ;;  %v6460_v6 = vrot.slane %v6458_v13, 2  ;;  %v6463_v32 = vrot.slane %v6461_v55, 3  ;;  %v26289_v55 = vld [vmem:[#allocation103_spill] sm:$0xff] }
 0x34d   : > { %v17766_v56 = vpop.f32.mrf.mxu0  ;;  %v6451_v3 = vrot.slane %v26284_v36, 2  ;;  %v6454_v5 = vrot.slane %v26285_v54, 3  ;;  %v17807_v47 = vpop.f32.mrf.mxu1  ;;  %v6060_v36 = vsel %vm3969_vm9, %v6057_v21, %v6059_v38  ;;  %v22720_v54 = vcombine.low %v6711_v31, %v26288_v1 }
 0x34e   : > { %v4230_v7 = vadd.f32 %v17766_v56, %v26286_v62  ;;  %v22714_v15 = vadd.f32 %v4528_v27, %v4227_v57  ;;  %v6062_v27 = vsel %vm3969_vm9, %v6059_v38, %v6061_v59  ;;  %v6063_v1 = vrot.slane %v26272_v45, 2 }
 0x34f   : > { %v4140_v4 = vpop.f32.mrf.mxu0  ;;  %v4560_v0 = vpop.f32.mrf.mxu1  ;;  %v6455_v13 = vor.u32 %v6454_v5, %v6451_v3  ;;  %v7006_v38 = vshll.u32 %v22720_v54, 16 }
 0x350   : > { %18010 = vmatmul.mubr.msk.bf16.gmra.mxu1 %vm2943_vm5, %v6438_v28  ;;  %v4228_v29 = vadd.f32 %v4140_v4, %v26287_v37  ;;  %v22722_v56 = vadd.f32 %v17800_v48, %v4230_v7  ;;  %v26290_v48 = vld [vmem:[#allocation111_spill] sm:$0xff]  ;;  %v7003_v37 = vshrl.u32 %v22720_v54, 16 }
 0x351   : > { %18013 = vmatprep.mubr.msk.bf16.mxu1 %vm2943_vm5, %v6447_v52  ;;  %v17769_v62 = vpop.f32.mrf.mxu0  ;;  %v17808_v28 = vpop.f32.mrf.mxu1  ;;  %v6464_v52 = vor.u32 %v6463_v32, %v6460_v6  ;;  %v6065_v6 = vrot.slane %v26275_v34, 2  ;;  %v26291_v32 = vld [vmem:[#allocation113_spill] sm:$0xff] }
 0x352   : > { %17972 = vmatmul.mubr.msk.bf16.gmra.mxu0 %vm2943_vm5, %v6060_v36  ;;  %v4233_v57 = vadd.f32 %v17769_v62, %v26289_v55  ;;  %v22729_v4 = vadd.f32 %v22665_v63, %v4228_v29  ;;  %v6456_v36 = vsel %vm5322_vm11, %v6446_v2, %v6455_v13  ;;  %v5956_v62 = vld [vmem:[#allocation2 + $0x8c] sm:$0x3]  ;;  %v7005_v34 = vrot.slane %v7003_v37, 3 }
 0x353   : > { %17975 = vmatprep.mubr.msk.bf16.mxu0 %vm2943_vm5, %v6062_v27  ;;  %v4153_v21 = vpop.f32.mrf.mxu0  ;;  %v4563_v31 = vpop.f32.mrf.mxu1  ;;  %v6465_v45 = vsel %vm5322_vm11, %v6455_v13, %v6464_v52  ;;  %v6066_v13 = vsel %vm3969_vm9, %v6063_v1, %v6065_v6 }
 0x354   : > { %v4231_v7 = vadd.f32 %v4153_v21, %v26290_v48  ;;  %v22735_v3 = vadd.f32 %v17803_v11, %v4233_v57  ;;  %v6064_v11 = vsel %vm3969_vm9, %v6061_v59, %v6063_v1  ;;  %v26292_v57 = vld [vmem:[#allocation32_spill] sm:$0xff]  ;;  %v7008_v48 = vrot.slane %v7006_v38, 4 }
 0x355   : > { %v17770_v5 = vpop.f32.mrf.mxu0  ;;  %v17811_v63 = vpop.f32.mrf.mxu1 }
 0x356   : > { %v4234_v29 = vadd.f32 %v17770_v5, %v26291_v32  ;;  %v22743_v27 = vadd.f32 %v22686_v9, %v4231_v7  ;;  %v7009_v38 = vor.u32 %v7008_v48, %v7005_v34 }
 0x357   : > { %v4156_v55 = vpop.f32.mrf.mxu0  ;;  %v4576_v21 = vpop.f32.mrf.mxu1 }
 0x358   : > { %18014 = vmatmul.mubr.msk.bf16.gmra.mxu1 %vm2943_vm5, %v6456_v36  ;;  %v4232_v2 = vadd.f32 %v4156_v55, %v26292_v57  ;;  %v22748_v5 = vadd.f32 %v17804_v50, %v4234_v29  ;;  %v19356_v36 = vld [vmem:[#allocation2 + $0x88] sm:$0xf]  ;;  %v6067_v29 = vrot.slane %v26283_v61, 2 }
 0x359   : > { %18017 = vmatprep.mubr.msk.bf16.mxu1 %vm2943_vm5, %v6465_v45  ;;  %v17773_v32 = vpop.f32.mrf.mxu0  ;;  %v15558_v9 = vcombine.low %v19356_v36, %v5956_v62  ;;  %v17812_v45 = vpop.f32.mrf.mxu1 }
 0x35a   : > { %17976 = vmatmul.mubr.msk.bf16.gmra.mxu0 %vm2943_vm5, %v6064_v11  ;;  %v4237_v7 = vadd.f32 %v17773_v32, %v22410_v26  ;;  %v22755_v59 = vadd.f32 %v22700_v39, %v4232_v2  ;;  %v26293_v32 = vld [vmem:[#allocation76_spill] sm:$0xff] }
 0x35b   : > { %17979 = vmatprep.mubr.msk.bf16.mxu0 %vm2943_vm5, %v6066_v13  ;;  %v4169_v55 = vpop.f32.mrf.mxu0  ;;  %v4579_v50 = vpop.f32.mrf.mxu1  ;;  %v6069_v57 = vrot.slane %v15558_v9, 2  ;;  %v7013_v39 = vsel %vm7001_vm12, %v7009_v38, %v26293_v32  ;;  %v26294_v38 = vld [vmem:[#allocation79_spill] sm:$0xff] }
 0x35c   : > { %v4235_v37 = vadd.f32 %v4169_v55, %v22432_v60  ;;  %v22759_v11 = vadd.f32 %v17807_v47, %v4237_v7  ;;  %v6068_v47 = vsel %vm3969_vm9, %v6065_v6, %v6067_v29 }
 0x35d   : > { %v17774_v1 = vpop.f32.mrf.mxu0  ;;  %v17815_v26 = vpop.f32.mrf.mxu1 }
 0x35e   : > { %v4238_v62 = vadd.f32 %v17774_v1, %v22449_v42  ;;  %v22765_v2 = vadd.f32 %v4560_v0, %v4235_v37  ;;  %v6070_v42 = vsel %vm3969_vm9, %v6067_v29, %v6069_v57  ;;  %v26295_v1 = vld [vmem:[#allocation80_spill] sm:$0xff] }
 0x35f   : > { %v4172_v13 = vpop.f32.mrf.mxu0  ;;  %v4592_v61 = vpop.f32.mrf.mxu1 }
 0x360   : > { %18018 = vmatmul.mubr.msk.bf16.gmra.mxu1 %vm2943_vm5, %v6464_v52  ;;  %v4236_v60 = vadd.f32 %v4172_v13, %v22471_v41  ;;  %v22770_v34 = vadd.f32 %v17808_v28, %v4238_v62  ;;  %v22784_v28 = vld [vmem:[%s25499_s4 + $0x88] sm:$0xff]  }
 0x361   : > { %18057 = vmatprep.mubr.msk.bf16.mxu1 %vm2943_vm5, %v7013_v39  ;;  %v17777_v48 = vpop.f32.mrf.mxu0  ;;  %v17816_v0 = vpop.f32.mrf.mxu1 }
 0x362   : > { %17980 = vmatmul.mubr.msk.bf16.gmra.mxu0 %vm2943_vm5, %v6068_v47  ;;  %v4241_v52 = vadd.f32 %v17777_v48, %v22487_v12  ;;  %v22776_v36 = vadd.f32 %v4563_v31, %v4236_v60 }
 0x363   : > { %17983 = vmatprep.mubr.msk.bf16.mxu0 %vm2943_vm5, %v6070_v42  ;;  %v4185_v9 = vpop.f32.mrf.mxu0  ;;  %v4595_v7 = vpop.f32.mrf.mxu1 }
 0x364   : > { %v4239_v41 = vadd.f32 %v4185_v9, %v22514_v46  ;;  %v22779_v55 = vadd.f32 %v17811_v63, %v4241_v52  ;;  %v6718_v46 = vrot.slane %v22720_v54, 3  ;;  %v26299_v9 = vld [vmem:[#allocation81_spill] sm:$0xff] }
 0x365   : > { %v17778_v6 = vpop.f32.mrf.mxu0  ;;  %v17855_v12 = vpop.f32.mrf.mxu1 }
 0x366   : > { %v4242_v37 = vadd.f32 %v17778_v6, %v22535_v18  ;;  %v22789_v31 = vadd.f32 %v4576_v21, %v4239_v41  ;;  %v26296_v21 = vrot.slane %v26181_v49, 3 }
 0x367   : > { %v4188_v29 = vpop.f32.mrf.mxu0  ;;  %v5158_v62 = vpop.f32.mrf.mxu1 }
 0x368   : > { %18058 = vmatmul.mubr.msk.bf16.vlgmr.msra.gmra.mxu1 %vm2943_vm5, %v26294_v38  ;;  %v4240_v63 = vadd.f32 %v4188_v29, %v22559_v24  ;;  %v22796_v32 = vadd.f32 %v17812_v45, %v4242_v37  ;;  %v6720_v39 = vsel %vm555_vm1, %v6718_v46, %v26296_v21 }
 0x369   : > { %18061 = vmatprep.mubr.msk.bf16.mxu1 %vm2943_vm5, %v26295_v1  ;;  %18124 = vmatpush3.bf16.msra.mxu1 %v22492_v43  ;;  %v17781_v18 = vpop.f32.mrf.mxu0  ;;  %v17856_v54 = vpop.f32.mrf.mxu1 }
 0x36a   : > { %18191 = vmatprep.subr.bf16.mxu1 %v22784_v28  ;;  %17984 = vmatmul.mubr.msk.bf16.gmra.mxu0 %vm2943_vm5, %v6069_v57  ;;  %v4245_v13 = vadd.f32 %v17781_v18, %v22567_v20  ;;  %v22805_v43 = vadd.f32 %v4579_v50, %v4240_v63  ;;  %v26297_v57 = vld [vmem:[#allocation83_spill] sm:$0xff]  ;;  %v26298_v20 = vld [vmem:[#allocation84_spill] sm:$0xff] }
 0x36b   : > { %18023 = vmatprep.mubr.msk.bf16.mxu0 %vm2943_vm5, %v6720_v39  ;;  %v4201_v24 = vpop.f32.mrf.mxu0  ;;  %v5161_v60 = vpop.f32.mrf.mxu1  ;;  %v22819_v50 = vld [vmem:[%s25499_s4 + $0x80] sm:$0xff]   ;;  %v26301_v18 = vld [vmem:[#allocation8_spill] sm:$0xff] }
 0x36c   : > { %v4243_v45 = vadd.f32 %v4201_v24, %v22580_v14  ;;  %v22808_v47 = vadd.f32 %v17815_v26, %v4245_v13  ;;  %v26303_v24 = vld [vmem:[#allocation7_spill] sm:$0xff] }
 0x36d   : > { %v17782_v48 = vpop.f32.mrf.mxu0  ;;  %v17859_v42 = vpop.f32.mrf.mxu1 }
 0x36e   : > { %v22812_v49 = vadd.f32 %v4592_v61, %v4243_v45  ;;  %v26300_v61 = vld [vmem:[#allocation85_spill] sm:$0xff]  ;;  %v26304_v45 = vld [vmem:[#allocation87_spill] sm:$0xff] }
 0x36f   : > { %v4204_v52 = vpop.f32.mrf.mxu0  ;;  %v5174_v26 = vpop.f32.mrf.mxu1 }
 0x370   : > { %18062 = vmatmul.mubr.msk.bf16.gmra.mxu1 %vm2943_vm5, %v26297_v57  ;;  %v4244_v14 = vadd.f32 %v4204_v52, %v22598_v51 }
 0x371   : > { %18065 = vmatprep.mubr.msk.bf16.mxu1 %vm2943_vm5, %v26298_v20  ;;  %v17821_v0 = vpop.f32.mrf.mxu0  ;;  %v17860_v6 = vpop.f32.mrf.mxu1 }
 0x372   : > { %18024 = vmatmul.mubr.msk.bf16.vlgmr.msra.gmra.mxu0 %vm2943_vm5, %v26299_v9  ;;  %v5003_v41 = vadd.f32 %v17821_v0, %v22605_v19  ;;  %v22828_v37 = vadd.f32 %v4595_v7, %v4244_v14  ;;  %v26302_v7 = vld [vmem:[#allocation86_spill] sm:$0xff] }
 0x373   : > { %18027 = vmatprep.mubr.msk.bf16.mxu0 %vm2943_vm5, %v26300_v61  ;;  %18090 = vmatpush3.bf16.msra.mxu0 %v22586_v23  ;;  %v4875_v38 = vpop.f32.mrf.mxu0  ;;  %v5177_v29 = vpop.f32.mrf.mxu1  ;;  %v26305_v9 = vld [vmem:[#allocation90_spill] sm:$0xff]  ;;  %v26306_v61 = vld [vmem:[#allocation91_spill] sm:$0xff] }
 0x374   : > { %18157 = vmatprep.subr.bf16.mxu0 %v22819_v50  ;;  %v5001_v51 = vadd.f32 %v4875_v38, %v22620_v16  ;;  %v22832_v1 = vadd.f32 %v17855_v12, %v5003_v41 }
 0x375   : > { %v17822_v46 = vpop.f32.mrf.mxu0  ;;  %v17863_v19 = vpop.f32.mrf.mxu1 }
 0x376   : > { %v5004_v63 = vadd.f32 %v17822_v46, %v22625_v30  ;;  %v22837_v21 = vadd.f32 %v5158_v62, %v5001_v51  ;;  %v26307_v51 = vld [vmem:[#allocation89_spill] sm:$0xff]  ;;  %v26308_v46 = vld [vmem:[#allocation92_spill] sm:$0xff] }
 0x377   : > { %v4878_v23 = vpop.f32.mrf.mxu0  ;;  %v5190_v13 = vpop.f32.mrf.mxu1 }
 0x378   : > { %18066 = vmatmul.mubr.msk.bf16.gmra.mxu1 %vm2943_vm5, %v26301_v18  ;;  %v5002_v39 = vadd.f32 %v4878_v23, %v22631_v53  ;;  %v22842_v16 = vadd.f32 %v17856_v54, %v5004_v63 }
 0x379   : > { %18069 = vmatprep.mubr.msk.bf16.mxu1 %vm2943_vm5, %v26302_v7  ;;  %v17825_v12 = vpop.f32.mrf.mxu0  ;;  %v17864_v62 = vpop.f32.mrf.mxu1 }
 0x37a   : > { %18028 = vmatmul.mubr.msk.bf16.gmra.mxu0 %vm2943_vm5, %v26303_v24  ;;  %v5007_v30 = vadd.f32 %v17825_v12, %v22639_v35  ;;  %v22849_v48 = vadd.f32 %v5161_v60, %v5002_v39  ;;  %v26309_v24 = vld [vmem:[#allocation96_spill] sm:$0xff] }
 0x37b   : > { %18031 = vmatprep.mubr.msk.bf16.mxu0 %vm2943_vm5, %v26304_v45  ;;  %v4891_v57 = vpop.f32.mrf.mxu0  ;;  %v5193_v20 = vpop.f32.mrf.mxu1  ;;  %v26310_v45 = vld [vmem:[#allocation97_spill] sm:$0xff] }
 0x37c   : > { %v5005_v52 = vadd.f32 %v4891_v57, %v22650_v8  ;;  %v22852_v53 = vadd.f32 %v17859_v42, %v5007_v30 }
 0x37d   : > { %v17826_v54 = vpop.f32.mrf.mxu0  ;;  %v17867_v0 = vpop.f32.mrf.mxu1 }
 0x37e   : > { %v5008_v14 = vadd.f32 %v17826_v54, %v22655_v25  ;;  %v22857_v35 = vadd.f32 %v5174_v26, %v5005_v52  ;;  %v26311_v52 = vld [vmem:[#allocation94_spill] sm:$0xff] }
 0x37f   : > { %v4894_v41 = vpop.f32.mrf.mxu0  ;;  %v5206_v38 = vpop.f32.mrf.mxu1  ;;  %v26312_v54 = vld [vmem:[#allocation98_spill] sm:$0xff] }
 0x380   : > { %18070 = vmatmul.mubr.msk.bf16.gmra.mxu1 %vm2943_vm5, %v26305_v9  ;;  %v5006_v60 = vadd.f32 %v4894_v41, %v22661_v17  ;;  %v22862_v8 = vadd.f32 %v17860_v6, %v5008_v14 }
 0x381   : > { %18073 = vmatprep.mubr.msk.bf16.mxu1 %vm2943_vm5, %v26306_v61  ;;  %v17829_v42 = vpop.f32.mrf.mxu0  ;;  %v17868_v26 = vpop.f32.mrf.mxu1 }
 0x382   : > { %18032 = vmatmul.mubr.msk.bf16.gmra.mxu0 %vm2943_vm5, %v26307_v51  ;;  %v5011_v25 = vadd.f32 %v17829_v42, %v22669_v33  ;;  %v22869_v63 = vadd.f32 %v5177_v29, %v5006_v60  ;;  %v26313_v51 = vld [vmem:[#allocation99_spill] sm:$0xff] }
 0x383   : > { %18035 = vmatprep.mubr.msk.bf16.mxu0 %vm2943_vm5, %v26308_v46  ;;  %v4907_v18 = vpop.f32.mrf.mxu0  ;;  %v5209_v7 = vpop.f32.mrf.mxu1  ;;  %v26314_v46 = vld [vmem:[#allocation104_spill] sm:$0xff] }
 0x384   : > { %v5009_v23 = vadd.f32 %v4907_v18, %v22682_v40  ;;  %v22872_v17 = vadd.f32 %v17863_v19, %v5011_v25 }
 0x385   : > { %v17830_v6 = vpop.f32.mrf.mxu0 }
 0x386   : > { %v5012_v39 = vadd.f32 %v17830_v6, %v22689_v22  ;;  %v22877_v33 = vadd.f32 %v5190_v13, %v5009_v23  ;;  %v26315_v23 = vld [vmem:[#allocation100_spill] sm:$0xff]  ;;  %v26316_v6 = vld [vmem:[#allocation101_spill] sm:$0xff] }
 0x387   : > { %v17871_v12 = vpop.f32.mrf.mxu1  ;;  %v4910_v30 = vpop.f32.mrf.mxu0 }
 0x388   : > { %18074 = vmatmul.mubr.msk.bf16.gmra.mxu1 %vm2943_vm5, %v26309_v24  ;;  %v5010_v29 = vadd.f32 %v4910_v30, %v22697_v58  ;;  %v22882_v40 = vadd.f32 %v17864_v62, %v5012_v39 }
 0x389   : > { %18077 = vmatprep.mubr.msk.bf16.mxu1 %vm2943_vm5, %v26310_v45  ;;  %v5222_v57 = vpop.f32.mrf.mxu1  ;;  %v17833_v19 = vpop.f32.mrf.mxu0 }
 0x38a   : > { %18036 = vmatmul.mubr.msk.bf16.gmra.mxu0 %vm2943_vm5, %v26311_v52  ;;  %v5015_v22 = vadd.f32 %v17833_v19, %v22704_v10  ;;  %v22889_v14 = vadd.f32 %v5193_v20, %v5010_v29  ;;  %v26317_v52 = vld [vmem:[#allocation105_spill] sm:$0xff] }
 0x38b   : > { %18039 = vmatprep.mubr.msk.bf16.mxu0 %vm2943_vm5, %v26312_v54  ;;  %v17872_v13 = vpop.f32.mrf.mxu1  ;;  %v4923_v9 = vpop.f32.mrf.mxu0  ;;  %v26318_v54 = vld [vmem:[#allocation108_spill] sm:$0xff] }
 0x38c   : > { %v5013_v41 = vadd.f32 %v4923_v9, %v22714_v15  ;;  %v22892_v58 = vadd.f32 %v17867_v0, %v5015_v22 }
 0x38d   : > { %v5225_v61 = vpop.f32.mrf.mxu1  ;;  %v17834_v62 = vpop.f32.mrf.mxu0 }
 0x38e   : > { %v5016_v60 = vadd.f32 %v17834_v62, %v22722_v56  ;;  %v22897_v10 = vadd.f32 %v5206_v38, %v5013_v41  ;;  %v26319_v41 = vld [vmem:[#allocation106_spill] sm:$0xff]  ;;  %v26320_v62 = vld [vmem:[#allocation107_spill] sm:$0xff] }
 0x38f   : > { %v17875_v42 = vpop.f32.mrf.mxu1  ;;  %v4926_v25 = vpop.f32.mrf.mxu0 }
 0x390   : > { %18078 = vmatmul.mubr.msk.bf16.gmra.mxu1 %vm2943_vm5, %v26313_v51  ;;  %v5014_v20 = vadd.f32 %v4926_v25, %v22729_v4  ;;  %v22902_v15 = vadd.f32 %v17868_v26, %v5016_v60  ;;  %v26321_v60 = vld [vmem:[#allocation115_spill] sm:$0xff] }
 0x391   : > { %18081 = vmatprep.mubr.msk.bf16.mxu1 %vm2943_vm5, %v26314_v46  ;;  %v5238_v18 = vpop.f32.mrf.mxu1  ;;  %v17837_v0 = vpop.f32.mrf.mxu0  ;;  %v7700_v51 = vrot.slane %v26321_v60, 3 }
 0x392   : > { %18040 = vmatmul.mubr.msk.bf16.gmra.mxu0 %vm2943_vm5, %v26315_v23  ;;  %v5019_v56 = vadd.f32 %v17837_v0, %v22735_v3  ;;  %v22909_v39 = vadd.f32 %v5209_v7, %v5014_v20 }
 0x393   : > { %18043 = vmatprep.mubr.msk.bf16.mxu0 %vm2943_vm5, %v26316_v6  ;;  %v17876_v38 = vpop.f32.mrf.mxu1  ;;  %v4939_v24 = vpop.f32.mrf.mxu0 }
 0x394   : > { %v5017_v30 = vadd.f32 %v4939_v24, %v22743_v27  ;;  %v22912_v4 = vadd.f32 %v17871_v12, %v5019_v56  ;;  %v26323_v24 = vld [vmem:[#allocation11_spill] sm:$0xff] }
 0x395   : > { %v5241_v45 = vpop.f32.mrf.mxu1  ;;  %v17838_v26 = vpop.f32.mrf.mxu0 }
 0x396   : > { %v5020_v29 = vadd.f32 %v17838_v26, %v22748_v5  ;;  %v22917_v3 = vadd.f32 %v5222_v57, %v5017_v30 }
 0x397   : > { %v17879_v19 = vpop.f32.mrf.mxu1  ;;  %v4942_v22 = vpop.f32.mrf.mxu0 }
 0x398   : > { %18082 = vmatmul.mubr.msk.bf16.gmra.mxu1 %vm2943_vm5, %v26317_v52  ;;  %v5018_v7 = vadd.f32 %v4942_v22, %v22755_v59  ;;  %v22922_v27 = vadd.f32 %v17872_v13, %v5020_v29  ;;  %v26322_v13 = vld [vmem:[#allocation112_spill] sm:$0xff] }
 0x399   : > { %18085 = vmatprep.mubr.msk.bf16.mxu1 %vm2943_vm5, %v26318_v54  ;;  %v5254_v9 = vpop.f32.mrf.mxu1  ;;  %v17841_v12 = vpop.f32.mrf.mxu0  ;;  %v7699_v0 = vrot.slane %v26322_v13, 3  ;;  %v26324_v22 = vld [vmem:[#allocation12_spill] sm:$0xff] }
 0x39a   : > { %18044 = vmatmul.mubr.msk.bf16.gmra.mxu0 %vm2943_vm5, %v26319_v41  ;;  %v5023_v5 = vadd.f32 %v17841_v12, %v22759_v11  ;;  %v22930_v25 = vadd.f32 %v5225_v61, %v5018_v7  ;;  %v26326_v12 = vld [vmem:[#allocation109_spill] sm:$0xff]  ;;  %v26327_v41 = vld [vmem:[#allocation134_spill] sm:$0xff] }
 0x39b   : > { %18047 = vmatprep.mubr.msk.bf16.mxu0 %vm2943_vm5, %v26320_v62  ;;  %v17880_v57 = vpop.f32.mrf.mxu1  ;;  %v4955_v46 = vpop.f32.mrf.mxu0  ;;  %v7701_v30 = vsel %vm555_vm1, %v7699_v0, %v7700_v51 }
 0x39c   : > { %v5021_v59 = vadd.f32 %v4955_v46, %v22765_v2  ;;  %v22934_v23 = vadd.f32 %v17875_v42, %v5023_v5  ;;  %v7704_v5 = vrot.slane %v26327_v41, 3 }
 0x39d   : > { %v5257_v20 = vpop.f32.mrf.mxu1  ;;  %v17842_v56 = vpop.f32.mrf.mxu0 }
 0x39e   : > { %v5024_v6 = vadd.f32 %v17842_v56, %v22770_v34  ;;  %v22940_v26 = vadd.f32 %v5238_v18, %v5021_v59  ;;  %v26325_v34 = vld [vmem:[#allocation119_spill] sm:$0xff]  ;;  %v22961_v59 = vld [vmem:[%s25499_s4 + $0x98] sm:$0xff]  }
 0x39f   : > { %v17883_v11 = vpop.f32.mrf.mxu1  ;;  %v4958_v61 = vpop.f32.mrf.mxu0  ;;  %v7702_v54 = vrot.slane %v26325_v34, 3 }
 0x3a0   : > { %18086 = vmatmul.mubr.msk.bf16.gmra.mxu1 %vm2943_vm5, %v26323_v24  ;;  %v5022_v2 = vadd.f32 %v4958_v61, %v22776_v36  ;;  %v22944_v52 = vadd.f32 %v17876_v38, %v5024_v6  ;;  %v19358_v61 = vld [vmem:[#allocation2 + $0x14] sm:$0xf] }
 0x3a1   : > { %18125 = vmatprep.mubr.msk.bf16.mxu1 %vm2943_vm5, %v7701_v30  ;;  %v5270_v29 = vpop.f32.mrf.mxu1  ;;  %v17845_v42 = vpop.f32.mrf.mxu0  ;;  %v7703_v13 = vsel %vm555_vm1, %v7700_v51, %v7702_v54  ;;  %v19357_v30 = vld [vmem:[#allocation2 + $0x18] sm:$0xf] }
 0x3a2   : > { %18048 = vmatmul.mubr.msk.bf16.gmra.mxu0 %vm2943_vm5, %v26324_v22  ;;  %v5027_v7 = vadd.f32 %v17845_v42, %v22779_v55  ;;  %v22953_v62 = vadd.f32 %v5241_v45, %v5022_v2  ;;  %v7705_v45 = vsel %vm555_vm1, %v7702_v54, %v7704_v5  ;;  %v15638_v51 = vcombine.low %v19358_v61, %v19357_v30  ;;  %v26332_v30 = vld [vmem:[#allocation42_spill] sm:$0xff] }
 0x3a3   : > { %18051 = vmatprep.mubr.msk.bf16.mxu0 %vm2943_vm5, %v26326_v12  ;;  %v17884_v18 = vpop.f32.mrf.mxu1  ;;  %v4971_v36 = vpop.f32.mrf.mxu0  ;;  %v26328_v42 = vrot.slane %v26281_v44, 3 }
 0x3a4   : > { %v5025_v38 = vadd.f32 %v4971_v36, %v22789_v31  ;;  %v22956_v46 = vadd.f32 %v17879_v19, %v5027_v7 }
 0x3a5   : > { %v5273_v60 = vpop.f32.mrf.mxu1  ;;  %v17846_v55 = vpop.f32.mrf.mxu0 }
 0x3a6   : > { %v5028_v0 = vadd.f32 %v17846_v55, %v22796_v32  ;;  %v22967_v6 = vadd.f32 %v5254_v9, %v5025_v38  ;;  %v26329_v9 = vld [vmem:[#allocation49_spill] sm:$0xff] }
 0x3a7   : > { %v17923_v56 = vpop.f32.mrf.mxu1  ;;  %v4974_v31 = vpop.f32.mrf.mxu0  ;;  %v7706_v22 = vrot.slane %v26329_v9, 3  ;;  %v26335_v9 = vld [vmem:[#allocation46_spill] sm:$0xff] }
 0x3a8   : > { %18126 = vmatmul.mubr.msk.bf16.vlgmr.msra.gmra.mxu1 %vm2943_vm5, %v7703_v13  ;;  %v5026_v19 = vadd.f32 %v4974_v31, %v22805_v43  ;;  %v22972_v2 = vadd.f32 %v17880_v57, %v5028_v0  ;;  %v26330_v43 = vld [vmem:[#allocation138_spill] sm:$0xff]  ;;  %v19359_v0 = vld [vmem:[#allocation2 + $0x24] sm:$0xf] }
 0x3a9   : > { %18129 = vmatprep.mubr.msk.bf16.mxu1 %vm2943_vm5, %v7705_v45  ;;  %18192 = vmatpush3.bf16.msra.mxu1 %v22784_v28  ;;  %v5768_v24 = vpop.f32.mrf.mxu1  ;;  %v17849_v32 = vpop.f32.mrf.mxu0  ;;  %v7708_v54 = vrot.slane %v26330_v43, 3  ;;  %v7707_v36 = vsel %vm555_vm1, %v7704_v5, %v7706_v22  ;;  %v19360_v5 = vld [vmem:[#allocation2 + $0x28] sm:$0xf] }
 0x3aa   : > { %18259 = vmatprep.subr.bf16.mxu1 %v22961_v59  ;;  %18052 = vmatmul.mubr.msk.bf16.gmra.mxu0 %vm2943_vm5, %v26328_v42  ;;  %v5031_v34 = vadd.f32 %v17849_v32, %v22808_v47  ;;  %v22982_v7 = vadd.f32 %v5257_v20, %v5026_v19  ;;  %v15640_v45 = vcombine.low %v19359_v0, %v19360_v5  ;;  %v26331_v19 = vld [vmem:[#allocation43_spill] sm:$0xff] }
 0x3ab   : > { %18091 = vmatprep.mubr.msk.bf16.mxu0 %vm2943_vm5, %v15638_v51  ;;  %v17924_v28 = vpop.f32.mrf.mxu1  ;;  %v4987_v57 = vpop.f32.mrf.mxu0  ;;  %v7709_v47 = vsel %vm555_vm1, %v7706_v22, %v7708_v54  ;;  %v26333_v61 = vcombine.low %v26331_v19, %v26332_v30  ;;  %v7712_v22 = vrot.slane %v26335_v9, 3  ;;  %v26336_v30 = vld [vmem:[#allocation143_spill] sm:$0xff] }
 0x3ac   : > { %v5029_v12 = vadd.f32 %v4987_v57, %v22812_v49  ;;  %v22985_v41 = vadd.f32 %v17883_v11, %v5031_v34  ;;  %v22996_v49 = vld [vmem:[%s25499_s4 + $0x90] sm:$0xff]  }
 0x3ad   : > { %v5771_v18 = vpop.f32.mrf.mxu1  ;;  %v17850_v44 = vpop.f32.mrf.mxu0 }
 0x3ae   : > { %v22990_v55 = vadd.f32 %v5270_v29, %v5029_v12  ;;  %v26334_v29 = vld [vmem:[#allocation139_spill] sm:$0xff] }
 0x3af   : > { %v17927_v38 = vpop.f32.mrf.mxu1  ;;  %v4990_v13 = vpop.f32.mrf.mxu0  ;;  %v7710_v51 = vrot.slane %v26334_v29, 3 }
 0x3b0   : > { %18130 = vmatmul.mubr.msk.bf16.gmra.mxu1 %vm2943_vm5, %v7707_v36  ;;  %v5030_v20 = vadd.f32 %v4990_v13, %v22828_v37 }
 0x3b1   : > { %18133 = vmatprep.mubr.msk.bf16.mxu1 %vm2943_vm5, %v7709_v47  ;;  %v5784_v11 = vpop.f32.mrf.mxu1  ;;  %v17889_v31 = vpop.f32.mrf.mxu0 }
 0x3b2   : > { %18092 = vmatmul.mubr.msk.bf16.vlgmr.msra.gmra.mxu0 %vm2943_vm5, %v26333_v61  ;;  %v5612_v32 = vadd.f32 %v17889_v31, %v22832_v1  ;;  %v23008_v37 = vadd.f32 %v5273_v60, %v5030_v20  ;;  %v7711_v1 = vsel %vm555_vm1, %v7708_v54, %v7710_v51  ;;  %v19361_v20 = vld [vmem:[#allocation2 + $0x2c] sm:$0xf]  ;;  %v19364_v54 = vld [vmem:[#allocation2 + $0x38] sm:$0xf] }
 0x3b3   : > { %18095 = vmatprep.mubr.msk.bf16.mxu0 %vm2943_vm5, %v15640_v45  ;;  %v17928_v42 = vpop.f32.mrf.mxu1  ;;  %18158 = vmatpush3.bf16.msra.mxu0 %v22819_v50  ;;  %v5484_v34 = vpop.f32.mrf.mxu0  ;;  %v7713_v50 = vsel %vm555_vm1, %v7710_v51, %v7712_v22  ;;  %v19363_v45 = vld [vmem:[#allocation2 + $0x34] sm:$0xf]  ;;  %v26337_v51 = vld [vmem:[#allocation147_spill] sm:$0xff] }
 0x3b4   : > { %18225 = vmatprep.subr.bf16.mxu0 %v22996_v49  ;;  %v5610_v43 = vadd.f32 %v5484_v34, %v22837_v21  ;;  %v23012_v12 = vadd.f32 %v17923_v56, %v5612_v32  ;;  %v19362_v21 = vld [vmem:[#allocation2 + $0x30] sm:$0xf]  ;;  %v15642_v31 = vcombine.low %v19363_v45, %v19364_v54  ;;  %v7716_v32 = vrot.slane %v26337_v51, 3 }
 0x3b5   : > { %v5787_v57 = vpop.f32.mrf.mxu1  ;;  %v17890_v44 = vpop.f32.mrf.mxu0  ;;  %v15641_v0 = vcombine.low %v19361_v20, %v19362_v21  ;;  %v19365_v20 = vld [vmem:[#allocation2 + $0x3c] sm:$0xf] }
 0x3b6   : > { %v5613_v36 = vadd.f32 %v17890_v44, %v22842_v16  ;;  %v23018_v60 = vadd.f32 %v5768_v24, %v5610_v43  ;;  %v7714_v24 = vrot.slane %v26336_v30, 3 }
 0x3b7   : > { %v17931_v47 = vpop.f32.mrf.mxu1  ;;  %v5487_v13 = vpop.f32.mrf.mxu0 }
 0x3b8   : > { %18134 = vmatmul.mubr.msk.bf16.gmra.mxu1 %vm2943_vm5, %v7711_v1  ;;  %v5611_v56 = vadd.f32 %v5487_v13, %v22849_v48  ;;  %v23022_v16 = vadd.f32 %v17924_v28, %v5613_v36  ;;  %v7715_v1 = vsel %vm555_vm1, %v7712_v22, %v7714_v24  ;;  %v19368_v22 = vld [vmem:[#allocation2 + $0x48] sm:$0xf] }
 0x3b9   : > { %18137 = vmatprep.mubr.msk.bf16.mxu1 %vm2943_vm5, %v7713_v50  ;;  %v5800_v5 = vpop.f32.mrf.mxu1  ;;  %v17893_v19 = vpop.f32.mrf.mxu0 }
 0x3ba   : > { %18096 = vmatmul.mubr.msk.bf16.gmra.mxu0 %vm2943_vm5, %v15641_v0  ;;  %v5616_v61 = vadd.f32 %v17893_v19, %v22852_v53  ;;  %v23029_v9 = vadd.f32 %v5771_v18, %v5611_v56  ;;  %v7717_v53 = vsel %vm555_vm1, %v7714_v24, %v7716_v32  ;;  %v19367_v56 = vld [vmem:[#allocation2 + $0x44] sm:$0xf]  ;;  %v26339_v24 = vld [vmem:[#allocation13_spill] sm:$0xff] }
 0x3bb   : > { %18099 = vmatprep.mubr.msk.bf16.mxu0 %vm2943_vm5, %v15642_v31  ;;  %v17932_v29 = vpop.f32.mrf.mxu1  ;;  %v5500_v48 = vpop.f32.mrf.mxu0  ;;  %v15644_v45 = vcombine.low %v19367_v56, %v19368_v22  ;;  %v26338_v31 = vld [vmem:[#allocation148_spill] sm:$0xff] }
 0x3bc   : > { %v5614_v34 = vadd.f32 %v5500_v48, %v22857_v35  ;;  %v23032_v28 = vadd.f32 %v17927_v38, %v5616_v61  ;;  %v19366_v35 = vld [vmem:[#allocation2 + $0x40] sm:$0xf]  ;;  %v7720_v61 = vrot.slane %v26339_v24, 3 }
 0x3bd   : > { %v5803_v43 = vpop.f32.mrf.mxu1  ;;  %v17894_v44 = vpop.f32.mrf.mxu0  ;;  %v15643_v21 = vcombine.low %v19365_v20, %v19366_v35  ;;  %v19369_v20 = vld [vmem:[#allocation2 + $0x4c] sm:$0xf] }
 0x3be   : > { %v5617_v36 = vadd.f32 %v17894_v44, %v22862_v8  ;;  %v23038_v13 = vadd.f32 %v5784_v11, %v5614_v34  ;;  %v7718_v11 = vrot.slane %v26338_v31, 3 }
 0x3bf   : > { %v17935_v50 = vpop.f32.mrf.mxu1  ;;  %v5503_v18 = vpop.f32.mrf.mxu0 }
 0x3c0   : > { %18138 = vmatmul.mubr.msk.bf16.gmra.mxu1 %vm2943_vm5, %v7715_v1  ;;  %v5615_v38 = vadd.f32 %v5503_v18, %v22869_v63  ;;  %v23042_v8 = vadd.f32 %v17928_v42, %v5617_v36  ;;  %v7719_v1 = vsel %vm555_vm1, %v7716_v32, %v7718_v11  ;;  %v19372_v32 = vld [vmem:[#allocation2 + $0x58] sm:$0xf] }
 0x3c1   : > { %18141 = vmatprep.mubr.msk.bf16.mxu1 %vm2943_vm5, %v7717_v53  ;;  %v5816_v0 = vpop.f32.mrf.mxu1  ;;  %v17897_v54 = vpop.f32.mrf.mxu0 }
 0x3c2   : > { %18100 = vmatmul.mubr.msk.bf16.gmra.mxu0 %vm2943_vm5, %v15643_v21  ;;  %v5620_v19 = vadd.f32 %v17897_v54, %v22872_v17  ;;  %v23049_v51 = vadd.f32 %v5787_v57, %v5615_v38  ;;  %v7721_v17 = vsel %vm555_vm1, %v7718_v11, %v7720_v61  ;;  %v19371_v38 = vld [vmem:[#allocation2 + $0x54] sm:$0xf] }
 0x3c3   : > { %18103 = vmatprep.mubr.msk.bf16.mxu0 %vm2943_vm5, %v15644_v45  ;;  %v17936_v30 = vpop.f32.mrf.mxu1  ;;  %v5516_v63 = vpop.f32.mrf.mxu0  ;;  %v15646_v56 = vcombine.low %v19371_v38, %v19372_v32  ;;  %v26340_v45 = vld [vmem:[#allocation152_spill] sm:$0xff]  ;;  %v26341_v11 = vld [vmem:[#allocation153_spill] sm:$0xff] }
 0x3c4   : > { %v5618_v48 = vadd.f32 %v5516_v63, %v22877_v33  ;;  %v23052_v42 = vadd.f32 %v17931_v47, %v5620_v19  ;;  %v19370_v33 = vld [vmem:[#allocation2 + $0x50] sm:$0xf]  ;;  %v7724_v19 = vrot.slane %v26341_v11, 3  ;;  %v7615_v63 = vld [vmem:[#allocation2 + $0x94] sm:$0x7] }
 0x3c5   : > { %v5819_v34 = vpop.f32.mrf.mxu1  ;;  %v17898_v44 = vpop.f32.mrf.mxu0  ;;  %v15645_v35 = vcombine.low %v19369_v20, %v19370_v33  ;;  %v19373_v20 = vld [vmem:[#allocation2 + $0x90] sm:$0xf] }
 0x3c6   : > { %v5621_v36 = vadd.f32 %v17898_v44, %v22882_v40  ;;  %v23058_v18 = vadd.f32 %v5800_v5, %v5618_v48  ;;  %v7722_v5 = vrot.slane %v26340_v45, 3  ;;  %v26342_v38 = vld [vmem:[#allocation56_spill] sm:$0xff] }
 0x3c7   : > { %v17939_v53 = vpop.f32.mrf.mxu1  ;;  %v5519_v57 = vpop.f32.mrf.mxu0 }
 0x3c8   : > { %18142 = vmatmul.mubr.msk.bf16.gmra.mxu1 %vm2943_vm5, %v7719_v1  ;;  %v5619_v47 = vadd.f32 %v5519_v57, %v22889_v14  ;;  %v23062_v40 = vadd.f32 %v17932_v29, %v5621_v36  ;;  %v7723_v36 = vsel %vm555_vm1, %v7720_v61, %v7722_v5  ;;  %v7725_v57 = vsel %vm555_vm1, %v7722_v5, %v7724_v19  ;;  %v26347_v5 = vld [vmem:[#allocation61_spill] sm:$0xff] }
 0x3c9   : > { %18145 = vmatprep.mubr.msk.bf16.mxu1 %vm2943_vm5, %v7721_v17  ;;  %v5832_v21 = vpop.f32.mrf.mxu1  ;;  %v17901_v22 = vpop.f32.mrf.mxu0 }
 0x3ca   : > { %18104 = vmatmul.mubr.msk.bf16.gmra.mxu0 %vm2943_vm5, %v15645_v35  ;;  %v5624_v54 = vadd.f32 %v17901_v22, %v22892_v58  ;;  %v23069_v24 = vadd.f32 %v5803_v43, %v5619_v47  ;;  %v15688_v43 = vcombine.low %v19373_v20, %v7615_v63 }
 0x3cb   : > { %18107 = vmatprep.mubr.msk.bf16.mxu0 %vm2943_vm5, %v15646_v56  ;;  %v17940_v31 = vpop.f32.mrf.mxu1  ;;  %v5532_v14 = vpop.f32.mrf.mxu0  ;;  %v26345_v56 = vld [vmem:[#allocation155_spill] sm:$0xff] }
 0x3cc   : > { %v5622_v48 = vadd.f32 %v5532_v14, %v22897_v10  ;;  %v23072_v44 = vadd.f32 %v17935_v50, %v5624_v54  ;;  %v7726_v22 = vrot.slane %v26345_v56, 3 }
 0x3cd   : > { %v5835_v29 = vpop.f32.mrf.mxu1  ;;  %v17902_v1 = vpop.f32.mrf.mxu0 }
 0x3ce   : > { %v5625_v17 = vadd.f32 %v17902_v1, %v22902_v15  ;;  %v23078_v33 = vadd.f32 %v5816_v0, %v5622_v48  ;;  %v26343_v15 = vld [vmem:[#allocation59_spill] sm:$0xff]  ;;  %v26346_v0 = vld [vmem:[#allocation60_spill] sm:$0xff] }
 0x3cf   : > { %v17943_v58 = vpop.f32.mrf.mxu1  ;;  %v5535_v35 = vpop.f32.mrf.mxu0  ;;  %v26344_v32 = vcombine.low %v26342_v38, %v26343_v15  ;;  %v26348_v54 = vcombine.low %v26346_v0, %v26347_v5  ;;  %v26352_v15 = vld [vmem:[#allocation65_spill] sm:$0xff] }
 0x3d0   : > { %18146 = vmatmul.mubr.msk.bf16.gmra.mxu1 %vm2943_vm5, %v7723_v36  ;;  %v5623_v10 = vadd.f32 %v5535_v35, %v22909_v39  ;;  %v23082_v47 = vadd.f32 %v17936_v30, %v5625_v17  ;;  %v7728_v39 = vrot.slane %v15688_v43, 3  ;;  %v7727_v17 = vsel %vm555_vm1, %v7724_v19, %v7726_v22  ;;  %v26350_v19 = vld [vmem:[#allocation64_spill] sm:$0xff] }
 0x3d1   : > { %18149 = vmatprep.mubr.msk.bf16.mxu1 %vm2943_vm5, %v7725_v57  ;;  %v5848_v50 = vpop.f32.mrf.mxu1  ;;  %v17905_v61 = vpop.f32.mrf.mxu0 }
 0x3d2   : > { %18108 = vmatmul.mubr.msk.bf16.gmra.mxu0 %vm2943_vm5, %v26344_v32  ;;  %v5628_v45 = vadd.f32 %v17905_v61, %v22912_v4  ;;  %v23094_v14 = vadd.f32 %v5819_v34, %v5623_v10  ;;  %v7729_v20 = vsel %vm555_vm1, %v7726_v22, %v7728_v39  ;;  %v26349_v61 = vld [vmem:[#allocation62_spill] sm:$0xff]  ;;  %v26353_v32 = vld [vmem:[#allocation71_spill] sm:$0xff]  ;;  %vm11705_vm1 = vsmask.f32 256 }
 0x3d3   : > { %18111 = vmatprep.mubr.msk.bf16.mxu0 %vm2943_vm5, %v26348_v54  ;;  %v17944_v11 = vpop.f32.mrf.mxu1  ;;  %v5548_v30 = vpop.f32.mrf.mxu0  ;;  %v26351_v38 = vcombine.low %v26349_v61, %v26350_v19  ;;  %v19374_v54 = vld [vmem:[#allocation2 + $0x1c] sm:$0xf]  ;;  %v26358_v61 = vld [vmem:[#allocation69_spill] sm:$0xff] }
 0x3d4   : > { %v5626_v63 = vadd.f32 %v5548_v30, %v22917_v3  ;;  %v23097_v1 = vadd.f32 %v17939_v53, %v5628_v45  ;;  %v19375_v30 = vld [vmem:[#allocation2 + $0x20] sm:$0xf] }
 0x3d5   : > { %v5851_v48 = vpop.f32.mrf.mxu1  ;;  %v17906_v36 = vpop.f32.mrf.mxu0 }
 0x3d6   : > { %v5629_v4 = vadd.f32 %v17906_v36, %v22922_v27  ;;  %v23103_v35 = vadd.f32 %v5832_v21, %v5626_v63  ;;  %v26354_v21 = vcombine.low %v26352_v15, %v26353_v32  ;;  %v15728_v63 = vcombine.low %v19374_v54, %v19375_v30  ;;  %v19379_v54 = vld [vmem:[#allocation2 + $0x30] sm:$0xf] }
 0x3d7   : > { %v17947_v57 = vpop.f32.mrf.mxu1  ;;  %v5551_v34 = vpop.f32.mrf.mxu0 }
 0x3d8   : > { %18150 = vmatmul.mubr.msk.bf16.gmra.mxu1 %vm2943_vm5, %v7727_v17  ;;  %v5627_v3 = vadd.f32 %v5551_v34, %v22930_v25  ;;  %v23107_v53 = vadd.f32 %v17940_v31, %v5629_v4  ;;  %v26355_v34 = vld [vmem:[#allocation67_spill] sm:$0xff] }
 0x3d9   : > { %18153 = vmatprep.mubr.msk.bf16.mxu1 %vm2943_vm5, %v7729_v20  ;;  %v5864_v43 = vpop.f32.mrf.mxu1  ;;  %v17909_v10 = vpop.f32.mrf.mxu0 }
 0x3da   : > { %18112 = vmatmul.mubr.msk.bf16.gmra.mxu0 %vm2943_vm5, %v26351_v38  ;;  %v5632_v27 = vadd.f32 %v17909_v10, %v22934_v23  ;;  %v23118_v22 = vadd.f32 %v5835_v29, %v5627_v3  ;;  %v26356_v3 = vld [vmem:[#allocation72_spill] sm:$0xff] }
 0x3db   : > { %18115 = vmatprep.mubr.msk.bf16.mxu0 %vm2943_vm5, %v26354_v21  ;;  %v17948_v56 = vpop.f32.mrf.mxu1  ;;  %v5564_v25 = vpop.f32.mrf.mxu0  ;;  %v26357_v10 = vcombine.low %v26355_v34, %v26356_v3  ;;  %v26361_v3 = vld [vmem:[#allocation156_spill] sm:$0xff] }
 0x3dc   : > { %v5630_v31 = vadd.f32 %v5564_v25, %v22940_v26  ;;  %v23121_v0 = vadd.f32 %v17943_v58, %v5632_v27  ;;  %v19376_v27 = vld [vmem:[#allocation2 + $0x24] sm:$0xf] }
 0x3dd   : > { %v5867_v45 = vpop.f32.mrf.mxu1  ;;  %v17910_v5 = vpop.f32.mrf.mxu0 }
 0x3de   : > { %v5633_v23 = vadd.f32 %v17910_v5, %v22944_v52  ;;  %v23125_v17 = vadd.f32 %v5848_v50, %v5630_v31  ;;  %v19378_v5 = vld [vmem:[#allocation2 + $0x2c] sm:$0xf] }
 0x3df   : > { %v5567_v4 = vpop.f32.mrf.mxu0  ;;  %v15730_v30 = vcombine.low %v19378_v5, %v19379_v54  ;;  %v26368_v54 = vld [vmem:[#allocation48_spill] sm:$0xff] }
 0x3e0   : > { %v17951_v36 = vpop.f32.mrf.mxu1  ;;  %18154 = vmatmul.mubr.msk.bf16.gmra.mxu1 %vm2943_vm5, %v7728_v39  ;;  %v5631_v29 = vadd.f32 %v5567_v4, %v22953_v62  ;;  %v23129_v20 = vadd.f32 %v17944_v11, %v5633_v23  ;;  %v26359_v39 = vld [vmem:[#allocation95_spill] sm:$0xff] }
 0x3e1   : > { %18193 = vmatprep.mubr.msk.bf16.mxu1 %vm2943_vm5, %v15728_v63  ;;  %v17913_v58 = vpop.f32.mrf.mxu0  ;;  %v26360_v50 = vcombine.low %v26358_v61, %v26359_v39  ;;  %v19377_v11 = vld [vmem:[#allocation2 + $0x28] sm:$0xf] }
 0x3e2   : > { %v5880_v26 = vpop.f32.mrf.mxu1  ;;  %18116 = vmatmul.mubr.msk.bf16.gmra.mxu0 %vm2943_vm5, %v26357_v10  ;;  %v5636_v52 = vadd.f32 %v17913_v58, %v22956_v46  ;;  %v23140_v38 = vadd.f32 %v5851_v48, %v5631_v29  ;;  %v15729_v15 = vcombine.low %v19376_v27, %v19377_v11  ;;  %v23148_v46 = vld [vmem:[%s25499_s4 + $0xa8] sm:$0xff]  }
 0x3e3   : > { %18119 = vmatprep.mubr.msk.bf16.mxu0 %vm2943_vm5, %v26360_v50  ;;  %v5580_v62 = vpop.f32.mrf.mxu0 }
 0x3e4   : > { %v17952_v19 = vpop.f32.mrf.mxu1  ;;  %v5634_v32 = vadd.f32 %v5580_v62, %v22967_v6  ;;  %v23143_v25 = vadd.f32 %v17947_v57, %v5636_v52  ;;  %v19380_v57 = vld [vmem:[#allocation2 + $0x8c] sm:$0xf]  ;;  %v26363_v62 = vld [vmem:[#allocation122_spill] sm:$0xff] }
 0x3e5   : > { %v17914_v31 = vpop.f32.mrf.mxu0  ;;  %v15653_v4 = vcombine.low %v19380_v57, %v19380_v57  ;;  %v26362_v19 = vld [vmem:[#allocation116_spill] sm:$0xff] }
 0x3e6   : > { %v5883_v21 = vpop.f32.mrf.mxu1  ;;  %v5637_v48 = vadd.f32 %v17914_v31, %v22972_v2  ;;  %v23152_v23 = vadd.f32 %v5864_v43, %v5634_v32  ;;  %v26364_v27 = vcombine.low %v26362_v19, %v26363_v62  ;;  %v26366_v32 = vld [vmem:[#allocation123_spill] sm:$0xff]  ;;  %v26374_v19 = vld [vmem:[#allocation129_spill] sm:$0xff] }
 0x3e7   : > { %v5583_v6 = vpop.f32.mrf.mxu0 }
 0x3e8   : > { %v17991_v63 = vpop.f32.mrf.mxu1  ;;  %18194 = vmatmul.mubr.msk.bf16.vlgmr.msra.gmra.mxu1 %vm2943_vm5, %v15729_v15  ;;  %v5635_v29 = vadd.f32 %v5583_v6, %v22982_v7  ;;  %v23157_v34 = vadd.f32 %v17948_v56, %v5637_v48  ;;  %v26365_v15 = vld [vmem:[#allocation120_spill] sm:$0xff] }
 0x3e9   : > { %18197 = vmatprep.mubr.msk.bf16.mxu1 %vm2943_vm5, %v15730_v30  ;;  %18260 = vmatpush3.bf16.msra.mxu1 %v22961_v59  ;;  %v26369_v30 = vld [vmem:[#allocation157_spill] sm:$0xff] }
 0x3ea   : > { %v6554_v58 = vpop.f32.mrf.mxu1  ;;  %18327 = vmatprep.subr.bf16.mxu1 %v23148_v46  ;;  %v17917_v2 = vpop.f32.mrf.mxu0  ;;  %18120 = vmatmul.mubr.msk.bf16.gmra.mxu0 %vm2943_vm5, %v15653_v4  ;;  %v23164_v52 = vadd.f32 %v5867_v45, %v5635_v29  ;;  %v26367_v45 = vcombine.low %v26365_v15, %v26366_v32  ;;  %v26377_v32 = vld [vmem:[#allocation159_spill] sm:$0xff] }
 0x3eb   : > { %v5640_v43 = vadd.f32 %v17917_v2, %v22985_v41  ;;  %18159 = vmatprep.mubr.msk.bf16.mxu0 %vm2943_vm5, %v26361_v3  ;;  %v26370_v3 = vld [vmem:[#allocation124_spill] sm:$0xff] }
 0x3ec   : > { %v17992_v10 = vpop.f32.mrf.mxu1  ;;  %v5596_v61 = vpop.f32.mrf.mxu0 }
 0x3ed   : > { %v5638_v59 = vadd.f32 %v5596_v61, %v22990_v55  ;;  %v23167_v39 = vadd.f32 %v17951_v36, %v5640_v43  ;;  %v23182_v55 = vld [vmem:[%s25499_s4 + $0xa0] sm:$0xff]   ;;  %v26371_v61 = vld [vmem:[#allocation125_spill] sm:$0xff] }
 0x3ee   : > { %v6557_v7 = vpop.f32.mrf.mxu1  ;;  %v17918_v56 = vpop.f32.mrf.mxu0 }
 0x3ef   : > { %v23173_v41 = vadd.f32 %v5880_v26, %v5638_v59  ;;  %v26372_v59 = vcombine.low %v26370_v3, %v26371_v61  ;;  %v26373_v56 = vld [vmem:[#allocation126_spill] sm:$0xff]  ;;  %v26382_v3 = vld [vmem:[#allocation144_spill] sm:$0xff] }
 0x3f0   : > { %v17995_v50 = vpop.f32.mrf.mxu1  ;;  %18198 = vmatmul.mubr.msk.bf16.gmra.mxu1 %vm2943_vm5, %v26364_v27  ;;  %v5599_v11 = vpop.f32.mrf.mxu0  ;;  %v26375_v62 = vcombine.low %v26373_v56, %v26374_v19  ;;  %v26385_v19 = vld [vmem:[#allocation162_spill] sm:$0xff] }
 0x3f1   : > { %18201 = vmatprep.mubr.msk.bf16.mxu1 %vm2943_vm5, %v26367_v45  ;;  %v5639_v36 = vadd.f32 %v5599_v11, %v23008_v37  ;;  %v26376_v11 = vld [vmem:[#allocation158_spill] sm:$0xff] }
 0x3f2   : > { %v6570_v31 = vpop.f32.mrf.mxu1  ;;  %v17957_v5 = vpop.f32.mrf.mxu0  ;;  %18160 = vmatmul.mubr.msk.bf16.vlgmr.msra.gmra.mxu0 %vm2943_vm5, %v26368_v54 }
 0x3f3   : > { %v6287_v26 = vadd.f32 %v17957_v5, %v23012_v12  ;;  %18163 = vmatprep.mubr.msk.bf16.mxu0 %vm2943_vm5, %v26369_v30  ;;  %18226 = vmatpush3.bf16.msra.mxu0 %v22996_v49  ;;  %v23191_v6 = vadd.f32 %v5883_v21, %v5639_v36 }
 0x3f4   : > { %v17996_v48 = vpop.f32.mrf.mxu1  ;;  %v6159_v57 = vpop.f32.mrf.mxu0  ;;  %18293 = vmatprep.subr.bf16.mxu0 %v23182_v55 }
 0x3f5   : > { %v6285_v37 = vadd.f32 %v6159_v57, %v23018_v60  ;;  %v23195_v29 = vadd.f32 %v17991_v63, %v6287_v26  ;;  %v26378_v57 = vld [vmem:[#allocation130_spill] sm:$0xff] }
 0x3f6   : > { %v6573_v4 = vpop.f32.mrf.mxu1  ;;  %v17958_v2 = vpop.f32.mrf.mxu0 }
 0x3f7   : > { %v6288_v43 = vadd.f32 %v17958_v2, %v23022_v16  ;;  %v23202_v49 = vadd.f32 %v6554_v58, %v6285_v37  ;;  %v26379_v37 = vld [vmem:[#allocation135_spill] sm:$0xff] }
 0x3f8   : > { %v17999_v12 = vpop.f32.mrf.mxu1  ;;  %18202 = vmatmul.mubr.msk.bf16.gmra.mxu1 %vm2943_vm5, %v26372_v59  ;;  %v6162_v21 = vpop.f32.mrf.mxu0  ;;  %v26380_v2 = vcombine.low %v26378_v57, %v26379_v37  ;;  %v26390_v57 = vld [vmem:[#allocation149_spill] sm:$0xff] }
 0x3f9   : > { %18205 = vmatprep.mubr.msk.bf16.mxu1 %vm2943_vm5, %v26375_v62  ;;  %v6286_v60 = vadd.f32 %v6162_v21, %v23029_v9  ;;  %v23209_v27 = vadd.f32 %v17992_v10, %v6288_v43  ;;  %v26384_v21 = vld [vmem:[#allocation161_spill] sm:$0xff] }
 0x3fa   : > { %v6586_v63 = vpop.f32.mrf.mxu1  ;;  %v17961_v16 = vpop.f32.mrf.mxu0  ;;  %18164 = vmatmul.mubr.msk.bf16.gmra.mxu0 %vm2943_vm5, %v26376_v11 }
 0x3fb   : > { %v6291_v15 = vadd.f32 %v17961_v16, %v23032_v28  ;;  %18167 = vmatprep.mubr.msk.bf16.mxu0 %vm2943_vm5, %v26377_v32  ;;  %v23216_v45 = vadd.f32 %v6557_v7, %v6286_v60  ;;  %v26381_v7 = vld [vmem:[#allocation131_spill] sm:$0xff] }
 0x3fc   : > { %v18000_v58 = vpop.f32.mrf.mxu1  ;;  %v6175_v36 = vpop.f32.mrf.mxu0  ;;  %v26383_v61 = vcombine.low %v26381_v7, %v26382_v3  ;;  %v26393_v3 = vld [vmem:[#allocation164_spill] sm:$0xff] }
 0x3fd   : > { %v6289_v5 = vadd.f32 %v6175_v36, %v23038_v13  ;;  %v23219_v9 = vadd.f32 %v17995_v50, %v6291_v15  ;;  %v26386_v36 = vld [vmem:[#allocation136_spill] sm:$0xff] }
 0x3fe   : > { %v6589_v54 = vpop.f32.mrf.mxu1  ;;  %v17962_v10 = vpop.f32.mrf.mxu0 }
 0x3ff   : > { %v6292_v26 = vadd.f32 %v17962_v10, %v23042_v8  ;;  %v23226_v28 = vadd.f32 %v6570_v31, %v6289_v5  ;;  %v26387_v5 = vld [vmem:[#allocation145_spill] sm:$0xff] }
 0x400   : > { %v18003_v30 = vpop.f32.mrf.mxu1  ;;  %18206 = vmatmul.mubr.msk.bf16.gmra.mxu1 %vm2943_vm5, %v26380_v2  ;;  %v6178_v43 = vpop.f32.mrf.mxu0  ;;  %v26388_v10 = vcombine.low %v26386_v36, %v26387_v5  ;;  %v26398_v36 = vld [vmem:[#allocation151_spill] sm:$0xff] }
 0x401   : > { %18209 = vmatprep.mubr.msk.bf16.mxu1 %vm2943_vm5, %v26383_v61  ;;  %v6290_v13 = vadd.f32 %v6178_v43, %v23049_v51  ;;  %v23233_v59 = vadd.f32 %v17996_v48, %v6292_v26  ;;  %v26392_v43 = vld [vmem:[#allocation163_spill] sm:$0xff] }
 0x402   : > { %v6602_v50 = vpop.f32.mrf.mxu1  ;;  %v17965_v8 = vpop.f32.mrf.mxu0  ;;  %18168 = vmatmul.mubr.msk.bf16.gmra.mxu0 %vm2943_vm5, %v26384_v21 }
 0x403   : > { %v6295_v56 = vadd.f32 %v17965_v8, %v23052_v42  ;;  %18171 = vmatprep.mubr.msk.bf16.mxu0 %vm2943_vm5, %v26385_v19  ;;  %v23240_v62 = vadd.f32 %v6573_v4, %v6290_v13  ;;  %v26389_v4 = vld [vmem:[#allocation137_spill] sm:$0xff] }
 0x404   : > { %v18004_v31 = vpop.f32.mrf.mxu1  ;;  %v6191_v60 = vpop.f32.mrf.mxu0  ;;  %v26391_v37 = vcombine.low %v26389_v4, %v26390_v57  ;;  %v26401_v57 = vld [vmem:[#allocation133_spill] sm:$0xff] }
 0x405   : > { %v6293_v16 = vadd.f32 %v6191_v60, %v23058_v18  ;;  %v23243_v51 = vadd.f32 %v17999_v12, %v6295_v56  ;;  %v26394_v60 = vld [vmem:[#allocation140_spill] sm:$0xff] }
 0x406   : > { %v6605_v11 = vpop.f32.mrf.mxu1  ;;  %v17966_v48 = vpop.f32.mrf.mxu0 }
 0x407   : > { %v6296_v15 = vadd.f32 %v17966_v48, %v23062_v40  ;;  %v23250_v42 = vadd.f32 %v6586_v63, %v6293_v16  ;;  %v26395_v16 = vld [vmem:[#allocation150_spill] sm:$0xff] }
 0x408   : > { %v18007_v32 = vpop.f32.mrf.mxu1  ;;  %18210 = vmatmul.mubr.msk.bf16.gmra.mxu1 %vm2943_vm5, %v26388_v10  ;;  %v6194_v26 = vpop.f32.mrf.mxu0  ;;  %v26396_v48 = vcombine.low %v26394_v60, %v26395_v16  ;;  %v26405_v16 = vld [vmem:[#allocation146_spill] sm:$0xff] }
 0x409   : > { %18213 = vmatprep.mubr.msk.bf16.mxu1 %vm2943_vm5, %v26391_v37  ;;  %v6294_v18 = vadd.f32 %v6194_v26, %v23069_v24  ;;  %v23257_v2 = vadd.f32 %v18000_v58, %v6296_v15  ;;  %v26400_v26 = vld [vmem:[#allocation165_spill] sm:$0xff] }
 0x40a   : > { %v6618_v12 = vpop.f32.mrf.mxu1  ;;  %v17969_v40 = vpop.f32.mrf.mxu0  ;;  %18172 = vmatmul.mubr.msk.bf16.gmra.mxu0 %vm2943_vm5, %v26392_v43 }
 0x40b   : > { %v6299_v7 = vadd.f32 %v17969_v40, %v23072_v44  ;;  %18175 = vmatprep.mubr.msk.bf16.mxu0 %vm2943_vm5, %v26393_v3  ;;  %v23264_v61 = vadd.f32 %v6589_v54, %v6294_v18  ;;  %v26397_v54 = vld [vmem:[#allocation141_spill] sm:$0xff] }
 0x40c   : > { %v18008_v63 = vpop.f32.mrf.mxu1  ;;  %v6207_v13 = vpop.f32.mrf.mxu0  ;;  %v26399_v5 = vcombine.low %v26397_v54, %v26398_v36 }
 0x40d   : > { %v6297_v8 = vadd.f32 %v6207_v13, %v23078_v33  ;;  %v23267_v24 = vadd.f32 %v18003_v30, %v6299_v7  ;;  %v8635_v7 = vld [vmem:[#allocation2 + $0x20] sm:$0xf] }
 0x40e   : > { %v6621_v21 = vpop.f32.mrf.mxu1  ;;  %v17970_v58 = vpop.f32.mrf.mxu0 }
 0x40f   : > { %v6300_v56 = vadd.f32 %v17970_v58, %v23082_v47  ;;  %v23274_v44 = vadd.f32 %v6602_v50, %v6297_v8  ;;  %v26402_v8 = vld [vmem:[#allocation142_spill] sm:$0xff] }
 0x410   : > { %v18011_v19 = vpop.f32.mrf.mxu1  ;;  %18214 = vmatmul.mubr.msk.bf16.gmra.mxu1 %vm2943_vm5, %v26396_v48  ;;  %v6210_v15 = vpop.f32.mrf.mxu0  ;;  %v26403_v58 = vld [vmem:[#allocation154_spill] sm:$0xff] }
 0x411   : > { %18217 = vmatprep.mubr.msk.bf16.mxu1 %vm2943_vm5, %v26399_v5  ;;  %v6298_v33 = vadd.f32 %v6210_v15, %v23094_v14  ;;  %v23281_v10 = vadd.f32 %v18004_v31, %v6300_v56  ;;  %v23298_v56 = vld [vmem:[#allocation2 + $0x24] sm:$0xff]  }
 0x412   : > { %v6634_v30 = vpop.f32.mrf.mxu1  ;;  %v17973_v47 = vpop.f32.mrf.mxu0  ;;  %18176 = vmatmul.mubr.msk.bf16.gmra.mxu0 %vm2943_vm5, %v26400_v26 }
 0x413   : > { %v6303_v4 = vadd.f32 %v17973_v47, %v23097_v1  ;;  %18179 = vmatprep.mubr.msk.bf16.mxu0 %vm2943_vm5, %v26401_v57  ;;  %v23288_v37 = vadd.f32 %v6605_v11, %v6298_v33  ;;  %v26404_v1 = vcombine.low %v26402_v8, %v26403_v58  ;;  %v26408_v33 = vld [vmem:[#allocation23_spill] sm:$0xff]  ;;  %v26409_v47 = vld [vmem:[#allocation117_spill] sm:$0xff]  ;;  %v9129_v57 = vrot.slane %v23298_v56, 1 }
 0x414   : > { %v18012_v50 = vpop.f32.mrf.mxu1  ;;  %v6223_v18 = vpop.f32.mrf.mxu0 }
 0x415   : > { %v6301_v40 = vadd.f32 %v6223_v18, %v23103_v35  ;;  %v23291_v14 = vadd.f32 %v18007_v32, %v6303_v4  ;;  %v26406_v35 = vld [vmem:[#allocation160_spill] sm:$0xff]  ;;  %v9121_v32 = vld [vmem:[#allocation2 + $0x1c] sm:$0xe] }
 0x416   : > { %v6637_v43 = vpop.f32.mrf.mxu1  ;;  %v17974_v31 = vpop.f32.mrf.mxu0  ;;  %v26407_v48 = vcombine.low %v26405_v16, %v26406_v35  ;;  %v15798_v54 = vcombine.low %v9121_v32, %v8635_v7  ;;  %v8634_v4 = vld [vmem:[#allocation2 + $0x1c] sm:$0xf] }
 0x417   : > { %v6304_v3 = vadd.f32 %v17974_v31, %v23107_v53  ;;  %v23300_v11 = vadd.f32 %v6618_v12, %v6301_v40  ;;  %v15763_v40 = vcombine.low %v8634_v4, %v8635_v7  ;;  %v23327_v7 = vld [vmem:[#allocation2 + $0x34] sm:$0xff]  }
 0x418   : > { %v18015_v13 = vpop.f32.mrf.mxu1  ;;  %18218 = vmatmul.mubr.msk.bf16.gmra.mxu1 %vm2943_vm5, %v26404_v1  ;;  %v6226_v60 = vpop.f32.mrf.mxu0  ;;  %v9128_v58 = vrot.slane %v15798_v54, 1 }
 0x419   : > { %18221 = vmatprep.mubr.msk.bf16.mxu1 %vm2943_vm5, %v26407_v48  ;;  %v6302_v15 = vadd.f32 %v6226_v60, %v23118_v22  ;;  %v23307_v36 = vadd.f32 %v18008_v63, %v6304_v3  ;;  %v19381_v3 = vld [vmem:[#allocation2 + $0x94] sm:$0xf]  ;;  %v23322_v60 = vld [vmem:[#allocation2 + $0x2c] sm:$0xff]   ;;  %v8752_v32 = vshll.u32 %v15763_v40, 16 }
 0x41a   : > { %v6650_v53 = vpop.f32.mrf.mxu1  ;;  %v17977_v5 = vpop.f32.mrf.mxu0  ;;  %18180 = vmatmul.mubr.msk.bf16.gmra.mxu0 %vm2943_vm5, %v26408_v33  ;;  %v15743_v8 = vcombine.low %v19381_v3, %v19381_v3  ;;  %v9131_v33 = vrot.slane %v23322_v60, 1 }
 0x41b   : > { %v6307_v12 = vadd.f32 %v17977_v5, %v23121_v0  ;;  %18183 = vmatprep.mubr.msk.bf16.mxu0 %vm2943_vm5, %v26409_v47  ;;  %v23315_v18 = vadd.f32 %v6621_v21, %v6302_v15  ;;  %v9130_v21 = vsel %vm3359_vm6, %v9128_v58, %v9129_v57  ;;  %v26410_v5 = vld [vmem:[#allocation118_spill] sm:$0xff] }
 0x41c   : > { %v18016_v26 = vpop.f32.mrf.mxu1  ;;  %v6239_v22 = vpop.f32.mrf.mxu0  ;;  %v26411_v47 = vld [vmem:[#allocation114_spill] sm:$0xff] }
 0x41d   : > { %v6305_v63 = vadd.f32 %v6239_v22, %v23125_v17  ;;  %v23320_v1 = vadd.f32 %v18011_v19, %v6307_v12  ;;  %v8757_v12 = vshll.u32 %v23298_v56, 16 }
 0x41e   : > { %v23318_v31 = vpop.f32.mrf.mxu1  ;;  %v17978_v0 = vpop.f32.mrf.mxu0 }
 0x41f   : > { %v6308_v16 = vadd.f32 %v17978_v0, %v23129_v20  ;;  %v23329_v17 = vadd.f32 %v6634_v30, %v6305_v63  ;;  %v8754_v63 = vrot.slane %v8752_v32, 1 }
 0x420   : > { %v18019_v35 = vpop.f32.mrf.mxu1  ;;  %18222 = vmatmul.mubr.msk.bf16.gmra.mxu1 %vm2943_vm5, %v15743_v8  ;;  %v6242_v48 = vpop.f32.mrf.mxu0 }
 0x421   : > { %18261 = vmatprep.mubr.msk.bf16.mxu1 %vm2943_vm5, %v9130_v21  ;;  %v6306_v19 = vadd.f32 %v6242_v48, %v23140_v38  ;;  %v23335_v54 = vadd.f32 %v18012_v50, %v6308_v16  ;;  %v9133_v38 = vrot.slane %v23327_v7, 1  ;;  %v9132_v16 = vsel %vm3359_vm6, %v9129_v57, %v9131_v33 }
 0x422   : > { %v23333_v15 = vpop.f32.mrf.mxu1  ;;  %v17981_v20 = vpop.f32.mrf.mxu0  ;;  %18184 = vmatmul.mubr.msk.bf16.gmra.mxu0 %vm2943_vm5, %v26410_v5  ;;  %v8750_v21 = vshrl.u32 %v15763_v40, 16  ;;  %v8759_v48 = vrot.slane %v8757_v12, 1  ;;  %v8765_v40 = vshll.u32 %v23322_v60, 16 }
 0x423   : > { %v6311_v30 = vadd.f32 %v17981_v20, %v23143_v25  ;;  %18187 = vmatprep.mubr.msk.bf16.mxu0 %vm2943_vm5, %v26411_v47  ;;  %v23345_v22 = vadd.f32 %v6637_v43, %v6306_v19  ;;  %v23355_v25 = vld [vmem:[%s25499_s4 + $0xb8] sm:$0xff]   ;;  %v26412_v47 = vld [vmem:[#allocation127_spill] sm:$0xff] }
 0x424   : > { %v18020_v4 = vpop.f32.mrf.mxu1  ;;  %v6255_v50 = vpop.f32.mrf.mxu0  ;;  %v23358_v43 = vld [vmem:[#allocation2 + $0x3c] sm:$0xff]   ;;  %v8755_v57 = vor.u32 %v8754_v63, %v8750_v21 }
 0x425   : > { %v6309_v3 = vadd.f32 %v6255_v50, %v23152_v23  ;;  %v23350_v58 = vadd.f32 %v18015_v13, %v6311_v30  ;;  %v9134_v23 = vsel %vm3359_vm6, %v9131_v33, %v9133_v38  ;;  %v23365_v13 = vld [vmem:[#allocation2 + $0x44] sm:$0xff]   ;;  %v9135_v4 = vrot.slane %v23358_v43, 1 }
 0x426   : > { %v23348_v8 = vpop.f32.mrf.mxu1  ;;  %v17982_v0 = vpop.f32.mrf.mxu0  ;;  %v8773_v50 = vshll.u32 %v23327_v7, 16 }
 0x427   : > { %v6312_v32 = vadd.f32 %v17982_v0, %v23157_v34  ;;  %v23367_v20 = vadd.f32 %v6650_v53, %v6309_v3  ;;  %v8760_v53 = vsel %vm2809_vm7, %v8755_v57, %v8759_v48  ;;  %v8767_v0 = vrot.slane %v8765_v40, 1 }
 0x428   : > { %v23361_v19 = vpop.f32.mrf.mxu1  ;;  %18262 = vmatmul.mubr.msk.bf16.vlgmr.msra.gmra.mxu1 %vm2943_vm5, %v9132_v16  ;;  %v6258_v5 = vpop.f32.mrf.mxu0  ;;  %v8761_v16 = vshrl.u32 %v23298_v56, 16  ;;  %v8769_v57 = vshrl.u32 %v23322_v60, 16  ;;  %v8781_v60 = vshll.u32 %v23358_v43, 16 }
 0x429   : > { %18265 = vmatprep.mubr.msk.bf16.mxu1 %vm2943_vm5, %v9134_v23  ;;  %18328 = vmatpush3.bf16.msra.mxu1 %v23148_v46  ;;  %v6310_v34 = vadd.f32 %v6258_v5, %v23164_v52  ;;  %v23375_v30 = vadd.f32 %v18016_v26, %v6312_v32  ;;  %v9137_v26 = vrot.slane %v23365_v13, 1  ;;  %v9136_v5 = vsel %vm3359_vm6, %v9133_v38, %v9135_v4 }
 0x42a   : > { %v23373_v12 = vpop.f32.mrf.mxu1  ;;  %18395 = vmatprep.subr.bf16.mxu1 %v23355_v25  ;;  %v17985_v33 = vpop.f32.mrf.mxu0  ;;  %18188 = vmatmul.mubr.msk.bf16.gmra.mxu0 %vm2943_vm5, %v26412_v47  ;;  %v23399_v47 = vld [vmem:[#allocation2 + $0x4c] sm:$0xff]   ;;  %v8771_v38 = vor.u32 %v8769_v57, %v8767_v0  ;;  %v8783_v57 = vrot.slane %v8781_v60, 1 }
 0x42b   : > { %v6315_v46 = vadd.f32 %v17985_v33, %v23167_v39  ;;  %18227 = vmatprep.mubr.msk.bf16.mxu0 %vm2943_vm5, %v8760_v53  ;;  %v23389_v63 = vadd.f32 %v23318_v31, %v6310_v34  ;;  %v8775_v33 = vrot.slane %v8773_v50, 1  ;;  %v8763_v31 = vor.u32 %v8761_v16, %v8759_v48  ;;  %v23415_v48 = vld [vmem:[%s25499_s4 + $0xb0] sm:$0xff]  }
 0x42c   : > { %v23385_v52 = vpop.f32.mrf.mxu1  ;;  %v6271_v3 = vpop.f32.mrf.mxu0  ;;  %v9138_v56 = vsel %vm3359_vm6, %v9135_v4, %v9137_v26  ;;  %v8789_v16 = vshll.u32 %v23365_v13, 16 }
 0x42d   : > { %v6313_v21 = vadd.f32 %v6271_v3, %v23173_v41  ;;  %v23395_v23 = vadd.f32 %v18019_v35, %v6315_v46  ;;  %v23405_v41 = vld [vmem:[#allocation2 + $0x54] sm:$0xff]   ;;  %v8768_v4 = vsel %vm2809_vm7, %v8763_v31, %v8767_v0  ;;  %v9139_v3 = vrot.slane %v23399_v47, 1 }
 0x42e   : > { %v23393_v32 = vpop.f32.mrf.mxu1  ;;  %v17986_v39 = vpop.f32.mrf.mxu0  ;;  %v8777_v31 = vshrl.u32 %v23327_v7, 16  ;;  %v23451_v7 = vld [vmem:[#allocation2 + $0x64] sm:$0xff]  }
 0x42f   : > { %v23408_v35 = vadd.f32 %v23333_v15, %v6313_v21  ;;  %v8776_v15 = vsel %vm2809_vm7, %v8771_v38, %v8775_v33 }
 0x430   : > { %v23401_v34 = vpop.f32.mrf.mxu1  ;;  %18266 = vmatmul.mubr.msk.bf16.gmra.mxu1 %vm2943_vm5, %v9136_v5  ;;  %v6274_v40 = vpop.f32.mrf.mxu0  ;;  %v8779_v60 = vor.u32 %v8777_v31, %v8775_v33 }
 0x431   : > { %18269 = vmatprep.mubr.msk.bf16.mxu1 %vm2943_vm5, %v9138_v56  ;;  %v6314_v53 = vadd.f32 %v6274_v40, %v23191_v6  ;;  %v9141_v6 = vrot.slane %v23405_v41, 1 }
 0x432   : > { %v23418_v50 = vpop.f32.mrf.mxu1  ;;  %v18025_v46 = vpop.f32.mrf.mxu0  ;;  %18228 = vmatmul.mubr.msk.bf16.vlgmr.msra.gmra.mxu0 %vm2943_vm5, %v8768_v4  ;;  %v9140_v4 = vsel %vm3359_vm6, %v9137_v26, %v9139_v3 }
 0x433   : > { %v6965_v21 = vadd.f32 %v18025_v46, %v23195_v29  ;;  %18231 = vmatprep.mubr.msk.bf16.mxu0 %vm2943_vm5, %v8776_v15  ;;  %18294 = vmatpush3.bf16.msra.mxu0 %v23182_v55  ;;  %v23432_v0 = vadd.f32 %v23348_v8, %v6314_v53  ;;  %v8785_v55 = vshrl.u32 %v23358_v43, 16  ;;  %v8791_v8 = vrot.slane %v8789_v16, 1  ;;  %v23444_v53 = vld [vmem:[#allocation2 + $0x5c] sm:$0xff]  }
 0x434   : > { %v23427_v39 = vpop.f32.mrf.mxu1  ;;  %v6837_v5 = vpop.f32.mrf.mxu0  ;;  %18361 = vmatprep.subr.bf16.mxu0 %v23415_v48  ;;  %v8797_v16 = vshll.u32 %v23399_v47, 16  ;;  %v9143_v31 = vrot.slane %v23444_v53, 1 }
 0x435   : > { %v6963_v56 = vadd.f32 %v6837_v5, %v23202_v49  ;;  %v23440_v40 = vadd.f32 %v23361_v19, %v6965_v21  ;;  %v9142_v49 = vsel %vm3359_vm6, %v9139_v3, %v9141_v6  ;;  %v8787_v43 = vor.u32 %v8785_v55, %v8783_v57 }
 0x436   : > { %v23437_v29 = vpop.f32.mrf.mxu1  ;;  %v18026_v38 = vpop.f32.mrf.mxu0  ;;  %v8784_v21 = vsel %vm2809_vm7, %v8779_v60, %v8783_v57  ;;  %v9145_v57 = vrot.slane %v23451_v7, 1  ;;  %v8799_v55 = vrot.slane %v8797_v16, 1  ;;  %v8793_v60 = vshrl.u32 %v23365_v13, 16  ;;  %v23493_v13 = vld [vmem:[#allocation2 + $0x74] sm:$0xff]  }
 0x437   : > { %v6966_v46 = vadd.f32 %v18026_v38, %v23209_v27  ;;  %v23454_v19 = vadd.f32 %v23373_v12, %v6963_v56  ;;  %v8792_v12 = vsel %vm2809_vm7, %v8787_v43, %v8791_v8  ;;  %v8805_v56 = vshll.u32 %v23405_v41, 16 }
 0x438   : > { %v23447_v15 = vpop.f32.mrf.mxu1  ;;  %18270 = vmatmul.mubr.msk.bf16.gmra.mxu1 %vm2943_vm5, %v9140_v4  ;;  %v6840_v26 = vpop.f32.mrf.mxu0  ;;  %v9144_v43 = vsel %vm3359_vm6, %v9141_v6, %v9143_v31 }
 0x439   : > { %18273 = vmatprep.mubr.msk.bf16.mxu1 %vm2943_vm5, %v9142_v49  ;;  %v6964_v33 = vadd.f32 %v6840_v26, %v23216_v45  ;;  %v23463_v5 = vadd.f32 %v23385_v52, %v6966_v46 }
 0x43a   : > { %v23459_v27 = vpop.f32.mrf.mxu1  ;;  %v18029_v3 = vpop.f32.mrf.mxu0  ;;  %18232 = vmatmul.mubr.msk.bf16.gmra.mxu0 %vm2943_vm5, %v8784_v21  ;;  %v8801_v21 = vshrl.u32 %v23399_v47, 16 }
 0x43b   : > { %v6969_v38 = vadd.f32 %v18029_v3, %v23219_v9  ;;  %18235 = vmatprep.mubr.msk.bf16.mxu0 %vm2943_vm5, %v8792_v12  ;;  %v23475_v52 = vadd.f32 %v23393_v32, %v6964_v33  ;;  %v8807_v3 = vrot.slane %v8805_v56, 1  ;;  %v23486_v12 = vld [vmem:[#allocation2 + $0x6c] sm:$0xff]   ;;  %v8795_v32 = vor.u32 %v8793_v60, %v8791_v8 }
 0x43c   : > { %v23471_v45 = vpop.f32.mrf.mxu1  ;;  %v6853_v4 = vpop.f32.mrf.mxu0  ;;  %v8803_v47 = vor.u32 %v8801_v21, %v8799_v55  ;;  %v8813_v56 = vshll.u32 %v23444_v53, 16  ;;  %v9147_v60 = vrot.slane %v23486_v12, 1 }
 0x43d   : > { %v6967_v46 = vadd.f32 %v6853_v4, %v23226_v28  ;;  %v23482_v26 = vadd.f32 %v23401_v34, %v6969_v38  ;;  %v9146_v28 = vsel %vm3359_vm6, %v9143_v31, %v9145_v57  ;;  %v8800_v38 = vsel %vm2809_vm7, %v8795_v32, %v8799_v55 }
 0x43e   : > { %v23479_v49 = vpop.f32.mrf.mxu1  ;;  %v18030_v9 = vpop.f32.mrf.mxu0  ;;  %v9149_v55 = vrot.slane %v23493_v13, 1  ;;  %v8815_v21 = vrot.slane %v8813_v56, 1  ;;  %v8809_v32 = vshrl.u32 %v23405_v41, 16  ;;  %v23535_v41 = vld [vmem:[#allocation2 + $0x84] sm:$0xff]  }
 0x43f   : > { %v6970_v16 = vadd.f32 %v18030_v9, %v23233_v59  ;;  %v23496_v34 = vadd.f32 %v23418_v50, %v6967_v46  ;;  %v8808_v50 = vsel %vm2809_vm7, %v8803_v47, %v8807_v3  ;;  %v8821_v46 = vshll.u32 %v23451_v7, 16 }
 0x440   : > { %v23489_v33 = vpop.f32.mrf.mxu1  ;;  %18274 = vmatmul.mubr.msk.bf16.gmra.mxu1 %vm2943_vm5, %v9144_v43  ;;  %v6856_v6 = vpop.f32.mrf.mxu0  ;;  %v9148_v47 = vsel %vm3359_vm6, %v9145_v57, %v9147_v60 }
 0x441   : > { %18277 = vmatprep.mubr.msk.bf16.mxu1 %vm2943_vm5, %v9146_v28  ;;  %v6968_v8 = vadd.f32 %v6856_v6, %v23240_v62  ;;  %v23505_v4 = vadd.f32 %v23427_v39, %v6970_v16 }
 0x442   : > { %v23501_v59 = vpop.f32.mrf.mxu1  ;;  %v18033_v31 = vpop.f32.mrf.mxu0  ;;  %18236 = vmatmul.mubr.msk.bf16.gmra.mxu0 %vm2943_vm5, %v8800_v38  ;;  %v8817_v38 = vshrl.u32 %v23444_v53, 16 }
 0x443   : > { %v6973_v9 = vadd.f32 %v18033_v31, %v23243_v51  ;;  %18239 = vmatprep.mubr.msk.bf16.mxu0 %vm2943_vm5, %v8808_v50  ;;  %v23517_v39 = vadd.f32 %v23437_v29, %v6968_v8  ;;  %v8823_v31 = vrot.slane %v8821_v46, 1  ;;  %v23528_v50 = vld [vmem:[#allocation2 + $0x7c] sm:$0xff]   ;;  %v8811_v29 = vor.u32 %v8809_v32, %v8807_v3 }
 0x444   : > { %v23513_v62 = vpop.f32.mrf.mxu1  ;;  %v6869_v43 = vpop.f32.mrf.mxu0  ;;  %v8819_v53 = vor.u32 %v8817_v38, %v8815_v21  ;;  %v8829_v46 = vshll.u32 %v23486_v12, 16  ;;  %v9151_v32 = vrot.slane %v23528_v50, 1 }
 0x445   : > { %v6971_v16 = vadd.f32 %v6869_v43, %v23250_v42  ;;  %v23524_v6 = vadd.f32 %v23447_v15, %v6973_v9  ;;  %v9150_v42 = vsel %vm3359_vm6, %v9147_v60, %v9149_v55  ;;  %v8816_v9 = vsel %vm2809_vm7, %v8811_v29, %v8815_v21 }
 0x446   : > { %v23521_v28 = vpop.f32.mrf.mxu1  ;;  %v18034_v51 = vpop.f32.mrf.mxu0  ;;  %v9153_v21 = vrot.slane %v23535_v41, 1  ;;  %v8831_v38 = vrot.slane %v8829_v46, 1  ;;  %v8825_v29 = vshrl.u32 %v23451_v7, 16  ;;  %v23577_v7 = vld [vmem:[#allocation2 + $0x94] sm:$0x1f]  }
 0x447   : > { %v6974_v56 = vadd.f32 %v18034_v51, %v23257_v2  ;;  %v23538_v15 = vadd.f32 %v23459_v27, %v6971_v16  ;;  %v8824_v27 = vsel %vm2809_vm7, %v8819_v53, %v8823_v31  ;;  %v8837_v16 = vshll.u32 %v23493_v13, 16 }
 0x448   : > { %v23531_v8 = vpop.f32.mrf.mxu1  ;;  %18278 = vmatmul.mubr.msk.bf16.gmra.mxu1 %vm2943_vm5, %v9148_v47  ;;  %v6872_v57 = vpop.f32.mrf.mxu0  ;;  %v9152_v53 = vsel %vm3359_vm6, %v9149_v55, %v9151_v32 }
 0x449   : > { %18281 = vmatprep.mubr.msk.bf16.mxu1 %vm2943_vm5, %v9150_v42  ;;  %v6972_v3 = vadd.f32 %v6872_v57, %v23264_v61  ;;  %v23547_v43 = vadd.f32 %v23471_v45, %v6974_v56 }
 0x44a   : > { %v23543_v2 = vpop.f32.mrf.mxu1  ;;  %v18037_v60 = vpop.f32.mrf.mxu0  ;;  %18240 = vmatmul.mubr.msk.bf16.gmra.mxu0 %vm2943_vm5, %v8816_v9  ;;  %v8833_v9 = vshrl.u32 %v23486_v12, 16 }
 0x44b   : > { %v6977_v51 = vadd.f32 %v18037_v60, %v23267_v24  ;;  %18243 = vmatprep.mubr.msk.bf16.mxu0 %vm2943_vm5, %v8824_v27  ;;  %v23559_v45 = vadd.f32 %v23479_v49, %v6972_v3  ;;  %v8839_v60 = vrot.slane %v8837_v16, 1  ;;  %v23570_v27 = vld [vmem:[#allocation2 + $0x8c] sm:$0xff]   ;;  %v8827_v49 = vor.u32 %v8825_v29, %v8823_v31  ;;  %v9761_v31 = vld [vmem:[#allocation2 + $0x24] sm:$0xf]  ;;  %v19382_v29 = vld [vmem:[#allocation2 + $0x28] sm:$0xf] }
 0x44c   : > { %v23555_v61 = vpop.f32.mrf.mxu1  ;;  %v6885_v47 = vpop.f32.mrf.mxu0  ;;  %v8835_v12 = vor.u32 %v8833_v9, %v8831_v38  ;;  %v8845_v16 = vshll.u32 %v23528_v50, 16  ;;  %v8853_v9 = vshll.u32 %v23535_v41, 16 }
 0x44d   : > { %v6975_v56 = vadd.f32 %v6885_v47, %v23274_v44  ;;  %v23566_v57 = vadd.f32 %v23489_v33, %v6977_v51  ;;  %v9154_v44 = vsel %vm3359_vm6, %v9151_v32, %v9153_v21  ;;  %v8832_v47 = vsel %vm2809_vm7, %v8827_v49, %v8831_v38 }
 0x44e   : > { %v23563_v42 = vpop.f32.mrf.mxu1  ;;  %v18038_v24 = vpop.f32.mrf.mxu0  ;;  %v15853_v32 = vcombine.low %v9761_v31, %v19382_v29  ;;  %v9157_v38 = vrot.slane %v23577_v7, 1  ;;  %v8841_v49 = vshrl.u32 %v23493_v13, 16 }
 0x44f   : > { %v6978_v46 = vadd.f32 %v18038_v24, %v23281_v10  ;;  %v23580_v33 = vadd.f32 %v23501_v59, %v6975_v56  ;;  %v8840_v56 = vsel %vm2809_vm7, %v8835_v12, %v8839_v60 }
 0x450   : > { %v23573_v3 = vpop.f32.mrf.mxu1  ;;  %18282 = vmatmul.mubr.msk.bf16.gmra.mxu1 %vm2943_vm5, %v9152_v53  ;;  %v6888_v55 = vpop.f32.mrf.mxu0  ;;  %v9155_v53 = vrot.slane %v23570_v27, 1  ;;  %v8843_v29 = vor.u32 %v8841_v49, %v8839_v60 }
 0x451   : > { %18285 = vmatprep.mubr.msk.bf16.mxu1 %vm2943_vm5, %v9154_v44  ;;  %v6976_v10 = vadd.f32 %v6888_v55, %v23288_v37  ;;  %v23589_v24 = vadd.f32 %v23513_v62, %v6978_v46  ;;  %v8847_v55 = vrot.slane %v8845_v16, 1  ;;  %v23617_v16 = vld [vmem:[#allocation2 + $0x2c] sm:$0xff]  }
 0x452   : > { %v23585_v51 = vpop.f32.mrf.mxu1  ;;  %v18041_v59 = vpop.f32.mrf.mxu0  ;;  %18244 = vmatmul.mubr.msk.bf16.gmra.mxu0 %vm2943_vm5, %v8832_v47  ;;  %v9879_v47 = vshll.u32 %v15853_v32, 16 }
 0x453   : > { %26413 = vst [vmem:[#allocation55_spill] sm:$0xff] %v23589_v24  ;;  %v6981_v37 = vadd.f32 %v18041_v59, %v23291_v14  ;;  %18247 = vmatprep.mubr.msk.bf16.mxu0 %vm2943_vm5, %v8840_v56  ;;  %v23601_v62 = vadd.f32 %v23521_v28, %v6976_v10  ;;  %v9156_v56 = vsel %vm3359_vm6, %v9153_v21, %v9155_v53  ;;  %v8849_v24 = vshrl.u32 %v23528_v50, 16 }
 0x454   : > { %v23597_v44 = vpop.f32.mrf.mxu1  ;;  %v6901_v46 = vpop.f32.mrf.mxu0  ;;  %v8855_v28 = vrot.slane %v8853_v9, 1  ;;  %v8861_v21 = vshll.u32 %v23570_v27, 16  ;;  %v8848_v49 = vsel %vm2809_vm7, %v8843_v29, %v8847_v55 }
 0x455   : > { %v6979_v12 = vadd.f32 %v6901_v46, %v23300_v11  ;;  %v23608_v14 = vadd.f32 %v23531_v8, %v6981_v37  ;;  %v9158_v11 = vsel %vm3359_vm6, %v9155_v53, %v9157_v38  ;;  %v25712_v8 = vshll.u32 %v23617_v16, 16 }
 0x456   : > { %v23605_v31 = vpop.f32.mrf.mxu1  ;;  %v18042_v59 = vpop.f32.mrf.mxu0  ;;  %v8851_v50 = vor.u32 %v8849_v24, %v8847_v55  ;;  %v9881_v53 = vrot.slane %v9879_v47, 1  ;;  %v8857_v47 = vshrl.u32 %v23535_v41, 16 }
 0x457   : > { %v6982_v10 = vadd.f32 %v18042_v59, %v23307_v36  ;;  %v23621_v60 = vadd.f32 %v23543_v2, %v6979_v12  ;;  %v8869_v12 = vshll.u32 %v23577_v7, 16  ;;  %v9886_v55 = vrot.slane %v25712_v8, 1 }
 0x458   : > { %v23613_v13 = vpop.f32.mrf.mxu1  ;;  %18286 = vmatmul.mubr.msk.bf16.gmra.mxu1 %vm2943_vm5, %v9156_v56  ;;  %v6904_v37 = vpop.f32.mrf.mxu0  ;;  %v8856_v2 = vsel %vm2809_vm7, %v8851_v50, %v8855_v28  ;;  %v9877_v56 = vshrl.u32 %v15853_v32, 16  ;;  %v23648_v50 = vld [vmem:[#allocation2 + $0x34] sm:$0xff]  }
 0x459   : > { %18289 = vmatprep.mubr.msk.bf16.mxu1 %vm2943_vm5, %v9158_v11  ;;  %v6980_v36 = vadd.f32 %v6904_v37, %v23315_v18  ;;  %v23630_v46 = vadd.f32 %v23555_v61, %v6982_v10  ;;  %v8863_v10 = vrot.slane %v8861_v21, 1 }
 0x45a   : > { %v23626_v9 = vpop.f32.mrf.mxu1  ;;  %v18045_v59 = vpop.f32.mrf.mxu0  ;;  %18248 = vmatmul.mubr.msk.bf16.gmra.mxu0 %vm2943_vm5, %v8848_v49  ;;  %v25706_v49 = vshll.u32 %v23648_v50, 16 }
 0x45b   : > { %v6985_v24 = vadd.f32 %v18045_v59, %v23320_v1  ;;  %18251 = vmatprep.mubr.msk.bf16.mxu0 %vm2943_vm5, %v8856_v2  ;;  %v23642_v61 = vadd.f32 %v23563_v42, %v6980_v36  ;;  %v9882_v1 = vor.u32 %v9881_v53, %v9877_v56  ;;  %v8859_v59 = vor.u32 %v8857_v47, %v8855_v28  ;;  %v23660_v53 = vld [vmem:[#allocation2 + $0x3c] sm:$0xff]  }
 0x45c   : > { %v23637_v18 = vpop.f32.mrf.mxu1  ;;  %v6917_v29 = vpop.f32.mrf.mxu0  ;;  %v8865_v42 = vshrl.u32 %v23570_v27, 16  ;;  %v8871_v36 = vrot.slane %v8869_v12, 1  ;;  %v25700_v56 = vshll.u32 %v23660_v53, 16 }
 0x45d   : > { %v6983_v11 = vadd.f32 %v6917_v29, %v23329_v17  ;;  %v23652_v32 = vadd.f32 %v23573_v3, %v6985_v24  ;;  %v9887_v17 = vsel %vm2809_vm7, %v9882_v1, %v9886_v55  ;;  %v8864_v24 = vsel %vm2809_vm7, %v8859_v59, %v8863_v10 }
 0x45e   : > { %v23646_v37 = vpop.f32.mrf.mxu1  ;;  %v18046_v2 = vpop.f32.mrf.mxu0  ;;  %v8867_v27 = vor.u32 %v8865_v42, %v8863_v10  ;;  %v25713_v29 = vshrl.u32 %v23617_v16, 16  ;;  %v25707_v10 = vshrl.u32 %v23648_v50, 16  ;;  %v9902_v59 = vrot.slane %v25700_v56, 1 }
 0x45f   : > { %v6986_v41 = vadd.f32 %v18046_v2, %v23335_v54  ;;  %v23664_v3 = vadd.f32 %v23585_v51, %v6983_v11 }
 0x460   : > { %v23656_v21 = vpop.f32.mrf.mxu1  ;;  %18290 = vmatmul.mubr.msk.bf16.gmra.mxu1 %vm2943_vm5, %v9157_v38  ;;  %v6920_v28 = vpop.f32.mrf.mxu0  ;;  %v9894_v38 = vrot.slane %v25706_v49, 1  ;;  %v8872_v11 = vsel %vm2809_vm7, %v8867_v27, %v8871_v36  ;;  %v9890_v2 = vor.u32 %v25713_v29, %v9886_v55 }
 0x461   : > { %18329 = vmatprep.mubr.msk.bf16.mxu1 %vm2943_vm5, %v9887_v17  ;;  %v6984_v12 = vadd.f32 %v6920_v28, %v23345_v22  ;;  %v23674_v47 = vadd.f32 %v23597_v44, %v6986_v41  ;;  %v23694_v28 = vld [vmem:[#allocation2 + $0x44] sm:$0xff]  }
 0x462   : > { %v23668_v54 = vpop.f32.mrf.mxu1  ;;  %v18049_v51 = vpop.f32.mrf.mxu0  ;;  %18252 = vmatmul.mubr.msk.bf16.gmra.mxu0 %vm2943_vm5, %v8864_v24  ;;  %v25698_v27 = vshll.u32 %v23694_v28, 16  ;;  %v9895_v55 = vsel %vm2809_vm7, %v9890_v2, %v9894_v38  ;;  %v19139_v2 = vld [vmem:[#allocation2 + $0x24] sm:$0xff]  }
 0x463   : > { %v6989_v1 = vadd.f32 %v18049_v51, %v23350_v58  ;;  %18255 = vmatprep.mubr.msk.bf16.mxu0 %vm2943_vm5, %v8872_v11  ;;  %v23685_v44 = vadd.f32 %v23605_v31, %v6984_v12  ;;  %v9898_v58 = vor.u32 %v25707_v10, %v9894_v38  ;;  %v8873_v31 = vshrl.u32 %v23577_v7, 16 }
 0x464   : > { %v18088_v22 = vpop.f32.mrf.mxu1  ;;  %v6933_v42 = vpop.f32.mrf.mxu0 }
 0x465   : > { %v6987_v41 = vadd.f32 %v6933_v42, %v23367_v20  ;;  %v23698_v24 = vadd.f32 %v23613_v13, %v6989_v1  ;;  %v9903_v11 = vsel %vm2809_vm7, %v9898_v58, %v9902_v59  ;;  %v23707_v22 = vld [vmem:[#allocation2 + $0x4c] sm:$0xff]   ;;  %v8875_v1 = vor.u32 %v8873_v31, %v8871_v36 }
 0x466   : > { %v23690_v17 = vpop.f32.mrf.mxu1  ;;  %v18050_v12 = vpop.f32.mrf.mxu0  ;;  %v25697_v42 = vshll.u32 %v23707_v22, 16  ;;  %v9910_v58 = vrot.slane %v25698_v27, 1 }
 0x467   : > { %v6990_v51 = vadd.f32 %v18050_v12, %v23375_v30  ;;  %v23711_v13 = vadd.f32 %v23626_v9, %v6987_v41  ;;  %v25702_v9 = vshrl.u32 %v23660_v53, 16 }
 0x468   : > { %v23703_v20 = vpop.f32.mrf.mxu1  ;;  %18330 = vmatmul.mubr.msk.bf16.vlgmr.msra.gmra.mxu1 %vm2943_vm5, %v9895_v55  ;;  %v6936_v7 = vpop.f32.mrf.mxu0  ;;  %v9918_v31 = vrot.slane %v25697_v42, 1 }
 0x469   : > { %18333 = vmatprep.mubr.msk.bf16.mxu1 %vm2943_vm5, %v9903_v11  ;;  %18396 = vmatpush3.bf16.msra.mxu1 %v23355_v25  ;;  %v6988_v30 = vadd.f32 %v6936_v7, %v23389_v63  ;;  %v23721_v12 = vadd.f32 %v23637_v18, %v6990_v51  ;;  %v25699_v63 = vshrl.u32 %v23694_v28, 16  ;;  %v9906_v18 = vor.u32 %v25702_v9, %v9902_v59  ;;  %v23742_v7 = vld [vmem:[#allocation2 + $0x54] sm:$0xff]   ;;  %v23753_v59 = vld [vmem:[#allocation2 + $0x5c] sm:$0xff]   ;;  %v23791_v9 = vld [vmem:[#allocation2 + $0x64] sm:$0xff]  }
 0x46a   : > { %v23716_v38 = vpop.f32.mrf.mxu1  ;;  %v18053_v41 = vpop.f32.mrf.mxu0  ;;  %18256 = vmatmul.mubr.msk.bf16.gmra.mxu0 %vm2943_vm5, %v8875_v1  ;;  %v25705_v56 = vshrl.u32 %v23742_v7, 16 }
 0x46b   : > { %v6993_v36 = vadd.f32 %v18053_v41, %v23395_v23  ;;  %18295 = vmatprep.mubr.msk.bf16.mxu0 %vm2943_vm5, %v19139_v2  ;;  %v23733_v55 = vadd.f32 %v23646_v37, %v6988_v30  ;;  %v9914_v23 = vor.u32 %v25699_v63, %v9910_v58  ;;  %v25701_v2 = vshll.u32 %v23742_v7, 16 }
 0x46c   : > { %v23727_v25 = vpop.f32.mrf.mxu1  ;;  %v6949_v51 = vpop.f32.mrf.mxu0  ;;  %v9911_v30 = vsel %vm2809_vm7, %v9906_v18, %v9910_v58  ;;  %v23763_v58 = vld [vmem:[%s25499_s4 + $0xc0] sm:$0xff]  }
 0x46d   : > { %v6991_v11 = vadd.f32 %v6949_v51, %v23408_v35  ;;  %v23746_v41 = vadd.f32 %v23656_v21, %v6993_v36  ;;  %v9919_v35 = vsel %vm2809_vm7, %v9914_v23, %v9918_v31  ;;  %v25703_v51 = vshll.u32 %v23753_v59, 16  ;;  %v19142_v21 = vld [vmem:[#allocation2 + $0x2c] sm:$0xff]   ;;  %v19143_v23 = vld [vmem:[#allocation2 + $0x34] sm:$0xff]  }
 0x46e   : > { %v23738_v1 = vpop.f32.mrf.mxu1  ;;  %v18054_v37 = vpop.f32.mrf.mxu0 }
 0x46f   : > { %v23757_v27 = vadd.f32 %v23668_v54, %v6991_v11  ;;  %v9926_v37 = vrot.slane %v25701_v2, 1  ;;  %v25704_v54 = vshrl.u32 %v23707_v22, 16 }
 0x470   : > { %v23749_v42 = vpop.f32.mrf.mxu1  ;;  %18334 = vmatmul.mubr.msk.bf16.gmra.mxu1 %vm2943_vm5, %v9911_v30  ;;  %v6952_v63 = vpop.f32.mrf.mxu0 }
 0x471   : > { %18337 = vmatprep.mubr.msk.bf16.mxu1 %vm2943_vm5, %v9919_v35  ;;  %v6992_v36 = vadd.f32 %v6952_v63, %v23432_v0  ;;  %v9934_v0 = vrot.slane %v25703_v51, 1  ;;  %v9922_v2 = vor.u32 %v25704_v54, %v9918_v31 }
 0x472   : > { %v23766_v18 = vpop.f32.mrf.mxu1  ;;  %v18093_v11 = vpop.f32.mrf.mxu0  ;;  %18296 = vmatmul.mubr.msk.bf16.vlgmr.msra.gmra.mxu0 %vm2943_vm5, %v19142_v21 }
 0x473   : > { %v7555_v30 = vadd.f32 %v18093_v11, %v23440_v40  ;;  %18299 = vmatprep.mubr.msk.bf16.mxu0 %vm2943_vm5, %v19143_v23  ;;  %18362 = vmatpush3.bf16.msra.mxu0 %v23415_v48  ;;  %v23781_v63 = vadd.f32 %v23690_v17, %v6992_v36  ;;  %v9930_v11 = vor.u32 %v25705_v56, %v9926_v37  ;;  %v25708_v48 = vshll.u32 %v23791_v9, 16 }
 0x474   : > { %v23774_v35 = vpop.f32.mrf.mxu1  ;;  %v7427_v21 = vpop.f32.mrf.mxu0  ;;  %18429 = vmatprep.subr.bf16.mxu0 %v23763_v58  ;;  %v9927_v31 = vsel %vm2809_vm7, %v9922_v2, %v9926_v37  ;;  %v19147_v37 = vld [vmem:[#allocation2 + $0x44] sm:$0xff]  }
 0x475   : > { %v7553_v40 = vadd.f32 %v7427_v21, %v23454_v19  ;;  %v23795_v17 = vadd.f32 %v23703_v20, %v7555_v30  ;;  %v9935_v19 = vsel %vm2809_vm7, %v9930_v11, %v9934_v0  ;;  %v23803_v21 = vld [vmem:[#allocation2 + $0x6c] sm:$0xff]   ;;  %v19146_v30 = vld [vmem:[#allocation2 + $0x3c] sm:$0xff]  }
 0x476   : > { %v23787_v23 = vpop.f32.mrf.mxu1  ;;  %v18094_v36 = vpop.f32.mrf.mxu0  ;;  %v25709_v56 = vshll.u32 %v23803_v21, 16 }
 0x477   : > { %v7556_v51 = vadd.f32 %v18094_v36, %v23463_v5  ;;  %v23807_v49 = vadd.f32 %v23716_v38, %v7553_v40  ;;  %v9942_v36 = vrot.slane %v25708_v48, 1 }
 0x478   : > { %v23799_v54 = vpop.f32.mrf.mxu1  ;;  %18338 = vmatmul.mubr.msk.bf16.gmra.mxu1 %vm2943_vm5, %v9927_v31  ;;  %v7430_v20 = vpop.f32.mrf.mxu0  ;;  %v25710_v31 = vshrl.u32 %v23753_v59, 16 }
 0x479   : > { %18341 = vmatprep.mubr.msk.bf16.mxu1 %vm2943_vm5, %v9935_v19  ;;  %v7554_v2 = vadd.f32 %v7430_v20, %v23475_v52  ;;  %v23816_v11 = vadd.f32 %v23727_v25, %v7556_v51  ;;  %v25711_v52 = vshrl.u32 %v23791_v9, 16  ;;  %v9950_v19 = vrot.slane %v25709_v56, 1 }
 0x47a   : > { %v23811_v5 = vpop.f32.mrf.mxu1  ;;  %v18097_v10 = vpop.f32.mrf.mxu0  ;;  %18300 = vmatmul.mubr.msk.bf16.gmra.mxu0 %vm2943_vm5, %v19146_v30  ;;  %v9938_v25 = vor.u32 %v25710_v31, %v9934_v0 }
 0x47b   : > { %v7559_v38 = vadd.f32 %v18097_v10, %v23482_v26  ;;  %18303 = vmatprep.mubr.msk.bf16.mxu0 %vm2943_vm5, %v19147_v37  ;;  %v23826_v20 = vadd.f32 %v23738_v1, %v7554_v2  ;;  %v9946_v26 = vor.u32 %v25711_v52, %v9942_v36  ;;  %v23835_v10 = vld [vmem:[#allocation2 + $0x74] sm:$0xff]  }
 0x47c   : > { %v18136_v40 = vpop.f32.mrf.mxu1  ;;  %v7443_v51 = vpop.f32.mrf.mxu0  ;;  %v25714_v37 = vshll.u32 %v23835_v10, 16  ;;  %v9943_v2 = vsel %vm2809_vm7, %v9938_v25, %v9942_v36  ;;  %v19151_v25 = vld [vmem:[#allocation2 + $0x54] sm:$0xff]  }
 0x47d   : > { %v7557_v48 = vadd.f32 %v7443_v51, %v23496_v34  ;;  %v23839_v56 = vadd.f32 %v23749_v42, %v7559_v38  ;;  %v9951_v34 = vsel %vm2809_vm7, %v9946_v26, %v9950_v19  ;;  %v23847_v51 = vld [vmem:[#allocation2 + $0x7c] sm:$0xff]   ;;  %v19150_v38 = vld [vmem:[#allocation2 + $0x4c] sm:$0xff]  }
 0x47e   : > { %v23831_v30 = vpop.f32.mrf.mxu1  ;;  %v18098_v1 = vpop.f32.mrf.mxu0  ;;  %v25715_v52 = vshll.u32 %v23847_v51, 16 }
 0x47f   : > { %v7560_v0 = vadd.f32 %v18098_v1, %v23505_v4  ;;  %v23851_v8 = vadd.f32 %v23766_v18, %v7557_v48  ;;  %v9958_v1 = vrot.slane %v25714_v37, 1 }
 0x480   : > { %v23843_v31 = vpop.f32.mrf.mxu1  ;;  %18342 = vmatmul.mubr.msk.bf16.gmra.mxu1 %vm2943_vm5, %v9943_v2  ;;  %v7446_v42 = vpop.f32.mrf.mxu0  ;;  %v25716_v2 = vshrl.u32 %v23803_v21, 16 }
 0x481   : > { %18345 = vmatprep.mubr.msk.bf16.mxu1 %vm2943_vm5, %v9951_v34  ;;  %v7558_v36 = vadd.f32 %v7446_v42, %v23517_v39  ;;  %v23858_v26 = vadd.f32 %v23774_v35, %v7560_v0  ;;  %v25717_v39 = vshrl.u32 %v23835_v10, 16  ;;  %v9966_v34 = vrot.slane %v25715_v52, 1 }
 0x482   : > { %v7866_v4 = vpop.f32.mrf.mxu1  ;;  %v18101_v29 = vpop.f32.mrf.mxu0  ;;  %18304 = vmatmul.mubr.msk.bf16.gmra.mxu0 %vm2943_vm5, %v19150_v38  ;;  %v9954_v35 = vor.u32 %v25716_v2, %v9950_v19 }
 0x483   : > { %v7563_v18 = vadd.f32 %v18101_v29, %v23524_v6  ;;  %18307 = vmatprep.mubr.msk.bf16.mxu0 %vm2943_vm5, %v19151_v25  ;;  %v23868_v42 = vadd.f32 %v23787_v23, %v7558_v36  ;;  %v9962_v6 = vor.u32 %v25717_v39, %v9958_v1  ;;  %v23877_v29 = vld [vmem:[#allocation2 + $0x84] sm:$0xff]  }
 0x484   : > { %v18140_v48 = vpop.f32.mrf.mxu1  ;;  %v7459_v0 = vpop.f32.mrf.mxu0  ;;  %v9959_v36 = vsel %vm2809_vm7, %v9954_v35, %v9958_v1  ;;  %v19155_v35 = vld [vmem:[#allocation2 + $0x64] sm:$0xff]  }
 0x485   : > { %26414 = vst [vmem:[#allocation57_spill] sm:$0xff] %v23868_v42  ;;  %v7561_v37 = vadd.f32 %v7459_v0, %v23538_v15  ;;  %v23881_v52 = vadd.f32 %v23799_v54, %v7563_v18  ;;  %v9967_v15 = vsel %vm2809_vm7, %v9962_v6, %v9966_v34  ;;  %v23889_v0 = vld [vmem:[#allocation2 + $0x8c] sm:$0xff]   ;;  %v19154_v18 = vld [vmem:[#allocation2 + $0x5c] sm:$0xff]   ;;  %v25719_v6 = vshrl.u32 %v23847_v51, 16 }
 0x486   : > { %v23873_v38 = vpop.f32.mrf.mxu1  ;;  %v18102_v23 = vpop.f32.mrf.mxu0  ;;  %v25718_v39 = vshll.u32 %v23889_v0, 16 }
 0x487   : > { %26415 = vst [vmem:[#allocation24_spill] sm:$0xff] %v23881_v52  ;;  %v7564_v19 = vadd.f32 %v18102_v23, %v23547_v43  ;;  %v23893_v25 = vadd.f32 %v23811_v5, %v7561_v37  ;;  %v26417_v23 = vshll.u32 %v23877_v29, 16 }
 0x488   : > { %v23885_v2 = vpop.f32.mrf.mxu1  ;;  %18346 = vmatmul.mubr.msk.bf16.gmra.mxu1 %vm2943_vm5, %v9959_v36  ;;  %v7462_v54 = vpop.f32.mrf.mxu0 }
 0x489   : > { %26416 = vst [vmem:[#allocation14_spill] sm:$0xff] %v23893_v25  ;;  %18349 = vmatprep.mubr.msk.bf16.mxu1 %vm2943_vm5, %v9967_v15  ;;  %v7562_v1 = vadd.f32 %v7462_v54, %v23559_v45  ;;  %v9974_v36 = vrot.slane %v26417_v23, 1  ;;  %v23899_v52 = vadd.f32 %v18136_v40, %v7564_v19  ;;  %v25720_v15 = vshrl.u32 %v23877_v29, 16  ;;  %v23913_v23 = vld [vmem:[#allocation2 + $0x94] sm:$0xff]  }
 0x48a   : > { %v7882_v43 = vpop.f32.mrf.mxu1  ;;  %v18105_v42 = vpop.f32.mrf.mxu0  ;;  %18308 = vmatmul.mubr.msk.bf16.gmra.mxu0 %vm2943_vm5, %v19154_v18  ;;  %v9982_v45 = vrot.slane %v25718_v39, 1  ;;  %v9970_v40 = vor.u32 %v25719_v6, %v9966_v34  ;;  %v26422_v18 = vld [vmem:[#allocation121_spill] sm:$0xff] }
 0x48b   : > { %26418 = vst [vmem:[#allocation53_spill] sm:$0xff] %v23899_v52  ;;  %v7567_v5 = vadd.f32 %v18105_v42, %v23566_v57  ;;  %18311 = vmatprep.mubr.msk.bf16.mxu0 %vm2943_vm5, %v19155_v35  ;;  %v23909_v54 = vadd.f32 %v23831_v30, %v7562_v1  ;;  %v9978_v35 = vor.u32 %v25720_v15, %v9974_v36  ;;  %v26421_v1 = vld [vmem:[#allocation55_spill] sm:$0xff]  ;;  %v9996_v25 = vshll.u32 %v26422_v18, 16  ;;  %v19159_v15 = vld [vmem:[#allocation2 + $0x6c] sm:$0xff]  }
 0x48c   : > { %v18144_v37 = vpop.f32.mrf.mxu1  ;;  %v7475_v19 = vpop.f32.mrf.mxu0  ;;  %v9975_v30 = vsel %vm2809_vm7, %v9970_v40, %v9974_v36 }
 0x48d   : > { %26419 = vst [vmem:[#allocation58_spill] sm:$0xff] %v23909_v54  ;;  %v7565_v57 = vadd.f32 %v7475_v19, %v23580_v33  ;;  %v23920_v52 = vadd.f32 %v23843_v31, %v7567_v5  ;;  %v9983_v6 = vsel %vm2809_vm7, %v9978_v35, %v9982_v45  ;;  %v26424_v31 = vshll.u32 %v23913_v23, 16 }
 0x48e   : > { %v7885_v42 = vpop.f32.mrf.mxu1  ;;  %v18106_v39 = vpop.f32.mrf.mxu0 }
 0x48f   : > { %26420 = vst [vmem:[#allocation27_spill] sm:$0xff] %v23920_v52  ;;  %v7568_v54 = vadd.f32 %v18106_v39, %v26421_v1  ;;  %v23927_v33 = vadd.f32 %v7866_v4, %v7565_v57  ;;  %v9990_v5 = vrot.slane %v26424_v31, 1  ;;  %v19160_v39 = vld [vmem:[#allocation2 + $0x74] sm:$0xff]   ;;  %v25722_v4 = vshrl.u32 %v23913_v23, 16 }
 0x490   : > { %v18147_v34 = vpop.f32.mrf.mxu1  ;;  %18350 = vmatmul.mubr.msk.bf16.gmra.mxu1 %vm2943_vm5, %v9975_v30  ;;  %v7478_v19 = vpop.f32.mrf.mxu0  ;;  %v25721_v30 = vshrl.u32 %v23889_v0, 16 }
 0x491   : > { %26423 = vst [vmem:[#allocation63_spill] sm:$0xff] %v23927_v33  ;;  %18353 = vmatprep.mubr.msk.bf16.mxu1 %vm2943_vm5, %v9983_v6  ;;  %v7566_v36 = vadd.f32 %v7478_v19, %v23601_v62  ;;  %v23933_v1 = vadd.f32 %v18140_v48, %v7568_v54  ;;  %v9998_v33 = vrot.slane %v9996_v25, 1  ;;  %v9994_v54 = vor.u32 %v25722_v4, %v9990_v5 }
 0x492   : > { %v7898_v40 = vpop.f32.mrf.mxu1  ;;  %v18109_v35 = vpop.f32.mrf.mxu0  ;;  %18312 = vmatmul.mubr.msk.bf16.gmra.mxu0 %vm2943_vm5, %v19159_v15  ;;  %v9986_v62 = vor.u32 %v25721_v30, %v9982_v45 }
 0x493   : > { %26425 = vst [vmem:[#allocation16_spill] sm:$0xff] %v23933_v1  ;;  %v7571_v57 = vadd.f32 %v18109_v35, %v23608_v14  ;;  %18315 = vmatprep.mubr.msk.bf16.mxu0 %vm2943_vm5, %v19160_v39  ;;  %v23941_v31 = vadd.f32 %v23873_v38, %v7566_v36  ;;  %v26426_v1 = vld [vmem:[#allocation15_spill] sm:$0xff]  ;;  %v26428_v36 = vshrl.u32 %v23617_v16, 16 }
 0x494   : > { %v18148_v6 = vpop.f32.mrf.mxu1  ;;  %v7491_v48 = vpop.f32.mrf.mxu0  ;;  %v10539_v52 = vshrl.u32 %v26426_v1, 16  ;;  %v10542_v14 = vshll.u32 %v26426_v1, 16  ;;  %v9991_v38 = vsel %vm2809_vm7, %v9986_v62, %v9990_v5 }
 0x495   : > { %v7569_v15 = vadd.f32 %v7491_v48, %v23621_v60  ;;  %v23951_v39 = vadd.f32 %v23885_v2, %v7571_v57  ;;  %v10546_v45 = vrot.slane %v26428_v36, 1  ;;  %v9999_v60 = vsel %vm2809_vm7, %v9994_v54, %v9998_v33  ;;  %v19163_v57 = vld [vmem:[#allocation2 + $0x7c] sm:$0xff]   ;;  %v19164_v36 = vld [vmem:[#allocation2 + $0x84] sm:$0xff]  }
 0x496   : > { %v7901_v19 = vpop.f32.mrf.mxu1  ;;  %v18110_v25 = vpop.f32.mrf.mxu0  ;;  %v26429_v48 = vshll.u32 %v23617_v16, 16  ;;  %v10000_v16 = vshrl.u32 %v26422_v18, 16  ;;  %v26431_v18 = vshll.u32 %v23648_v50, 16 }
 0x497   : > { %26427 = vst [vmem:[#allocation17_spill] sm:$0xff] %v23951_v39  ;;  %v7572_v35 = vadd.f32 %v18110_v25, %v23630_v46  ;;  %v23961_v1 = vadd.f32 %v7882_v43, %v7569_v15  ;;  %v10541_v39 = vrot.slane %v10539_v52, 1  ;;  %v10544_v46 = vrot.slane %v10542_v14, 2 }
 0x498   : > { %v18151_v30 = vpop.f32.mrf.mxu1  ;;  %18354 = vmatmul.mubr.msk.bf16.gmra.mxu1 %vm2943_vm5, %v9991_v38  ;;  %v10547_v4 = vrot.slane %v26429_v48, 2  ;;  %v7494_v2 = vpop.f32.mrf.mxu0  ;;  %v10002_v48 = vor.u32 %v10000_v16, %v9998_v33  ;;  %v19167_v16 = vld [vmem:[#allocation2 + $0x94] sm:$0xff]  }
 0x499   : > { %18357 = vmatprep.mubr.msk.bf16.mxu1 %vm2943_vm5, %v9999_v60  ;;  %v7570_v5 = vadd.f32 %v7494_v2, %v23642_v61  ;;  %v23965_v25 = vadd.f32 %v18144_v37, %v7572_v35  ;;  %v10545_v37 = vor.u32 %v10544_v46, %v10541_v39  ;;  %v26430_v2 = vshrl.u32 %v23648_v50, 16  ;;  %v19166_v50 = vld [vmem:[#allocation2 + $0x8c] sm:$0xff]  }
 0x49a   : > { %v7914_v62 = vpop.f32.mrf.mxu1  ;;  %v18113_v38 = vpop.f32.mrf.mxu0  ;;  %18316 = vmatmul.mubr.msk.bf16.gmra.mxu0 %vm2943_vm5, %v19163_v57  ;;  %v10548_v15 = vor.u32 %v10547_v4, %v10546_v45 }
 0x49b   : > { %v7575_v43 = vadd.f32 %v18113_v38, %v23652_v32  ;;  %18319 = vmatprep.mubr.msk.bf16.mxu0 %vm2943_vm5, %v19164_v36  ;;  %v23971_v60 = vadd.f32 %v7885_v42, %v7570_v5  ;;  %v10550_v57 = vrot.slane %v26430_v2, 1  ;;  %v10551_v32 = vrot.slane %v26431_v18, 2 }
 0x49c   : > { %v18152_v54 = vpop.f32.mrf.mxu1  ;;  %v7507_v61 = vpop.f32.mrf.mxu0  ;;  %v26432_v36 = vshrl.u32 %v23660_v53, 16  ;;  %v26433_v42 = vshll.u32 %v23660_v53, 16 }
 0x49d   : > { %v7573_v52 = vadd.f32 %v7507_v61, %v23664_v3  ;;  %v23974_v35 = vadd.f32 %v18147_v34, %v7575_v43  ;;  %v10549_v34 = vsel %vm3643_vm8, %v10545_v37, %v10548_v15  ;;  %v10552_v53 = vor.u32 %v10551_v32, %v10550_v57 }
 0x49e   : > { %v7917_v14 = vpop.f32.mrf.mxu1  ;;  %v18114_v38 = vpop.f32.mrf.mxu0  ;;  %v10554_v4 = vrot.slane %v26432_v36, 1  ;;  %v10555_v45 = vrot.slane %v26433_v42, 2 }
 0x49f   : > { %v7576_v33 = vadd.f32 %v18114_v38, %v23674_v47  ;;  %v23987_v39 = vadd.f32 %v7898_v40, %v7573_v52  ;;  %v10553_v36 = vsel %vm3643_vm8, %v10548_v15, %v10552_v53  ;;  %v19169_v15 = vld [vmem:[#allocation2 + $0x9c] ss:$0 sps:$4 sm:$0xff]  }
 0x4a0   : > { %v18155_v3 = vpop.f32.mrf.mxu1  ;;  %18358 = vmatmul.mubr.msk.bf16.gmra.mxu1 %vm2943_vm5, %v10002_v48  ;;  %v7510_v5 = vpop.f32.mrf.mxu0  ;;  %v10556_v47 = vor.u32 %v10555_v45, %v10554_v4 }
 0x4a1   : > { %18397 = vmatprep.mubr.msk.bf16.mxu1 %vm2943_vm5, %v10549_v34  ;;  %v7574_v18 = vadd.f32 %v7510_v5, %v23685_v44  ;;  %v23991_v43 = vadd.f32 %v18148_v6, %v7576_v33  ;;  %v26434_v6 = vshrl.u32 %v23694_v28, 16  ;;  %v26437_v33 = vshll.u32 %v23707_v22, 16 }
 0x4a2   : > { %v7930_v46 = vpop.f32.mrf.mxu1  ;;  %v18117_v61 = vpop.f32.mrf.mxu0  ;;  %18320 = vmatmul.mubr.msk.bf16.gmra.mxu0 %vm2943_vm5, %v19166_v50  ;;  %v10557_v4 = vsel %vm3643_vm8, %v10552_v53, %v10556_v47 }
 0x4a3   : > { %v7579_v48 = vadd.f32 %v18117_v61, %v23698_v24  ;;  %18323 = vmatprep.mubr.msk.bf16.mxu0 %vm2943_vm5, %v19167_v16  ;;  %v23996_v52 = vadd.f32 %v7901_v19, %v7574_v18  ;;  %v10558_v57 = vrot.slane %v26434_v6, 1  ;;  %v26435_v24 = vshll.u32 %v23694_v28, 16 }
 0x4a4   : > { %v18156_v40 = vpop.f32.mrf.mxu1  ;;  %v7523_v37 = vpop.f32.mrf.mxu0  ;;  %v10563_v34 = vrot.slane %v26437_v33, 2 }
 0x4a5   : > { %v7577_v2 = vadd.f32 %v7523_v37, %v23711_v13  ;;  %v23999_v38 = vadd.f32 %v18151_v30, %v7579_v48  ;;  %v10559_v42 = vrot.slane %v26435_v24, 2  ;;  %v26436_v13 = vshrl.u32 %v23707_v22, 16  ;;  %v26438_v48 = vld [vmem:[#allocation19_spill] sm:$0xff] }
 0x4a6   : > { %v7933_v44 = vpop.f32.mrf.mxu1  ;;  %v18118_v32 = vpop.f32.mrf.mxu0 }
 0x4a7   : > { %v7580_v19 = vadd.f32 %v18118_v32, %v23721_v12  ;;  %v10562_v30 = vrot.slane %v26436_v13, 1  ;;  %v24013_v5 = vadd.f32 %v7914_v62, %v7577_v2  ;;  %v10560_v53 = vor.u32 %v10559_v42, %v10558_v57 }
 0x4a8   : > { %v18195_v45 = vpop.f32.mrf.mxu1  ;;  %18398 = vmatmul.mubr.msk.bf16.vlgmr.msra.gmra.mxu1 %vm2943_vm5, %v10553_v36  ;;  %v7526_v50 = vpop.f32.mrf.mxu0  ;;  %v26441_v42 = vshrl.u32 %v23753_v59, 16 }
 0x4a9   : > { %18401 = vmatprep.mubr.msk.bf16.mxu1 %vm2943_vm5, %v10557_v4  ;;  %v7578_v28 = vadd.f32 %v7526_v50, %v23733_v55  ;;  %v24017_v16 = vadd.f32 %v18152_v54, %v7580_v19  ;;  %v10564_v62 = vor.u32 %v10563_v34, %v10562_v30  ;;  %v26439_v54 = vshrl.u32 %v23742_v7, 16  ;;  %v26443_v34 = vld [vmem:[#allocation75_spill] sm:$0xff] }
 0x4aa   : > { %v8477_v18 = vpop.f32.mrf.mxu1  ;;  %v18121_v12 = vpop.f32.mrf.mxu0  ;;  %18324 = vmatmul.mubr.msk.bf16.gmra.mxu0 %vm2943_vm5, %v19169_v15  ;;  %v10561_v57 = vsel %vm3643_vm8, %v10556_v47, %v10560_v53 }
 0x4ab   : > { %v7583_v61 = vadd.f32 %v18121_v12, %v23746_v41  ;;  %18363 = vmatprep.mubr.msk.bf16.mxu0 %vm2943_vm5, %v26438_v48  ;;  %v24023_v40 = vadd.f32 %v7917_v14, %v7578_v28  ;;  %v10566_v32 = vrot.slane %v26439_v54, 1  ;;  %v26440_v41 = vshll.u32 %v23742_v7, 16  ;;  %v26444_v28 = vld [vmem:[#allocation26_spill] sm:$0xff] }
 0x4ac   : > { %v18196_v22 = vpop.f32.mrf.mxu1  ;;  %v7539_v37 = vpop.f32.mrf.mxu0  ;;  %v10565_v14 = vsel %vm3643_vm8, %v10560_v53, %v10564_v62 }
 0x4ad   : > { %v7581_v2 = vadd.f32 %v7539_v37, %v23757_v27  ;;  %v24026_v6 = vadd.f32 %v18155_v3, %v7583_v61  ;;  %v10567_v4 = vrot.slane %v26440_v41, 2  ;;  %v10570_v27 = vrot.slane %v26441_v42, 1 }
 0x4ae   : > { %v8480_v55 = vpop.f32.mrf.mxu1  ;;  %v18122_v36 = vpop.f32.mrf.mxu0  ;;  %v26442_v3 = vshll.u32 %v23753_v59, 16  ;;  %v26445_v37 = vshrl.u32 %v23791_v9, 16 }
 0x4af   : > { %v24039_v13 = vadd.f32 %v7930_v46, %v7581_v2  ;;  %v10568_v50 = vor.u32 %v10567_v4, %v10566_v32  ;;  %v26446_v32 = vshll.u32 %v23791_v9, 16 }
 0x4b0   : > { %v18199_v24 = vpop.f32.mrf.mxu1  ;;  %18402 = vmatmul.mubr.msk.bf16.gmra.mxu1 %vm2943_vm5, %v10561_v57  ;;  %v10571_v19 = vrot.slane %v26442_v3, 2  ;;  %v7542_v30 = vpop.f32.mrf.mxu0  ;;  %v10574_v2 = vrot.slane %v26445_v37, 1  ;;  %v26447_v57 = vshrl.u32 %v23803_v21, 16 }
 0x4b1   : > { %18405 = vmatprep.mubr.msk.bf16.mxu1 %vm2943_vm5, %v10565_v14  ;;  %v7582_v47 = vadd.f32 %v7542_v30, %v23781_v63  ;;  %v10575_v36 = vrot.slane %v26446_v32, 2 }
 0x4b2   : > { %v8493_v7 = vpop.f32.mrf.mxu1  ;;  %v18161_v33 = vpop.f32.mrf.mxu0  ;;  %18364 = vmatmul.mubr.msk.bf16.vlgmr.msra.gmra.mxu0 %vm2943_vm5, %v26443_v34  ;;  %v10572_v12 = vor.u32 %v10571_v19, %v10570_v27 }
 0x4b3   : > { %v8341_v15 = vadd.f32 %v18161_v33, %v23795_v17  ;;  %18367 = vmatprep.mubr.msk.bf16.mxu0 %vm2943_vm5, %v26444_v28  ;;  %18430 = vmatpush3.bf16.msra.mxu0 %v23763_v58  ;;  %v24049_v46 = vadd.f32 %v7933_v44, %v7582_v47  ;;  %v10569_v17 = vsel %vm3643_vm8, %v10564_v62, %v10568_v50  ;;  %v10578_v58 = vrot.slane %v26447_v57, 1  ;;  %v26450_v47 = vld [vmem:[#allocation78_spill] sm:$0xff] }
 0x4b4   : > { %v18200_v59 = vpop.f32.mrf.mxu1  ;;  %v8213_v53 = vpop.f32.mrf.mxu0  ;;  %v10576_v19 = vor.u32 %v10575_v36, %v10574_v2  ;;  %v26453_v2 = vshrl.u32 %v23847_v51, 16 }
 0x4b5   : > { %v8339_v63 = vadd.f32 %v8213_v53, %v23807_v49  ;;  %v24052_v48 = vadd.f32 %v18195_v45, %v8341_v15  ;;  %v10573_v49 = vsel %vm3643_vm8, %v10568_v50, %v10572_v12  ;;  %v26448_v45 = vshll.u32 %v23803_v21, 16 }
 0x4b6   : > { %v8496_v61 = vpop.f32.mrf.mxu1  ;;  %v18162_v54 = vpop.f32.mrf.mxu0  ;;  %v26451_v15 = vshrl.u32 %v23835_v10, 16 }
 0x4b7   : > { %v8342_v44 = vadd.f32 %v18162_v54, %v23816_v11  ;;  %v10579_v4 = vrot.slane %v26448_v45, 2  ;;  %v24066_v14 = vadd.f32 %v8477_v18, %v8339_v63  ;;  %v26449_v11 = vld [vmem:[#allocation82_spill] sm:$0xff]  ;;  %v10577_v63 = vsel %vm3643_vm8, %v10572_v12, %v10576_v19 }
 0x4b8   : > { %v18203_v41 = vpop.f32.mrf.mxu1  ;;  %18406 = vmatmul.mubr.msk.bf16.gmra.mxu1 %vm2943_vm5, %v10569_v17  ;;  %v8216_v42 = vpop.f32.mrf.mxu0  ;;  %v10582_v28 = vrot.slane %v26451_v15, 1  ;;  %v10586_v54 = vrot.slane %v26453_v2, 1 }
 0x4b9   : > { %18409 = vmatprep.mubr.msk.bf16.mxu1 %vm2943_vm5, %v10573_v49  ;;  %v8340_v9 = vadd.f32 %v8216_v42, %v23826_v20  ;;  %v24070_v27 = vadd.f32 %v18196_v22, %v8342_v44  ;;  %v10580_v18 = vor.u32 %v10579_v4, %v10578_v58  ;;  %v26457_v4 = vld [vmem:[#allocation24_spill] sm:$0xff] }
 0x4ba   : > { %v8509_v62 = vpop.f32.mrf.mxu1  ;;  %v18165_v3 = vpop.f32.mrf.mxu0  ;;  %18368 = vmatmul.mubr.msk.bf16.gmra.mxu0 %vm2943_vm5, %v26449_v11 }
 0x4bb   : > { %v8345_v30 = vadd.f32 %v18165_v3, %v23839_v56  ;;  %18371 = vmatprep.mubr.msk.bf16.mxu0 %vm2943_vm5, %v26450_v47  ;;  %v24077_v33 = vadd.f32 %v8480_v55, %v8340_v9  ;;  %v26452_v56 = vshll.u32 %v23835_v10, 16  ;;  %v26455_v10 = vld [vmem:[#allocation57_spill] sm:$0xff] }
 0x4bc   : > { %v18204_v21 = vpop.f32.mrf.mxu1  ;;  %v8229_v34 = vpop.f32.mrf.mxu0  ;;  %v26458_v9 = vld [vmem:[#allocation9_spill] sm:$0xff] }
 0x4bd   : > { %v8343_v20 = vadd.f32 %v8229_v34, %v23851_v8  ;;  %v24080_v22 = vadd.f32 %v18199_v24, %v8345_v30  ;;  %v10583_v37 = vrot.slane %v26452_v56, 2  ;;  %v10581_v8 = vsel %vm3643_vm8, %v10576_v19, %v10580_v18 }
 0x4be   : > { %v8512_v50 = vpop.f32.mrf.mxu1  ;;  %v18166_v53 = vpop.f32.mrf.mxu0  ;;  %v26454_v24 = vshll.u32 %v23847_v51, 16  ;;  %v26459_v19 = vshrl.u32 %v23877_v29, 16  ;;  %v26462_v56 = vshrl.u32 %v23889_v0, 16 }
 0x4bf   : > { %v8346_v55 = vadd.f32 %v18166_v53, %v23858_v26  ;;  %v24094_v36 = vadd.f32 %v8493_v7, %v8343_v20  ;;  %v26456_v26 = vld [vmem:[#allocation29_spill] sm:$0xff]  ;;  %v10584_v45 = vor.u32 %v10583_v37, %v10582_v28  ;;  %v26461_v53 = vshll.u32 %v23877_v29, 16  ;;  %v26465_v29 = vld [vmem:[#allocation58_spill] sm:$0xff] }
 0x4c0   : > { %v18207_v17 = vpop.f32.mrf.mxu1  ;;  %18410 = vmatmul.mubr.msk.bf16.gmra.mxu1 %vm2943_vm5, %v10577_v63  ;;  %v10587_v32 = vrot.slane %v26454_v24, 2  ;;  %v8232_v57 = vpop.f32.mrf.mxu0  ;;  %v10590_v30 = vrot.slane %v26459_v19, 1  ;;  %v10594_v37 = vrot.slane %v26462_v56, 1 }
 0x4c1   : > { %18413 = vmatprep.mubr.msk.bf16.mxu1 %vm2943_vm5, %v10581_v8  ;;  %v8344_v12 = vadd.f32 %v8232_v57, %v26455_v10  ;;  %v24098_v44 = vadd.f32 %v18200_v59, %v8346_v55  ;;  %v26460_v59 = vld [vmem:[#allocation14_spill] sm:$0xff]  ;;  %v10585_v28 = vsel %vm3643_vm8, %v10580_v18, %v10584_v45  ;;  %v10591_v63 = vrot.slane %v26461_v53, 2 }
 0x4c2   : > { %v8525_v58 = vpop.f32.mrf.mxu1  ;;  %v18169_v49 = vpop.f32.mrf.mxu0  ;;  %18372 = vmatmul.mubr.msk.bf16.gmra.mxu0 %vm2943_vm5, %v26456_v26  ;;  %v10588_v7 = vor.u32 %v10587_v32, %v10586_v54  ;;  %v26464_v54 = vld [vmem:[#allocation53_spill] sm:$0xff] }
 0x4c3   : > { %v8349_v42 = vadd.f32 %v18169_v49, %v26457_v4  ;;  %18375 = vmatprep.mubr.msk.bf16.mxu0 %vm2943_vm5, %v26458_v9  ;;  %v24105_v3 = vadd.f32 %v8496_v61, %v8344_v12  ;;  %v26463_v61 = vshll.u32 %v23889_v0, 16  ;;  %v26466_v0 = vld [vmem:[#allocation10_spill] sm:$0xff]  ;;  %v10592_v49 = vor.u32 %v10591_v63, %v10590_v30  ;;  %v26467_v4 = vld [vmem:[#allocation27_spill] sm:$0xff] }
 0x4c4   : > { %v18208_v51 = vpop.f32.mrf.mxu1  ;;  %v8245_v11 = vpop.f32.mrf.mxu0  ;;  %v26468_v9 = vld [vmem:[#allocation30_spill] sm:$0xff]  ;;  %v26471_v30 = vshrl.u32 %v23913_v23, 16 }
 0x4c5   : > { %v8347_v47 = vadd.f32 %v8245_v11, %v26460_v59  ;;  %v24110_v20 = vadd.f32 %v18203_v41, %v8349_v42  ;;  %v10595_v2 = vrot.slane %v26463_v61, 2  ;;  %v10589_v41 = vsel %vm3643_vm8, %v10584_v45, %v10588_v7  ;;  %v26469_v45 = vld [vmem:[#allocation37_spill] sm:$0xff] }
 0x4c6   : > { %v8528_v34 = vpop.f32.mrf.mxu1  ;;  %v18170_v15 = vpop.f32.mrf.mxu0  ;;  %v10603_v11 = vshrl.u32 %v26469_v45, 16  ;;  %v10606_v19 = vshll.u32 %v26469_v45, 16  ;;  %v10598_v63 = vrot.slane %v26471_v30, 1 }
 0x4c7   : > { %v8350_v55 = vadd.f32 %v18170_v15, %v26464_v54  ;;  %v24122_v24 = vadd.f32 %v8509_v62, %v8347_v47  ;;  %v10596_v26 = vor.u32 %v10595_v2, %v10594_v37  ;;  %v26470_v47 = vld [vmem:[#allocation63_spill] sm:$0xff]  ;;  %v10593_v37 = vsel %vm3643_vm8, %v10588_v7, %v10592_v49 }
 0x4c8   : > { %v18211_v8 = vpop.f32.mrf.mxu1  ;;  %18414 = vmatmul.mubr.msk.bf16.gmra.mxu1 %vm2943_vm5, %v10585_v28  ;;  %v8248_v32 = vpop.f32.mrf.mxu0  ;;  %v26472_v2 = vshll.u32 %v23913_v23, 16  ;;  %v26474_v23 = vld [vmem:[#allocation31_spill] sm:$0xff] }
 0x4c9   : > { %18417 = vmatprep.mubr.msk.bf16.mxu1 %vm2943_vm5, %v10589_v41  ;;  %v8348_v18 = vadd.f32 %v8248_v32, %v26465_v29  ;;  %v24126_v10 = vadd.f32 %v18204_v21, %v8350_v55  ;;  %v10597_v61 = vsel %vm3643_vm8, %v10592_v49, %v10596_v26  ;;  %v10605_v32 = vrot.slane %v10603_v11, 1 }
 0x4ca   : > { %v8541_v57 = vpop.f32.mrf.mxu1  ;;  %v18173_v12 = vpop.f32.mrf.mxu0  ;;  %18376 = vmatmul.mubr.msk.bf16.gmra.mxu0 %vm2943_vm5, %v26466_v0  ;;  %v10599_v54 = vrot.slane %v26472_v2, 2  ;;  %v10608_v29 = vrot.slane %v10606_v19, 2 }
 0x4cb   : > { %v8353_v42 = vadd.f32 %v18173_v12, %v26467_v4  ;;  %18379 = vmatprep.mubr.msk.bf16.mxu0 %vm2943_vm5, %v26468_v9  ;;  %v24135_v59 = vadd.f32 %v8512_v50, %v8348_v18  ;;  %v26473_v50 = vld [vmem:[#allocation16_spill] sm:$0xff] }
 0x4cc   : > { %v18212_v62 = vpop.f32.mrf.mxu1  ;;  %v8261_v21 = vpop.f32.mrf.mxu0  ;;  %v10600_v4 = vor.u32 %v10599_v54, %v10598_v63  ;;  %v10609_v11 = vor.u32 %v10608_v29, %v10605_v32 }
 0x4cd   : > { %v8351_v15 = vadd.f32 %v8261_v21, %v26470_v47  ;;  %v24140_v53 = vadd.f32 %v18207_v17, %v8353_v42  ;;  %v26475_v42 = vld [vmem:[#allocation17_spill] sm:$0xff]  ;;  %v26476_v21 = vld [vmem:[#allocation132_spill] sm:$0xff] }
 0x4ce   : > { %v24138_v28 = vpop.f32.mrf.mxu1  ;;  %v18174_v56 = vpop.f32.mrf.mxu0 }
 0x4cf   : > { %v8354_v55 = vadd.f32 %v18174_v56, %v26473_v50  ;;  %v24150_v17 = vadd.f32 %v8525_v58, %v8351_v15  ;;  %v10601_v56 = vsel %vm3643_vm8, %v10596_v26, %v10600_v4  ;;  %v26478_v26 = vld [vmem:[#allocation33_spill] sm:$0xff] }
 0x4d0   : > { %v18215_v41 = vpop.f32.mrf.mxu1  ;;  %18418 = vmatmul.mubr.msk.bf16.gmra.mxu1 %vm2943_vm5, %v10593_v37  ;;  %v8264_v18 = vpop.f32.mrf.mxu0 }
 0x4d1   : > { %18421 = vmatprep.mubr.msk.bf16.mxu1 %vm2943_vm5, %v10597_v61  ;;  %v8352_v12 = vadd.f32 %v8264_v18, %v23941_v31  ;;  %v24154_v0 = vadd.f32 %v18208_v51, %v8354_v55  ;;  %v10610_v61 = vsel %vm3643_vm8, %v10600_v4, %v10609_v11  ;;  %v26479_v55 = vld [vmem:[#allocation50_spill] sm:$0xff] }
 0x4d2   : > { %v8557_v7 = vpop.f32.mrf.mxu1  ;;  %v18177_v49 = vpop.f32.mrf.mxu0  ;;  %18380 = vmatmul.mubr.msk.bf16.gmra.mxu0 %vm2943_vm5, %v26474_v23 }
 0x4d3   : > { %v8357_v9 = vadd.f32 %v18177_v49, %v26475_v42  ;;  %18383 = vmatprep.mubr.msk.bf16.mxu0 %vm2943_vm5, %v26476_v21  ;;  %v24161_v19 = vadd.f32 %v8528_v34, %v8352_v12  ;;  %v26482_v21 = vld [vmem:[#allocation35_spill] sm:$0xff] }
 0x4d4   : > { %v18216_v58 = vpop.f32.mrf.mxu1  ;;  %v8277_v47 = vpop.f32.mrf.mxu0 }
 0x4d5   : > { %v8355_v31 = vadd.f32 %v8277_v47, %v23961_v1  ;;  %v24166_v51 = vadd.f32 %v18211_v8, %v8357_v9  ;;  %v26483_v47 = vld [vmem:[#allocation51_spill] sm:$0xff] }
 0x4d6   : > { %v24164_v15 = vpop.f32.mrf.mxu1  ;;  %v18178_v30 = vpop.f32.mrf.mxu0 }
 0x4d7   : > { %26477 = vst [vmem:[#allocation18_spill] sm:$0xff] %v24164_v15  ;;  %v8358_v63 = vadd.f32 %v18178_v30, %v23965_v25  ;;  %v24172_v2 = vadd.f32 %v8541_v57, %v8355_v31 }
 0x4d8   : > { %v18219_v37 = vpop.f32.mrf.mxu1  ;;  %18422 = vmatmul.mubr.msk.bf16.gmra.mxu1 %vm2943_vm5, %v10601_v56  ;;  %v8280_v34 = vpop.f32.mrf.mxu0 }
 0x4d9   : > { %18425 = vmatprep.mubr.msk.bf16.mxu1 %vm2943_vm5, %v10610_v61  ;;  %v24176_v1 = vadd.f32 %v8280_v34, %v23971_v60  ;;  %v24178_v54 = vadd.f32 %v18212_v62, %v8358_v63 }
 0x4da   : > { %v8573_v8 = vpop.f32.mrf.mxu1  ;;  %v18181_v50 = vpop.f32.mrf.mxu0  ;;  %18384 = vmatmul.mubr.msk.bf16.gmra.mxu0 %vm2943_vm5, %v26478_v26 }
 0x4db   : > { %v8361_v25 = vadd.f32 %v18181_v50, %v23974_v35  ;;  %18387 = vmatprep.mubr.msk.bf16.mxu0 %vm2943_vm5, %v26479_v55  ;;  %v26488_v55 = vld [vmem:[#allocation36_spill] sm:$0xff] }
 0x4dc   : > { %v18220_v57 = vpop.f32.mrf.mxu1  ;;  %v8293_v32 = vpop.f32.mrf.mxu0 }
 0x4dd   : > { %v8359_v29 = vadd.f32 %v8293_v32, %v23987_v39  ;;  %v24188_v60 = vadd.f32 %v18215_v41, %v8361_v25  ;;  %v26486_v25 = vld [vmem:[#allocation121_spill] sm:$0xff] }
 0x4de   : > { %v24186_v18 = vpop.f32.mrf.mxu1  ;;  %v18182_v12 = vpop.f32.mrf.mxu0 }
 0x4df   : > { %26480 = vst [vmem:[#allocation66_spill] sm:$0xff] %v24186_v18  ;;  %v8362_v62 = vadd.f32 %v18182_v12, %v23991_v43  ;;  %v24192_v23 = vadd.f32 %v8557_v7, %v8359_v29 }
 0x4e0   : > { %v18223_v49 = vpop.f32.mrf.mxu1  ;;  %18426 = vmatmul.mubr.msk.bf16.gmra.mxu1 %vm2943_vm5, %v10609_v11  ;;  %v8296_v35 = vpop.f32.mrf.mxu0 }
 0x4e1   : > { %v24195_v4 = vadd.f32 %v8296_v35, %v23996_v52  ;;  %v24197_v9 = vadd.f32 %v18216_v58, %v8362_v62 }
 0x4e2   : > { %v8589_v42 = vpop.f32.mrf.mxu1  ;;  %v18185_v39 = vpop.f32.mrf.mxu0  ;;  %18388 = vmatmul.mubr.msk.bf16.gmra.mxu0 %vm2943_vm5, %v26482_v21 }
 0x4e3   : > { %26481 = vst [vmem:[#allocation68_spill] sm:$0xff] %v24195_v4  ;;  %v8365_v41 = vadd.f32 %v18185_v39, %v23999_v38  ;;  %18391 = vmatprep.mubr.msk.bf16.mxu0 %vm2943_vm5, %v26483_v47 }
 0x4e4   : > { %v18224_v43 = vpop.f32.mrf.mxu1  ;;  %v8309_v11 = vpop.f32.mrf.mxu0 }
 0x4e5   : > { %v8363_v7 = vadd.f32 %v8309_v11, %v24013_v5  ;;  %v24207_v52 = vadd.f32 %v18219_v37, %v8365_v41  ;;  %v26487_v5 = vrot.slane %v26486_v25, 1  ;;  %v26490_v41 = vld [vmem:[#allocation52_spill] sm:$0xff] }
 0x4e6   : > { %v24205_v31 = vpop.f32.mrf.mxu1  ;;  %v18186_v30 = vpop.f32.mrf.mxu0 }
 0x4e7   : > { %26484 = vst [vmem:[#allocation47_spill] sm:$0xff] %v24205_v31  ;;  %v8366_v58 = vadd.f32 %v18186_v30, %v24017_v16  ;;  %v24210_v63 = vadd.f32 %v8573_v8, %v8363_v7 }
 0x4e8   : > { %v18263_v56 = vpop.f32.mrf.mxu1  ;;  %v8312_v61 = vpop.f32.mrf.mxu0 }
 0x4e9   : > { %v24213_v38 = vadd.f32 %v8312_v61, %v24023_v40  ;;  %v24215_v50 = vadd.f32 %v18220_v57, %v8366_v58 }
 0x4ea   : > { %v9247_v34 = vpop.f32.mrf.mxu1  ;;  %v18189_v26 = vpop.f32.mrf.mxu0  ;;  %18392 = vmatmul.mubr.msk.bf16.gmra.mxu0 %vm2943_vm5, %v26487_v5 }
 0x4eb   : > { %26485 = vst [vmem:[#allocation20_spill] sm:$0xff] %v24213_v38  ;;  %v8369_v37 = vadd.f32 %v18189_v26, %v24026_v6  ;;  %18431 = vmatprep.mubr.msk.bf16.mxu0 %vm2943_vm5, %v26488_v55  ;;  %v26492_v55 = vld [vmem:[#allocation39_spill] sm:$0xff] }
 0x4ec   : > { %v18264_v16 = vpop.f32.mrf.mxu1  ;;  %v8325_v8 = vpop.f32.mrf.mxu0 }
 0x4ed   : > { %v8367_v32 = vadd.f32 %v8325_v8, %v24039_v13  ;;  %v24226_v40 = vadd.f32 %v18223_v49, %v8369_v37  ;;  %v26491_v13 = vld [vmem:[#allocation38_spill] sm:$0xff] }
 0x4ee   : > { %v24224_v29 = vpop.f32.mrf.mxu1  ;;  %v18190_v57 = vpop.f32.mrf.mxu0 }
 0x4ef   : > { %v24228_v62 = vadd.f32 %v8589_v42, %v8367_v32 }
 0x4f0   : > { %v18267_v12 = vpop.f32.mrf.mxu1  ;;  %v8328_v35 = vpop.f32.mrf.mxu0 }
 0x4f1   : > { %v24231_v39 = vadd.f32 %v8328_v35, %v24049_v46 }
 0x4f2   : > { %v9263_v6 = vpop.f32.mrf.mxu1  ;;  %v18229_v21 = vpop.f32.mrf.mxu0  ;;  %18432 = vmatmul.mubr.msk.bf16.vlgmr.msra.gmra.mxu0 %vm2943_vm5, %v26490_v41 }
 0x4f3   : > { %26489 = vst [vmem:[#allocation21_spill] sm:$0xff] %v24231_v39  ;;  %v9092_v47 = vadd.f32 %v18229_v21, %v24052_v48  ;;  %18435 = vmatprep.mubr.msk.bf16.mxu0 %vm2943_vm5, %v26491_v13 }
 0x4f4   : > { %v18268_v49 = vpop.f32.mrf.mxu1  ;;  %v8964_v43 = vpop.f32.mrf.mxu0 }
 0x4f5   : > { %v9090_v11 = vadd.f32 %v8964_v43, %v24066_v14  ;;  %v24241_v7 = vadd.f32 %v18263_v56, %v9092_v47  ;;  %v26493_v56 = vld [vmem:[#allocation40_spill] sm:$0xff] }
 0x4f6   : > { %v24239_v42 = vpop.f32.mrf.mxu1  ;;  %v18230_v46 = vpop.f32.mrf.mxu0 }
 0x4f7   : > { %v9093_v30 = vadd.f32 %v18230_v46, %v24070_v27  ;;  %v24244_v61 = vadd.f32 %v9247_v34, %v9090_v11  ;;  %v26494_v11 = vld [vmem:[#allocation54_spill] sm:$0xff] }
 0x4f8   : > { %v18271_v58 = vpop.f32.mrf.mxu1  ;;  %v8967_v26 = vpop.f32.mrf.mxu0 }
 0x4f9   : > { %v24247_v48 = vadd.f32 %v8967_v26, %v24077_v33  ;;  %v24249_v5 = vadd.f32 %v18264_v16, %v9093_v30 }
 0x4fa   : > { %v9279_v25 = vpop.f32.mrf.mxu1  ;;  %v18233_v37 = vpop.f32.mrf.mxu0  ;;  %18436 = vmatmul.mubr.msk.bf16.gmra.mxu0 %vm2943_vm5, %v26492_v55 }
 0x4fb   : > { %v9096_v14 = vadd.f32 %v18233_v37, %v24080_v22  ;;  %18439 = vmatprep.mubr.msk.bf16.mxu0 %vm2943_vm5, %v26493_v56 }
 0x4fc   : > { %v18272_v27 = vpop.f32.mrf.mxu1  ;;  %v8980_v8 = vpop.f32.mrf.mxu0 }
 0x4fd   : > { %v9094_v34 = vadd.f32 %v8980_v8, %v24094_v36  ;;  %v24259_v33 = vadd.f32 %v18267_v12, %v9096_v14  ;;  %v26495_v12 = vld [vmem:[#allocation34_spill] sm:$0xff] }
 0x4fe   : > { %v24257_v32 = vpop.f32.mrf.mxu1  ;;  %v18234_v57 = vpop.f32.mrf.mxu0 }
 0x4ff   : > { %v9097_v16 = vadd.f32 %v18234_v57, %v24098_v44  ;;  %v24262_v21 = vadd.f32 %v9263_v6, %v9094_v34  ;;  %v26496_v57 = vld [vmem:[#allocation41_spill] sm:$0xff] }
 0x500   : > { %v18275_v35 = vpop.f32.mrf.mxu1  ;;  %v8983_v41 = vpop.f32.mrf.mxu0 }
 0x501   : > { %v24265_v22 = vadd.f32 %v8983_v41, %v24105_v3  ;;  %v24267_v13 = vadd.f32 %v18268_v49, %v9097_v16 }
 0x502   : > { %v9295_v47 = vpop.f32.mrf.mxu1  ;;  %v18237_v43 = vpop.f32.mrf.mxu0  ;;  %18440 = vmatmul.mubr.msk.bf16.gmra.mxu0 %vm2943_vm5, %v26494_v11 }
 0x503   : > { %v9100_v36 = vadd.f32 %v18237_v43, %v24110_v20  ;;  %18443 = vmatprep.mubr.msk.bf16.mxu0 %vm2943_vm5, %v26495_v12 }
 0x504   : > { %v18276_v44 = vpop.f32.mrf.mxu1  ;;  %v8996_v46 = vpop.f32.mrf.mxu0 }
 0x505   : > { %v9098_v6 = vadd.f32 %v8996_v46, %v24122_v24  ;;  %v24277_v3 = vadd.f32 %v18271_v58, %v9100_v36  ;;  %v26497_v58 = vld [vmem:[#allocation45_spill] sm:$0xff] }
 0x506   : > { %v24275_v30 = vpop.f32.mrf.mxu1  ;;  %v18238_v26 = vpop.f32.mrf.mxu0 }
 0x507   : > { %v9101_v49 = vadd.f32 %v18238_v26, %v24126_v10  ;;  %v24280_v55 = vadd.f32 %v9279_v25, %v9098_v6 }
 0x508   : > { %v18279_v37 = vpop.f32.mrf.mxu1  ;;  %v8999_v14 = vpop.f32.mrf.mxu0 }
 0x509   : > { %v24283_v20 = vadd.f32 %v8999_v14, %v24135_v59  ;;  %v24285_v8 = vadd.f32 %v18272_v27, %v9101_v49  ;;  %v26499_v49 = vld [vmem:[#allocation166_spill] sm:$0xff] }
 0x50a   : > { %v9311_v56 = vpop.f32.mrf.mxu1  ;;  %v18241_v34 = vpop.f32.mrf.mxu0  ;;  %18444 = vmatmul.mubr.msk.bf16.gmra.mxu0 %vm2943_vm5, %v26496_v57 }
 0x50b   : > { %v9104_v24 = vadd.f32 %v18241_v34, %v24140_v53  ;;  %18447 = vmatprep.mubr.msk.bf16.mxu0 %vm2943_vm5, %v26497_v58 }
 0x50c   : > { %v18280_v10 = vpop.f32.mrf.mxu1  ;;  %v9012_v16 = vpop.f32.mrf.mxu0 }
 0x50d   : > { %v9102_v25 = vadd.f32 %v9012_v16, %v24150_v17  ;;  %v24295_v59 = vadd.f32 %v18275_v35, %v9104_v24  ;;  %v26500_v35 = vld [vmem:[#allocation167_spill] sm:$0xff] }
 0x50e   : > { %v24293_v41 = vpop.f32.mrf.mxu1  ;;  %v18242_v43 = vpop.f32.mrf.mxu0 }
 0x50f   : > { %26498 = vst [vmem:[#allocation22_spill] sm:$0xff] %v24293_v41  ;;  %v9105_v27 = vadd.f32 %v18242_v43, %v24154_v0  ;;  %v24298_v36 = vadd.f32 %v9295_v47, %v9102_v25 }
 0x510   : > { %v18283_v11 = vpop.f32.mrf.mxu1  ;;  %v9015_v12 = vpop.f32.mrf.mxu0 }
 0x511   : > { %v24301_v53 = vadd.f32 %v9015_v12, %v24161_v19  ;;  %v24303_v6 = vadd.f32 %v18276_v44, %v9105_v27  ;;  %v26503_v27 = vld [vmem:[#allocation168_spill] sm:$0xff]  ;;  %v26504_v12 = vld [vmem:[#allocation169_spill] sm:$0xff] }
 0x512   : > { %v9327_v46 = vpop.f32.mrf.mxu1  ;;  %v18245_v26 = vpop.f32.mrf.mxu0  ;;  %18448 = vmatmul.mubr.msk.bf16.gmra.mxu0 %vm2943_vm5, %v26499_v49 }
 0x513   : > { %v9108_v17 = vadd.f32 %v18245_v26, %v24166_v51  ;;  %18451 = vmatprep.mubr.msk.bf16.mxu0 %vm2943_vm5, %v26500_v35 }
 0x514   : > { %v18284_v0 = vpop.f32.mrf.mxu1  ;;  %v9028_v14 = vpop.f32.mrf.mxu0 }
 0x515   : > { %v9106_v47 = vadd.f32 %v9028_v14, %v24172_v2  ;;  %v24313_v19 = vadd.f32 %v18279_v37, %v9108_v17 }
 0x516   : > { %v24311_v34 = vpop.f32.mrf.mxu1  ;;  %v18246_v57 = vpop.f32.mrf.mxu0 }
 0x517   : > { %26501 = vst [vmem:[#allocation70_spill] sm:$0xff] %v24311_v34  ;;  %v9109_v44 = vadd.f32 %v18246_v57, %v24178_v54  ;;  %v24316_v58 = vadd.f32 %v9311_v56, %v9106_v47 }
 0x518   : > { %v18287_v24 = vpop.f32.mrf.mxu1  ;;  %v24318_v16 = vpop.f32.mrf.mxu0 }
 0x519   : > { %26502 = vst [vmem:[#allocation73_spill] sm:$0xff] %v24318_v16  ;;  %v24320_v25 = vadd.f32 %v18280_v10, %v9109_v44 }
 0x51a   : > { %v9343_v51 = vpop.f32.mrf.mxu1  ;;  %v18249_v43 = vpop.f32.mrf.mxu0  ;;  %18452 = vmatmul.mubr.msk.bf16.gmra.mxu0 %vm2943_vm5, %v26503_v27  ;;  %v26508_v27 = vld [vmem:[#allocation170_spill] sm:$0xff] }
 0x51b   : > { %v9112_v2 = vadd.f32 %v18249_v43, %v24188_v60  ;;  %18455 = vmatprep.mubr.msk.bf16.mxu0 %vm2943_vm5, %v26504_v12  ;;  %v26507_v43 = vld [vmem:[#allocation44_spill] sm:$0xff] }
 0x51c   : > { %v18288_v37 = vpop.f32.mrf.mxu1  ;;  %v9044_v26 = vpop.f32.mrf.mxu0 }
 0x51d   : > { %v9110_v54 = vadd.f32 %v9044_v26, %v24192_v23  ;;  %v24330_v49 = vadd.f32 %v18283_v11, %v9112_v2 }
 0x51e   : > { %v24328_v56 = vpop.f32.mrf.mxu1  ;;  %v18250_v17 = vpop.f32.mrf.mxu0 }
 0x51f   : > { %26505 = vst [vmem:[#allocation25_spill] sm:$0xff] %v24328_v56  ;;  %v9113_v10 = vadd.f32 %v18250_v17, %v24197_v9  ;;  %v24333_v14 = vadd.f32 %v9327_v46, %v9110_v54 }
 0x520   : > { %v18291_v35 = vpop.f32.mrf.mxu1  ;;  %v24335_v47 = vpop.f32.mrf.mxu0 }
 0x521   : > { %26506 = vst [vmem:[#allocation77_spill] sm:$0xff] %v24335_v47  ;;  %v24337_v57 = vadd.f32 %v18284_v0, %v9113_v10 }
 0x522   : > { %v9359_v60 = vpop.f32.mrf.mxu1  ;;  %v18253_v44 = vpop.f32.mrf.mxu0  ;;  %18456 = vmatmul.mubr.msk.bf16.gmra.mxu0 %vm2943_vm5, %v26507_v43 }
 0x523   : > { %v9116_v23 = vadd.f32 %v18253_v44, %v24207_v52  ;;  %18459 = vmatprep.mubr.msk.bf16.mxu0 %vm2943_vm5, %v26508_v27  ;;  %v26511_v27 = vrot.slane %v26469_v45, 2 }
 0x524   : > { %v18292_v11 = vpop.f32.mrf.mxu1  ;;  %v9060_v2 = vpop.f32.mrf.mxu0 }
 0x525   : > { %v9114_v9 = vadd.f32 %v9060_v2, %v24210_v63  ;;  %v24347_v12 = vadd.f32 %v18287_v24, %v9116_v23 }
 0x526   : > { %v24345_v46 = vpop.f32.mrf.mxu1  ;;  %v18254_v26 = vpop.f32.mrf.mxu0 }
 0x527   : > { %26509 = vst [vmem:[#allocation88_spill] sm:$0xff] %v24345_v46  ;;  %v9117_v0 = vadd.f32 %v18254_v26, %v24215_v50  ;;  %v24350_v17 = vadd.f32 %v9343_v51, %v9114_v9 }
 0x528   : > { %v18331_v54 = vpop.f32.mrf.mxu1  ;;  %v24352_v10 = vpop.f32.mrf.mxu0 }
 0x529   : > { %26510 = vst [vmem:[#allocation102_spill] sm:$0xff] %v24352_v10  ;;  %v24354_v44 = vadd.f32 %v18288_v37, %v9117_v0 }
 0x52a   : > { %v10091_v52 = vpop.f32.mrf.mxu1  ;;  %v18257_v43 = vpop.f32.mrf.mxu0  ;;  %18460 = vmatmul.mubr.msk.bf16.gmra.mxu0 %vm2943_vm5, %v26511_v27 }
 0x52b   : > { %v9120_v63 = vadd.f32 %v18257_v43, %v24226_v40 }
 0x52c   : > { %v18332_v24 = vpop.f32.mrf.mxu1  ;;  %v9076_v23 = vpop.f32.mrf.mxu0 }
 0x52d   : > { %v9118_v11 = vadd.f32 %v9076_v23, %v24228_v62  ;;  %v24363_v51 = vadd.f32 %v18291_v35, %v9120_v63 }
 0x52e   : > { %v24361_v50 = vpop.f32.mrf.mxu1  ;;  %v18258_v2 = vpop.f32.mrf.mxu0 }
 0x52f   : > { %v24365_v26 = vadd.f32 %v9359_v60, %v9118_v11 }
 0x530   : > { %v18335_v9 = vpop.f32.mrf.mxu1  ;;  %v24367_v37 = vpop.f32.mrf.mxu0 }
 0x531   : > { %26512 = vst [vmem:[#allocation28_spill] sm:$0xff] %v24367_v37 }
 0x532   : > { %v10107_v0 = vpop.f32.mrf.mxu1  ;;  %v18297_v45 = vpop.f32.mrf.mxu0 }
 0x533   : > { %v9732_v27 = vadd.f32 %v18297_v45, %v24241_v7 }
 0x534   : > { %v18336_v46 = vpop.f32.mrf.mxu1  ;;  %v9604_v40 = vpop.f32.mrf.mxu0 }
 0x535   : > { %v9730_v43 = vadd.f32 %v9604_v40, %v24244_v61  ;;  %v24373_v62 = vadd.f32 %v18331_v54, %v9732_v27 }
 0x536   : > { %v24371_v31 = vpop.f32.mrf.mxu1  ;;  %v18298_v35 = vpop.f32.mrf.mxu0 }
 0x537   : > { %v9733_v63 = vadd.f32 %v18298_v35, %v24249_v5  ;;  %v24376_v60 = vadd.f32 %v10091_v52, %v9730_v43 }
 0x538   : > { %v18339_v23 = vpop.f32.mrf.mxu1  ;;  %v24378_v11 = vpop.f32.mrf.mxu0 }
 0x539   : > { %v24380_v37 = vadd.f32 %v18332_v24, %v9733_v63 }
 0x53a   : > { %v10123_v2 = vpop.f32.mrf.mxu1  ;;  %v18301_v7 = vpop.f32.mrf.mxu0 }
 0x53b   : > { %v9736_v45 = vadd.f32 %v18301_v7, %v24259_v33 }
 0x53c   : > { %v18340_v39 = vpop.f32.mrf.mxu1  ;;  %v9620_v61 = vpop.f32.mrf.mxu0 }
 0x53d   : > { %v9734_v40 = vadd.f32 %v9620_v61, %v24262_v21  ;;  %v24386_v27 = vadd.f32 %v18335_v9, %v9736_v45 }
 0x53e   : > { %v24384_v54 = vpop.f32.mrf.mxu1  ;;  %v18302_v5 = vpop.f32.mrf.mxu0 }
 0x53f   : > { %v9737_v52 = vadd.f32 %v18302_v5, %v24267_v13  ;;  %v24389_v35 = vadd.f32 %v10107_v0, %v9734_v40 }
 0x540   : > { %v18343_v43 = vpop.f32.mrf.mxu1  ;;  %v24391_v56 = vpop.f32.mrf.mxu0 }
 0x541   : > { %v24393_v63 = vadd.f32 %v18336_v46, %v9737_v52 }
 0x542   : > { %v10139_v24 = vpop.f32.mrf.mxu1  ;;  %v18305_v33 = vpop.f32.mrf.mxu0 }
 0x543   : > { %v9740_v7 = vadd.f32 %v18305_v33, %v24277_v3 }
 0x544   : > { %v18344_v10 = vpop.f32.mrf.mxu1  ;;  %v9636_v21 = vpop.f32.mrf.mxu0 }
 0x545   : > { %v9738_v61 = vadd.f32 %v9636_v21, %v24280_v55  ;;  %v24399_v45 = vadd.f32 %v18339_v23, %v9740_v7 }
 0x546   : > { %v24397_v9 = vpop.f32.mrf.mxu1  ;;  %v18306_v13 = vpop.f32.mrf.mxu0 }
 0x547   : > { %26513 = vst [vmem:[#allocation74_spill] sm:$0xff] %v24397_v9  ;;  %v9741_v0 = vadd.f32 %v18306_v13, %v24285_v8  ;;  %v24402_v5 = vadd.f32 %v10123_v2, %v9738_v61 }
 0x548   : > { %v18347_v40 = vpop.f32.mrf.mxu1  ;;  %v24404_v18 = vpop.f32.mrf.mxu0 }
 0x549   : > { %v24406_v52 = vadd.f32 %v18340_v39, %v9741_v0 }
 0x54a   : > { %v10155_v46 = vpop.f32.mrf.mxu1  ;;  %v18309_v3 = vpop.f32.mrf.mxu0 }
 0x54b   : > { %v9744_v33 = vadd.f32 %v18309_v3, %v24295_v59 }
 0x54c   : > { %v18348_v38 = vpop.f32.mrf.mxu1  ;;  %v9652_v55 = vpop.f32.mrf.mxu0 }
 0x54d   : > { %v9742_v21 = vadd.f32 %v9652_v55, %v24298_v36  ;;  %v24412_v7 = vadd.f32 %v18343_v43, %v9744_v33 }
 0x54e   : > { %v24410_v23 = vpop.f32.mrf.mxu1  ;;  %v18310_v8 = vpop.f32.mrf.mxu0 }
 0x54f   : > { %26514 = vst [vmem:[#allocation93_spill] sm:$0xff] %v24410_v23  ;;  %v9745_v2 = vadd.f32 %v18310_v8, %v24303_v6  ;;  %v24415_v13 = vadd.f32 %v10139_v24, %v9742_v21 }
 0x550   : > { %v18351_v61 = vpop.f32.mrf.mxu1  ;;  %v24417_v34 = vpop.f32.mrf.mxu0 }
 0x551   : > { %v24419_v0 = vadd.f32 %v18344_v10, %v9745_v2 }
 0x552   : > { %v10171_v39 = vpop.f32.mrf.mxu1  ;;  %v18313_v59 = vpop.f32.mrf.mxu0 }
 0x553   : > { %v9748_v3 = vadd.f32 %v18313_v59, %v24313_v19 }
 0x554   : > { %v18352_v47 = vpop.f32.mrf.mxu1  ;;  %v9668_v36 = vpop.f32.mrf.mxu0 }
 0x555   : > { %v9746_v55 = vadd.f32 %v9668_v36, %v24316_v58  ;;  %v24425_v33 = vadd.f32 %v18347_v40, %v9748_v3 }
 0x556   : > { %v24423_v43 = vpop.f32.mrf.mxu1  ;;  %v18314_v6 = vpop.f32.mrf.mxu0 }
 0x557   : > { %26515 = vst [vmem:[#allocation110_spill] sm:$0xff] %v24423_v43  ;;  %v9749_v24 = vadd.f32 %v18314_v6, %v24320_v25  ;;  %v24428_v8 = vadd.f32 %v10155_v46, %v9746_v55 }
 0x558   : > { %v18355_v21 = vpop.f32.mrf.mxu1  ;;  %v24430_v23 = vpop.f32.mrf.mxu0 }
 0x559   : > { %26516 = vst [vmem:[#allocation128_spill] sm:$0xff] %v24430_v23  ;;  %v24432_v2 = vadd.f32 %v18348_v38, %v9749_v24 }
 0x55a   : > { %v10187_v10 = vpop.f32.mrf.mxu1  ;;  %v18317_v19 = vpop.f32.mrf.mxu0 }
 0x55b   : > { %v9752_v59 = vadd.f32 %v18317_v19, %v24330_v49 }
 0x55c   : > { %v18356_v15 = vpop.f32.mrf.mxu1  ;;  %v9684_v58 = vpop.f32.mrf.mxu0 }
 0x55d   : > { %v9750_v36 = vadd.f32 %v9684_v58, %v24333_v14  ;;  %v24438_v3 = vadd.f32 %v18351_v61, %v9752_v59 }
 0x55e   : > { %v24436_v40 = vpop.f32.mrf.mxu1  ;;  %v18318_v25 = vpop.f32.mrf.mxu0 }
 0x55f   : > { %26517 = vst [vmem:[#allocation103_spill] sm:$0xff] %v24436_v40  ;;  %v9753_v46 = vadd.f32 %v18318_v25, %v24337_v57  ;;  %v24441_v6 = vadd.f32 %v10171_v39, %v9750_v36 }
 0x560   : > { %v18359_v55 = vpop.f32.mrf.mxu1  ;;  %v24443_v43 = vpop.f32.mrf.mxu0 }
 0x561   : > { %26518 = vst [vmem:[#allocation111_spill] sm:$0xff] %v24443_v43  ;;  %v24445_v24 = vadd.f32 %v18352_v47, %v9753_v46 }
 0x562   : > { %v10203_v38 = vpop.f32.mrf.mxu1  ;;  %v18321_v49 = vpop.f32.mrf.mxu0 }
 0x563   : > { %v9756_v19 = vadd.f32 %v18321_v49, %v24347_v12 }
 0x564   : > { %v18360_v23 = vpop.f32.mrf.mxu1  ;;  %v9700_v14 = vpop.f32.mrf.mxu0 }
 0x565   : > { %v9754_v58 = vadd.f32 %v9700_v14, %v24350_v17  ;;  %v24451_v59 = vadd.f32 %v18355_v21, %v9756_v19 }
 0x566   : > { %v24449_v61 = vpop.f32.mrf.mxu1  ;;  %v18322_v57 = vpop.f32.mrf.mxu0 }
 0x567   : > { %26519 = vst [vmem:[#allocation113_spill] sm:$0xff] %v24449_v61  ;;  %v9757_v39 = vadd.f32 %v18322_v57, %v24354_v44  ;;  %v24454_v25 = vadd.f32 %v10187_v10, %v9754_v58 }
 0x568   : > { %v18399_v36 = vpop.f32.mrf.mxu1  ;;  %v24456_v40 = vpop.f32.mrf.mxu0 }
 0x569   : > { %26520 = vst [vmem:[#allocation32_spill] sm:$0xff] %v24456_v40  ;;  %v24458_v46 = vadd.f32 %v18356_v15, %v9757_v39 }
 0x56a   : > { %v10699_v47 = vpop.f32.mrf.mxu1  ;;  %v18325_v12 = vpop.f32.mrf.mxu0 }
 0x56b   : > { %v9760_v23 = vadd.f32 %v18325_v12, %v24363_v51 }
 0x56c   : > { %v18400_v49 = vpop.f32.mrf.mxu1  ;;  %v9716_v17 = vpop.f32.mrf.mxu0 }
 0x56d   : > { %v9758_v14 = vadd.f32 %v9716_v17, %v24365_v26  ;;  %v24464_v19 = vadd.f32 %v18359_v55, %v9760_v23 }
 0x56e   : > { %v24462_v21 = vpop.f32.mrf.mxu1  ;;  %v18326_v44 = vpop.f32.mrf.mxu0 }
 0x56f   : > { %v24466_v10 = vadd.f32 %v10203_v38, %v9758_v14 }
 0x570   : > { %v18403_v57 = vpop.f32.mrf.mxu1  ;;  %v24468_v58 = vpop.f32.mrf.mxu0 }
 0x571   : > { %26521 = vst [vmem:[#allocation76_spill] sm:$0xff] %v24468_v58 }
 0x572   : > { %v10715_v61 = vpop.f32.mrf.mxu1  ;;  %v18365_v15 = vpop.f32.mrf.mxu0 }
 0x573   : > { %v10502_v39 = vadd.f32 %v18365_v15, %v24373_v62 }
 0x574   : > { %v18404_v40 = vpop.f32.mrf.mxu1  ;;  %v10374_v51 = vpop.f32.mrf.mxu0 }
 0x575   : > { %v10500_v12 = vadd.f32 %v10374_v51, %v24376_v60  ;;  %v24474_v26 = vadd.f32 %v18399_v36, %v10502_v39 }
 0x576   : > { %v24472_v43 = vpop.f32.mrf.mxu1  ;;  %v18366_v55 = vpop.f32.mrf.mxu0 }
 0x577   : > { %v10503_v23 = vadd.f32 %v18366_v55, %v24380_v37  ;;  %v24477_v38 = vadd.f32 %v10699_v47, %v10500_v12 }
 0x578   : > { %v18407_v17 = vpop.f32.mrf.mxu1  ;;  %v24479_v14 = vpop.f32.mrf.mxu0 }
 0x579   : > { %v24481_v58 = vadd.f32 %v18400_v49, %v10503_v23 }
 0x57a   : > { %v10731_v44 = vpop.f32.mrf.mxu1  ;;  %v18369_v62 = vpop.f32.mrf.mxu0 }
 0x57b   : > { %v10506_v15 = vadd.f32 %v18369_v62, %v24386_v27 }
 0x57c   : > { %v18408_v4 = vpop.f32.mrf.mxu1  ;;  %v10390_v60 = vpop.f32.mrf.mxu0 }
 0x57d   : > { %v10504_v51 = vadd.f32 %v10390_v60, %v24389_v35  ;;  %v24487_v39 = vadd.f32 %v18403_v57, %v10506_v15 }
 0x57e   : > { %v24485_v36 = vpop.f32.mrf.mxu1  ;;  %v18370_v37 = vpop.f32.mrf.mxu0 }
 0x57f   : > { %26522 = vst [vmem:[#allocation79_spill] sm:$0xff] %v24485_v36  ;;  %v10507_v47 = vadd.f32 %v18370_v37, %v24393_v63  ;;  %v24490_v55 = vadd.f32 %v10715_v61, %v10504_v51 }
 0x580   : > { %v18411_v12 = vpop.f32.mrf.mxu1  ;;  %v24492_v41 = vpop.f32.mrf.mxu0 }
 0x581   : > { %v24494_v23 = vadd.f32 %v18404_v40, %v10507_v47 }
 0x582   : > { %v10747_v49 = vpop.f32.mrf.mxu1  ;;  %v18373_v27 = vpop.f32.mrf.mxu0 }
 0x583   : > { %v10510_v62 = vadd.f32 %v18373_v27, %v24399_v45 }
 0x584   : > { %v18412_v9 = vpop.f32.mrf.mxu1  ;;  %v10406_v35 = vpop.f32.mrf.mxu0 }
 0x585   : > { %v10508_v60 = vadd.f32 %v10406_v35, %v24402_v5  ;;  %v24500_v15 = vadd.f32 %v18407_v17, %v10510_v62 }
 0x586   : > { %v24498_v57 = vpop.f32.mrf.mxu1  ;;  %v18374_v63 = vpop.f32.mrf.mxu0 }
 0x587   : > { %26523 = vst [vmem:[#allocation80_spill] sm:$0xff] %v24498_v57  ;;  %v10511_v61 = vadd.f32 %v18374_v63, %v24406_v52  ;;  %v24503_v37 = vadd.f32 %v10731_v44, %v10508_v60 }
 0x588   : > { %v18415_v51 = vpop.f32.mrf.mxu1  ;;  %v24505_v36 = vpop.f32.mrf.mxu0 }
 0x589   : > { %v24507_v47 = vadd.f32 %v18408_v4, %v10511_v61  ;;  %v19175_v4 = vld [vmem:[%s25501_s6 + $0x4] ss:$8 sps:$4 sm:$0xff]  }
 0x58a   : > { %v10763_v40 = vpop.f32.mrf.mxu1  ;;  %v18377_v45 = vpop.f32.mrf.mxu0  ;;  %15954 = vmatprep.mubr.msk.bf16.mxu1 %vm11195_vm13, %v19175_v4 }
 0x58b   : > { %v10514_v27 = vadd.f32 %v18377_v45, %v24412_v7 }
 0x58c   : > { %v18416_v16 = vpop.f32.mrf.mxu1  ;;  %v10422_v5 = vpop.f32.mrf.mxu0 }
 0x58d   : > { %v10512_v35 = vadd.f32 %v10422_v5, %v24415_v13  ;;  %v24513_v62 = vadd.f32 %v18411_v12, %v10514_v27 }
 0x58e   : > { %v24511_v17 = vpop.f32.mrf.mxu1  ;;  %v18378_v52 = vpop.f32.mrf.mxu0 }
 0x58f   : > { %26524 = vst [vmem:[#allocation83_spill] sm:$0xff] %v24511_v17  ;;  %v10515_v44 = vadd.f32 %v18378_v52, %v24419_v0  ;;  %v24516_v63 = vadd.f32 %v10747_v49, %v10512_v35 }
 0x590   : > { %v18419_v60 = vpop.f32.mrf.mxu1  ;;  %v24521_v7 = vpop.f32.mrf.mxu0 }
 0x591   : > { %26525 = vst [vmem:[#allocation84_spill] sm:$0xff] %v24516_v63  ;;  %v24523_v45 = vadd.f32 %v18412_v9, %v10515_v44 }
 0x592   : > { %v10779_v61 = vpop.f32.mrf.mxu1  ;;  %v18381_v13 = vpop.f32.mrf.mxu0 }
 0x593   : > { %26526 = vst [vmem:[#allocation81_spill] sm:$0xff] %v24523_v45  ;;  %v10518_v12 = vadd.f32 %v18381_v13, %v24425_v33 }
 0x594   : > { %v18420_v27 = vpop.f32.mrf.mxu1  ;;  %v10438_v0 = vpop.f32.mrf.mxu0 }
 0x595   : > { %v10516_v49 = vadd.f32 %v10438_v0, %v24428_v8  ;;  %v24530_v35 = vadd.f32 %v18415_v51, %v10518_v12 }
 0x596   : > { %v24528_v5 = vpop.f32.mrf.mxu1  ;;  %v18382_v52 = vpop.f32.mrf.mxu0 }
 0x597   : > { %26527 = vst [vmem:[#allocation85_spill] sm:$0xff] %v24528_v5  ;;  %v10519_v17 = vadd.f32 %v18382_v52, %v24432_v2  ;;  %v24533_v57 = vadd.f32 %v10763_v40, %v10516_v49 }
 0x598   : > { %v18423_v63 = vpop.f32.mrf.mxu1  ;;  %v24535_v9 = vpop.f32.mrf.mxu0 }
 0x599   : > { %26528 = vst [vmem:[#allocation8_spill] sm:$0xff] %v24533_v57  ;;  %v24537_v4 = vadd.f32 %v18416_v16, %v10519_v17 }
 0x59a   : > { %v10795_v44 = vpop.f32.mrf.mxu1  ;;  %v18385_v33 = vpop.f32.mrf.mxu0 }
 0x59b   : > { %v10522_v13 = vadd.f32 %v18385_v33, %v24438_v3 }
 0x59c   : > { %v18424_v45 = vpop.f32.mrf.mxu1  ;;  %v10454_v8 = vpop.f32.mrf.mxu0 }
 0x59d   : > { %v10520_v0 = vadd.f32 %v10454_v8, %v24441_v6  ;;  %v24543_v12 = vadd.f32 %v18419_v60, %v10522_v13 }
 0x59e   : > { %v24541_v51 = vpop.f32.mrf.mxu1  ;;  %v18386_v2 = vpop.f32.mrf.mxu0 }
 0x59f   : > { %v10523_v40 = vadd.f32 %v18386_v2, %v24445_v24  ;;  %v24546_v52 = vadd.f32 %v10779_v61, %v10520_v0 }
 0x5a0   : > { %v18427_v49 = vpop.f32.mrf.mxu1  ;;  %v24548_v5 = vpop.f32.mrf.mxu0 }
 0x5a1   : > { %v24550_v17 = vadd.f32 %v18420_v27, %v10523_v40  ;;  %v9374_v40 = vadd.f32 %v24224_v29, %v24247_v48  ;;  %v19189_v29 = vld [vmem:[%s25501_s6 + $0x74] ss:$8 sps:$4 sm:$0xff]  }
 0x5a2   : > { %v10811_v16 = vpop.f32.mrf.mxu1  ;;  %v18389_v3 = vpop.f32.mrf.mxu0  ;;  %15992 = vmatprep.mubr.msk.bf16.mxu0 %vm11195_vm13, %v19189_v29 }
 0x5a3   : > { %v10526_v33 = vadd.f32 %v18389_v3, %v24451_v59 }
 0x5a4   : > { %v18428_v57 = vpop.f32.mrf.mxu1  ;;  %v10470_v6 = vpop.f32.mrf.mxu0 }
 0x5a5   : > { %v10524_v8 = vadd.f32 %v10470_v6, %v24454_v25  ;;  %v24554_v60 = vadd.f32 %v18423_v63, %v10526_v33  ;;  %v9731_v25 = vadd.f32 %v24378_v11, %v9374_v40 }
 0x5a6   : > { %v18390_v13 = vpop.f32.mrf.mxu0 }
 0x5a7   : > { %v10527_v24 = vadd.f32 %v18390_v13, %v24458_v46  ;;  %v24557_v2 = vadd.f32 %v10795_v44, %v10524_v8 }
 0x5a8   : > { %v24559_v61 = vpop.f32.mrf.mxu0 }
 0x5a9   : > { %v24561_v0 = vadd.f32 %v18424_v45, %v10527_v24  ;;  %v10218_v45 = vadd.f32 %v24361_v50, %v9731_v25 }
 0x5aa   : > { %v18393_v27 = vpop.f32.mrf.mxu0 }
 0x5ab   : > { %v10530_v59 = vadd.f32 %v18393_v27, %v24464_v19  ;;  %v9378_v19 = vadd.f32 %v24239_v42, %v24265_v22  ;;  %v10501_v11 = vadd.f32 %v24479_v14, %v10218_v45 }
 0x5ac   : > { %v10486_v57 = vpop.f32.mrf.mxu0 }
 0x5ad   : > { %v10528_v63 = vadd.f32 %v10486_v57, %v24466_v10  ;;  %v24568_v3 = vadd.f32 %v18427_v49, %v10530_v59  ;;  %v10826_v13 = vadd.f32 %v24462_v21, %v10501_v11 }
 0x5ae   : > { %v18394_v46 = vpop.f32.mrf.mxu0 }
 0x5af   : > { %v24570_v44 = vadd.f32 %v10811_v16, %v10528_v63  ;;  %v9735_v16 = vadd.f32 %v24391_v56, %v9378_v19 }
 0x5b0   : > { %v24572_v33 = vpop.f32.mrf.mxu0 }
 0x5b1   : > { %v10222_v27 = vadd.f32 %v24371_v31, %v9735_v16 }
 0x5b2   : > { %v18433_v48 = vpop.f32.mrf.mxu0 }
 0x5b3   : > { %v11110_v10 = vadd.f32 %v18433_v48, %v24474_v26  ;;  %v9382_v26 = vadd.f32 %v24257_v32, %v24283_v20  ;;  %v10505_v40 = vadd.f32 %v24492_v41, %v10222_v27  ;;  %v26529_v48 = vld [vmem:[#allocation73_spill] sm:$0xff] }
 0x5b4   : > { %v10982_v49 = vpop.f32.mrf.mxu0 }
 0x5b5   : > { %v11108_v6 = vadd.f32 %v10982_v49, %v24477_v38  ;;  %v10830_v25 = vadd.f32 %v24472_v43, %v10505_v40  ;;  %v26536_v40 = vld [vmem:[#allocation77_spill] sm:$0xff] }
 0x5b6   : > { %v18434_v50 = vpop.f32.mrf.mxu0 }
 0x5b7   : > { %v11111_v8 = vadd.f32 %v18434_v50, %v24481_v58  ;;  %v9739_v58 = vadd.f32 %v24404_v18, %v9382_v26 }
 0x5b8   : > { %v10985_v24 = vpop.f32.mrf.mxu0 }
 0x5b9   : > { %v24588_v42 = vpack.c.bf16 %v11111_v8, %v11110_v10  ;;  %v11109_v22 = vadd.f32 %v10985_v24, %v10826_v13  ;;  %v10226_v46 = vadd.f32 %v24384_v54, %v9739_v58  ;;  %v26530_v10 = vld [vmem:[#allocation79_spill] sm:$0xff]  ;;  %v26533_v24 = vld [vmem:[#allocation68_spill] sm:$0xff] }
 0x5ba   : > { %v18437_v14 = vpop.f32.mrf.mxu0 }
 0x5bb   : > { %v24593_v56 = vpack.c.bf16 %v11109_v22, %v11108_v6  ;;  %v11114_v38 = vadd.f32 %v18437_v14, %v24487_v39  ;;  %v9386_v39 = vadd.f32 %v24275_v30, %v24301_v53  ;;  %v10509_v45 = vadd.f32 %v24505_v36, %v10226_v46  ;;  %v26531_v53 = vld [vmem:[#allocation74_spill] sm:$0xff]  ;;  %v26535_v22 = vld [vmem:[#allocation128_spill] sm:$0xff] }
 0x5bc   : > { %v10998_v59 = vpop.f32.mrf.mxu0 }
 0x5bd   : > { %v11112_v21 = vadd.f32 %v10998_v59, %v24490_v55  ;;  %v9743_v43 = vadd.f32 %v24417_v34, %v9386_v39  ;;  %v10834_v49 = vadd.f32 %v26530_v10, %v10509_v45  ;;  %v26537_v59 = vld [vmem:[#allocation81_spill] sm:$0xff]  ;;  %v26541_v45 = vld [vmem:[#allocation70_spill] sm:$0xff] }
 0x5be   : > { %v18438_v57 = vpop.f32.mrf.mxu0 }
 0x5bf   : > { %v11115_v31 = vadd.f32 %v18438_v57, %v24494_v23  ;;  %v8620_v23 = vadd.f32 %v24138_v28, %v24176_v1  ;;  %v10230_v36 = vadd.f32 %v26531_v53, %v9743_v43  ;;  %v26532_v1 = vld [vmem:[#allocation22_spill] sm:$0xff] }
 0x5c0   : > { %v11001_v63 = vpop.f32.mrf.mxu0 }
 0x5c1   : > { %v24601_v32 = vpack.c.bf16 %v11115_v31, %v11114_v38  ;;  %v11113_v20 = vadd.f32 %v11001_v63, %v10830_v25  ;;  %v9107_v54 = vadd.f32 %v26529_v48, %v8620_v23  ;;  %v10513_v8 = vadd.f32 %v24521_v7, %v10230_v36  ;;  %v26539_v25 = vld [vmem:[#allocation93_spill] sm:$0xff]  ;;  %v26540_v63 = vld [vmem:[#allocation84_spill] sm:$0xff]  ;;  %v26543_v48 = vld [vmem:[#allocation66_spill] sm:$0xff] }
 0x5c2   : > { %v18441_v41 = vpop.f32.mrf.mxu0 }
 0x5c3   : > { %v24606_v18 = vpack.c.bf16 %v11113_v20, %v11112_v21  ;;  %v11118_v19 = vadd.f32 %v18441_v41, %v24500_v15  ;;  %v9390_v34 = vadd.f32 %v26532_v1, %v9107_v54  ;;  %v26538_v21 = vld [vmem:[#allocation80_spill] sm:$0xff]  ;;  %v26547_v1 = vld [vmem:[#allocation110_spill] sm:$0xff] }
 0x5c4   : > { %v11014_v55 = vpop.f32.mrf.mxu0  ;;  %v10838_v57 = vadd.f32 %v26538_v21, %v10513_v8  ;;  %v26553_v21 = vld [vmem:[#allocation28_spill] sm:$0xff] }
 0x5c5   : > { %v11116_v16 = vadd.f32 %v11014_v55, %v24503_v37  ;;  %v9747_v14 = vadd.f32 %v26535_v22, %v9390_v34  ;;  %v26548_v34 = vld [vmem:[#allocation8_spill] sm:$0xff] }
 0x5c6   : > { %v18442_v29 = vpop.f32.mrf.mxu0 }
 0x5c7   : > { %v11119_v11 = vadd.f32 %v18442_v29, %v24507_v47  ;;  %v26534_v47 = vld [vmem:[#allocation18_spill] sm:$0xff]  ;;  %v10234_v7 = vadd.f32 %v26539_v25, %v9747_v14  ;;  %v26542_v29 = vld [vmem:[#allocation20_spill] sm:$0xff] }
 0x5c8   : > { %v11017_v30 = vpop.f32.mrf.mxu0  ;;  %v8624_v27 = vadd.f32 %v26534_v47, %v26533_v24  ;;  %v8628_v54 = vadd.f32 %v26543_v48, %v26542_v29 }
 0x5c9   : > { %v24617_v6 = vpack.c.bf16 %v11119_v11, %v11118_v19  ;;  %v11117_v50 = vadd.f32 %v11017_v30, %v10834_v49  ;;  %v10517_v23 = vadd.f32 %v24535_v9, %v10234_v7  ;;  %v26544_v19 = vld [vmem:[#allocation111_spill] sm:$0xff]  ;;  %v26545_v49 = vld [vmem:[#allocation102_spill] sm:$0xff]  ;;  %v26554_v7 = vld [vmem:[#allocation85_spill] sm:$0xff] }
 0x5ca   : > { %v18445_v28 = vpop.f32.mrf.mxu0  ;;  %v9111_v38 = vadd.f32 %v26536_v40, %v8624_v27  ;;  %v9115_v30 = vadd.f32 %v26545_v49, %v8628_v54  ;;  %v26549_v27 = vld [vmem:[#allocation25_spill] sm:$0xff] }
 0x5cb   : > { %v24621_v13 = vpack.c.bf16 %v11117_v50, %v11116_v16  ;;  %v11122_v37 = vadd.f32 %v18445_v28, %v24513_v62  ;;  %v26546_v16 = vld [vmem:[#allocation83_spill] sm:$0xff]  ;;  %v26550_v40 = vld [vmem:[#allocation21_spill] sm:$0xff] }
 0x5cc   : > { %v11030_v15 = vpop.f32.mrf.mxu0  ;;  %v9394_v55 = vadd.f32 %v26541_v45, %v9111_v38  ;;  %v10842_v50 = vadd.f32 %v26546_v16, %v10517_v23  ;;  %v9398_v22 = vadd.f32 %v26549_v27, %v9115_v30  ;;  %v19187_v27 = vld [vmem:[%s25501_s6 + $0x70] ss:$8 sps:$4 sm:$0xff]  }
 0x5cd   : > { %v11120_v46 = vadd.f32 %v11030_v15, %v26540_v63 }
 0x5ce   : > { %v18446_v26 = vpop.f32.mrf.mxu0  ;;  %v9751_v11 = vadd.f32 %v26544_v19, %v9394_v55  ;;  %v26557_v19 = vld [vmem:[#allocation76_spill] sm:$0xff] }
 0x5cf   : > { %v11123_v58 = vadd.f32 %v18446_v26, %v26537_v59 }
 0x5d0   : > { %v11033_v31 = vpop.f32.mrf.mxu0  ;;  %v10238_v9 = vadd.f32 %v26547_v1, %v9751_v11 }
 0x5d1   : > { %v24632_v20 = vpack.c.bf16 %v11123_v58, %v11122_v37  ;;  %v11121_v41 = vadd.f32 %v11033_v31, %v10838_v57  ;;  %v26552_v37 = vld [vmem:[#allocation32_spill] sm:$0xff] }
 0x5d2   : > { %v18449_v39 = vpop.f32.mrf.mxu0  ;;  %v10521_v14 = vadd.f32 %v24548_v5, %v10238_v9  ;;  %v9755_v59 = vadd.f32 %v26552_v37, %v9398_v22  ;;  %v19176_v22 = vld [vmem:[%s25501_s6 + $0x14] ss:$8 sps:$4 sm:$0xff]  }
 0x5d3   : > { %v24636_v43 = vpack.c.bf16 %v11121_v41, %v11120_v46  ;;  %v11126_v53 = vadd.f32 %v18449_v39, %v24530_v35  ;;  %v26555_v41 = vld [vmem:[#allocation103_spill] sm:$0xff]  ;;  %v19199_v37 = vld [vmem:[%s25501_s6 + $0x94] ss:$8 sps:$4 sm:$0xff]  }
 0x5d4   : > { %v11046_v62 = vpop.f32.mrf.mxu0  ;;  %v10846_v63 = vadd.f32 %v26554_v7, %v10521_v14  ;;  %v10242_v5 = vadd.f32 %v26555_v41, %v9755_v59  ;;  %v19193_v14 = vld [vmem:[%s25501_s6 + $0x84] ss:$8 sps:$4 sm:$0xff]   ;;  %v11161_v59 = vld [vmem:[%s25501_s6 + $0x30] sm:$0x11]  ;;  %v19184_v41 = vld [vmem:[%s25501_s6 + $0x38] ss:$8 sps:$4 sm:$0xff]  }
 0x5d5   : > { %v11124_v8 = vadd.f32 %v11046_v62, %v26548_v34  ;;  %v26556_v62 = vld [vmem:[#allocation88_spill] sm:$0xff]  ;;  %v15952_v7 = vcombine.low %v11161_v59, %v11161_v59 }
 0x5d6   : > { %v18450_v10 = vpop.f32.mrf.mxu0  ;;  %v10525_v48 = vadd.f32 %v24559_v61, %v10242_v5  ;;  %v19190_v5 = vld [vmem:[%s25501_s6 + $0x4c] ss:$8 sps:$4 sm:$0xff]  }
 0x5d7   : > { %v11127_v36 = vadd.f32 %v18450_v10, %v24537_v4  ;;  %v26551_v4 = vld [vmem:[#allocation47_spill] sm:$0xff] }
 0x5d8   : > { %v11049_v28 = vpop.f32.mrf.mxu0  ;;  %v8632_v38 = vadd.f32 %v26551_v4, %v26550_v40  ;;  %v19178_v40 = vld [vmem:[%s25501_s6 + $0x10] ss:$8 sps:$4 sm:$0xff]   ;;  %v19195_v4 = vld [vmem:[%s25501_s6 + $0x80] ss:$8 sps:$4 sm:$0xff]  }
 0x5d9   : > { %v24647_v15 = vpack.c.bf16 %v11127_v36, %v11126_v53  ;;  %v11125_v24 = vadd.f32 %v11049_v28, %v10842_v50  ;;  %v26558_v53 = vld [vmem:[#allocation113_spill] sm:$0xff] }
 0x5da   : > { %v18453_v47 = vpop.f32.mrf.mxu0  ;;  %v9119_v57 = vadd.f32 %v26553_v21, %v8632_v38  ;;  %v19179_v38 = vld [vmem:[%s25501_s6 + $0x24] ss:$8 sps:$4 sm:$0xff]   ;;  %v19181_v21 = vld [vmem:[%s25501_s6 + $0x20] ss:$8 sps:$4 sm:$0xff]  }
 0x5db   : > { %v24651_v26 = vpack.c.bf16 %v11125_v24, %v11124_v8  ;;  %v11130_v31 = vadd.f32 %v18453_v47, %v24543_v12 }
 0x5dc   : > { %v11062_v35 = vpop.f32.mrf.mxu0  ;;  %v9402_v29 = vadd.f32 %v26556_v62, %v9119_v57  ;;  %v19201_v57 = vld [vmem:[%s25501_s6 + $0x90] ss:$8 sps:$4 sm:$0xff]   ;;  %v19208_v62 = vld [vmem:[%s25501_s6 + $0xac] ss:$8 sps:$4 sm:$0xff]  }
 0x5dd   : > { %v11128_v39 = vadd.f32 %v11062_v35, %v24546_v52  ;;  %v10850_v52 = vadd.f32 %v24541_v51, %v10525_v48  ;;  %v26559_v35 = vmov 0.0   ;;  %v19218_v48 = vld [vmem:[%s25502_s7 + $0x18] sm:$0xff]  }
 0x5de   : > { %v18454_v58 = vpop.f32.mrf.mxu0 }
 0x5df   : > { %v11131_v25 = vadd.f32 %v18454_v58, %v24550_v17  ;;  %v9759_v17 = vadd.f32 %v26557_v19, %v9402_v29  ;;  %v15983_v58 = vld [vmem:[%s25501_s6 + $0xa0] sm:$0x11]  ;;  %v19217_v29 = vld [vmem:[%s25502_s7 + $0x8] sm:$0xff]  }
 0x5e0   : > { %v11065_v46 = vpop.f32.mrf.mxu0 }
 0x5e1   : > { %v24662_v45 = vpack.c.bf16 %v11131_v25, %v11130_v31  ;;  %v11129_v55 = vadd.f32 %v11065_v46, %v10846_v63  ;;  %v10246_v36 = vadd.f32 %v26558_v53, %v9759_v17  ;;  %v15953_v31 = vcombine.high %v11161_v59, %v11161_v59  ;;  %v19186_v46 = vld [vmem:[%s25501_s6 + $0x3c] ss:$8 sps:$4 sm:$0xff]  }
 0x5e2   : > { %v18457_v23 = vpop.f32.mrf.mxu0  ;;  %v15991_v25 = vcombine.high %v15983_v58, %v15983_v58  ;;  %v15990_v63 = vcombine.low %v15983_v58, %v15983_v58 }
 0x5e3   : > { %v24666_v54 = vpack.c.bf16 %v11129_v55, %v11128_v39  ;;  %v11134_v10 = vadd.f32 %v18457_v23, %v24554_v60  ;;  %v10529_v1 = vadd.f32 %v24572_v33, %v10246_v36  ;;  %v19192_v39 = vld [vmem:[%s25501_s6 + $0x48] ss:$8 sps:$4 sm:$0xff]   ;;  %v19196_v55 = vld [vmem:[%s25501_s6 + $0x5c] ss:$8 sps:$4 sm:$0xff]  }
 0x5e4   : > { %v11078_v12 = vpop.f32.mrf.mxu0 }
 0x5e5   : > { %v11132_v16 = vadd.f32 %v11078_v12, %v24557_v2  ;;  %v19221_v12 = vld [vmem:[%s25502_s7 + $0x10] sm:$0xff]  }
 0x5e6   : > { %v18458_v11 = vpop.f32.mrf.mxu0 }
 0x5e7   : > { %v11135_v49 = vadd.f32 %v18458_v11, %v24561_v0  ;;  %v10814_v0 = vpop.f32.mrf.mxu1 }
 0x5e8   : > { %v11081_v30 = vpop.f32.mrf.mxu0  ;;  %v10854_v2 = vadd.f32 %v10814_v0, %v10529_v1 }
 0x5e9   : > { %v24674_v50 = vpack.c.bf16 %v11135_v49, %v11134_v10  ;;  %v11133_v61 = vadd.f32 %v11081_v30, %v10850_v52 }
 0x5ea   : > { %v18461_v28 = vpop.f32.mrf.mxu0 }
 0x5eb   : > { %v24677_v9 = vpack.c.bf16 %v11133_v61, %v11132_v16  ;;  %v11138_v34 = vadd.f32 %v18461_v28, %v24568_v3 }
 0x5ec   : > { %v11094_v60 = vpop.f32.mrf.mxu0 }
 0x5ed   : > { %v24680_v8 = vpack.c.bf16 %v11138_v34, %v11138_v34  ;;  %v11136_v33 = vadd.f32 %v11094_v60, %v24570_v44  ;;  %v19173_v44 = vld [vmem:[%s25501_s6] ss:$8 sps:$4 sm:$0xff]  }
 0x5ee   : > { %v18462_v51 = vpop.f32.mrf.mxu0 }
 0x5ef   : > { %18855 = vmatprep.subr.msk.bf16.mxu1 %vm554_vm0, %v24680_v8  ;;  %18857 = vmatprep.subr.msk.bf16.mxu0 %vm554_vm0, %v24680_v8 }
 0x5f0   : > { %v11097_v24 = vpop.f32.mrf.mxu0  ;;  %16955 = vmatpush3.bf16.msra.mxu1 %v24632_v20  ;;  %17035 = vmatpush3.bf16.msra.mxu0 %v24632_v20 }
 0x5f1   : > { %v11137_v3 = vadd.f32 %v11097_v24, %v10854_v2 }
 0x5f3   : > { %v24689_v47 = vpack.c.bf16 %v11137_v3, %v11136_v33 }
 0x5f5   : > { %16956 = vmatprep.subr.bf16.mxu1 %v24689_v47  ;;  %17036 = vmatprep.subr.bf16.mxu0 %v24689_v47 }
 0x5f6   : > { %16957 = vmatpush3.bf16.msra.mxu1 %v24636_v43  ;;  %17037 = vmatpush3.bf16.msra.mxu0 %v24636_v43 }
 0x5f7   : > { %16958 = vmatprep.subr.bf16.mxu1 %v24674_v50  ;;  %17038 = vmatprep.subr.bf16.mxu0 %v24674_v50 }
 0x5fa   : > { %16959 = vmatpush3.bf16.msra.mxu1 %v24617_v6  ;;  %17039 = vmatpush3.bf16.msra.mxu0 %v24617_v6 }
 0x5fb   : > { %16960 = vmatprep.subr.bf16.mxu1 %v24677_v9  ;;  %17040 = vmatprep.subr.bf16.mxu0 %v24677_v9 }
 0x5fe   : > { %16961 = vmatpush3.bf16.msra.mxu1 %v24621_v13  ;;  %17041 = vmatpush3.bf16.msra.mxu0 %v24621_v13 }
 0x5ff   : > { %16962 = vmatprep.subr.bf16.mxu1 %v24662_v45  ;;  %17042 = vmatprep.subr.bf16.mxu0 %v24662_v45 }
 0x602   : > { %16963 = vmatpush3.bf16.msra.mxu1 %v24601_v32  ;;  %17043 = vmatpush3.bf16.msra.mxu0 %v24601_v32 }
 0x603   : > { %16964 = vmatprep.subr.bf16.mxu1 %v24666_v54  ;;  %17044 = vmatprep.subr.bf16.mxu0 %v24666_v54 }
 0x606   : > { %16965 = vmatpush3.bf16.msra.mxu1 %v24606_v18  ;;  %17045 = vmatpush3.bf16.msra.mxu0 %v24606_v18 }
 0x607   : > { %16966 = vmatprep.subr.bf16.mxu1 %v24647_v15  ;;  %17046 = vmatprep.subr.bf16.mxu0 %v24647_v15 }
 0x60a   : > { %16967 = vmatpush3.bf16.msra.mxu1 %v24588_v42  ;;  %17047 = vmatpush3.bf16.msra.mxu0 %v24588_v42 }
 0x60b   : > { %16968 = vmatprep.subr.bf16.mxu1 %v24651_v26  ;;  %17048 = vmatprep.subr.bf16.mxu0 %v24651_v26 }
 0x60e   : > { %16969 = vmatpush3.bf16.msra.mxu1 %v24593_v56  ;;  %17049 = vmatpush3.bf16.msra.mxu0 %v24593_v56 }
 0x60f   : > { %18856 = vmatprep.subr.msk.bf16.mxu1 %vm554_vm0, %v24680_v8  ;;  %18463 = vmatprep.subr.bf16.mxu0 %v26559_v35 }
 0x611   : > { %11244 = vmatmul.mubr.bf16.vlgmr.msra.gmra.mxu1 %v19173_v44  ;;  %11485 = vmatmul.mubr.bf16.vlgmr.msra.gmra.mxu0 %v19187_v27 }
 0x612   : > { %16995 = vmatpush3.bf16.msra.mxu1 %v24632_v20  ;;  %15955 = vmatprep.mubr.msk.bf16.mxu1 %vm11195_vm13, %v19176_v22 }
 0x613   : > { %16996 = vmatprep.subr.bf16.mxu1 %v24689_v47  ;;  %15993 = vmatprep.mubr.msk.bf16.mxu0 %vm11195_vm13, %v19193_v14 }
 0x614   : > { %18464 = vmatpush3.bf16.msra.mxu0 %v19218_v48 }
 0x615   : > { %18465 = vmatprep.subr.bf16.mxu0 %v26559_v35 }
 0x616   : > { %16997 = vmatpush3.bf16.msra.mxu1 %v24636_v43 }
 0x617   : > { %16998 = vmatprep.subr.bf16.mxu1 %v24674_v50 }
 0x618   : > { %18466 = vmatpush3.bf16.msra.mxu0 %v19221_v12  ;;  %v24898_v12 = vld [vmem:[%s25500_s5] ss:$0 sm:$0xff] }
 0x619   : > { %11252 = vmatmul.mubr.bf16.gmra.mxu1 %v19178_v40  ;;  %11493 = vmatmul.mubr.bf16.gmra.mxu0 %v19195_v4 }
 0x61a   : > { %16999 = vmatpush3.bf16.msra.mxu1 %v24617_v6  ;;  %15956 = vmatprep.mubr.msk.bf16.mxu1 %vm11195_vm13, %v19179_v38 }
 0x61b   : > { %17000 = vmatprep.subr.bf16.mxu1 %v24677_v9  ;;  %15994 = vmatprep.mubr.msk.bf16.mxu0 %vm11195_vm13, %v19199_v37 }
 0x61c   : > { %18479 = vmatprep.subr.bf16.mxu0 %v26559_v35 }
 0x61e   : > { %17001 = vmatpush3.bf16.msra.mxu1 %v24621_v13 }
 0x61f   : > { %17002 = vmatprep.subr.bf16.mxu1 %v24662_v45 }
 0x621   : > { %11260 = vmatmul.mubr.bf16.gmra.mxu1 %v19181_v21  ;;  %11501 = vmatmul.mubr.bf16.gmra.mxu0 %v19201_v57 }
 0x622   : > { %17003 = vmatpush3.bf16.msra.mxu1 %v24601_v32  ;;  %15957 = vmatprep.mubr.msk.bf16.mxu1 %vm11195_vm13, %v15953_v31 }
 0x623   : > { %17004 = vmatprep.subr.bf16.mxu1 %v24666_v54  ;;  %15995 = vmatprep.mubr.msk.bf16.mxu0 %vm11195_vm13, %v15991_v25 }
 0x626   : > { %17005 = vmatpush3.bf16.msra.mxu1 %v24606_v18 }
 0x627   : > { %17006 = vmatprep.subr.bf16.mxu1 %v24647_v15 }
 0x629   : > { %11268 = vmatmul.mubr.bf16.gmra.mxu1 %v15952_v7  ;;  %11509 = vmatmul.mubr.bf16.gmra.mxu0 %v15990_v63 }
 0x62a   : > { %17007 = vmatpush3.bf16.msra.mxu1 %v24588_v42  ;;  %15973 = vmatprep.mubr.msk.bf16.mxu1 %vm11195_vm13, %v19186_v46 }
 0x62b   : > { %17008 = vmatprep.subr.bf16.mxu1 %v24651_v26  ;;  %18467 = vmatprep.mubr.msk.bf16.mxu0 %vm19461_vm2, %v26559_v35 }
 0x62e   : > { %17009 = vmatpush3.bf16.msra.mxu1 %v24593_v56 }
 0x62f   : > { %18858 = vmatprep.subr.msk.bf16.mxu1 %vm554_vm0, %v24680_v8  ;;  %vm11704_vm0 = vcmask 253952  }
 0x630   : > { %vm11706_vm3 = vmand %vm11704_vm0, %vm11705_vm1 }
 0x631   : > { %11361 = vmatmul.mubr.bf16.vlgmr.msra.gmra.mxu1 %v19184_v41 }
 0x632   : > { %17075 = vmatpush3.bf16.msra.mxu1 %v24632_v20  ;;  %15974 = vmatprep.mubr.msk.bf16.mxu1 %vm11195_vm13, %v19190_v5  ;;  %v15964_v20 = vld [vmem:[%s25501_s6 + $0x68] sm:$0x11] }
 0x633   : > { %17076 = vmatprep.subr.bf16.mxu1 %v24689_v47  ;;  %v15972_v23 = vcombine.high %v15964_v20, %v15964_v20 }
 0x636   : > { %17077 = vmatpush3.bf16.msra.mxu1 %v24636_v43  ;;  %v19198_v43 = vld [vmem:[%s25501_s6 + $0x58] ss:$8 sps:$4 sm:$0xff]  }
 0x637   : > { %17078 = vmatprep.subr.bf16.mxu1 %v24674_v50 }
 0x639   : > { %11369 = vmatmul.mubr.bf16.gmra.mxu1 %v19192_v39 }
 0x63a   : > { %17079 = vmatpush3.bf16.msra.mxu1 %v24617_v6  ;;  %15975 = vmatprep.mubr.msk.bf16.mxu1 %vm11195_vm13, %v19196_v55  ;;  %v15971_v6 = vcombine.low %v15964_v20, %v15964_v20 }
 0x63b   : > { %17080 = vmatprep.subr.bf16.mxu1 %v24677_v9 }
 0x63e   : > { %17081 = vmatpush3.bf16.msra.mxu1 %v24621_v13  ;;  %v19212_v13 = vld [vmem:[%s25501_s6 + $0xcc] ss:$8 sps:$4 sm:$0xff]  }
 0x63f   : > { %17082 = vmatprep.subr.bf16.mxu1 %v24662_v45 }
 0x641   : > { %11377 = vmatmul.mubr.bf16.gmra.mxu1 %v19198_v43 }
 0x642   : > { %17083 = vmatpush3.bf16.msra.mxu1 %v24601_v32  ;;  %15976 = vmatprep.mubr.msk.bf16.mxu1 %vm11195_vm13, %v15972_v23  ;;  %v19206_v32 = vld [vmem:[%s25501_s6 + $0xa8] ss:$8 sps:$4 sm:$0xff]  }
 0x643   : > { %17084 = vmatprep.subr.bf16.mxu1 %v24666_v54  ;;  %v19219_v54 = vld [vmem:[%s25502_s7] sm:$0xff]  }
 0x646   : > { %17085 = vmatpush3.bf16.msra.mxu1 %v24606_v18  ;;  %v19209_v18 = vld [vmem:[%s25501_s6 + $0xbc] ss:$8 sps:$4 sm:$0xff]  }
 0x647   : > { %17086 = vmatprep.subr.bf16.mxu1 %v24647_v15  ;;  %v19214_v15 = vld [vmem:[%s25501_s6 + $0xc8] ss:$8 sps:$4 sm:$0xff]  }
 0x649   : > { %11385 = vmatmul.mubr.bf16.gmra.mxu1 %v15971_v6 }
 0x64a   : > { %17087 = vmatpush3.bf16.msra.mxu1 %v24588_v42  ;;  %16011 = vmatprep.mubr.msk.bf16.mxu1 %vm11195_vm13, %v19208_v62  ;;  %v19211_v42 = vld [vmem:[%s25501_s6 + $0xb8] ss:$8 sps:$4 sm:$0xff]  }
 0x64b   : > { %17088 = vmatprep.subr.bf16.mxu1 %v24651_v26 }
 0x64e   : > { %17089 = vmatpush3.bf16.msra.mxu1 %v24593_v56  ;;  %v16002_v56 = vld [vmem:[%s25501_s6 + $0xd8] sm:$0x11] }
 0x64f   : > { %18471 = vmatprep.subr.bf16.mxu1 %v26559_v35  ;;  %v16010_v26 = vcombine.high %v16002_v56, %v16002_v56  ;;  %v16009_v45 = vcombine.low %v16002_v56, %v16002_v56 }
 0x651   : > { %11609 = vmatmul.mubr.bf16.vlgmr.msra.gmra.mxu1 %v19206_v32 }
 0x652   : > { %16012 = vmatprep.mubr.msk.bf16.mxu1 %vm11195_vm13, %v19209_v18  ;;  %18472 = vmatpush3.bf16.msra.mxu1 %v19217_v29 }
 0x653   : > { %18473 = vmatprep.subr.bf16.mxu1 %v26559_v35 }
 0x656   : > { %18474 = vmatpush3.bf16.msra.mxu1 %v19219_v54 }
 0x657   : > { %18487 = vmatprep.subr.bf16.mxu1 %v26559_v35 }
 0x659   : > { %11617 = vmatmul.mubr.bf16.gmra.mxu1 %v19211_v42 }
 0x65a   : > { %16013 = vmatprep.mubr.msk.bf16.mxu1 %vm11195_vm13, %v19212_v13 }
 0x661   : > { %11625 = vmatmul.mubr.bf16.gmra.mxu1 %v19214_v15 }
 0x662   : > { %16014 = vmatprep.mubr.msk.bf16.mxu1 %vm11195_vm13, %v16010_v26 }
 0x669   : > { %11633 = vmatmul.mubr.bf16.gmra.mxu1 %v16009_v45 }
 0x66a   : > { %18475 = vmatprep.mubr.msk.bf16.mxu1 %vm19461_vm2, %v26559_v35 }
 0x6d1   : > { %v16970_v19 = vpop.f32.mrf.mxu1  ;;  %v17050_v17 = vpop.f32.mrf.mxu0 }
 0x6d3   : > { %v16971_v11 = vpop.f32.mrf.mxu1  ;;  %v17051_v10 = vpop.f32.mrf.mxu0 }
 0x6d4   : > { %v16972_v23 = vadd.f32 %v16971_v11, %v16970_v19  ;;  %v17052_v32 = vadd.f32 %v17051_v10, %v17050_v17 }
 0x6d5   : > { %v16973_v49 = vpop.f32.mrf.mxu1  ;;  %v17053_v52 = vpop.f32.mrf.mxu0 }
 0x6d7   : > { %v16974_v30 = vpop.f32.mrf.mxu1  ;;  %v17054_v53 = vpop.f32.mrf.mxu0 }
 0x6d8   : > { %v16975_v13 = vadd.f32 %v16974_v30, %v16973_v49  ;;  %v17055_v29 = vadd.f32 %v17054_v53, %v17053_v52 }
 0x6d9   : > { %v16976_v36 = vpop.f32.mrf.mxu1  ;;  %v17056_v16 = vpop.f32.mrf.mxu0 }
 0x6db   : > { %v16977_v50 = vpop.f32.mrf.mxu1  ;;  %v17057_v61 = vpop.f32.mrf.mxu0 }
 0x6dc   : > { %v16978_v54 = vadd.f32 %v16977_v50, %v16976_v36 }
 0x6dd   : > { %v16979_v28 = vpop.f32.mrf.mxu1  ;;  %v24867_v1 = vpop.f32.mrf.mxu0 }
 0x6df   : > { %v16980_v9 = vpop.f32.mrf.mxu1  ;;  %v24869_v34 = vpop.f32.mrf.mxu0 }
 0x6e1   : > { %v24871_v60 = vpop.f32.mrf.mxu1  ;;  %v24873_v8 = vpop.f32.mrf.mxu0 }
 0x6e3   : > { %v24875_v0 = vpop.f32.mrf.mxu1  ;;  %v24877_v51 = vpop.f32.mrf.mxu0 }
 0x6e5   : > { %v24879_v2 = vpop.f32.mrf.mxu1  ;;  %v24881_v24 = vpop.f32.mrf.mxu0 }
 0x6e7   : > { %v24883_v33 = vpop.f32.mrf.mxu1  ;;  %v24885_v3 = vpop.f32.mrf.mxu0 }
 0x6e9   : > { %v24887_v47 = vpop.f32.mrf.mxu1  ;;  %v24889_v44 = vpop.f32.mrf.mxu0 }
 0x6eb   : > { %v24891_v27 = vpop.f32.mrf.mxu1  ;;  %v24893_v22 = vpop.f32.mrf.mxu0 }
 0x6ed   : > { %v16991_v14 = vpop.f32.mrf.mxu1  ;;  %v17071_v40 = vpop.f32.mrf.mxu0 }
 0x6ee   : > { %v17058_v40 = vadd.f32 %v17057_v61, %v17056_v16 }
 0x6ef   : > { %v16992_v4 = vpop.f32.mrf.mxu1  ;;  %v17072_v38 = vpop.f32.mrf.mxu0 }
 0x6f0   : > { %v16981_v38 = vadd.f32 %v16980_v9, %v16979_v28 }
 0x6f1   : > { %v17010_v37 = vpop.f32.mrf.mxu1 }
 0x6f3   : > { %v17011_v59 = vpop.f32.mrf.mxu1 }
 0x6f4   : > { %v17012_v20 = vadd.f32 %v17011_v59, %v17010_v37  ;;  %v17061_v59 = vadd.f32 %v24869_v34, %v24867_v1 }
 0x6f5   : > { %v17013_v58 = vpop.f32.mrf.mxu1 }
 0x6f6   : > { %v11392_v62 = vmax.f32 %v16972_v23, %v17012_v20  ;;  %v17064_v20 = vadd.f32 %v24877_v51, %v24873_v8 }
 0x6f7   : > { %v17014_v21 = vpop.f32.mrf.mxu1 }
 0x6f8   : > { %v17015_v18 = vadd.f32 %v17014_v21, %v17013_v58  ;;  %v11516_v26 = vmax.f32 %v11392_v62, %v17052_v32 }
 0x6f9   : > { %v17016_v57 = vpop.f32.mrf.mxu1 }
 0x6fa   : > { %v11393_v45 = vmax.f32 %v16975_v13, %v17015_v18  ;;  %v17067_v18 = vadd.f32 %v24885_v3, %v24881_v24  ;;  %v16990_v13 = vadd.f32 %v24891_v27, %v24887_v47  ;;  %v19223_v47 = vld [vmem:[%s25502_s7 + $0x28] sm:$0xff]   ;;  %v19224_v27 = vld [vmem:[%s25502_s7 + $0x30] sm:$0xff]  }
 0x6fb   : > { %v17017_v31 = vpop.f32.mrf.mxu1 }
 0x6fc   : > { %v17018_v56 = vadd.f32 %v17017_v31, %v17016_v57  ;;  %v11517_v4 = vmax.f32 %v11393_v45, %v17055_v29  ;;  %v17070_v29 = vadd.f32 %v24893_v22, %v24889_v44 }
 0x6fd   : > { %v17019_v25 = vpop.f32.mrf.mxu1 }
 0x6fe   : > { %v11394_v11 = vmax.f32 %v16978_v54, %v17018_v56 }
 0x6ff   : > { %v17020_v7 = vpop.f32.mrf.mxu1 }
 0x700   : > { %v17021_v17 = vadd.f32 %v17020_v7, %v17019_v25  ;;  %v11518_v36 = vmax.f32 %v11394_v11, %v17058_v40  ;;  %v16984_v25 = vadd.f32 %v24875_v0, %v24871_v60 }
 0x701   : > { %v17022_v63 = vpop.f32.mrf.mxu1 }
 0x702   : > { %v11395_v50 = vmax.f32 %v16981_v38, %v17021_v17 }
 0x703   : > { %v17023_v46 = vpop.f32.mrf.mxu1 }
 0x704   : > { %v17024_v21 = vadd.f32 %v17023_v46, %v17022_v63  ;;  %v11519_v7 = vmax.f32 %v11395_v50, %v17061_v59 }
 0x705   : > { %v17025_v41 = vpop.f32.mrf.mxu1 }
 0x707   : > { %v17026_v5 = vpop.f32.mrf.mxu1 }
 0x708   : > { %v17027_v1 = vadd.f32 %v17026_v5, %v17025_v41  ;;  %v19222_v41 = vld [vmem:[%s25502_s7 + $0x38] sm:$0xff]  }
 0x709   : > { %v17028_v39 = vpop.f32.mrf.mxu1 }
 0x70b   : > { %v17029_v55 = vpop.f32.mrf.mxu1 }
 0x70c   : > { %v17030_v8 = vadd.f32 %v17029_v55, %v17028_v39 }
 0x70d   : > { %v17031_v43 = vpop.f32.mrf.mxu1 }
 0x70e   : > { %v11396_v43 = vmax.f32 %v16984_v25, %v17024_v21  ;;  %v11398_v45 = vmax.f32 %v16990_v13, %v17030_v8  ;;  %v19228_v21 = vld [vmem:[%s25502_s7 + $0x48] sm:$0xff]  }
 0x70f   : > { %v17032_v6 = vpop.f32.mrf.mxu1  ;;  %v19238_v8 = vld [vmem:[%s25502_s7 + $0x88] sm:$0xff]  }
 0x710   : > { %v16987_v6 = vadd.f32 %v24883_v33, %v24879_v2  ;;  %v11520_v5 = vmax.f32 %v11396_v43, %v17064_v20  ;;  %v19232_v20 = vld [vmem:[%s25502_s7 + $0x78] sm:$0xff]  }
 0x711   : > { %v17090_v42 = vpop.f32.mrf.mxu1 }
 0x712   : > { %v11397_v32 = vmax.f32 %v16987_v6, %v17027_v1 }
 0x713   : > { %v17091_v15 = vpop.f32.mrf.mxu1 }
 0x714   : > { %v17092_v48 = vadd.f32 %v17091_v15, %v17090_v42 }
 0x715   : > { %v17093_v14 = vpop.f32.mrf.mxu1 }
 0x716   : > { %v11640_v19 = vmax.f32 %v11516_v26, %v17092_v48  ;;  %v11521_v26 = vmax.f32 %v11397_v32, %v17067_v18 }
 0x717   : > { %v17094_v10 = vpop.f32.mrf.mxu1 }
 0x718   : > { %v11654_v49 = vadd.f32 %v24898_v12, %v11640_v19  ;;  %v17095_v30 = vadd.f32 %v17094_v10, %v17093_v14  ;;  %v11522_v10 = vmax.f32 %v11398_v45, %v17070_v29  ;;  %v19248_v45 = vld [vmem:[%s25502_s7 + $0xc8] sm:$0xff]   ;;  %v19249_v29 = vld [vmem:[%s25502_s7 + $0xd0] sm:$0xff]  }
 0x719   : > { %v17096_v37 = vpop.f32.mrf.mxu1 }
 0x71a   : > { %v11661_v52 = vmax.f32 %v11654_v49, 0.0  ;;  %v11641_v53 = vmax.f32 %v11517_v4, %v17095_v30  ;;  %v19226_v49 = vld [vmem:[%s25502_s7 + $0x20] sm:$0xff]   ;;  %v19227_v30 = vld [vmem:[%s25502_s7 + $0x58] sm:$0xff]  }
 0x71b   : > { %v17097_v58 = vpop.f32.mrf.mxu1 }
 0x71c   : > { %v16430_v57 = vpack.c.bf16 %v11661_v52, %v11661_v52  ;;  %v11655_v16 = vadd.f32 %v24898_v12, %v11641_v53  ;;  %v17098_v61 = vadd.f32 %v17097_v58, %v17096_v37 }
 0x71d   : > { %v17099_v31 = vpop.f32.mrf.mxu1 }
 0x71e   : > { %11698 = vst.msk [vmem:[#allocation3] sm:$0xf] %vm11697_vm14, %v16430_v57  ;;  %v11662_v28 = vmax.f32 %v11655_v16, 0.0  ;;  %v11642_v9 = vmax.f32 %v11518_v36, %v17098_v61  ;;  %v19229_v57 = vld [vmem:[%s25502_s7 + $0x50] sm:$0xff]  }
 0x71f   : > { %v17100_v34 = vpop.f32.mrf.mxu1 }
 0x720   : > { %v16431_v63 = vpack.c.bf16 %v11662_v28, %v11662_v28  ;;  %v11656_v46 = vadd.f32 %v24898_v12, %v11642_v9  ;;  %v17101_v23 = vadd.f32 %v17100_v34, %v17099_v31 }
 0x721   : > { %v17102_v62 = vpop.f32.mrf.mxu1 }
 0x722   : > { %11699 = vst.msk [vmem:[#allocation3 + $0x4] sm:$0xf] %vm11697_vm14, %v16431_v63  ;;  %v11663_v60 = vmax.f32 %v11656_v46, 0.0  ;;  %v11643_v0 = vmax.f32 %v11519_v7, %v17101_v23  ;;  %v11707_v7 = vld [vmem:[#allocation3 + $0x18] sm:$0x1]  ;;  %v19233_v46 = vld [vmem:[%s25502_s7 + $0x68] sm:$0xff]  }
 0x723   : > { %v17103_v51 = vpop.f32.mrf.mxu1  ;;  %v19234_v23 = vld [vmem:[%s25502_s7 + $0x70] sm:$0xff]  }
 0x724   : > { %v16432_v42 = vpack.c.bf16 %v11663_v60, %v11663_v60  ;;  %v11657_v2 = vadd.f32 %v24898_v12, %v11643_v0  ;;  %v17104_v33 = vadd.f32 %v17103_v51, %v17102_v62  ;;  %v19236_v60 = vld [vmem:[%s25502_s7 + $0x60] sm:$0xff]   ;;  %v19237_v0 = vld [vmem:[%s25502_s7 + $0x98] sm:$0xff]   ;;  %v19239_v51 = vld [vmem:[%s25502_s7 + $0x90] sm:$0xff]  }
 0x725   : > { %v17105_v56 = vpop.f32.mrf.mxu1  ;;  %v11710_v15 = vld [vmem:[#allocation3] sm:$0x1] }
 0x726   : > { %11700 = vst.msk [vmem:[#allocation3 + $0x8] sm:$0xf] %vm11697_vm14, %v16432_v42  ;;  %v11664_v24 = vmax.f32 %v11657_v2, 0.0  ;;  %v11644_v3 = vmax.f32 %v11520_v5, %v17104_v33  ;;  %v16027_v39 = vcombine.low %v11710_v15, %v11710_v15  ;;  %18476 = vmatmul.mubr.msk.bf16.vlgmr.msra.gmra.mxu1 %vm11738_vm15, %v11710_v15  ;;  %v19225_v55 = vld [vmem:[#allocation3] ss:$0 sps:$4 sm:$0x22]  }
 0x727   : > { %v17106_v48 = vpop.f32.mrf.mxu1  ;;  %18488 = vmatpush3.bf16.msra.mxu1 %v19222_v41  ;;  %18491 = vmatprep.mubr.msk.bf16.mxu1 %vm19461_vm2, %v26559_v35  ;;  %v11909_v22 = vshrl.u32 %v19225_v55, 16  ;;  %v19230_v36 = vld [vmem:[#allocation3] ss:$0 sps:$4 sm:$0x44]   ;;  %v11846_v25 = vrot.slane %v19225_v55, 1  ;;  %v19242_v2 = vld [vmem:[%s25502_s7 + $0xb8] sm:$0xff]  }
 0x728   : > { %v16433_v54 = vpack.c.bf16 %v11664_v24, %v11664_v24  ;;  %v11658_v14 = vadd.f32 %v24898_v12, %v11644_v3  ;;  %v11724_v19 = vshrl.u32 %v16027_v39, 16  ;;  %v17107_v11 = vadd.f32 %v17106_v48, %v17105_v56  ;;  %18489 = vmatprep.subr.bf16.mxu1 %v26559_v35  ;;  %v19235_v43 = vld [vmem:[#allocation3] ss:$0 sps:$4 sm:$0x88]   ;;  %v19243_v56 = vld [vmem:[%s25502_s7 + $0xa8] sm:$0xff]   ;;  %v19244_v15 = vld [vmem:[%s25502_s7 + $0xb0] sm:$0xff]  }
 0x729   : > { %v17108_v44 = vpop.f32.mrf.mxu1  ;;  %v11911_v53 = vrot.slane %v11909_v22, 1  ;;  %v12040_v28 = vshrl.u32 %v19230_v36, 16  ;;  %v11977_v6 = vrot.slane %v19230_v36, 2  ;;  %v12171_v62 = vshrl.u32 %v19235_v43, 16  ;;  %v12230_v18 = vld [vmem:[#allocation3 + $0x4] sm:$0x1] }
 0x72a   : > { %11701 = vst.msk [vmem:[#allocation3 + $0xc] sm:$0xf] %vm11697_vm14, %v16433_v54  ;;  %v11665_v40 = vmax.f32 %v11658_v14, 0.0  ;;  %v11645_v17 = vmax.f32 %v11521_v26, %v17107_v11  ;;  %18468 = vmatmul.mubr.msk.bf16.vlgmr.msra.gmra.mxu0 %vm11738_vm15, %v11724_v19  ;;  %v12108_v41 = vrot.slane %v19235_v43, 3  ;;  %v16090_v5 = vcombine.low %v12230_v18, %v12230_v18  ;;  %v19241_v42 = vld [vmem:[%s25502_s7 + $0x80] sm:$0xff]   ;;  %v19247_v39 = vld [vmem:[%s25502_s7 + $0xd8] sm:$0xff]  }
 0x72b   : > { %v17109_v4 = vpop.f32.mrf.mxu1  ;;  %18480 = vmatpush3.bf16.msra.mxu0 %v19223_v47  ;;  %18490 = vmatpush3.bf16.msra.mxu1 %v19224_v27  ;;  %v12042_v34 = vrot.slane %v12040_v28, 2  ;;  %v12173_v32 = vrot.slane %v12171_v62, 3  ;;  %v19245_v13 = vld [vmem:[#allocation3 + $0x4] ss:$0 sps:$4 sm:$0x22]   ;;  %v19246_v3 = vld [vmem:[%s25502_s7 + $0xa0] sm:$0xff]  }
 0x72c   : > { %v16434_v38 = vpack.c.bf16 %v11665_v40, %v11665_v40  ;;  %v11659_v37 = vadd.f32 %v24898_v12, %v11645_v17  ;;  %v17110_v52 = vadd.f32 %v17109_v4, %v17108_v44  ;;  %18481 = vmatprep.subr.bf16.mxu0 %v26559_v35  ;;  %18503 = vmatprep.subr.bf16.mxu1 %v26559_v35  ;;  %v12301_v33 = vshrl.u32 %v16090_v5, 16  ;;  %v19250_v26 = vld [vmem:[#allocation3 + $0x4] ss:$0 sps:$4 sm:$0x44]   ;;  %v19251_v27 = vld [vmem:[%s25502_s7 + $0xc0] sm:$0xff]   ;;  %v19252_v54 = vld [vmem:[%s25502_s7 + $0xf8] sm:$0xff]  }
 0x72d   : > { %18483 = vmatprep.mubr.msk.bf16.mxu0 %vm19461_vm2, %v26559_v35  ;;  %v17111_v50 = vpop.f32.mrf.mxu1  ;;  %v12431_v24 = vshrl.u32 %v19245_v13, 16  ;;  %v12368_v48 = vrot.slane %v19245_v13, 1  ;;  %v12562_v47 = vshrl.u32 %v19250_v26, 16  ;;  %v19255_v19 = vld [vmem:[#allocation3 + $0x4] ss:$0 sps:$4 sm:$0x88]  }
 0x72e   : > { %11702 = vst.msk [vmem:[#allocation3 + $0x10] sm:$0xf] %vm11697_vm14, %v16434_v38  ;;  %v11666_v59 = vmax.f32 %v11659_v37, 0.0  ;;  %v11646_v58 = vmax.f32 %v11522_v10, %v17110_v52  ;;  %18492 = vmatmul.mubr.msk.bf16.vlgmr.msra.gmra.mxu1 %vm11738_vm15, %v11911_v53  ;;  %v19253_v11 = vld [vmem:[%s25502_s7 + $0xe8] sm:$0xff]   ;;  %v19254_v44 = vld [vmem:[%s25502_s7 + $0xf0] sm:$0xff]   ;;  %v12499_v22 = vrot.slane %v19250_v26, 2 }
 0x72f   : > { %18482 = vmatpush3.bf16.msra.mxu0 %v19226_v49  ;;  %18504 = vmatpush3.bf16.msra.mxu1 %v19227_v30  ;;  %v17112_v16 = vpop.f32.mrf.mxu1  ;;  %v12433_v55 = vrot.slane %v12431_v24, 1  ;;  %v12564_v14 = vrot.slane %v12562_v47, 2  ;;  %v12693_v40 = vshrl.u32 %v19255_v19, 16  ;;  %v19256_v17 = vld [vmem:[%s25502_s7 + $0xe0] sm:$0xff]   ;;  %v19257_v10 = vld [vmem:[%s25502_s7 + $0x118] sm:$0xff]   ;;  %v19258_v30 = vld [vmem:[%s25502_s7 + $0x108] sm:$0xff]  }
 0x730   : > { %v16435_v61 = vpack.c.bf16 %v11666_v59, %v11666_v59  ;;  %v11660_v31 = vadd.f32 %v24898_v12, %v11646_v58  ;;  %18495 = vmatprep.subr.bf16.mxu0 %v26559_v35  ;;  %18505 = vmatprep.subr.bf16.mxu1 %v26559_v35  ;;  %v19231_v12 = vld [vmem:[%s25502_s7 + $0x40] sm:$0xff]   ;;  %v12752_v49 = vld [vmem:[#allocation3 + $0x8] sm:$0x1]  ;;  %v19259_v38 = vld [vmem:[%s25502_s7 + $0x110] sm:$0xff]   ;;  %v12630_v37 = vrot.slane %v19255_v19, 3 }
 0x731   : > { %18507 = vmatprep.mubr.msk.bf16.mxu1 %vm19461_vm2, %v26559_v35  ;;  %v12695_v4 = vrot.slane %v12693_v40, 3  ;;  %v16150_v52 = vcombine.low %v12752_v49, %v12752_v49  ;;  %v19261_v53 = vld [vmem:[%s25502_s7 + $0x100] sm:$0xff]   ;;  %v19262_v36 = vld [vmem:[%s25502_s7 + $0x138] sm:$0xff]   ;;  %v19265_v59 = vld [vmem:[#allocation3 + $0x8] ss:$0 sps:$4 sm:$0x22]  }
 0x732   : > { %11703 = vst.msk [vmem:[#allocation3 + $0x14] sm:$0xf] %vm11697_vm14, %v16435_v61  ;;  %v11667_v9 = vmax.f32 %v11660_v31, 0.0  ;;  %18484 = vmatmul.mubr.msk.bf16.vlgmr.msra.gmra.mxu0 %vm11738_vm15, %v11846_v25  ;;  %v19263_v58 = vld [vmem:[%s25502_s7 + $0x128] sm:$0xff]   ;;  %v19266_v16 = vld [vmem:[%s25502_s7 + $0x120] sm:$0xff]   ;;  %v19267_v61 = vld [vmem:[%s25502_s7 + $0x158] sm:$0xff]  }
 0x733   : > { %18496 = vmatpush3.bf16.msra.mxu0 %v19228_v21  ;;  %18506 = vmatpush3.bf16.msra.mxu1 %v19229_v57  ;;  %v12823_v50 = vshrl.u32 %v16150_v52, 16  ;;  %v19264_v21 = vld [vmem:[%s25502_s7 + $0x130] sm:$0xff]   ;;  %v12953_v57 = vshrl.u32 %v19265_v59, 16  ;;  %v19270_v25 = vld [vmem:[#allocation3 + $0x8] ss:$0 sps:$4 sm:$0x44]  }
 0x734   : > { %v16436_v1 = vpack.c.bf16 %v11667_v9, %v11667_v9  ;;  %18497 = vmatprep.subr.bf16.mxu0 %v26559_v35  ;;  %18519 = vmatprep.subr.bf16.mxu1 %v26559_v35  ;;  %v19268_v28 = vld [vmem:[%s25502_s7 + $0x148] sm:$0xff]   ;;  %v19269_v9 = vld [vmem:[%s25502_s7 + $0x150] sm:$0xff]   ;;  %v19276_v62 = vld [vmem:[%s25502_s7 + $0x160] sm:$0xff]  }
 0x735   : > { %18499 = vmatprep.mubr.msk.bf16.mxu0 %vm19461_vm2, %v26559_v35  ;;  %v12955_v31 = vrot.slane %v12953_v57, 1  ;;  %v19275_v43 = vld [vmem:[#allocation3 + $0x8] ss:$0 sps:$4 sm:$0x88]   ;;  %v19281_v5 = vld [vmem:[%s25502_s7 + $0x180] sm:$0xff]  }
 0x736   : > { %v11708_v63 = vsel %vm11706_vm3, %v16436_v1, %v11707_v7  ;;  %18508 = vmatmul.mubr.msk.bf16.vlgmr.msra.gmra.mxu1 %vm11738_vm15, %v12042_v34  ;;  %v12890_v7 = vrot.slane %v19265_v59, 1  ;;  %v19272_v1 = vld [vmem:[%s25502_s7 + $0x178] sm:$0xff]   ;;  %v19283_v13 = vld [vmem:[%s25502_s7 + $0x1a8] sm:$0xff]   ;;  %v19286_v24 = vld [vmem:[%s25502_s7 + $0x1a0] sm:$0xff]  }
 0x737   : > { %11709 = vst [vmem:[#allocation3 + $0x18] sm:$0x1] %v11708_v63  ;;  %18498 = vmatpush3.bf16.msra.mxu0 %v19231_v12  ;;  %18520 = vmatpush3.bf16.msra.mxu1 %v19232_v20  ;;  %v13084_v12 = vshrl.u32 %v19270_v25, 16  ;;  %v19271_v20 = vld [vmem:[%s25502_s7 + $0x140] sm:$0xff]   ;;  %v19273_v63 = vld [vmem:[%s25502_s7 + $0x168] sm:$0xff]  }
 0x738   : > { %18511 = vmatprep.subr.bf16.mxu0 %v26559_v35  ;;  %18521 = vmatprep.subr.bf16.mxu1 %v26559_v35  ;;  %v19288_v26 = vld [vmem:[%s25502_s7 + $0x1c8] sm:$0xff]   ;;  %v19291_v47 = vld [vmem:[%s25502_s7 + $0x1c0] sm:$0xff]  }
 0x739   : > { %18523 = vmatprep.mubr.msk.bf16.mxu1 %vm19461_vm2, %v26559_v35  ;;  %v13086_v34 = vrot.slane %v13084_v12, 2  ;;  %v19293_v19 = vld [vmem:[%s25502_s7 + $0x1e8] sm:$0xff]   ;;  %v19296_v40 = vld [vmem:[%s25502_s7 + $0x1e0] sm:$0xff]  }
 0x73a   : > { %18500 = vmatmul.mubr.msk.bf16.vlgmr.msra.gmra.mxu0 %vm11738_vm15, %v11977_v6  ;;  %v13215_v6 = vshrl.u32 %v19275_v43, 16  ;;  %v19301_v52 = vld [vmem:[%s25502_s7 + $0x200] sm:$0xff]   ;;  %v19303_v59 = vld [vmem:[%s25502_s7 + $0x228] sm:$0xff]  }
 0x73b   : > { %18512 = vmatpush3.bf16.msra.mxu0 %v19233_v46  ;;  %18522 = vmatpush3.bf16.msra.mxu1 %v19234_v23  ;;  %v19274_v46 = vld [vmem:[%s25502_s7 + $0x170] sm:$0xff]   ;;  %v13021_v23 = vrot.slane %v19270_v25, 2  ;;  %v19306_v57 = vld [vmem:[%s25502_s7 + $0x220] sm:$0xff]   ;;  %v19308_v25 = vld [vmem:[%s25502_s7 + $0x248] sm:$0xff]  }
 0x73c   : > { %18513 = vmatprep.subr.bf16.mxu0 %v26559_v35  ;;  %18535 = vmatprep.subr.bf16.mxu1 %v26559_v35  ;;  %v19311_v12 = vld [vmem:[%s25502_s7 + $0x240] sm:$0xff]  }
 0x73d   : > { %18515 = vmatprep.mubr.msk.bf16.mxu0 %vm19461_vm2, %v26559_v35 }
 0x73e   : > { %18524 = vmatmul.mubr.msk.bf16.vlgmr.msra.gmra.mxu1 %vm11738_vm15, %v12173_v32  ;;  %v13274_v32 = vld [vmem:[#allocation3 + $0xc] sm:$0x1] }
 0x73f   : > { %18514 = vmatpush3.bf16.msra.mxu0 %v19236_v60  ;;  %18536 = vmatpush3.bf16.msra.mxu1 %v19237_v0  ;;  %v19277_v60 = vld [vmem:[%s25502_s7 + $0x198] sm:$0xff]   ;;  %v13217_v0 = vrot.slane %v13215_v6, 3  ;;  %v19316_v6 = vld [vmem:[%s25502_s7 + $0x260] sm:$0xff]  }
 0x740   : > { %18527 = vmatprep.subr.bf16.mxu0 %v26559_v35  ;;  %18537 = vmatprep.subr.bf16.mxu1 %v26559_v35 }
 0x741   : > { %18539 = vmatprep.mubr.msk.bf16.mxu1 %vm19461_vm2, %v26559_v35 }
 0x742   : > { %18516 = vmatmul.mubr.msk.bf16.vlgmr.msra.gmra.mxu0 %vm11738_vm15, %v12108_v41  ;;  %v16210_v41 = vcombine.low %v13274_v32, %v13274_v32 }
 0x743   : > { %18528 = vmatpush3.bf16.msra.mxu0 %v19238_v8  ;;  %18538 = vmatpush3.bf16.msra.mxu1 %v19239_v51  ;;  %v19279_v8 = vld [vmem:[%s25502_s7 + $0x190] sm:$0xff]   ;;  %v13152_v51 = vrot.slane %v19275_v43, 3  ;;  %v19313_v43 = vld [vmem:[%s25502_s7 + $0x268] sm:$0xff]  }
 0x744   : > { %18529 = vmatprep.subr.bf16.mxu0 %v26559_v35  ;;  %18551 = vmatprep.subr.bf16.mxu1 %v26559_v35 }
 0x745   : > { %18531 = vmatprep.mubr.msk.bf16.mxu0 %vm19461_vm2, %v26559_v35 }
 0x746   : > { %18540 = vmatmul.mubr.msk.bf16.vlgmr.msra.gmra.mxu1 %vm11738_vm15, %v12301_v33  ;;  %v19285_v33 = vld [vmem:[#allocation3 + $0xc] ss:$0 sps:$4 sm:$0x22]  }
 0x747   : > { %18530 = vmatpush3.bf16.msra.mxu0 %v19241_v42  ;;  %18552 = vmatpush3.bf16.msra.mxu1 %v19242_v2  ;;  %v19282_v42 = vld [vmem:[%s25502_s7 + $0x1b8] sm:$0xff]   ;;  %v13345_v2 = vshrl.u32 %v16210_v41, 16  ;;  %v19321_v41 = vld [vmem:[%s25502_s7 + $0x280] sm:$0xff]  }
 0x748   : > { %18543 = vmatprep.subr.bf16.mxu0 %v26559_v35  ;;  %18553 = vmatprep.subr.bf16.mxu1 %v26559_v35 }
 0x749   : > { %18555 = vmatprep.mubr.msk.bf16.mxu1 %vm19461_vm2, %v26559_v35 }
 0x74a   : > { %18532 = vmatmul.mubr.msk.bf16.vlgmr.msra.gmra.mxu0 %vm11738_vm15, %v12230_v18  ;;  %v19278_v18 = vld [vmem:[%s25502_s7 + $0x188] sm:$0xff]  }
 0x74b   : > { %18544 = vmatpush3.bf16.msra.mxu0 %v19243_v56  ;;  %18554 = vmatpush3.bf16.msra.mxu1 %v19244_v15  ;;  %v19284_v56 = vld [vmem:[%s25502_s7 + $0x1b0] sm:$0xff]   ;;  %v13475_v15 = vshrl.u32 %v19285_v33, 16 }
 0x74c   : > { %18545 = vmatprep.subr.bf16.mxu0 %v26559_v35  ;;  %18567 = vmatprep.subr.bf16.mxu1 %v26559_v35 }
 0x74d   : > { %18547 = vmatprep.mubr.msk.bf16.mxu0 %vm19461_vm2, %v26559_v35 }
 0x74e   : > { %18556 = vmatmul.mubr.msk.bf16.vlgmr.msra.gmra.mxu1 %vm11738_vm15, %v12433_v55  ;;  %v19290_v55 = vld [vmem:[#allocation3 + $0xc] ss:$0 sps:$4 sm:$0x44]  }
 0x74f   : > { %18546 = vmatpush3.bf16.msra.mxu0 %v19246_v3  ;;  %18568 = vmatpush3.bf16.msra.mxu1 %v19247_v39  ;;  %v19287_v3 = vld [vmem:[%s25502_s7 + $0x1d8] sm:$0xff]   ;;  %v13477_v39 = vrot.slane %v13475_v15, 1  ;;  %v19326_v15 = vld [vmem:[%s25502_s7 + $0x2a0] sm:$0xff]  }
 0x750   : > { %18559 = vmatprep.subr.bf16.mxu0 %v26559_v35  ;;  %18569 = vmatprep.subr.bf16.mxu1 %v26559_v35 }
 0x751   : > { %18571 = vmatprep.mubr.msk.bf16.mxu1 %vm19461_vm2, %v26559_v35 }
 0x752   : > { %18548 = vmatmul.mubr.msk.bf16.vlgmr.msra.gmra.mxu0 %vm11738_vm15, %v12368_v48  ;;  %v13606_v48 = vshrl.u32 %v19290_v55, 16 }
 0x753   : > { %18560 = vmatpush3.bf16.msra.mxu0 %v19248_v45  ;;  %18570 = vmatpush3.bf16.msra.mxu1 %v19249_v29  ;;  %v19289_v45 = vld [vmem:[%s25502_s7 + $0x1d0] sm:$0xff]   ;;  %v13412_v29 = vrot.slane %v19285_v33, 1  ;;  %v19323_v33 = vld [vmem:[%s25502_s7 + $0x2a8] sm:$0xff]  }
 0x754   : > { %18561 = vmatprep.subr.bf16.mxu0 %v26559_v35  ;;  %18583 = vmatprep.subr.bf16.mxu1 %v26559_v35 }
 0x755   : > { %18563 = vmatprep.mubr.msk.bf16.mxu0 %vm19461_vm2, %v26559_v35 }
 0x756   : > { %18572 = vmatmul.mubr.msk.bf16.vlgmr.msra.gmra.mxu1 %vm11738_vm15, %v12564_v14  ;;  %v19295_v14 = vld [vmem:[#allocation3 + $0xc] ss:$0 sps:$4 sm:$0x88]  }
 0x757   : > { %18562 = vmatpush3.bf16.msra.mxu0 %v19251_v27  ;;  %18584 = vmatpush3.bf16.msra.mxu1 %v19252_v54  ;;  %v19292_v27 = vld [vmem:[%s25502_s7 + $0x1f8] sm:$0xff]   ;;  %v13608_v54 = vrot.slane %v13606_v48, 2  ;;  %v19331_v48 = vld [vmem:[%s25502_s7 + $0x2c0] sm:$0xff]  }
 0x758   : > { %18575 = vmatprep.subr.bf16.mxu0 %v26559_v35  ;;  %18585 = vmatprep.subr.bf16.mxu1 %v26559_v35 }
 0x759   : > { %18587 = vmatprep.mubr.msk.bf16.mxu1 %vm19461_vm2, %v26559_v35 }
 0x75a   : > { %18564 = vmatmul.mubr.msk.bf16.vlgmr.msra.gmra.mxu0 %vm11738_vm15, %v12499_v22  ;;  %v13737_v22 = vshrl.u32 %v19295_v14, 16 }
 0x75b   : > { %18576 = vmatpush3.bf16.msra.mxu0 %v19253_v11  ;;  %18586 = vmatpush3.bf16.msra.mxu1 %v19254_v44  ;;  %v19294_v11 = vld [vmem:[%s25502_s7 + $0x1f0] sm:$0xff]   ;;  %v13543_v44 = vrot.slane %v19290_v55, 2  ;;  %v19328_v55 = vld [vmem:[%s25502_s7 + $0x2c8] sm:$0xff]  }
 0x75c   : > { %18577 = vmatprep.subr.bf16.mxu0 %v26559_v35  ;;  %18599 = vmatprep.subr.bf16.mxu1 %v26559_v35 }
 0x75d   : > { %18579 = vmatprep.mubr.msk.bf16.mxu0 %vm19461_vm2, %v26559_v35 }
 0x75e   : > { %18588 = vmatmul.mubr.msk.bf16.vlgmr.msra.gmra.mxu1 %vm11738_vm15, %v12695_v4  ;;  %v13796_v4 = vld [vmem:[#allocation3 + $0x10] sm:$0x1] }
 0x75f   : > { %18578 = vmatpush3.bf16.msra.mxu0 %v19256_v17  ;;  %18600 = vmatpush3.bf16.msra.mxu1 %v19257_v10  ;;  %v19297_v17 = vld [vmem:[%s25502_s7 + $0x218] sm:$0xff]   ;;  %v13739_v10 = vrot.slane %v13737_v22, 3  ;;  %v19336_v22 = vld [vmem:[%s25502_s7 + $0x2e0] sm:$0xff]  }
 0x760   : > { %18591 = vmatprep.subr.bf16.mxu0 %v26559_v35  ;;  %18601 = vmatprep.subr.bf16.mxu1 %v26559_v35 }
 0x761   : > { %18603 = vmatprep.mubr.msk.bf16.mxu1 %vm19461_vm2, %v26559_v35 }
 0x762   : > { %18580 = vmatmul.mubr.msk.bf16.vlgmr.msra.gmra.mxu0 %vm11738_vm15, %v12630_v37  ;;  %v16270_v37 = vcombine.low %v13796_v4, %v13796_v4 }
 0x763   : > { %18592 = vmatpush3.bf16.msra.mxu0 %v19258_v30  ;;  %18602 = vmatpush3.bf16.msra.mxu1 %v19259_v38  ;;  %v19299_v30 = vld [vmem:[%s25502_s7 + $0x210] sm:$0xff]   ;;  %v13674_v38 = vrot.slane %v19295_v14, 3  ;;  %v19333_v14 = vld [vmem:[%s25502_s7 + $0x2e8] sm:$0xff]  }
 0x764   : > { %18593 = vmatprep.subr.bf16.mxu0 %v26559_v35  ;;  %18615 = vmatprep.subr.bf16.mxu1 %v26559_v35 }
 0x765   : > { %18595 = vmatprep.mubr.msk.bf16.mxu0 %vm19461_vm2, %v26559_v35 }
 0x766   : > { %18604 = vmatmul.mubr.msk.bf16.vlgmr.msra.gmra.mxu1 %vm11738_vm15, %v12823_v50  ;;  %v19305_v50 = vld [vmem:[#allocation3 + $0x10] ss:$0 sps:$4 sm:$0x22]  }
 0x767   : > { %18594 = vmatpush3.bf16.msra.mxu0 %v19261_v53  ;;  %18616 = vmatpush3.bf16.msra.mxu1 %v19262_v36  ;;  %v19302_v53 = vld [vmem:[%s25502_s7 + $0x238] sm:$0xff]   ;;  %v13867_v36 = vshrl.u32 %v16270_v37, 16 }
 0x768   : > { %18607 = vmatprep.subr.bf16.mxu0 %v26559_v35  ;;  %18617 = vmatprep.subr.bf16.mxu1 %v26559_v35 }
 0x769   : > { %18619 = vmatprep.mubr.msk.bf16.mxu1 %vm19461_vm2, %v26559_v35 }
 0x76a   : > { %18596 = vmatmul.mubr.msk.bf16.vlgmr.msra.gmra.mxu0 %vm11738_vm15, %v12752_v49  ;;  %v19298_v49 = vld [vmem:[%s25502_s7 + $0x208] sm:$0xff]  }
 0x76b   : > { %18608 = vmatpush3.bf16.msra.mxu0 %v19263_v58  ;;  %18618 = vmatpush3.bf16.msra.mxu1 %v19264_v21  ;;  %v19304_v58 = vld [vmem:[%s25502_s7 + $0x230] sm:$0xff]   ;;  %v13997_v21 = vshrl.u32 %v19305_v50, 16 }
 0x76c   : > { %18609 = vmatprep.subr.bf16.mxu0 %v26559_v35  ;;  %18631 = vmatprep.subr.bf16.mxu1 %v26559_v35 }
 0x76d   : > { %18611 = vmatprep.mubr.msk.bf16.mxu0 %vm19461_vm2, %v26559_v35 }
 0x76e   : > { %18620 = vmatmul.mubr.msk.bf16.vlgmr.msra.gmra.mxu1 %vm11738_vm15, %v12955_v31  ;;  %v19310_v31 = vld [vmem:[#allocation3 + $0x10] ss:$0 sps:$4 sm:$0x44]  }
 0x76f   : > { %18610 = vmatpush3.bf16.msra.mxu0 %v19266_v16  ;;  %18632 = vmatpush3.bf16.msra.mxu1 %v19267_v61  ;;  %v19307_v16 = vld [vmem:[%s25502_s7 + $0x258] sm:$0xff]   ;;  %v13999_v61 = vrot.slane %v13997_v21, 1 }
 0x770   : > { %18623 = vmatprep.subr.bf16.mxu0 %v26559_v35  ;;  %18633 = vmatprep.subr.bf16.mxu1 %v26559_v35 }
 0x771   : > { %18635 = vmatprep.mubr.msk.bf16.mxu1 %vm19461_vm2, %v26559_v35 }
 0x772   : > { %18612 = vmatmul.mubr.msk.bf16.vlgmr.msra.gmra.mxu0 %vm11738_vm15, %v12890_v7  ;;  %v14128_v7 = vshrl.u32 %v19310_v31, 16 }
 0x773   : > { %18624 = vmatpush3.bf16.msra.mxu0 %v19268_v28  ;;  %18634 = vmatpush3.bf16.msra.mxu1 %v19269_v9  ;;  %v19309_v28 = vld [vmem:[%s25502_s7 + $0x250] sm:$0xff]   ;;  %v13934_v9 = vrot.slane %v19305_v50, 1 }
 0x774   : > { %18625 = vmatprep.subr.bf16.mxu0 %v26559_v35  ;;  %18647 = vmatprep.subr.bf16.mxu1 %v26559_v35 }
 0x775   : > { %18627 = vmatprep.mubr.msk.bf16.mxu0 %vm19461_vm2, %v26559_v35 }
 0x776   : > { %18636 = vmatmul.mubr.msk.bf16.vlgmr.msra.gmra.mxu1 %vm11738_vm15, %v13086_v34  ;;  %v19315_v34 = vld [vmem:[#allocation3 + $0x10] ss:$0 sps:$4 sm:$0x88]  }
 0x777   : > { %18626 = vmatpush3.bf16.msra.mxu0 %v19271_v20  ;;  %18648 = vmatpush3.bf16.msra.mxu1 %v19272_v1  ;;  %v19312_v20 = vld [vmem:[%s25502_s7 + $0x278] sm:$0xff]   ;;  %v14130_v1 = vrot.slane %v14128_v7, 2 }
 0x778   : > { %18639 = vmatprep.subr.bf16.mxu0 %v26559_v35  ;;  %18649 = vmatprep.subr.bf16.mxu1 %v26559_v35 }
 0x779   : > { %18651 = vmatprep.mubr.msk.bf16.mxu1 %vm19461_vm2, %v26559_v35 }
 0x77a   : > { %18628 = vmatmul.mubr.msk.bf16.vlgmr.msra.gmra.mxu0 %vm11738_vm15, %v13021_v23  ;;  %v14259_v23 = vshrl.u32 %v19315_v34, 16 }
 0x77b   : > { %18640 = vmatpush3.bf16.msra.mxu0 %v19273_v63  ;;  %18650 = vmatpush3.bf16.msra.mxu1 %v19274_v46  ;;  %v19314_v63 = vld [vmem:[%s25502_s7 + $0x270] sm:$0xff]   ;;  %v14065_v46 = vrot.slane %v19310_v31, 2 }
 0x77c   : > { %18641 = vmatprep.subr.bf16.mxu0 %v26559_v35  ;;  %18663 = vmatprep.subr.bf16.mxu1 %v26559_v35 }
 0x77d   : > { %18643 = vmatprep.mubr.msk.bf16.mxu0 %vm19461_vm2, %v26559_v35 }
 0x77e   : > { %18652 = vmatmul.mubr.msk.bf16.vlgmr.msra.gmra.mxu1 %vm11738_vm15, %v13217_v0  ;;  %v14318_v0 = vld [vmem:[#allocation3 + $0x14] sm:$0x1] }
 0x77f   : > { %18642 = vmatpush3.bf16.msra.mxu0 %v19276_v62  ;;  %18664 = vmatpush3.bf16.msra.mxu1 %v19277_v60  ;;  %v19317_v62 = vld [vmem:[%s25502_s7 + $0x298] sm:$0xff]   ;;  %v14261_v60 = vrot.slane %v14259_v23, 3 }
 0x780   : > { %18655 = vmatprep.subr.bf16.mxu0 %v26559_v35  ;;  %18665 = vmatprep.subr.bf16.mxu1 %v26559_v35 }
 0x781   : > { %18667 = vmatprep.mubr.msk.bf16.mxu1 %vm19461_vm2, %v26559_v35 }
 0x782   : > { %18644 = vmatmul.mubr.msk.bf16.vlgmr.msra.gmra.mxu0 %vm11738_vm15, %v13152_v51  ;;  %v16330_v51 = vcombine.low %v14318_v0, %v14318_v0 }
 0x783   : > { %18656 = vmatpush3.bf16.msra.mxu0 %v19278_v18  ;;  %18666 = vmatpush3.bf16.msra.mxu1 %v19279_v8  ;;  %v19319_v18 = vld [vmem:[%s25502_s7 + $0x290] sm:$0xff]   ;;  %v14196_v8 = vrot.slane %v19315_v34, 3 }
 0x784   : > { %18657 = vmatprep.subr.bf16.mxu0 %v26559_v35  ;;  %18679 = vmatprep.subr.bf16.mxu1 %v26559_v35 }
 0x785   : > { %18659 = vmatprep.mubr.msk.bf16.mxu0 %vm19461_vm2, %v26559_v35 }
 0x786   : > { %18668 = vmatmul.mubr.msk.bf16.vlgmr.msra.gmra.mxu1 %vm11738_vm15, %v13345_v2  ;;  %v19325_v2 = vld [vmem:[#allocation3 + $0x14] ss:$0 sps:$4 sm:$0x22]  }
 0x787   : > { %18658 = vmatpush3.bf16.msra.mxu0 %v19281_v5  ;;  %18680 = vmatpush3.bf16.msra.mxu1 %v19282_v42  ;;  %v19322_v5 = vld [vmem:[%s25502_s7 + $0x2b8] sm:$0xff]   ;;  %v14389_v42 = vshrl.u32 %v16330_v51, 16 }
 0x788   : > { %18671 = vmatprep.subr.bf16.mxu0 %v26559_v35  ;;  %18681 = vmatprep.subr.bf16.mxu1 %v26559_v35 }
 0x789   : > { %18683 = vmatprep.mubr.msk.bf16.mxu1 %vm19461_vm2, %v26559_v35 }
 0x78a   : > { %18660 = vmatmul.mubr.msk.bf16.vlgmr.msra.gmra.mxu0 %vm11738_vm15, %v13274_v32  ;;  %v19318_v32 = vld [vmem:[%s25502_s7 + $0x288] sm:$0xff]  }
 0x78b   : > { %18672 = vmatpush3.bf16.msra.mxu0 %v19283_v13  ;;  %18682 = vmatpush3.bf16.msra.mxu1 %v19284_v56  ;;  %v19324_v13 = vld [vmem:[%s25502_s7 + $0x2b0] sm:$0xff]   ;;  %v14519_v56 = vshrl.u32 %v19325_v2, 16 }
 0x78c   : > { %18673 = vmatprep.subr.bf16.mxu0 %v26559_v35  ;;  %18695 = vmatprep.subr.bf16.mxu1 %v26559_v35 }
 0x78d   : > { %18675 = vmatprep.mubr.msk.bf16.mxu0 %vm19461_vm2, %v26559_v35 }
 0x78e   : > { %18684 = vmatmul.mubr.msk.bf16.vlgmr.msra.gmra.mxu1 %vm11738_vm15, %v13477_v39  ;;  %v19330_v39 = vld [vmem:[#allocation3 + $0x14] ss:$0 sps:$4 sm:$0x44]  }
 0x78f   : > { %18674 = vmatpush3.bf16.msra.mxu0 %v19286_v24  ;;  %18696 = vmatpush3.bf16.msra.mxu1 %v19287_v3  ;;  %v19327_v24 = vld [vmem:[%s25502_s7 + $0x2d8] sm:$0xff]   ;;  %v14521_v3 = vrot.slane %v14519_v56, 1 }
 0x790   : > { %18687 = vmatprep.subr.bf16.mxu0 %v26559_v35  ;;  %18697 = vmatprep.subr.bf16.mxu1 %v26559_v35 }
 0x791   : > { %18699 = vmatprep.mubr.msk.bf16.mxu1 %vm19461_vm2, %v26559_v35 }
 0x792   : > { %18676 = vmatmul.mubr.msk.bf16.vlgmr.msra.gmra.mxu0 %vm11738_vm15, %v13412_v29  ;;  %v14650_v29 = vshrl.u32 %v19330_v39, 16 }
 0x793   : > { %18688 = vmatpush3.bf16.msra.mxu0 %v19288_v26  ;;  %18698 = vmatpush3.bf16.msra.mxu1 %v19289_v45  ;;  %v19329_v26 = vld [vmem:[%s25502_s7 + $0x2d0] sm:$0xff]   ;;  %v14456_v45 = vrot.slane %v19325_v2, 1 }
 0x794   : > { %18689 = vmatprep.subr.bf16.mxu0 %v26559_v35  ;;  %18711 = vmatprep.subr.bf16.mxu1 %v26559_v35 }
 0x795   : > { %18691 = vmatprep.mubr.msk.bf16.mxu0 %vm19461_vm2, %v26559_v35 }
 0x796   : > { %18700 = vmatmul.mubr.msk.bf16.vlgmr.msra.gmra.mxu1 %vm11738_vm15, %v13608_v54  ;;  %v19335_v54 = vld [vmem:[#allocation3 + $0x14] ss:$0 sps:$4 sm:$0x88]  }
 0x797   : > { %18690 = vmatpush3.bf16.msra.mxu0 %v19291_v47  ;;  %18712 = vmatpush3.bf16.msra.mxu1 %v19292_v27  ;;  %v19332_v47 = vld [vmem:[%s25502_s7 + $0x2f8] sm:$0xff]   ;;  %v14652_v27 = vrot.slane %v14650_v29, 2 }
 0x798   : > { %18703 = vmatprep.subr.bf16.mxu0 %v26559_v35  ;;  %18713 = vmatprep.subr.bf16.mxu1 %v26559_v35 }
 0x799   : > { %18715 = vmatprep.mubr.msk.bf16.mxu1 %vm19461_vm2, %v26559_v35 }
 0x79a   : > { %18692 = vmatmul.mubr.msk.bf16.vlgmr.msra.gmra.mxu0 %vm11738_vm15, %v13543_v44  ;;  %v14781_v44 = vshrl.u32 %v19335_v54, 16 }
 0x79b   : > { %18704 = vmatpush3.bf16.msra.mxu0 %v19293_v19  ;;  %18714 = vmatpush3.bf16.msra.mxu1 %v19294_v11  ;;  %v19334_v19 = vld [vmem:[%s25502_s7 + $0x2f0] sm:$0xff]   ;;  %v14587_v11 = vrot.slane %v19330_v39, 2 }
 0x79c   : > { %18705 = vmatprep.subr.bf16.mxu0 %v26559_v35  ;;  %18727 = vmatprep.subr.bf16.mxu1 %v26559_v35 }
 0x79d   : > { %18707 = vmatprep.mubr.msk.bf16.mxu0 %vm19461_vm2, %v26559_v35 }
 0x79e   : > { %18716 = vmatmul.mubr.msk.bf16.vlgmr.msra.gmra.mxu1 %vm11738_vm15, %v13739_v10  ;;  %v14718_v10 = vrot.slane %v19335_v54, 3 }
 0x79f   : > { %18706 = vmatpush3.bf16.msra.mxu0 %v19296_v40  ;;  %18728 = vmatpush3.bf16.msra.mxu1 %v19297_v17  ;;  %v14783_v40 = vrot.slane %v14781_v44, 3  ;;  %v19337_v17 = vld [vmem:[%s25502_s7 + $0x308] sm:$0xff]  }
 0x7a0   : > { %18719 = vmatprep.subr.bf16.mxu0 %v26559_v35  ;;  %18729 = vmatprep.subr.bf16.mxu1 %v26559_v35 }
 0x7a1   : > { %18731 = vmatprep.mubr.msk.bf16.mxu1 %vm19461_vm2, %v26559_v35 }
 0x7a2   : > { %18708 = vmatmul.mubr.msk.bf16.vlgmr.msra.gmra.mxu0 %vm11738_vm15, %v13674_v38  ;;  %v14840_v38 = vld [vmem:[#allocation3 + $0x18] sm:$0x1] }
 0x7a3   : > { %18720 = vmatpush3.bf16.msra.mxu0 %v19298_v49  ;;  %18730 = vmatpush3.bf16.msra.mxu1 %v19299_v30 }
 0x7a4   : > { %18721 = vmatprep.subr.bf16.mxu0 %v26559_v35  ;;  %18743 = vmatprep.subr.bf16.mxu1 %v26559_v35 }
 0x7a5   : > { %18723 = vmatprep.mubr.msk.bf16.mxu0 %vm19461_vm2, %v26559_v35 }
 0x7a6   : > { %18732 = vmatmul.mubr.msk.bf16.vlgmr.msra.gmra.mxu1 %vm11738_vm15, %v13867_v36 }
 0x7a7   : > { %18722 = vmatpush3.bf16.msra.mxu0 %v19301_v52  ;;  %18744 = vmatpush3.bf16.msra.mxu1 %v19302_v53 }
 0x7a8   : > { %18735 = vmatprep.subr.bf16.mxu0 %v26559_v35  ;;  %18745 = vmatprep.subr.bf16.mxu1 %v26559_v35 }
 0x7a9   : > { %18747 = vmatprep.mubr.msk.bf16.mxu1 %vm19461_vm2, %v26559_v35 }
 0x7aa   : > { %18724 = vmatmul.mubr.msk.bf16.vlgmr.msra.gmra.mxu0 %vm11738_vm15, %v13796_v4  ;;  %v19338_v4 = vld [vmem:[%s25502_s7 + $0x300] sm:$0xff]  }
 0x7ab   : > { %18736 = vmatpush3.bf16.msra.mxu0 %v19303_v59  ;;  %18746 = vmatpush3.bf16.msra.mxu1 %v19304_v58 }
 0x7ac   : > { %18737 = vmatprep.subr.bf16.mxu0 %v26559_v35  ;;  %18759 = vmatprep.subr.bf16.mxu1 %v26559_v35 }
 0x7ad   : > { %18739 = vmatprep.mubr.msk.bf16.mxu0 %vm19461_vm2, %v26559_v35 }
 0x7ae   : > { %18748 = vmatmul.mubr.msk.bf16.vlgmr.msra.gmra.mxu1 %vm11738_vm15, %v13999_v61 }
 0x7af   : > { %18738 = vmatpush3.bf16.msra.mxu0 %v19306_v57  ;;  %18760 = vmatpush3.bf16.msra.mxu1 %v19307_v16 }
 0x7b0   : > { %18751 = vmatprep.subr.bf16.mxu0 %v26559_v35  ;;  %18761 = vmatprep.subr.bf16.mxu1 %v26559_v35 }
 0x7b1   : > { %18763 = vmatprep.mubr.msk.bf16.mxu1 %vm19461_vm2, %v26559_v35 }
 0x7b2   : > { %18740 = vmatmul.mubr.msk.bf16.vlgmr.msra.gmra.mxu0 %vm11738_vm15, %v13934_v9 }
 0x7b3   : > { %18752 = vmatpush3.bf16.msra.mxu0 %v19308_v25  ;;  %18762 = vmatpush3.bf16.msra.mxu1 %v19309_v28 }
 0x7b4   : > { %18753 = vmatprep.subr.bf16.mxu0 %v26559_v35  ;;  %18775 = vmatprep.subr.bf16.mxu1 %v26559_v35 }
 0x7b5   : > { %18755 = vmatprep.mubr.msk.bf16.mxu0 %vm19461_vm2, %v26559_v35 }
 0x7b6   : > { %18764 = vmatmul.mubr.msk.bf16.vlgmr.msra.gmra.mxu1 %vm11738_vm15, %v14130_v1 }
 0x7b7   : > { %18754 = vmatpush3.bf16.msra.mxu0 %v19311_v12  ;;  %18776 = vmatpush3.bf16.msra.mxu1 %v19312_v20 }
 0x7b8   : > { %18767 = vmatprep.subr.bf16.mxu0 %v26559_v35  ;;  %18777 = vmatprep.subr.bf16.mxu1 %v26559_v35 }
 0x7b9   : > { %18779 = vmatprep.mubr.msk.bf16.mxu1 %vm19461_vm2, %v26559_v35 }
 0x7ba   : > { %18756 = vmatmul.mubr.msk.bf16.vlgmr.msra.gmra.mxu0 %vm11738_vm15, %v14065_v46 }
 0x7bb   : > { %18768 = vmatpush3.bf16.msra.mxu0 %v19313_v43  ;;  %18778 = vmatpush3.bf16.msra.mxu1 %v19314_v63 }
 0x7bc   : > { %18769 = vmatprep.subr.bf16.mxu0 %v26559_v35  ;;  %18791 = vmatprep.subr.bf16.mxu1 %v26559_v35 }
 0x7bd   : > { %18771 = vmatprep.mubr.msk.bf16.mxu0 %vm19461_vm2, %v26559_v35 }
 0x7be   : > { %18780 = vmatmul.mubr.msk.bf16.vlgmr.msra.gmra.mxu1 %vm11738_vm15, %v14261_v60 }
 0x7bf   : > { %18770 = vmatpush3.bf16.msra.mxu0 %v19316_v6  ;;  %18792 = vmatpush3.bf16.msra.mxu1 %v19317_v62 }
 0x7c0   : > { %18783 = vmatprep.subr.bf16.mxu0 %v26559_v35  ;;  %18793 = vmatprep.subr.bf16.mxu1 %v26559_v35 }
 0x7c1   : > { %18795 = vmatprep.mubr.msk.bf16.mxu1 %vm19461_vm2, %v26559_v35 }
 0x7c2   : > { %18772 = vmatmul.mubr.msk.bf16.vlgmr.msra.gmra.mxu0 %vm11738_vm15, %v14196_v8 }
 0x7c3   : > { %18784 = vmatpush3.bf16.msra.mxu0 %v19318_v32  ;;  %18794 = vmatpush3.bf16.msra.mxu1 %v19319_v18 }
 0x7c4   : > { %18785 = vmatprep.subr.bf16.mxu0 %v26559_v35  ;;  %18807 = vmatprep.subr.bf16.mxu1 %v26559_v35 }
 0x7c5   : > { %18787 = vmatprep.mubr.msk.bf16.mxu0 %vm19461_vm2, %v26559_v35 }
 0x7c6   : > { %18796 = vmatmul.mubr.msk.bf16.vlgmr.msra.gmra.mxu1 %vm11738_vm15, %v14389_v42 }
 0x7c7   : > { %18786 = vmatpush3.bf16.msra.mxu0 %v19321_v41  ;;  %18808 = vmatpush3.bf16.msra.mxu1 %v19322_v5 }
 0x7c8   : > { %18799 = vmatprep.subr.bf16.mxu0 %v26559_v35  ;;  %18809 = vmatprep.subr.bf16.mxu1 %v26559_v35 }
 0x7c9   : > { %18811 = vmatprep.mubr.msk.bf16.mxu1 %vm19461_vm2, %v26559_v35 }
 0x7ca   : > { %18788 = vmatmul.mubr.msk.bf16.vlgmr.msra.gmra.mxu0 %vm11738_vm15, %v14318_v0 }
 0x7cb   : > { %18800 = vmatpush3.bf16.msra.mxu0 %v19323_v33  ;;  %18810 = vmatpush3.bf16.msra.mxu1 %v19324_v13 }
 0x7cc   : > { %18801 = vmatprep.subr.bf16.mxu0 %v26559_v35  ;;  %18823 = vmatprep.subr.bf16.mxu1 %v26559_v35 }
 0x7cd   : > { %18803 = vmatprep.mubr.msk.bf16.mxu0 %vm19461_vm2, %v26559_v35 }
 0x7ce   : > { %18812 = vmatmul.mubr.msk.bf16.vlgmr.msra.gmra.mxu1 %vm11738_vm15, %v14521_v3 }
 0x7cf   : > { %18802 = vmatpush3.bf16.msra.mxu0 %v19326_v15  ;;  %18824 = vmatpush3.bf16.msra.mxu1 %v19327_v24 }
 0x7d0   : > { %18815 = vmatprep.subr.bf16.mxu0 %v26559_v35  ;;  %18825 = vmatprep.subr.bf16.mxu1 %v26559_v35 }
 0x7d1   : > { %18827 = vmatprep.mubr.msk.bf16.mxu1 %vm19461_vm2, %v26559_v35 }
 0x7d2   : > { %18804 = vmatmul.mubr.msk.bf16.vlgmr.msra.gmra.mxu0 %vm11738_vm15, %v14456_v45 }
 0x7d3   : > { %18816 = vmatpush3.bf16.msra.mxu0 %v19328_v55  ;;  %18826 = vmatpush3.bf16.msra.mxu1 %v19329_v26 }
 0x7d4   : > { %18817 = vmatprep.subr.bf16.mxu0 %v26559_v35  ;;  %18839 = vmatprep.subr.bf16.mxu1 %v26559_v35 }
 0x7d5   : > { %18819 = vmatprep.mubr.msk.bf16.mxu0 %vm19461_vm2, %v26559_v35 }
 0x7d6   : > { %18828 = vmatmul.mubr.msk.bf16.vlgmr.msra.gmra.mxu1 %vm11738_vm15, %v14652_v27 }
 0x7d7   : > { %18818 = vmatpush3.bf16.msra.mxu0 %v19331_v48  ;;  %18840 = vmatpush3.bf16.msra.mxu1 %v19332_v47 }
 0x7d8   : > { %18831 = vmatprep.subr.bf16.mxu0 %v26559_v35  ;;  %18841 = vmatprep.subr.bf16.mxu1 %v26559_v35 }
 0x7d9   : > { %18843 = vmatprep.mubr.msk.bf16.mxu1 %vm19461_vm2, %v26559_v35 }
 0x7da   : > { %18820 = vmatmul.mubr.msk.bf16.vlgmr.msra.gmra.mxu0 %vm11738_vm15, %v14587_v11 }
 0x7db   : > { %18832 = vmatpush3.bf16.msra.mxu0 %v19333_v14  ;;  %18842 = vmatpush3.bf16.msra.mxu1 %v19334_v19 }
 0x7dc   : > { %18833 = vmatprep.subr.bf16.mxu0 %v26559_v35  ;;  %18835 = vmatprep.mubr.msk.bf16.mxu0 %vm19461_vm2, %v26559_v35 }
 0x7de   : > { %18844 = vmatmul.mubr.msk.bf16.vlgmr.msra.gmra.mxu1 %vm11738_vm15, %v14783_v40 }
 0x7df   : > { %18834 = vmatpush3.bf16.msra.mxu0 %v19336_v22 }
 0x7e0   : > { %18847 = vmatprep.subr.bf16.mxu0 %v26559_v35 }
 0x7e2   : > { %18836 = vmatmul.mubr.msk.bf16.vlgmr.msra.gmra.mxu0 %vm11738_vm15, %v14718_v10 }
 0x7e3   : > { %18848 = vmatpush3.bf16.msra.mxu0 %v19337_v17  ;;  %18851 = vmatprep.mubr.msk.bf16.mxu0 %vm19461_vm2, %v26559_v35 }
 0x7e4   : > { %18849 = vmatprep.subr.bf16.mxu0 %v26559_v35 }
 0x7e6   : > { %v11831_v49 = vpop.f32.mrf.mxu1 }
 0x7e7   : > { %18850 = vmatpush3.bf16.msra.mxu0 %v19338_v4 }
 0x7e8   : > { %v18477_v30 = vpop.f32.mrf.mxu1 }
 0x7ea   : > { %v11776_v37 = vpop.f32.mrf.mxu0  ;;  %v11834_v52 = vpop.f32.mrf.mxu1  ;;  %18852 = vmatmul.mubr.msk.bf16.vlgmr.msra.gmra.mxu0 %vm11738_vm15, %v14840_v38 }
 0x7eb   : > { %v11832_v53 = vadd.f32 %v11831_v49, %v11776_v37 }
 0x7ec   : > { %v18469_v36 = vpop.f32.mrf.mxu0  ;;  %v18478_v50 = vpop.f32.mrf.mxu1 }
 0x7ee   : > { %v11779_v59 = vpop.f32.mrf.mxu0  ;;  %v11961_v58 = vpop.f32.mrf.mxu1 }
 0x7f0   : > { %v18470_v21 = vpop.f32.mrf.mxu0  ;;  %v18493_v57 = vpop.f32.mrf.mxu1 }
 0x7f2   : > { %v11896_v16 = vpop.f32.mrf.mxu0  ;;  %v11964_v61 = vpop.f32.mrf.mxu1 }
 0x7f3   : > { %v11902_v31 = vadd.f32 %v11896_v16, %v11832_v53 }
 0x7f4   : > { %v18485_v25 = vpop.f32.mrf.mxu0  ;;  %v18494_v35 = vpop.f32.mrf.mxu1 }
 0x7f5   : > { %v11967_v28 = vadd.f32 %v11961_v58, %v11902_v31 }
 0x7f6   : > { %v11899_v9 = vpop.f32.mrf.mxu0  ;;  %v12092_v7 = vpop.f32.mrf.mxu1 }
 0x7f8   : > { %v18486_v12 = vpop.f32.mrf.mxu0  ;;  %v18509_v20 = vpop.f32.mrf.mxu1 }
 0x7fa   : > { %v12027_v1 = vpop.f32.mrf.mxu0  ;;  %v12095_v34 = vpop.f32.mrf.mxu1 }
 0x7fb   : > { %v12033_v43 = vadd.f32 %v12027_v1, %v11967_v28 }
 0x7fc   : > { %v18501_v63 = vpop.f32.mrf.mxu0  ;;  %v18510_v46 = vpop.f32.mrf.mxu1 }
 0x7fd   : > { %v12098_v23 = vadd.f32 %v12092_v7, %v12033_v43 }
 0x7fe   : > { %v12030_v6 = vpop.f32.mrf.mxu0  ;;  %v12223_v62 = vpop.f32.mrf.mxu1 }
 0x800   : > { %v18502_v60 = vpop.f32.mrf.mxu0  ;;  %v18525_v0 = vpop.f32.mrf.mxu1 }
 0x802   : > { %v12158_v32 = vpop.f32.mrf.mxu0  ;;  %v12226_v18 = vpop.f32.mrf.mxu1 }
 0x803   : > { %v12164_v8 = vadd.f32 %v12158_v32, %v12098_v23 }
 0x804   : > { %v18517_v51 = vpop.f32.mrf.mxu0  ;;  %v18526_v41 = vpop.f32.mrf.mxu1 }
 0x805   : > { %v12229_v5 = vadd.f32 %v12223_v62, %v12164_v8 }
 0x806   : > { %v12161_v42 = vpop.f32.mrf.mxu0  ;;  %v12352_v2 = vpop.f32.mrf.mxu1 }
 0x808   : > { %v18518_v33 = vpop.f32.mrf.mxu0  ;;  %v18541_v13 = vpop.f32.mrf.mxu1 }
 0x80a   : > { %v12285_v56 = vpop.f32.mrf.mxu0  ;;  %v12355_v15 = vpop.f32.mrf.mxu1 }
 0x80b   : > { %v12291_v24 = vadd.f32 %v12285_v56, %v12229_v5 }
 0x80c   : > { %v18533_v3 = vpop.f32.mrf.mxu0  ;;  %v18542_v39 = vpop.f32.mrf.mxu1 }
 0x80d   : > { %v12358_v55 = vadd.f32 %v12352_v2, %v12291_v24 }
 0x80e   : > { %v12288_v26 = vpop.f32.mrf.mxu0  ;;  %v12483_v45 = vpop.f32.mrf.mxu1 }
 0x810   : > { %v18534_v29 = vpop.f32.mrf.mxu0  ;;  %v18557_v48 = vpop.f32.mrf.mxu1 }
 0x812   : > { %v12418_v47 = vpop.f32.mrf.mxu0  ;;  %v12486_v27 = vpop.f32.mrf.mxu1 }
 0x813   : > { %v12424_v54 = vadd.f32 %v12418_v47, %v12358_v55 }
 0x814   : > { %v18549_v14 = vpop.f32.mrf.mxu0  ;;  %v18558_v19 = vpop.f32.mrf.mxu1 }
 0x815   : > { %v12489_v11 = vadd.f32 %v12483_v45, %v12424_v54 }
 0x816   : > { %v12421_v44 = vpop.f32.mrf.mxu0  ;;  %v12614_v22 = vpop.f32.mrf.mxu1 }
 0x818   : > { %v18550_v40 = vpop.f32.mrf.mxu0  ;;  %v18573_v17 = vpop.f32.mrf.mxu1 }
 0x81a   : > { %v12549_v10 = vpop.f32.mrf.mxu0  ;;  %v12617_v4 = vpop.f32.mrf.mxu1 }
 0x81b   : > { %v12555_v49 = vadd.f32 %v12549_v10, %v12489_v11 }
 0x81c   : > { %v18565_v30 = vpop.f32.mrf.mxu0  ;;  %v18574_v38 = vpop.f32.mrf.mxu1 }
 0x81d   : > { %v12620_v37 = vadd.f32 %v12614_v22, %v12555_v49 }
 0x81e   : > { %v12552_v52 = vpop.f32.mrf.mxu0  ;;  %v12745_v53 = vpop.f32.mrf.mxu1 }
 0x820   : > { %v18566_v36 = vpop.f32.mrf.mxu0  ;;  %v18589_v50 = vpop.f32.mrf.mxu1 }
 0x822   : > { %v12680_v59 = vpop.f32.mrf.mxu0  ;;  %v12748_v58 = vpop.f32.mrf.mxu1 }
 0x823   : > { %v12686_v21 = vadd.f32 %v12680_v59, %v12620_v37 }
 0x824   : > { %v18581_v57 = vpop.f32.mrf.mxu0  ;;  %v18590_v16 = vpop.f32.mrf.mxu1 }
 0x825   : > { %v12751_v61 = vadd.f32 %v12745_v53, %v12686_v21 }
 0x826   : > { %v12683_v31 = vpop.f32.mrf.mxu0  ;;  %v12874_v25 = vpop.f32.mrf.mxu1 }
 0x828   : > { %v18582_v35 = vpop.f32.mrf.mxu0  ;;  %v18605_v28 = vpop.f32.mrf.mxu1 }
 0x82a   : > { %v12807_v9 = vpop.f32.mrf.mxu0  ;;  %v12877_v7 = vpop.f32.mrf.mxu1 }
 0x82b   : > { %v12813_v12 = vadd.f32 %v12807_v9, %v12751_v61 }
 0x82c   : > { %v18597_v20 = vpop.f32.mrf.mxu0  ;;  %v18606_v1 = vpop.f32.mrf.mxu1 }
 0x82d   : > { %v12880_v34 = vadd.f32 %v12874_v25, %v12813_v12 }
 0x82e   : > { %v12810_v43 = vpop.f32.mrf.mxu0  ;;  %v13005_v63 = vpop.f32.mrf.mxu1 }
 0x830   : > { %v18598_v46 = vpop.f32.mrf.mxu0  ;;  %v18621_v23 = vpop.f32.mrf.mxu1 }
 0x832   : > { %v12940_v6 = vpop.f32.mrf.mxu0  ;;  %v13008_v62 = vpop.f32.mrf.mxu1 }
 0x833   : > { %v12946_v60 = vadd.f32 %v12940_v6, %v12880_v34 }
 0x834   : > { %v18613_v0 = vpop.f32.mrf.mxu0  ;;  %v18622_v32 = vpop.f32.mrf.mxu1 }
 0x835   : > { %v13011_v18 = vadd.f32 %v13005_v63, %v12946_v60 }
 0x836   : > { %v12943_v8 = vpop.f32.mrf.mxu0  ;;  %v13136_v51 = vpop.f32.mrf.mxu1 }
 0x838   : > { %v18614_v41 = vpop.f32.mrf.mxu0  ;;  %v18637_v5 = vpop.f32.mrf.mxu1 }
 0x83a   : > { %v13071_v42 = vpop.f32.mrf.mxu0  ;;  %v13139_v2 = vpop.f32.mrf.mxu1 }
 0x83b   : > { %v13077_v52 = vadd.f32 %v13071_v42, %v13011_v18 }
 0x83c   : > { %v18629_v33 = vpop.f32.mrf.mxu0  ;;  %v18638_v13 = vpop.f32.mrf.mxu1 }
 0x83d   : > { %v13142_v58 = vadd.f32 %v13136_v51, %v13077_v52 }
 0x83e   : > { %v13074_v56 = vpop.f32.mrf.mxu0  ;;  %v13267_v15 = vpop.f32.mrf.mxu1 }
 0x840   : > { %v18630_v24 = vpop.f32.mrf.mxu0  ;;  %v18653_v3 = vpop.f32.mrf.mxu1 }
 0x842   : > { %v13202_v39 = vpop.f32.mrf.mxu0  ;;  %v13270_v55 = vpop.f32.mrf.mxu1 }
 0x843   : > { %v13208_v16 = vadd.f32 %v13202_v39, %v13142_v58 }
 0x844   : > { %v18645_v26 = vpop.f32.mrf.mxu0  ;;  %v18654_v45 = vpop.f32.mrf.mxu1 }
 0x845   : > { %v13273_v28 = vadd.f32 %v13267_v15, %v13208_v16 }
 0x846   : > { %v13205_v29 = vpop.f32.mrf.mxu0  ;;  %v13396_v48 = vpop.f32.mrf.mxu1 }
 0x848   : > { %v18646_v47 = vpop.f32.mrf.mxu0  ;;  %v18669_v27 = vpop.f32.mrf.mxu1 }
 0x84a   : > { %v13329_v54 = vpop.f32.mrf.mxu0  ;;  %v13399_v14 = vpop.f32.mrf.mxu1 }
 0x84b   : > { %v13335_v12 = vadd.f32 %v13329_v54, %v13273_v28 }
 0x84c   : > { %v18661_v19 = vpop.f32.mrf.mxu0  ;;  %v18670_v11 = vpop.f32.mrf.mxu1 }
 0x84d   : > { %v13402_v63 = vadd.f32 %v13396_v48, %v13335_v12 }
 0x84e   : > { %v13332_v44 = vpop.f32.mrf.mxu0  ;;  %v13527_v22 = vpop.f32.mrf.mxu1 }
 0x850   : > { %v18662_v40 = vpop.f32.mrf.mxu0  ;;  %v18685_v17 = vpop.f32.mrf.mxu1 }
 0x852   : > { %v13462_v10 = vpop.f32.mrf.mxu0  ;;  %v13530_v4 = vpop.f32.mrf.mxu1 }
 0x853   : > { %v13468_v6 = vadd.f32 %v13462_v10, %v13402_v63 }
 0x854   : > { %v18677_v49 = vpop.f32.mrf.mxu0  ;;  %v18686_v30 = vpop.f32.mrf.mxu1 }
 0x855   : > { %v13533_v18 = vadd.f32 %v13527_v22, %v13468_v6 }
 0x856   : > { %v13465_v38 = vpop.f32.mrf.mxu0  ;;  %v13658_v37 = vpop.f32.mrf.mxu1 }
 0x858   : > { %v18678_v53 = vpop.f32.mrf.mxu0  ;;  %v18701_v36 = vpop.f32.mrf.mxu1 }
 0x85a   : > { %v13593_v50 = vpop.f32.mrf.mxu0  ;;  %v13661_v59 = vpop.f32.mrf.mxu1 }
 0x85b   : > { %v13599_v41 = vadd.f32 %v13593_v50, %v13533_v18 }
 0x85c   : > { %v18693_v21 = vpop.f32.mrf.mxu0  ;;  %v18702_v57 = vpop.f32.mrf.mxu1 }
 0x85d   : > { %v13664_v13 = vadd.f32 %v13658_v37, %v13599_v41 }
 0x85e   : > { %v13596_v61 = vpop.f32.mrf.mxu0  ;;  %v13789_v31 = vpop.f32.mrf.mxu1 }
 0x860   : > { %v18694_v25 = vpop.f32.mrf.mxu0  ;;  %v18717_v35 = vpop.f32.mrf.mxu1 }
 0x862   : > { %v13724_v9 = vpop.f32.mrf.mxu0  ;;  %v13792_v7 = vpop.f32.mrf.mxu1 }
 0x863   : > { %v13730_v24 = vadd.f32 %v13724_v9, %v13664_v13 }
 0x864   : > { %v18709_v20 = vpop.f32.mrf.mxu0  ;;  %v18718_v1 = vpop.f32.mrf.mxu1 }
 0x865   : > { %v13795_v45 = vadd.f32 %v13789_v31, %v13730_v24 }
 0x866   : > { %v13727_v34 = vpop.f32.mrf.mxu0  ;;  %v13918_v43 = vpop.f32.mrf.mxu1 }
 0x868   : > { %v18710_v46 = vpop.f32.mrf.mxu0  ;;  %v18733_v23 = vpop.f32.mrf.mxu1 }
 0x86a   : > { %v13851_v62 = vpop.f32.mrf.mxu0  ;;  %v13921_v60 = vpop.f32.mrf.mxu1 }
 0x86b   : > { %v13857_v47 = vadd.f32 %v13851_v62, %v13795_v45  ;;  %v14902_v45 = vld [vmem:[%s25503_s8] sm:$0x1] }
 0x86c   : > { %v18725_v0 = vpop.f32.mrf.mxu0  ;;  %v18734_v32 = vpop.f32.mrf.mxu1 }
 0x86d   : > { %v13924_v11 = vadd.f32 %v13918_v43, %v13857_v47 }
 0x86e   : > { %v13854_v8 = vpop.f32.mrf.mxu0  ;;  %v14049_v51 = vpop.f32.mrf.mxu1 }
 0x870   : > { %v18726_v5 = vpop.f32.mrf.mxu0  ;;  %v18749_v42 = vpop.f32.mrf.mxu1 }
 0x872   : > { %v13984_v2 = vpop.f32.mrf.mxu0  ;;  %v14052_v33 = vpop.f32.mrf.mxu1 }
 0x873   : > { %v13990_v40 = vadd.f32 %v13984_v2, %v13924_v11 }
 0x874   : > { %v18741_v56 = vpop.f32.mrf.mxu0  ;;  %v18750_v15 = vpop.f32.mrf.mxu1 }
 0x875   : > { %v14055_v30 = vadd.f32 %v14049_v51, %v13990_v40 }
 0x876   : > { %v13987_v3 = vpop.f32.mrf.mxu0  ;;  %v14180_v39 = vpop.f32.mrf.mxu1 }
 0x878   : > { %v18742_v55 = vpop.f32.mrf.mxu0  ;;  %v18765_v26 = vpop.f32.mrf.mxu1 }
 0x87a   : > { %v14115_v29 = vpop.f32.mrf.mxu0  ;;  %v14183_v48 = vpop.f32.mrf.mxu1 }
 0x87b   : > { %v14121_v52 = vadd.f32 %v14115_v29, %v14055_v30 }
 0x87c   : > { %v18757_v27 = vpop.f32.mrf.mxu0  ;;  %v18766_v54 = vpop.f32.mrf.mxu1 }
 0x87d   : > { %v14186_v58 = vadd.f32 %v14180_v39, %v14121_v52 }
 0x87e   : > { %v14118_v14 = vpop.f32.mrf.mxu0  ;;  %v14311_v19 = vpop.f32.mrf.mxu1 }
 0x880   : > { %v18758_v44 = vpop.f32.mrf.mxu0  ;;  %v18781_v22 = vpop.f32.mrf.mxu1 }
 0x882   : > { %v14246_v17 = vpop.f32.mrf.mxu0  ;;  %v14314_v10 = vpop.f32.mrf.mxu1 }
 0x883   : > { %v14252_v16 = vadd.f32 %v14246_v17, %v14186_v58 }
 0x884   : > { %v18773_v4 = vpop.f32.mrf.mxu0  ;;  %v18782_v49 = vpop.f32.mrf.mxu1 }
 0x885   : > { %v14317_v28 = vadd.f32 %v14311_v19, %v14252_v16 }
 0x886   : > { %v14249_v38 = vpop.f32.mrf.mxu0  ;;  %v14440_v37 = vpop.f32.mrf.mxu1 }
 0x888   : > { %v18774_v53 = vpop.f32.mrf.mxu0  ;;  %v18797_v36 = vpop.f32.mrf.mxu1 }
 0x88a   : > { %v14373_v50 = vpop.f32.mrf.mxu0  ;;  %v14443_v59 = vpop.f32.mrf.mxu1 }
 0x88b   : > { %v14379_v12 = vadd.f32 %v14373_v50, %v14317_v28 }
 0x88c   : > { %v18789_v21 = vpop.f32.mrf.mxu0  ;;  %v18798_v57 = vpop.f32.mrf.mxu1 }
 0x88d   : > { %v14446_v63 = vadd.f32 %v14440_v37, %v14379_v12 }
 0x88e   : > { %v14376_v61 = vpop.f32.mrf.mxu0  ;;  %v14571_v31 = vpop.f32.mrf.mxu1 }
 0x890   : > { %v18790_v25 = vpop.f32.mrf.mxu0  ;;  %v18813_v35 = vpop.f32.mrf.mxu1 }
 0x892   : > { %v14506_v9 = vpop.f32.mrf.mxu0  ;;  %v14574_v7 = vpop.f32.mrf.mxu1 }
 0x893   : > { %v14512_v6 = vadd.f32 %v14506_v9, %v14446_v63 }
 0x894   : > { %v18805_v20 = vpop.f32.mrf.mxu0  ;;  %v18814_v1 = vpop.f32.mrf.mxu1 }
 0x895   : > { %v14577_v18 = vadd.f32 %v14571_v31, %v14512_v6 }
 0x896   : > { %v14509_v34 = vpop.f32.mrf.mxu0  ;;  %v14702_v43 = vpop.f32.mrf.mxu1 }
 0x898   : > { %v18806_v46 = vpop.f32.mrf.mxu0  ;;  %v18829_v23 = vpop.f32.mrf.mxu1 }
 0x89a   : > { %v14637_v62 = vpop.f32.mrf.mxu0  ;;  %v14705_v60 = vpop.f32.mrf.mxu1 }
 0x89b   : > { %v14643_v41 = vadd.f32 %v14637_v62, %v14577_v18 }
 0x89c   : > { %v18821_v0 = vpop.f32.mrf.mxu0  ;;  %v18830_v32 = vpop.f32.mrf.mxu1 }
 0x89d   : > { %v14708_v13 = vadd.f32 %v14702_v43, %v14643_v41 }
 0x89e   : > { %v14640_v8 = vpop.f32.mrf.mxu0  ;;  %v14833_v51 = vpop.f32.mrf.mxu1 }
 0x8a0   : > { %v18822_v5 = vpop.f32.mrf.mxu0  ;;  %v18845_v42 = vpop.f32.mrf.mxu1 }
 0x8a2   : > { %v14768_v2 = vpop.f32.mrf.mxu0  ;;  %v14836_v33 = vpop.f32.mrf.mxu1 }
 0x8a3   : > { %v14774_v24 = vadd.f32 %v14768_v2, %v14708_v13 }
 0x8a4   : > { %v18837_v56 = vpop.f32.mrf.mxu0  ;;  %v18846_v15 = vpop.f32.mrf.mxu1 }
 0x8a5   : > { %v14839_v55 = vadd.f32 %v14833_v51, %v14774_v24 }
 0x8a6   : > { %v14771_v3 = vpop.f32.mrf.mxu0 }
 0x8a8   : > { %v18838_v39 = vpop.f32.mrf.mxu0 }
 0x8aa   : > { %v14895_v26 = vpop.f32.mrf.mxu0 }
 0x8ab   : > { %v14901_v29 = vadd.f32 %v14895_v26, %v14839_v55 }
 0x8ac   : > { %v18853_v48 = vpop.f32.mrf.mxu0 }
 0x8ad   : > { %v14903_v47 = vadd.f32 %v14902_v45, %v14901_v29 }
 0x8ae   : > { %v14898_v27 = vpop.f32.mrf.mxu0 }
 0x8af   : > { %14904 = vst [vmem:[%s324_s25] sm:$0x1] %v14903_v47 }
 0x8b0   : > { %v18854_v54 = vpop.f32.mrf.mxu0 }
 0x8b1   : > { %19410 = shalt.err (!%p19407_p3)
}
 0x8b2   : > { %s19411_s23 = scalar_lea.hbm %s25454_s28, 16  ;;  %s19415_s25 = scalar_lea.hbm %s25504_s9, 32 }
 0x8b3   : > { %p19412_p4 = scmp.ne.s32.totalorder %s25454_s28, %s19411_s23  ;;  %p19416_p9 = scmp.lt.s32.totalorder %s25454_s28, %s25504_s9 }
 0x8b4   : > { %p19417_p10 = scmp.lt.s32.totalorder %s19415_s25, %s19411_s23 }
 0x8b5   : > { %p19413_p7 = pnand %p19412_p4, %p19552_p5 }
 0x8b6   : > { %p19418_p11 = por %p19417_p10, %p19416_p9 }
 0x8b7   : > { %p19414_p8 = pneg %p19413_p7 }
 0x8b9   : > { %p19419_p12 = pnand %p19418_p11, %p19414_p8 }
 0x8bb   : > { %19422 = shalt.err (!%p19419_p12)
}
 0x8bc   : > { %18860 = dma.vmem_to_hbm [thread:$0]  (%p19552_p5), %s25456_s26, 16, %s25454_s28, %s14906_s14  }
 0x8bd PF: > { %p18866_p13 = scmp.ge.s32.totalorder %s19457_s12, 2  ;;  %s14930_s13 = sand.u32 1, %s19445_s30  }
 0x8be   : > { %s14931_s16 = scalar_lea.sflag [#allocation5], %s14930_s13 }
 0x8bf   : > { %p18863_p0 = pnand %p18866_p13, %p19556_p6 }
 0x8c1   : > { %p18864_p1 = pneg %p18863_p0 }
 0x8c3   : > { %19440 = dma.done.wait (%p18864_p1), %s14931_s16, 16  }
 0x8c4   : > { %19442 = vsyncadd (%p18864_p1), %s14931_s16, 4294967280  ;;  %p19_p2 = scmp.ge.s32.totalorder %s19539_s15, 4   ;;  %s26560_s30 = smov %s19449_s10 }
 0x8c5   : > { %s26561_s10 = smov %s19453_s11  ;;  %s26562_s11 = smov %s19550_s18 }
 0x8c6   : > { %s26563_s12 = smov %s19539_s15  ;;  %21 = sbr.rel (!%p19_p2) target bundleno = 3 (0x3), region = 169 }
 0x8cb   :  { %14935 = vsyncpa [#allocation5], 1 }
 0x8cc   :  { %14937 = vsyncpa [#allocation5 + $0x1], 1 }

</bundles_post_ra>
